<compile_context>
chip_gen: v6e
topology: v6e:2x2x1
jax: 0.10.0
libtpu: 0.0.40
codegen_flags: <defaults>
</compile_context>

<pallas_src>
import math
import functools
import numpy as np
import jax
import jax.numpy as jnp
from jax.experimental import pallas as pl
from jax.experimental.pallas import tpu as pltpu

_INV_LOG2 = 1.0 / math.log(2.0)
_VMEM_LIMIT = 48 * 1024 * 1024
_LANES = 512          # lane width of the bits-reduction stream


def _round_up(x, m):
    return ((x + m - 1) // m) * m


# ------------------------- Pallas fused matmul (conv core) -------------------

def _matmul_kernel(a_ref, b_ref, bias_ref, o_ref, acc_ref, *, activation):
    @pl.when(pl.program_id(2) == 0)
    def _():
        acc_ref[...] = jnp.zeros_like(acc_ref)

    acc_ref[...] += jnp.dot(a_ref[...], b_ref[...],
                            preferred_element_type=jnp.float32)

    @pl.when(pl.program_id(2) == pl.num_programs(2) - 1)
    def _():
        out = acc_ref[...] + bias_ref[...]          # (TM,TN) + (1,TN)
        if activation == "relu":
            out = jnp.maximum(out, 0.0)
        o_ref[...] = out.astype(o_ref.dtype)


def pallas_matmul_fused(a, b, bias=None, *, activation=None,
                        out_dtype=jnp.float32):
    """(M,K)@(K,N) with fused bias / ReLU / down-cast epilogue.

    bf16 MXU operands, f32 accumulation, output in `out_dtype`."""
    M, K = a.shape
    K2, N = b.shape
    assert K == K2
    a = a.astype(jnp.bfloat16)
    b = b.astype(jnp.bfloat16)
    Np0 = _round_up(N, 128)
    TN = Np0 if Np0 <= 1024 else 512        # all N in this model fit in one tile
    Np = _round_up(N, TN)
    TM = min(512, _round_up(M, 128))
    Mp = _round_up(M, TM)
    TK = min(1024, _round_up(K, 128))
    Kp = _round_up(K, TK)
    if (Mp, Kp) != (M, K):
        a = jnp.pad(a, ((0, Mp - M), (0, Kp - K)))
    if (Kp, Np) != (K, N):
        b = jnp.pad(b, ((0, Kp - K), (0, Np - N)))
    if bias is None:
        bias_row = jnp.zeros((1, Np), jnp.float32)
    else:
        bias_row = jnp.pad(bias.astype(jnp.float32).reshape(1, N),
                           ((0, 0), (0, Np - N)))

    kernel = functools.partial(_matmul_kernel, activation=activation)
    out = pl.pallas_call(
        kernel,
        out_shape=jax.ShapeDtypeStruct((Mp, Np), out_dtype),
        grid_spec=pltpu.PrefetchScalarGridSpec(
            num_scalar_prefetch=0,
            grid=(Mp // TM, Np // TN, Kp // TK),
            in_specs=[pl.BlockSpec((TM, TK), lambda i, j, k: (i, k)),
                      pl.BlockSpec((TK, TN), lambda i, j, k: (k, j)),
                      pl.BlockSpec((1, TN), lambda i, j, k: (0, j))],
            out_specs=pl.BlockSpec((TM, TN), lambda i, j, k: (i, j)),
            scratch_shapes=[pltpu.VMEM((TM, TN), jnp.float32)]),
        compiler_params=pltpu.CompilerParams(
            dimension_semantics=("parallel", "parallel", "arbitrary"),
            vmem_limit_bytes=_VMEM_LIMIT),
    )(a, b, bias_row)
    if (Mp, Np) != (M, N):
        out = out[:M, :N]
    return out


# -------------------------- fused ConvLSTM step kernel ------------------------

def _lstm_step_kernel(a_ref, w_ref, xg_ref, cin_ref, hid_ref, cell_ref,
                      acc_ref, *, Cpg):
    @pl.when(pl.program_id(1) == 0)
    def _():
        acc_ref[...] = jnp.zeros_like(acc_ref)

    acc_ref[...] += jnp.dot(a_ref[...], w_ref[...],
                            preferred_element_type=jnp.float32)

    @pl.when(pl.program_id(1) == pl.num_programs(1) - 1)
    def _():
        # hid->gate contribution + precomputed x-path gates (bias already in xg)
        g = acc_ref[...] + xg_ref[...]
        # gate groups are padded to Cpg (multiple of 128) -> aligned lane slices
        i_g = jax.nn.sigmoid(g[:, 0 * Cpg:1 * Cpg])
        f_g = jax.nn.sigmoid(g[:, 1 * Cpg:2 * Cpg])
        o_g = jax.nn.sigmoid(g[:, 2 * Cpg:3 * Cpg])
        g_g = jnp.tanh(g[:, 3 * Cpg:4 * Cpg])
        cell = f_g * cin_ref[...] + i_g * g_g
        hid = o_g * jnp.tanh(cell)
        hid_ref[...] = hid.astype(hid_ref.dtype)
        cell_ref[...] = cell.astype(cell_ref.dtype)


def pallas_lstm_step(hid_col, wh_mat, xg_t, cell_pad, Cpg):
    """One ConvLSTM timestep: hid im2col matmul + gate nonlinearity + cell/hid
    update, fused in a single Pallas call."""
    M, K = hid_col.shape
    Ng = wh_mat.shape[1]
    TM = min(512, _round_up(M, 128))
    Mp = _round_up(M, TM)
    TK = min(512, _round_up(K, 128))
    Kp = _round_up(K, TK)
    a = hid_col
    if (Mp, Kp) != (M, K):
        a = jnp.pad(a, ((0, Mp - M), (0, Kp - K)))
    w = wh_mat
    if Kp != K:
        w = jnp.pad(w, ((0, Kp - K), (0, 0)))
    assert xg_t.shape == (Mp, Ng) and cell_pad.shape == (Mp, Cpg)

    kernel = functools.partial(_lstm_step_kernel, Cpg=Cpg)
    hid_pad, cell_new = pl.pallas_call(
        kernel,
        out_shape=(jax.ShapeDtypeStruct((Mp, Cpg), jnp.float32),
                   jax.ShapeDtypeStruct((Mp, Cpg), jnp.float32)),
        grid_spec=pltpu.PrefetchScalarGridSpec(
            num_scalar_prefetch=0,
            grid=(Mp // TM, Kp // TK),
            in_specs=[pl.BlockSpec((TM, TK), lambda i, k: (i, k)),
                      pl.BlockSpec((TK, Ng), lambda i, k: (k, 0)),
                      pl.BlockSpec((TM, Ng), lambda i, k: (i, 0)),
                      pl.BlockSpec((TM, Cpg), lambda i, k: (i, 0))],
            out_specs=[pl.BlockSpec((TM, Cpg), lambda i, k: (i, 0)),
                       pl.BlockSpec((TM, Cpg), lambda i, k: (i, 0))],
            scratch_shapes=[pltpu.VMEM((TM, Ng), jnp.float32)]),
        compiler_params=pltpu.CompilerParams(
            dimension_semantics=("parallel", "arbitrary"),
            vmem_limit_bytes=_VMEM_LIMIT),
    )(a, w, xg_t, cell_pad)
    return hid_pad, cell_new


# --------------------------- bits-reduction kernels ---------------------------

def _laplace_bits_kernel(f_ref, s_ref, m_ref, o_ref):
    @pl.when(pl.program_id(1) == 0)
    def _():
        o_ref[...] = jnp.zeros_like(o_ref)

    f = f_ref[...]
    sig = jnp.clip(s_ref[...], 1e-10, 1e10)
    inv_sig = pl.reciprocal(sig, approx=True)          # EUP path, no division
    mu = m_ref[...]
    d1 = f + 0.5 - mu
    d2 = f - 0.5 - mu
    e1 = jnp.exp(-jnp.abs(d1) * inv_sig)
    e2 = jnp.exp(-jnp.abs(d2) * inv_sig)
    cdf1 = jnp.where(d1 >= 0.0, 1.0 - 0.5 * e1, 0.5 * e1)
    cdf2 = jnp.where(d2 >= 0.0, 1.0 - 0.5 * e2, 0.5 * e2)
    probs = cdf1 - cdf2
    bits = jnp.clip(-jnp.log(probs + 1e-10) * _INV_LOG2, 0.0, 50.0)
    o_ref[...] += bits.reshape(-1, 8, _LANES).sum(axis=0)


def _prob_bits_kernel(p_ref, o_ref):
    @pl.when(pl.program_id(1) == 0)
    def _():
        o_ref[...] = jnp.zeros_like(o_ref)

    bits = jnp.clip(-jnp.log(p_ref[...] + 1e-10) * _INV_LOG2, 0.0, 50.0)
    o_ref[...] += bits.reshape(-1, 8, _LANES).sum(axis=0)


def _reduction_layout(n):
    r0 = max(1, -(-n // _LANES))                  # rows of _LANES lanes
    TR = 256 if r0 >= 256 else _round_up(r0, 8)   # >= 0.5 MB / input / step
    P = 2 if r0 > TR else 1                       # 2-way split (v7x megacore)
    R = _round_up(r0, P * TR)
    nb = R // (P * TR)
    return R, TR, P, nb


def _to_rows(v, R, fill):
    flat = v.reshape(-1).astype(jnp.float32)
    n = flat.shape[0]
    pad = R * _LANES - n
    if pad:
        flat = jnp.pad(flat, (0, pad), constant_values=fill)
    return flat.reshape(R, _LANES)


def _run_bits_reduction(kernel, arrays, fills):
    n = arrays[0].size
    R, TR, P, nb = _reduction_layout(n)
    rows = [_to_rows(a, R, f) for a, f in zip(arrays, fills)]
    out = pl.pallas_call(
        kernel,
        out_shape=jax.ShapeDtypeStruct((P * 8, _LANES), jnp.float32),
        grid_spec=pltpu.PrefetchScalarGridSpec(
            num_scalar_prefetch=0,
            grid=(P, nb),
            in_specs=[pl.BlockSpec((TR, _LANES), lambda p, i: (p * nb + i, 0))
                      for _ in rows],
            out_specs=pl.BlockSpec((8, _LANES), lambda p, i: (p, 0))),
        compiler_params=pltpu.CompilerParams(
            dimension_semantics=("parallel", "arbitrary")),
    )(*rows)
    return jnp.sum(out)


def laplace_total_bits(feature, sigma, mu):
    # zero padding contributes exactly 0 bits (sigma -> 1e-10 => probs == 1)
    return _run_bits_reduction(_laplace_bits_kernel,
                               [feature, sigma, mu], [0.0, 0.0, 0.0])


def prob_total_bits(prob):
    # padding with prob = 1.0 contributes exactly 0 bits
    return _run_bits_reduction(_prob_bits_kernel, [prob], [1.0])


# --------------------------- conv glue (NHWC im2col) --------------------------

def _im2col_nhwc(x, kh, kw, stride, pad):
    N, H, W, C = x.shape
    xp = jnp.pad(x, ((0, 0), pad[0], pad[1], (0, 0)))
    Hp = H + pad[0][0] + pad[0][1]
    Wp = W + pad[1][0] + pad[1][1]
    Ho = (Hp - kh) // stride + 1
    Wo = (Wp - kw) // stride + 1
    if kh == 1 and kw == 1 and stride == 1:
        return xp.reshape(N * Ho * Wo, C), Ho, Wo
    patches = []
    for a in range(kh):
        for b in range(kw):
            patches.append(xp[:, a:a + stride * Ho:stride,
                              b:b + stride * Wo:stride, :])
    col = jnp.stack(patches, axis=3)               # (N, Ho, Wo, kh*kw, C)
    return col.reshape(N * Ho * Wo, kh * kw * C), Ho, Wo


def conv2d_mat(x, wmat, b=None, *, kh, kw, stride=1, padding=0,
               activation=None, out_dtype=jnp.float32):
    """NHWC conv = bf16 im2col + fused Pallas matmul (bias/ReLU in epilogue)."""
    N = x.shape[0]
    pad = (((padding, padding), (padding, padding))
           if isinstance(padding, int) else padding)
    col, Ho, Wo = _im2col_nhwc(x.astype(jnp.bfloat16), kh, kw, stride, pad)
    out = pallas_matmul_fused(col, wmat, b, activation=activation,
                              out_dtype=out_dtype)
    return out.reshape(N, Ho, Wo, wmat.shape[1])


def deconv2d_phase(x, wmat4, b4=None, *, activation=None,
                   out_dtype=jnp.float32):
    """ConvTranspose2d(k=5, stride=2, pad=2, out_pad=1) as a single 3x3 conv with
    phase-decomposed weights (4*Cout channels) + depth-to-space interleave."""
    N, H, W, _ = x.shape
    Cout = wmat4.shape[1] // 4
    y = conv2d_mat(x, wmat4, b4, kh=3, kw=3, stride=1, padding=1,
                   activation=activation, out_dtype=out_dtype)
    # TODO(synk): the depth-to-space interleave stays in XLA; expressing it via
    # the matmul out BlockSpec would need an element scatter, not a rect block.
    y = y.reshape(N, H, W, 2, 2, Cout).transpose(0, 1, 3, 2, 4, 5)
    return y.reshape(N, 2 * H, 2 * W, Cout)


# --------------------------- weight preparation (init-time) -------------------

def _conv_wmat_np(w):
    # torch Conv2d weight (Cout, Cin, kh, kw) -> (kh*kw*Cin, Cout) f32 numpy
    w = np.asarray(w, np.float32)
    Cout, Cin, kh, kw = w.shape
    return np.transpose(w, (2, 3, 1, 0)).reshape(kh * kw * Cin, Cout)


def _conv_wmat(w):
    return jnp.asarray(_conv_wmat_np(w), jnp.bfloat16)


def _deconv_phase_wmat(w):
    # torch ConvTranspose2d weight (Cin, Cout, 5, 5) with stride=2, pad=2,
    # output_padding=1  ->  (3*3*Cin, 4*Cout) bf16 phase-decomposed matrix.
    Cin, Cout, kh, kw = np.shape(w)
    assert kh == 5 and kw == 5
    w_np = np.asarray(w, np.float32)
    taps = {0: (4, 2, 0), 1: (None, 3, 1)}   # output phase -> kernel tap indices
    G = np.zeros((3, 3, Cin, 2, 2, Cout), np.float32)
    for ri in (0, 1):
        for rj in (0, 1):
            for a, ta in enumerate(taps[ri]):
                if ta is None:
                    continue
                for bb, tb in enumerate(taps[rj]):
                    if tb is None:
                        continue
                    G[a, bb, :, ri, rj, :] = w_np[:, :, ta, tb]
    return jnp.asarray(G.reshape(3 * 3 * Cin, 4 * Cout), jnp.bfloat16)


def _rand_conv_w(key, cout, cin, kh, kw):
    std = 1.0 / math.sqrt(cin * kh * kw)
    return jax.random.normal(key, (cout, cin, kh, kw), jnp.float32) * std


def _rand_deconv_w(key, cin, cout, kh, kw):
    std = 1.0 / math.sqrt(cin * kh * kw)
    return jax.random.normal(key, (cin, cout, kh, kw), jnp.float32) * std


# --------------------------- forward (pure, jitted) ---------------------------

def _video_coder_forward(params, prev1, prev2, prev3, prev4, prev5, cur,
                         *, feature_channel, latent_channel, training):
    C, L = feature_channel, latent_channel
    Cpg = _round_up(C, 128)
    B, _, H, W = cur.shape
    nhwc = lambda t: jnp.transpose(t, (0, 2, 3, 1))

    def encode(img):
        p = params["enc"]
        h = conv2d_mat(img, p[0]["w"], p[0]["b"], kh=5, kw=5, stride=2,
                       padding=2, activation="relu", out_dtype=jnp.bfloat16)
        h = conv2d_mat(h, p[1]["w"], p[1]["b"], kh=5, kw=5, stride=2,
                       padding=2, activation="relu", out_dtype=jnp.bfloat16)
        return conv2d_mat(h, p[2]["w"], p[2]["b"], kh=5, kw=5, stride=2,
                          padding=2, out_dtype=jnp.float32)

    def decode(f):
        p = params["dec"]
        h = deconv2d_phase(f, p[0]["w"], p[0]["b"],
                           activation="relu", out_dtype=jnp.bfloat16)
        h = deconv2d_phase(h, p[1]["w"], p[1]["b"],
                           activation="relu", out_dtype=jnp.bfloat16)
        return deconv2d_phase(h, p[2]["w"], p[2]["b"], out_dtype=jnp.float32)

    def convlstm(seq):
        # seq: (B, T, h, w, C); batch_first=True, return_all_layers=False
        Bq, T, hh, ww, Cq = seq.shape
        M = Bq * hh * ww
        TMl = min(512, _round_up(M, 128))
        Mp = _round_up(M, TMl)
        n_layers = len(params["lstm"])
        layer_in = seq
        hid_spatial = None
        for li, layer in enumerate(params["lstm"]):
            # input->gate conv for ALL timesteps in one big MXU matmul (bias fused)
            xg = conv2d_mat(layer_in.reshape(Bq * T, hh, ww, Cq),
                            layer["wx"], layer["b"],
                            kh=3, kw=3, stride=1, padding=1,
                            out_dtype=jnp.float32)
            Ng = xg.shape[-1]
            xg = xg.reshape(Bq, T, hh, ww, Ng)
            hid_spatial = jnp.zeros((Bq, hh, ww, Cq), jnp.float32)
            cell_pad = jnp.zeros((Mp, Cpg), jnp.float32)
            outs = []
            for t in range(T):
                xg_t = xg[:, t].reshape(M, Ng)
                if Mp != M:
                    xg_t = jnp.pad(xg_t, ((0, Mp - M), (0, 0)))
                hid_col, _, _ = _im2col_nhwc(hid_spatial.astype(jnp.bfloat16),
                                             3, 3, 1, ((1, 1), (1, 1)))
                hid_pad, cell_pad = pallas_lstm_step(hid_col, layer["wh"],
                                                     xg_t, cell_pad, Cpg)
                hid_spatial = hid_pad[:M, :Cq].reshape(Bq, hh, ww, Cq)
                outs.append(hid_spatial)
            if li + 1 < n_layers:
                layer_in = jnp.stack(outs, axis=1)
        return hid_spatial   # last layer's final hidden state == cur_pred[0][0]

    def prior_encode(r):
        p = params["prior_enc"]
        h = conv2d_mat(r, p[0]["w"], p[0]["b"], kh=3, kw=3, stride=1,
                       padding=1, activation="relu", out_dtype=jnp.bfloat16)
        return conv2d_mat(h, p[1]["w"], p[1]["b"], kh=5, kw=5, stride=2,
                          padding=2, out_dtype=jnp.float32)

    def prior_decode(zz):
        p = params["prior_dec"]
        h = deconv2d_phase(zz, p[0]["w"], p[0]["b"],
                           activation="relu", out_dtype=jnp.bfloat16)
        return conv2d_mat(h, p[1]["w"], p[1]["b"], kh=3, kw=3, stride=1,
                          padding=1, out_dtype=jnp.float32)

    def context(f):
        # TODO(synk): masked conv type 'A' (center zeroed) assumed; the
        # reference MaskedConv implementation is not given (could be type 'B').
        p = params["ctx"]
        return conv2d_mat(f, p["w"], p["b"], kh=5, kw=5, stride=1, padding=2,
                          out_dtype=jnp.float32)

    def entropy_params(cm, hd):
        p = params["ent"]
        x = jnp.concatenate([cm, hd], axis=-1)
        x = conv2d_mat(x, p[0]["w"], p[0]["b"], kh=1, kw=1,
                       activation="relu", out_dtype=jnp.bfloat16)
        x = conv2d_mat(x, p[1]["w"], p[1]["b"], kh=1, kw=1,
                       out_dtype=jnp.float32)
        half = L // 2
        return x[..., :half], x[..., half:]   # sigma, mu

    def bit_estimator(x):
        for li, layer in enumerate(params["be"]):
            hsc = jax.nn.softplus(layer["h"]).reshape(1, 1, 1, -1)
            bia = layer["b"].reshape(1, 1, 1, -1)
            x = x * hsc + bia
            if li < 3:
                a = jnp.tanh(layer["a"]).reshape(1, 1, 1, -1)
                x = x + jnp.tanh(x) * a
            else:
                x = jax.nn.sigmoid(x)
        return x

    # TODO(synk): demo(prev4, prev5) is a RAFT optical-flow + warp network with
    # no clean Pallas equivalent; approximated with an identity warp.
    warpped_image = prev5

    prev1_f = encode(nhwc(prev1))
    prev2_f = encode(nhwc(prev2))
    prev3_f = encode(nhwc(prev3))
    prev4_f = encode(nhwc(prev4))
    prev5_f = encode(nhwc(prev5))
    cur_f = encode(nhwc(cur))
    warp_f = encode(nhwc(warpped_image))

    seq = jnp.stack([prev1_f, prev2_f, prev3_f, prev4_f, prev5_f, warp_f], axis=1)
    cur_pred = convlstm(seq)

    residual = cur_f - cur_pred
    z = prior_encode(residual)

    if training:
        # training branch: additive uniform(-0.5, 0.5) noise
        # (torch CUDA RNG cannot be reproduced; fixed JAX key used instead)
        k1, k2 = jax.random.split(jax.random.PRNGKey(123))
        compressed_z = z + jax.random.uniform(k1, z.shape, jnp.float32, -0.5, 0.5)
        compressed_feature = residual + jax.random.uniform(
            k2, residual.shape, jnp.float32, -0.5, 0.5)
    else:
        compressed_z = jnp.round(z)
        compressed_feature = jnp.round(residual)

    hd_out = prior_decode(compressed_z)
    recon_cur = decode(cur_pred + compressed_feature)
    cm_out = context(compressed_feature)
    recon_sigma, recon_mu = entropy_params(cm_out, hd_out)

    clipped_recon_cur = jnp.clip(recon_cur, 0.0, 1.0)
    mse_loss = jnp.mean((clipped_recon_cur - nhwc(cur)) ** 2)

    total_bits_feature = laplace_total_bits(compressed_feature,
                                            recon_sigma, recon_mu)
    prob_z = bit_estimator(compressed_z + 0.5) - bit_estimator(compressed_z - 0.5)
    # mathematically >= 0 (monotone estimator); guard float cancellation -> NaN
    prob_z = jnp.maximum(prob_z, 0.0)
    total_bits_z = prob_total_bits(prob_z)

    denom = B * H * W
    bpp_feature = total_bits_feature / denom
    bpp_z = total_bits_z / denom
    bpp = bpp_feature + bpp_z

    # back to NCHW (torch layout) for the returned image / residual
    clipped_nchw = jnp.transpose(clipped_recon_cur, (0, 3, 1, 2))
    residual_nchw = jnp.transpose(residual, (0, 3, 1, 2))
    return clipped_nchw, mse_loss, bpp_feature, bpp_z, bpp, residual_nchw


# ----------------------------------- model ------------------------------------

class VideoCoderPallas:
    def __init__(self, feature_channel=192, latent_channel=384,
                 key=jax.random.PRNGKey(1), training=False):
        self.feature_channel = feature_channel
        self.latent_channel = latent_channel
        self.training = training
        C, L = feature_channel, latent_channel
        Cpg = _round_up(C, 128)
        ks = iter(jax.random.split(key, 48))

        def conv_params(cout, cin, kh, kw):
            w = _rand_conv_w(next(ks), cout, cin, kh, kw)
            return {"w": _conv_wmat(w), "b": jnp.zeros((cout,), jnp.float32)}

        def deconv_params(cin, cout):
            w = _rand_deconv_w(next(ks), cin, cout, 5, 5)
            # bias is per output channel, identical across the 4 phase groups
            return {"w": _deconv_phase_wmat(w),
                    "b": jnp.tile(jnp.zeros((cout,), jnp.float32), 4)}

        def lstm_params():
            # full gate conv (4C, 2C, 3, 3) split into x-path / h-path matrices,
            # with each of the 4 gate groups padded to Cpg lanes (aligned slices
            # inside the fused step kernel).
            w = _rand_conv_w(next(ks), 4 * C, 2 * C, 3, 3)
            wx = _conv_wmat_np(w[:, :C])   # (9C, 4C)
            wh = _conv_wmat_np(w[:, C:])

            def gpad(m):
                out = np.zeros((m.shape[0], 4 * Cpg), np.float32)
                for g in range(4):
                    out[:, g * Cpg:g * Cpg + C] = m[:, g * C:(g + 1) * C]
                return jnp.asarray(out, jnp.bfloat16)

            return {"wx": gpad(wx), "wh": gpad(wh),
                    "b": jnp.zeros((4 * Cpg,), jnp.float32)}

        # Context_model_autoregressive: masked 5x5 conv, C -> L (mask hoisted here)
        ctx_w = _rand_conv_w(next(ks), L, C, 5, 5)
        mask = np.ones((5, 5), np.float32)
        mask[2, 2:] = 0.0
        mask[3:, :] = 0.0
        ctx_w = ctx_w * jnp.asarray(mask).reshape(1, 1, 5, 5)

        be = []
        for _ in range(4):
            be.append({"h": jax.random.normal(next(ks), (C,), jnp.float32) * 0.01,
                       "b": jax.random.normal(next(ks), (C,), jnp.float32) * 0.01,
                       "a": jax.random.normal(next(ks), (C,), jnp.float32) * 0.01})

        self.params = {
            # Feature_encoder: 3 -> C at H/8
            "enc": [conv_params(C, 3, 5, 5),
                    conv_params(C, C, 5, 5),
                    conv_params(C, C, 5, 5)],
            # Feature_decoder: C -> 3 at H
            "dec": [deconv_params(C, C), deconv_params(C, C), deconv_params(C, 3)],
            # ConvLSTM: 8 layers (the second assignment in the reference
            # __init__ overrides the 15-layer one), hidden = C, kernel 3x3
            "lstm": [lstm_params() for _ in range(8)],
            # Analysis_prior_net: C -> C at H/16
            "prior_enc": [conv_params(C, C, 3, 3), conv_params(C, C, 5, 5)],
            # Synthesis_prior_net: C -> L at H/8
            "prior_dec": [deconv_params(C, C), conv_params(L, C, 3, 3)],
            "ctx": {"w": _conv_wmat(ctx_w), "b": jnp.zeros((L,), jnp.float32)},
            # Entropy_parameters: 2L -> L (split into sigma / mu)
            "ent": [conv_params(L, 2 * L, 1, 1), conv_params(L, L, 1, 1)],
            # Bit_estimator (ICLR18 factorized model), per-channel params
            "be": be,
        }

        self._forward_jit = jax.jit(functools.partial(
            _video_coder_forward, feature_channel=C, latent_channel=L,
            training=training))

    def forward(self, prev1, prev2, prev3, prev4, prev5, cur,
                residuals_list, dir_image=None):
        (clipped, mse_loss, bpp_feature, bpp_z, bpp,
         residual) = self._forward_jit(self.params, prev1, prev2, prev3,
                                       prev4, prev5, cur)
        # device->host transfer kept OUT of the jitted graph
        residuals_list.append(np.asarray(jnp.squeeze(residual)))
        return clipped, mse_loss, bpp_feature, bpp_z, bpp


# ----------------------------------- demo --------------------------------------

if __name__ == "__main__":
    key = jax.random.PRNGKey(0)
    ks = jax.random.split(key, 6)
    B, H, W = 2, 32, 32
    prev1 = jax.random.uniform(ks[0], (B, 3, H, W), jnp.float32)
    prev2 = jax.random.uniform(ks[1], (B, 3, H, W), jnp.float32)
    prev3 = jax.random.uniform(ks[2], (B, 3, H, W), jnp.float32)
    prev4 = jax.random.uniform(ks[3], (B, 3, H, W), jnp.float32)
    prev5 = jax.random.uniform(ks[4], (B, 3, H, W), jnp.float32)
    cur = jax.random.uniform(ks[5], (B, 3, H, W), jnp.float32)

    model = VideoCoderPallas(feature_channel=8, latent_channel=16,
                             key=jax.random.PRNGKey(1), training=False)
    residuals_list = []
    out = model.forward(prev1, prev2, prev3, prev4, prev5, cur,
                        residuals_list, dir_image=None)
    out = jax.block_until_ready(out)

    clipped_recon_cur, mse_loss, bpp_feature, bpp_z, bpp = out
    assert clipped_recon_cur.shape == (B, 3, H, W)
    assert len(residuals_list) == 1
    assert all(jnp.isfinite(v).all() for v in
               (clipped_recon_cur, mse_loss, bpp_feature, bpp_z, bpp))
    print("KERNEL_OK")
</pallas_src>

<mosaic_0001>
module attributes {stable_mosaic.version = 11 : i64} {
  func.func @_matmul_kernel(%arg0: i32, %arg1: i32, %arg2: i32, %arg3: memref<512x128xbf16, #tpu.memory_space<vmem>>, %arg4: memref<128x128xbf16, #tpu.memory_space<vmem>>, %arg5: memref<1x128xf32, #tpu.memory_space<vmem>>, %arg6: memref<512x128xbf16, #tpu.memory_space<vmem>>, %arg7: memref<512x128xf32, #tpu.memory_space<vmem>>) attributes {dimension_semantics = [#tpu.dimension_semantics<parallel>, #tpu.dimension_semantics<parallel>, #tpu.dimension_semantics<arbitrary>], iteration_bounds = array<i64: 1, 1, 1>, scalar_prefetch = 0 : i64, scratch_operands = 1 : i64, tpu.core_type = #tpu.core_type<tc>, window_params = [{transform_indices = @transform_0, window_bounds = array<i64: 512, 128>}, {transform_indices = @transform_1, window_bounds = array<i64: 128, 128>}, {transform_indices = @transform_2, window_bounds = array<i64: 1, 128>}, {transform_indices = @transform_3, window_bounds = array<i64: 512, 128>}]} {
    %c0_i32 = arith.constant 0 : i32
    %0 = arith.cmpi eq, %arg2, %c0_i32 : i32
    %1 = arith.extui %0 : i1 to i32
    %c0_i32_0 = arith.constant 0 : i32
    %2 = arith.cmpi ne, %1, %c0_i32_0 : i32
    scf.if %2 {
      %cst_10 = arith.constant 0.000000e+00 : f32
      %12 = vector.broadcast %cst_10 : f32 to vector<512x128xf32>
      %c0_11 = arith.constant 0 : index
      %c0_12 = arith.constant 0 : index
      %13 = vector.load %arg7[%c0_11, %c0_12] : memref<512x128xf32, #tpu.memory_space<vmem>>, vector<512x128xf32>
      tpu.vector_store %arg7[%c0_11, %c0_12], %12 {strides = array<i32>} : memref<512x128xf32, #tpu.memory_space<vmem>>, vector<512x128xf32>,
    } else {
    }
    %c0 = arith.constant 0 : index
    %c0_1 = arith.constant 0 : index
    %3 = vector.load %arg7[%c0, %c0_1] : memref<512x128xf32, #tpu.memory_space<vmem>>, vector<512x128xf32>
    %c0_2 = arith.constant 0 : index
    %c0_3 = arith.constant 0 : index
    %4 = vector.load %arg3[%c0_2, %c0_3] : memref<512x128xbf16, #tpu.memory_space<vmem>>, vector<512x128xbf16>
    %c0_4 = arith.constant 0 : index
    %c0_5 = arith.constant 0 : index
    %5 = vector.load %arg4[%c0_4, %c0_5] : memref<128x128xbf16, #tpu.memory_space<vmem>>, vector<128x128xbf16>
    %cst = arith.constant dense<0.000000e+00> : vector<512x128xf32>
    %6 = tpu.matmul %4, %5, %cst {dimension_numbers = #tpu.dot_dimension_numbers<[1], [0], [0], [1], [0, 0, 1, 1], [], []>} : vector<512x128xbf16>, vector<128x128xbf16>, vector<512x128xf32> -> vector<512x128xf32>
    %7 = arith.addf %3, %6 : vector<512x128xf32>
    %c0_6 = arith.constant 0 : index
    %c0_7 = arith.constant 0 : index
    %8 = vector.load %arg7[%c0_6, %c0_7] : memref<512x128xf32, #tpu.memory_space<vmem>>, vector<512x128xf32>
    tpu.vector_store %arg7[%c0_6, %c0_7], %7 {strides = array<i32>} : memref<512x128xf32, #tpu.memory_space<vmem>>, vector<512x128xf32>,
    %c0_i32_8 = arith.constant 0 : i32
    %9 = arith.cmpi eq, %arg2, %c0_i32_8 : i32
    %10 = arith.extui %9 : i1 to i32
    %c0_i32_9 = arith.constant 0 : i32
    %11 = arith.cmpi ne, %10, %c0_i32_9 : i32
    scf.if %11 {
      %c0_10 = arith.constant 0 : index
      %c0_11 = arith.constant 0 : index
      %12 = vector.load %arg7[%c0_10, %c0_11] : memref<512x128xf32, #tpu.memory_space<vmem>>, vector<512x128xf32>
      %c0_12 = arith.constant 0 : index
      %c0_13 = arith.constant 0 : index
      %13 = vector.load %arg5[%c0_12, %c0_13] : memref<1x128xf32, #tpu.memory_space<vmem>>, vector<1x128xf32>
      %14 = vector.broadcast %13 : vector<1x128xf32> to vector<512x128xf32>
      %15 = arith.addf %12, %14 : vector<512x128xf32>
      %cst_14 = arith.constant 0.000000e+00 : f32
      %16 = vector.broadcast %cst_14 : f32 to vector<512x128xf32>
      %17 = arith.maximumf %15, %16 : vector<512x128xf32>
      %18 = arith.truncf %17 : vector<512x128xf32> to vector<512x128xbf16>
      %c0_15 = arith.constant 0 : index
      %c0_16 = arith.constant 0 : index
      %19 = vector.load %arg6[%c0_15, %c0_16] : memref<512x128xbf16, #tpu.memory_space<vmem>>, vector<512x128xbf16>
      tpu.vector_store %arg6[%c0_15, %c0_16], %18 {strides = array<i32>} : memref<512x128xbf16, #tpu.memory_space<vmem>>, vector<512x128xbf16>,
    } else {
    }
    return
  }
  func.func @transform_0(%arg0: i32, %arg1: i32, %arg2: i32) -> (i32, i32) {
    %c0_i32 = arith.constant 0 : i32
    return %arg0, %arg2 : i32, i32
  }
  func.func @transform_1(%arg0: i32, %arg1: i32, %arg2: i32) -> (i32, i32) {
    %c0_i32 = arith.constant 0 : i32
    return %arg2, %arg1 : i32, i32
  }
  func.func @transform_2(%arg0: i32, %arg1: i32, %arg2: i32) -> (i32, i32) {
    %c0_i32 = arith.constant 0 : i32
    %c0_i32_0 = arith.constant 0 : i32
    return %c0_i32, %arg1 : i32, i32
  }
  func.func @transform_3(%arg0: i32, %arg1: i32, %arg2: i32) -> (i32, i32) {
    %c0_i32 = arith.constant 0 : i32
    return %arg0, %arg1 : i32, i32
  }
}

module attributes {stable_mosaic.version = 11 : i64} {
  func.func @_matmul_kernel(%arg0: i32, %arg1: i32, %arg2: i32, %arg3: memref<128x256xbf16, #tpu.memory_space<vmem>>, %arg4: memref<256x128xbf16, #tpu.memory_space<vmem>>, %arg5: memref<1x128xf32, #tpu.memory_space<vmem>>, %arg6: memref<128x128xbf16, #tpu.memory_space<vmem>>, %arg7: memref<128x128xf32, #tpu.memory_space<vmem>>) attributes {dimension_semantics = [#tpu.dimension_semantics<parallel>, #tpu.dimension_semantics<parallel>, #tpu.dimension_semantics<arbitrary>], iteration_bounds = array<i64: 1, 1, 1>, scalar_prefetch = 0 : i64, scratch_operands = 1 : i64, tpu.core_type = #tpu.core_type<tc>, window_params = [{transform_indices = @transform_0, window_bounds = array<i64: 128, 256>}, {transform_indices = @transform_1, window_bounds = array<i64: 256, 128>}, {transform_indices = @transform_2, window_bounds = array<i64: 1, 128>}, {transform_indices = @transform_3, window_bounds = array<i64: 128, 128>}]} {
    %c0_i32 = arith.constant 0 : i32
    %0 = arith.cmpi eq, %arg2, %c0_i32 : i32
    %1 = arith.extui %0 : i1 to i32
    %c0_i32_0 = arith.constant 0 : i32
    %2 = arith.cmpi ne, %1, %c0_i32_0 : i32
    scf.if %2 {
      %cst_10 = arith.constant 0.000000e+00 : f32
      %12 = vector.broadcast %cst_10 : f32 to vector<128x128xf32>
      %c0_11 = arith.constant 0 : index
      %c0_12 = arith.constant 0 : index
      %13 = vector.load %arg7[%c0_11, %c0_12] : memref<128x128xf32, #tpu.memory_space<vmem>>, vector<128x128xf32>
      tpu.vector_store %arg7[%c0_11, %c0_12], %12 {strides = array<i32>} : memref<128x128xf32, #tpu.memory_space<vmem>>, vector<128x128xf32>,
    } else {
    }
    %c0 = arith.constant 0 : index
    %c0_1 = arith.constant 0 : index
    %3 = vector.load %arg7[%c0, %c0_1] : memref<128x128xf32, #tpu.memory_space<vmem>>, vector<128x128xf32>
    %c0_2 = arith.constant 0 : index
    %c0_3 = arith.constant 0 : index
    %4 = vector.load %arg3[%c0_2, %c0_3] : memref<128x256xbf16, #tpu.memory_space<vmem>>, vector<128x256xbf16>
    %c0_4 = arith.constant 0 : index
    %c0_5 = arith.constant 0 : index
    %5 = vector.load %arg4[%c0_4, %c0_5] : memref<256x128xbf16, #tpu.memory_space<vmem>>, vector<256x128xbf16>
    %cst = arith.constant dense<0.000000e+00> : vector<128x128xf32>
    %6 = tpu.matmul %4, %5, %cst {dimension_numbers = #tpu.dot_dimension_numbers<[1], [0], [0], [1], [0, 0, 1, 1], [], []>} : vector<128x256xbf16>, vector<256x128xbf16>, vector<128x128xf32> -> vector<128x128xf32>
    %7 = arith.addf %3, %6 : vector<128x128xf32>
    %c0_6 = arith.constant 0 : index
    %c0_7 = arith.constant 0 : index
    %8 = vector.load %arg7[%c0_6, %c0_7] : memref<128x128xf32, #tpu.memory_space<vmem>>, vector<128x128xf32>
    tpu.vector_store %arg7[%c0_6, %c0_7], %7 {strides = array<i32>} : memref<128x128xf32, #tpu.memory_space<vmem>>, vector<128x128xf32>,
    %c0_i32_8 = arith.constant 0 : i32
    %9 = arith.cmpi eq, %arg2, %c0_i32_8 : i32
    %10 = arith.extui %9 : i1 to i32
    %c0_i32_9 = arith.constant 0 : i32
    %11 = arith.cmpi ne, %10, %c0_i32_9 : i32
    scf.if %11 {
      %c0_10 = arith.constant 0 : index
      %c0_11 = arith.constant 0 : index
      %12 = vector.load %arg7[%c0_10, %c0_11] : memref<128x128xf32, #tpu.memory_space<vmem>>, vector<128x128xf32>
      %c0_12 = arith.constant 0 : index
      %c0_13 = arith.constant 0 : index
      %13 = vector.load %arg5[%c0_12, %c0_13] : memref<1x128xf32, #tpu.memory_space<vmem>>, vector<1x128xf32>
      %14 = vector.broadcast %13 : vector<1x128xf32> to vector<128x128xf32>
      %15 = arith.addf %12, %14 : vector<128x128xf32>
      %cst_14 = arith.constant 0.000000e+00 : f32
      %16 = vector.broadcast %cst_14 : f32 to vector<128x128xf32>
      %17 = arith.maximumf %15, %16 : vector<128x128xf32>
      %18 = arith.truncf %17 : vector<128x128xf32> to vector<128x128xbf16>
      %c0_15 = arith.constant 0 : index
      %c0_16 = arith.constant 0 : index
      %19 = vector.load %arg6[%c0_15, %c0_16] : memref<128x128xbf16, #tpu.memory_space<vmem>>, vector<128x128xbf16>
      tpu.vector_store %arg6[%c0_15, %c0_16], %18 {strides = array<i32>} : memref<128x128xbf16, #tpu.memory_space<vmem>>, vector<128x128xbf16>,
    } else {
    }
    return
  }
  func.func @transform_0(%arg0: i32, %arg1: i32, %arg2: i32) -> (i32, i32) {
    %c0_i32 = arith.constant 0 : i32
    return %arg0, %arg2 : i32, i32
  }
  func.func @transform_1(%arg0: i32, %arg1: i32, %arg2: i32) -> (i32, i32) {
    %c0_i32 = arith.constant 0 : i32
    return %arg2, %arg1 : i32, i32
  }
  func.func @transform_2(%arg0: i32, %arg1: i32, %arg2: i32) -> (i32, i32) {
    %c0_i32 = arith.constant 0 : i32
    %c0_i32_0 = arith.constant 0 : i32
    return %c0_i32, %arg1 : i32, i32
  }
  func.func @transform_3(%arg0: i32, %arg1: i32, %arg2: i32) -> (i32, i32) {
    %c0_i32 = arith.constant 0 : i32
    return %arg0, %arg1 : i32, i32
  }
}

module attributes {stable_mosaic.version = 11 : i64} {
  func.func @_matmul_kernel(%arg0: i32, %arg1: i32, %arg2: i32, %arg3: memref<128x256xbf16, #tpu.memory_space<vmem>>, %arg4: memref<256x128xbf16, #tpu.memory_space<vmem>>, %arg5: memref<1x128xf32, #tpu.memory_space<vmem>>, %arg6: memref<128x128xf32, #tpu.memory_space<vmem>>, %arg7: memref<128x128xf32, #tpu.memory_space<vmem>>) attributes {dimension_semantics = [#tpu.dimension_semantics<parallel>, #tpu.dimension_semantics<parallel>, #tpu.dimension_semantics<arbitrary>], iteration_bounds = array<i64: 1, 1, 1>, scalar_prefetch = 0 : i64, scratch_operands = 1 : i64, tpu.core_type = #tpu.core_type<tc>, window_params = [{transform_indices = @transform_0, window_bounds = array<i64: 128, 256>}, {transform_indices = @transform_1, window_bounds = array<i64: 256, 128>}, {transform_indices = @transform_2, window_bounds = array<i64: 1, 128>}, {transform_indices = @transform_3, window_bounds = array<i64: 128, 128>}]} {
    %c0_i32 = arith.constant 0 : i32
    %0 = arith.cmpi eq, %arg2, %c0_i32 : i32
    %1 = arith.extui %0 : i1 to i32
    %c0_i32_0 = arith.constant 0 : i32
    %2 = arith.cmpi ne, %1, %c0_i32_0 : i32
    scf.if %2 {
      %cst_10 = arith.constant 0.000000e+00 : f32
      %12 = vector.broadcast %cst_10 : f32 to vector<128x128xf32>
      %c0_11 = arith.constant 0 : index
      %c0_12 = arith.constant 0 : index
      %13 = vector.load %arg7[%c0_11, %c0_12] : memref<128x128xf32, #tpu.memory_space<vmem>>, vector<128x128xf32>
      tpu.vector_store %arg7[%c0_11, %c0_12], %12 {strides = array<i32>} : memref<128x128xf32, #tpu.memory_space<vmem>>, vector<128x128xf32>,
    } else {
    }
    %c0 = arith.constant 0 : index
    %c0_1 = arith.constant 0 : index
    %3 = vector.load %arg7[%c0, %c0_1] : memref<128x128xf32, #tpu.memory_space<vmem>>, vector<128x128xf32>
    %c0_2 = arith.constant 0 : index
    %c0_3 = arith.constant 0 : index
    %4 = vector.load %arg3[%c0_2, %c0_3] : memref<128x256xbf16, #tpu.memory_space<vmem>>, vector<128x256xbf16>
    %c0_4 = arith.constant 0 : index
    %c0_5 = arith.constant 0 : index
    %5 = vector.load %arg4[%c0_4, %c0_5] : memref<256x128xbf16, #tpu.memory_space<vmem>>, vector<256x128xbf16>
    %cst = arith.constant dense<0.000000e+00> : vector<128x128xf32>
    %6 = tpu.matmul %4, %5, %cst {dimension_numbers = #tpu.dot_dimension_numbers<[1], [0], [0], [1], [0, 0, 1, 1], [], []>} : vector<128x256xbf16>, vector<256x128xbf16>, vector<128x128xf32> -> vector<128x128xf32>
    %7 = arith.addf %3, %6 : vector<128x128xf32>
    %c0_6 = arith.constant 0 : index
    %c0_7 = arith.constant 0 : index
    %8 = vector.load %arg7[%c0_6, %c0_7] : memref<128x128xf32, #tpu.memory_space<vmem>>, vector<128x128xf32>
    tpu.vector_store %arg7[%c0_6, %c0_7], %7 {strides = array<i32>} : memref<128x128xf32, #tpu.memory_space<vmem>>, vector<128x128xf32>,
    %c0_i32_8 = arith.constant 0 : i32
    %9 = arith.cmpi eq, %arg2, %c0_i32_8 : i32
    %10 = arith.extui %9 : i1 to i32
    %c0_i32_9 = arith.constant 0 : i32
    %11 = arith.cmpi ne, %10, %c0_i32_9 : i32
    scf.if %11 {
      %c0_10 = arith.constant 0 : index
      %c0_11 = arith.constant 0 : index
      %12 = vector.load %arg7[%c0_10, %c0_11] : memref<128x128xf32, #tpu.memory_space<vmem>>, vector<128x128xf32>
      %c0_12 = arith.constant 0 : index
      %c0_13 = arith.constant 0 : index
      %13 = vector.load %arg5[%c0_12, %c0_13] : memref<1x128xf32, #tpu.memory_space<vmem>>, vector<1x128xf32>
      %14 = vector.broadcast %13 : vector<1x128xf32> to vector<128x128xf32>
      %15 = arith.addf %12, %14 : vector<128x128xf32>
      %c0_14 = arith.constant 0 : index
      %c0_15 = arith.constant 0 : index
      %16 = vector.load %arg6[%c0_14, %c0_15] : memref<128x128xf32, #tpu.memory_space<vmem>>, vector<128x128xf32>
      tpu.vector_store %arg6[%c0_14, %c0_15], %15 {strides = array<i32>} : memref<128x128xf32, #tpu.memory_space<vmem>>, vector<128x128xf32>,
    } else {
    }
    return
  }
  func.func @transform_0(%arg0: i32, %arg1: i32, %arg2: i32) -> (i32, i32) {
    %c0_i32 = arith.constant 0 : i32
    return %arg0, %arg2 : i32, i32
  }
  func.func @transform_1(%arg0: i32, %arg1: i32, %arg2: i32) -> (i32, i32) {
    %c0_i32 = arith.constant 0 : i32
    return %arg2, %arg1 : i32, i32
  }
  func.func @transform_2(%arg0: i32, %arg1: i32, %arg2: i32) -> (i32, i32) {
    %c0_i32 = arith.constant 0 : i32
    %c0_i32_0 = arith.constant 0 : i32
    return %c0_i32, %arg1 : i32, i32
  }
  func.func @transform_3(%arg0: i32, %arg1: i32, %arg2: i32) -> (i32, i32) {
    %c0_i32 = arith.constant 0 : i32
    return %arg0, %arg1 : i32, i32
  }
}

module attributes {stable_mosaic.version = 11 : i64} {
  func.func @_matmul_kernel(%arg0: i32, %arg1: i32, %arg2: i32, %arg3: memref<256x128xbf16, #tpu.memory_space<vmem>>, %arg4: memref<128x512xbf16, #tpu.memory_space<vmem>>, %arg5: memref<1x512xf32, #tpu.memory_space<vmem>>, %arg6: memref<256x512xf32, #tpu.memory_space<vmem>>, %arg7: memref<256x512xf32, #tpu.memory_space<vmem>>) attributes {dimension_semantics = [#tpu.dimension_semantics<parallel>, #tpu.dimension_semantics<parallel>, #tpu.dimension_semantics<arbitrary>], iteration_bounds = array<i64: 1, 1, 1>, scalar_prefetch = 0 : i64, scratch_operands = 1 : i64, tpu.core_type = #tpu.core_type<tc>, window_params = [{transform_indices = @transform_0, window_bounds = array<i64: 256, 128>}, {transform_indices = @transform_1, window_bounds = array<i64: 128, 512>}, {transform_indices = @transform_2, window_bounds = array<i64: 1, 512>}, {transform_indices = @transform_3, window_bounds = array<i64: 256, 512>}]} {
    %c0_i32 = arith.constant 0 : i32
    %0 = arith.cmpi eq, %arg2, %c0_i32 : i32
    %1 = arith.extui %0 : i1 to i32
    %c0_i32_0 = arith.constant 0 : i32
    %2 = arith.cmpi ne, %1, %c0_i32_0 : i32
    scf.if %2 {
      %cst_10 = arith.constant 0.000000e+00 : f32
      %12 = vector.broadcast %cst_10 : f32 to vector<256x512xf32>
      %c0_11 = arith.constant 0 : index
      %c0_12 = arith.constant 0 : index
      %13 = vector.load %arg7[%c0_11, %c0_12] : memref<256x512xf32, #tpu.memory_space<vmem>>, vector<256x512xf32>
      tpu.vector_store %arg7[%c0_11, %c0_12], %12 {strides = array<i32>} : memref<256x512xf32, #tpu.memory_space<vmem>>, vector<256x512xf32>,
    } else {
    }
    %c0 = arith.constant 0 : index
    %c0_1 = arith.constant 0 : index
    %3 = vector.load %arg7[%c0, %c0_1] : memref<256x512xf32, #tpu.memory_space<vmem>>, vector<256x512xf32>
    %c0_2 = arith.constant 0 : index
    %c0_3 = arith.constant 0 : index
    %4 = vector.load %arg3[%c0_2, %c0_3] : memref<256x128xbf16, #tpu.memory_space<vmem>>, vector<256x128xbf16>
    %c0_4 = arith.constant 0 : index
    %c0_5 = arith.constant 0 : index
    %5 = vector.load %arg4[%c0_4, %c0_5] : memref<128x512xbf16, #tpu.memory_space<vmem>>, vector<128x512xbf16>
    %cst = arith.constant dense<0.000000e+00> : vector<256x512xf32>
    %6 = tpu.matmul %4, %5, %cst {dimension_numbers = #tpu.dot_dimension_numbers<[1], [0], [0], [1], [0, 0, 1, 1], [], []>} : vector<256x128xbf16>, vector<128x512xbf16>, vector<256x512xf32> -> vector<256x512xf32>
    %7 = arith.addf %3, %6 : vector<256x512xf32>
    %c0_6 = arith.constant 0 : index
    %c0_7 = arith.constant 0 : index
    %8 = vector.load %arg7[%c0_6, %c0_7] : memref<256x512xf32, #tpu.memory_space<vmem>>, vector<256x512xf32>
    tpu.vector_store %arg7[%c0_6, %c0_7], %7 {strides = array<i32>} : memref<256x512xf32, #tpu.memory_space<vmem>>, vector<256x512xf32>,
    %c0_i32_8 = arith.constant 0 : i32
    %9 = arith.cmpi eq, %arg2, %c0_i32_8 : i32
    %10 = arith.extui %9 : i1 to i32
    %c0_i32_9 = arith.constant 0 : i32
    %11 = arith.cmpi ne, %10, %c0_i32_9 : i32
    scf.if %11 {
      %c0_10 = arith.constant 0 : index
      %c0_11 = arith.constant 0 : index
      %12 = vector.load %arg7[%c0_10, %c0_11] : memref<256x512xf32, #tpu.memory_space<vmem>>, vector<256x512xf32>
      %c0_12 = arith.constant 0 : index
      %c0_13 = arith.constant 0 : index
      %13 = vector.load %arg5[%c0_12, %c0_13] : memref<1x512xf32, #tpu.memory_space<vmem>>, vector<1x512xf32>
      %14 = vector.broadcast %13 : vector<1x512xf32> to vector<256x512xf32>
      %15 = arith.addf %12, %14 : vector<256x512xf32>
      %c0_14 = arith.constant 0 : index
      %c0_15 = arith.constant 0 : index
      %16 = vector.load %arg6[%c0_14, %c0_15] : memref<256x512xf32, #tpu.memory_space<vmem>>, vector<256x512xf32>
      tpu.vector_store %arg6[%c0_14, %c0_15], %15 {strides = array<i32>} : memref<256x512xf32, #tpu.memory_space<vmem>>, vector<256x512xf32>,
    } else {
    }
    return
  }
  func.func @transform_0(%arg0: i32, %arg1: i32, %arg2: i32) -> (i32, i32) {
    %c0_i32 = arith.constant 0 : i32
    return %arg0, %arg2 : i32, i32
  }
  func.func @transform_1(%arg0: i32, %arg1: i32, %arg2: i32) -> (i32, i32) {
    %c0_i32 = arith.constant 0 : i32
    return %arg2, %arg1 : i32, i32
  }
  func.func @transform_2(%arg0: i32, %arg1: i32, %arg2: i32) -> (i32, i32) {
    %c0_i32 = arith.constant 0 : i32
    %c0_i32_0 = arith.constant 0 : i32
    return %c0_i32, %arg1 : i32, i32
  }
  func.func @transform_3(%arg0: i32, %arg1: i32, %arg2: i32) -> (i32, i32) {
    %c0_i32 = arith.constant 0 : i32
    return %arg0, %arg1 : i32, i32
  }
}

module attributes {stable_mosaic.version = 11 : i64} {
  func.func @_lstm_step_kernel(%arg0: i32, %arg1: i32, %arg2: memref<128x128xbf16, #tpu.memory_space<vmem>>, %arg3: memref<128x512xbf16, #tpu.memory_space<vmem>>, %arg4: memref<128x512xf32, #tpu.memory_space<vmem>>, %arg5: memref<128x128xf32, #tpu.memory_space<vmem>>, %arg6: memref<128x128xf32, #tpu.memory_space<vmem>>, %arg7: memref<128x128xf32, #tpu.memory_space<vmem>>, %arg8: memref<128x512xf32, #tpu.memory_space<vmem>>) attributes {dimension_semantics = [#tpu.dimension_semantics<parallel>, #tpu.dimension_semantics<arbitrary>], iteration_bounds = array<i64: 1, 1>, scalar_prefetch = 0 : i64, scratch_operands = 1 : i64, tpu.core_type = #tpu.core_type<tc>, window_params = [{transform_indices = @transform_0, window_bounds = array<i64: 128, 128>}, {transform_indices = @transform_1, window_bounds = array<i64: 128, 512>}, {transform_indices = @transform_2, window_bounds = array<i64: 128, 512>}, {transform_indices = @transform_3, window_bounds = array<i64: 128, 128>}, {transform_indices = @transform_4, window_bounds = array<i64: 128, 128>}, {transform_indices = @transform_5, window_bounds = array<i64: 128, 128>}]} {
    %c0_i32 = arith.constant 0 : i32
    %0 = arith.cmpi eq, %arg1, %c0_i32 : i32
    %1 = arith.extui %0 : i1 to i32
    %c0_i32_0 = arith.constant 0 : i32
    %2 = arith.cmpi ne, %1, %c0_i32_0 : i32
    scf.if %2 {
      %cst_10 = arith.constant 0.000000e+00 : f32
      %12 = vector.broadcast %cst_10 : f32 to vector<128x512xf32>
      %c0_11 = arith.constant 0 : index
      %c0_12 = arith.constant 0 : index
      %13 = vector.load %arg8[%c0_11, %c0_12] : memref<128x512xf32, #tpu.memory_space<vmem>>, vector<128x512xf32>
      tpu.vector_store %arg8[%c0_11, %c0_12], %12 {strides = array<i32>} : memref<128x512xf32, #tpu.memory_space<vmem>>, vector<128x512xf32>,
    } else {
    }
    %c0 = arith.constant 0 : index
    %c0_1 = arith.constant 0 : index
    %3 = vector.load %arg8[%c0, %c0_1] : memref<128x512xf32, #tpu.memory_space<vmem>>, vector<128x512xf32>
    %c0_2 = arith.constant 0 : index
    %c0_3 = arith.constant 0 : index
    %4 = vector.load %arg2[%c0_2, %c0_3] : memref<128x128xbf16, #tpu.memory_space<vmem>>, vector<128x128xbf16>
    %c0_4 = arith.constant 0 : index
    %c0_5 = arith.constant 0 : index
    %5 = vector.load %arg3[%c0_4, %c0_5] : memref<128x512xbf16, #tpu.memory_space<vmem>>, vector<128x512xbf16>
    %cst = arith.constant dense<0.000000e+00> : vector<128x512xf32>
    %6 = tpu.matmul %4, %5, %cst {dimension_numbers = #tpu.dot_dimension_numbers<[1], [0], [0], [1], [0, 0, 1, 1], [], []>} : vector<128x128xbf16>, vector<128x512xbf16>, vector<128x512xf32> -> vector<128x512xf32>
    %7 = arith.addf %3, %6 : vector<128x512xf32>
    %c0_6 = arith.constant 0 : index
    %c0_7 = arith.constant 0 : index
    %8 = vector.load %arg8[%c0_6, %c0_7] : memref<128x512xf32, #tpu.memory_space<vmem>>, vector<128x512xf32>
    tpu.vector_store %arg8[%c0_6, %c0_7], %7 {strides = array<i32>} : memref<128x512xf32, #tpu.memory_space<vmem>>, vector<128x512xf32>,
    %c0_i32_8 = arith.constant 0 : i32
    %9 = arith.cmpi eq, %arg1, %c0_i32_8 : i32
    %10 = arith.extui %9 : i1 to i32
    %c0_i32_9 = arith.constant 0 : i32
    %11 = arith.cmpi ne, %10, %c0_i32_9 : i32
    scf.if %11 {
      %c0_10 = arith.constant 0 : index
      %c0_11 = arith.constant 0 : index
      %12 = vector.load %arg8[%c0_10, %c0_11] : memref<128x512xf32, #tpu.memory_space<vmem>>, vector<128x512xf32>
      %c0_12 = arith.constant 0 : index
      %c0_13 = arith.constant 0 : index
      %13 = vector.load %arg4[%c0_12, %c0_13] : memref<128x512xf32, #tpu.memory_space<vmem>>, vector<128x512xf32>
      %14 = arith.addf %12, %13 : vector<128x512xf32>
      %15 = vector.extract_strided_slice %14 {offsets = [0, 0], sizes = [128, 128], strides = [1, 1]} : vector<128x512xf32> to vector<128x128xf32>
      %16 = arith.negf %15 : vector<128x128xf32>
      %17 = math.exp %16 : vector<128x128xf32>
      %cst_14 = arith.constant 1.000000e+00 : f32
      %18 = vector.broadcast %cst_14 : f32 to vector<128x128xf32>
      %19 = arith.addf %18, %17 : vector<128x128xf32>
      %20 = arith.divf %18, %19 : vector<128x128xf32>
      %21 = vector.extract_strided_slice %14 {offsets = [0, 128], sizes = [128, 128], strides = [1, 1]} : vector<128x512xf32> to vector<128x128xf32>
      %22 = arith.negf %21 : vector<128x128xf32>
      %23 = math.exp %22 : vector<128x128xf32>
      %cst_15 = arith.constant 1.000000e+00 : f32
      %24 = vector.broadcast %cst_15 : f32 to vector<128x128xf32>
      %25 = arith.addf %24, %23 : vector<128x128xf32>
      %26 = arith.divf %24, %25 : vector<128x128xf32>
      %27 = vector.extract_strided_slice %14 {offsets = [0, 256], sizes = [128, 128], strides = [1, 1]} : vector<128x512xf32> to vector<128x128xf32>
      %28 = arith.negf %27 : vector<128x128xf32>
      %29 = math.exp %28 : vector<128x128xf32>
      %cst_16 = arith.constant 1.000000e+00 : f32
      %30 = vector.broadcast %cst_16 : f32 to vector<128x128xf32>
      %31 = arith.addf %30, %29 : vector<128x128xf32>
      %32 = arith.divf %30, %31 : vector<128x128xf32>
      %33 = vector.extract_strided_slice %14 {offsets = [0, 384], sizes = [128, 128], strides = [1, 1]} : vector<128x512xf32> to vector<128x128xf32>
      %34 = math.tanh %33 : vector<128x128xf32>
      %c0_17 = arith.constant 0 : index
      %c0_18 = arith.constant 0 : index
      %35 = vector.load %arg5[%c0_17, %c0_18] : memref<128x128xf32, #tpu.memory_space<vmem>>, vector<128x128xf32>
      %36 = arith.mulf %26, %35 : vector<128x128xf32>
      %37 = arith.mulf %20, %34 : vector<128x128xf32>
      %38 = arith.addf %36, %37 : vector<128x128xf32>
      %39 = math.tanh %38 : vector<128x128xf32>
      %40 = arith.mulf %32, %39 : vector<128x128xf32>
      %c0_19 = arith.constant 0 : index
      %c0_20 = arith.constant 0 : index
      %41 = vector.load %arg6[%c0_19, %c0_20] : memref<128x128xf32, #tpu.memory_space<vmem>>, vector<128x128xf32>
      tpu.vector_store %arg6[%c0_19, %c0_20], %40 {strides = array<i32>} : memref<128x128xf32, #tpu.memory_space<vmem>>, vector<128x128xf32>,
      %c0_21 = arith.constant 0 : index
      %c0_22 = arith.constant 0 : index
      %42 = vector.load %arg7[%c0_21, %c0_22] : memref<128x128xf32, #tpu.memory_space<vmem>>, vector<128x128xf32>
      tpu.vector_store %arg7[%c0_21, %c0_22], %38 {strides = array<i32>} : memref<128x128xf32, #tpu.memory_space<vmem>>, vector<128x128xf32>,
    } else {
    }
    return
  }
  func.func @transform_0(%arg0: i32, %arg1: i32) -> (i32, i32) {
    %c0_i32 = arith.constant 0 : i32
    return %arg0, %arg1 : i32, i32
  }
  func.func @transform_1(%arg0: i32, %arg1: i32) -> (i32, i32) {
    %c0_i32 = arith.constant 0 : i32
    %c0_i32_0 = arith.constant 0 : i32
    return %arg1, %c0_i32 : i32, i32
  }
  func.func @transform_2(%arg0: i32, %arg1: i32) -> (i32, i32) {
    %c0_i32 = arith.constant 0 : i32
    %c0_i32_0 = arith.constant 0 : i32
    return %arg0, %c0_i32 : i32, i32
  }
  func.func @transform_3(%arg0: i32, %arg1: i32) -> (i32, i32) {
    %c0_i32 = arith.constant 0 : i32
    %c0_i32_0 = arith.constant 0 : i32
    return %arg0, %c0_i32 : i32, i32
  }
  func.func @transform_4(%arg0: i32, %arg1: i32) -> (i32, i32) {
    %c0_i32 = arith.constant 0 : i32
    %c0_i32_0 = arith.constant 0 : i32
    return %arg0, %c0_i32 : i32, i32
  }
  func.func @transform_5(%arg0: i32, %arg1: i32) -> (i32, i32) {
    %c0_i32 = arith.constant 0 : i32
    %c0_i32_0 = arith.constant 0 : i32
    return %arg0, %c0_i32 : i32, i32
  }
}

module attributes {stable_mosaic.version = 11 : i64} {
  func.func @_lstm_step_kernel(%arg0: i32, %arg1: i32, %arg2: memref<128x128xbf16, #tpu.memory_space<vmem>>, %arg3: memref<128x512xbf16, #tpu.memory_space<vmem>>, %arg4: memref<128x512xf32, #tpu.memory_space<vmem>>, %arg5: memref<128x128xf32, #tpu.memory_space<vmem>>, %arg6: memref<128x128xf32, #tpu.memory_space<vmem>>, %arg7: memref<128x128xf32, #tpu.memory_space<vmem>>, %arg8: memref<128x512xf32, #tpu.memory_space<vmem>>) attributes {dimension_semantics = [#tpu.dimension_semantics<parallel>, #tpu.dimension_semantics<arbitrary>], iteration_bounds = array<i64: 1, 1>, scalar_prefetch = 0 : i64, scratch_operands = 1 : i64, tpu.core_type = #tpu.core_type<tc>, window_params = [{transform_indices = @transform_0, window_bounds = array<i64: 128, 128>}, {transform_indices = @transform_1, window_bounds = array<i64: 128, 512>}, {transform_indices = @transform_2, window_bounds = array<i64: 128, 512>}, {transform_indices = @transform_3, window_bounds = array<i64: 128, 128>}, {transform_indices = @transform_4, window_bounds = array<i64: 128, 128>}, {transform_indices = @transform_5, window_bounds = array<i64: 128, 128>}]} {
    %c0_i32 = arith.constant 0 : i32
    %0 = arith.cmpi eq, %arg1, %c0_i32 : i32
    %1 = arith.extui %0 : i1 to i32
    %c0_i32_0 = arith.constant 0 : i32
    %2 = arith.cmpi ne, %1, %c0_i32_0 : i32
    scf.if %2 {
      %cst_10 = arith.constant 0.000000e+00 : f32
      %12 = vector.broadcast %cst_10 : f32 to vector<128x512xf32>
      %c0_11 = arith.constant 0 : index
      %c0_12 = arith.constant 0 : index
      %13 = vector.load %arg8[%c0_11, %c0_12] : memref<128x512xf32, #tpu.memory_space<vmem>>, vector<128x512xf32>
      tpu.vector_store %arg8[%c0_11, %c0_12], %12 {strides = array<i32>} : memref<128x512xf32, #tpu.memory_space<vmem>>, vector<128x512xf32>,
    } else {
    }
    %c0 = arith.constant 0 : index
    %c0_1 = arith.constant 0 : index
    %3 = vector.load %arg8[%c0, %c0_1] : memref<128x512xf32, #tpu.memory_space<vmem>>, vector<128x512xf32>
    %c0_2 = arith.constant 0 : index
    %c0_3 = arith.constant 0 : index
    %4 = vector.load %arg2[%c0_2, %c0_3] : memref<128x128xbf16, #tpu.memory_space<vmem>>, vector<128x128xbf16>
    %c0_4 = arith.constant 0 : index
    %c0_5 = arith.constant 0 : index
    %5 = vector.load %arg3[%c0_4, %c0_5] : memref<128x512xbf16, #tpu.memory_space<vmem>>, vector<128x512xbf16>
    %cst = arith.constant dense<0.000000e+00> : vector<128x512xf32>
    %6 = tpu.matmul %4, %5, %cst {dimension_numbers = #tpu.dot_dimension_numbers<[1], [0], [0], [1], [0, 0, 1, 1], [], []>} : vector<128x128xbf16>, vector<128x512xbf16>, vector<128x512xf32> -> vector<128x512xf32>
    %7 = arith.addf %3, %6 : vector<128x512xf32>
    %c0_6 = arith.constant 0 : index
    %c0_7 = arith.constant 0 : index
    %8 = vector.load %arg8[%c0_6, %c0_7] : memref<128x512xf32, #tpu.memory_space<vmem>>, vector<128x512xf32>
    tpu.vector_store %arg8[%c0_6, %c0_7], %7 {strides = array<i32>} : memref<128x512xf32, #tpu.memory_space<vmem>>, vector<128x512xf32>,
    %c0_i32_8 = arith.constant 0 : i32
    %9 = arith.cmpi eq, %arg1, %c0_i32_8 : i32
    %10 = arith.extui %9 : i1 to i32
    %c0_i32_9 = arith.constant 0 : i32
    %11 = arith.cmpi ne, %10, %c0_i32_9 : i32
    scf.if %11 {
      %c0_10 = arith.constant 0 : index
      %c0_11 = arith.constant 0 : index
      %12 = vector.load %arg8[%c0_10, %c0_11] : memref<128x512xf32, #tpu.memory_space<vmem>>, vector<128x512xf32>
      %c0_12 = arith.constant 0 : index
      %c0_13 = arith.constant 0 : index
      %13 = vector.load %arg4[%c0_12, %c0_13] : memref<128x512xf32, #tpu.memory_space<vmem>>, vector<128x512xf32>
      %14 = arith.addf %12, %13 : vector<128x512xf32>
      %15 = vector.extract_strided_slice %14 {offsets = [0, 0], sizes = [128, 128], strides = [1, 1]} : vector<128x512xf32> to vector<128x128xf32>
      %16 = arith.negf %15 : vector<128x128xf32>
      %17 = math.exp %16 : vector<128x128xf32>
      %cst_14 = arith.constant 1.000000e+00 : f32
      %18 = vector.broadcast %cst_14 : f32 to vector<128x128xf32>
      %19 = arith.addf %18, %17 : vector<128x128xf32>
      %20 = arith.divf %18, %19 : vector<128x128xf32>
      %21 = vector.extract_strided_slice %14 {offsets = [0, 128], sizes = [128, 128], strides = [1, 1]} : vector<128x512xf32> to vector<128x128xf32>
      %22 = arith.negf %21 : vector<128x128xf32>
      %23 = math.exp %22 : vector<128x128xf32>
      %cst_15 = arith.constant 1.000000e+00 : f32
      %24 = vector.broadcast %cst_15 : f32 to vector<128x128xf32>
      %25 = arith.addf %24, %23 : vector<128x128xf32>
      %26 = arith.divf %24, %25 : vector<128x128xf32>
      %27 = vector.extract_strided_slice %14 {offsets = [0, 256], sizes = [128, 128], strides = [1, 1]} : vector<128x512xf32> to vector<128x128xf32>
      %28 = arith.negf %27 : vector<128x128xf32>
      %29 = math.exp %28 : vector<128x128xf32>
      %cst_16 = arith.constant 1.000000e+00 : f32
      %30 = vector.broadcast %cst_16 : f32 to vector<128x128xf32>
      %31 = arith.addf %30, %29 : vector<128x128xf32>
      %32 = arith.divf %30, %31 : vector<128x128xf32>
      %33 = vector.extract_strided_slice %14 {offsets = [0, 384], sizes = [128, 128], strides = [1, 1]} : vector<128x512xf32> to vector<128x128xf32>
      %34 = math.tanh %33 : vector<128x128xf32>
      %c0_17 = arith.constant 0 : index
      %c0_18 = arith.constant 0 : index
      %35 = vector.load %arg5[%c0_17, %c0_18] : memref<128x128xf32, #tpu.memory_space<vmem>>, vector<128x128xf32>
      %36 = arith.mulf %26, %35 : vector<128x128xf32>
      %37 = arith.mulf %20, %34 : vector<128x128xf32>
      %38 = arith.addf %36, %37 : vector<128x128xf32>
      %39 = math.tanh %38 : vector<128x128xf32>
      %40 = arith.mulf %32, %39 : vector<128x128xf32>
      %c0_19 = arith.constant 0 : index
      %c0_20 = arith.constant 0 : index
      %41 = vector.load %arg6[%c0_19, %c0_20] : memref<128x128xf32, #tpu.memory_space<vmem>>, vector<128x128xf32>
      tpu.vector_store %arg6[%c0_19, %c0_20], %40 {strides = array<i32>} : memref<128x128xf32, #tpu.memory_space<vmem>>, vector<128x128xf32>,
      %c0_21 = arith.constant 0 : index
      %c0_22 = arith.constant 0 : index
      %42 = vector.load %arg7[%c0_21, %c0_22] : memref<128x128xf32, #tpu.memory_space<vmem>>, vector<128x128xf32>
      tpu.vector_store %arg7[%c0_21, %c0_22], %38 {strides = array<i32>} : memref<128x128xf32, #tpu.memory_space<vmem>>, vector<128x128xf32>,
    } else {
    }
    return
  }
  func.func @transform_0(%arg0: i32, %arg1: i32) -> (i32, i32) {
    %c0_i32 = arith.constant 0 : i32
    return %arg0, %arg1 : i32, i32
  }
  func.func @transform_1(%arg0: i32, %arg1: i32) -> (i32, i32) {
    %c0_i32 = arith.constant 0 : i32
    %c0_i32_0 = arith.constant 0 : i32
    return %arg1, %c0_i32 : i32, i32
  }
  func.func @transform_2(%arg0: i32, %arg1: i32) -> (i32, i32) {
    %c0_i32 = arith.constant 0 : i32
    %c0_i32_0 = arith.constant 0 : i32
    return %arg0, %c0_i32 : i32, i32
  }
  func.func @transform_3(%arg0: i32, %arg1: i32) -> (i32, i32) {
    %c0_i32 = arith.constant 0 : i32
    %c0_i32_0 = arith.constant 0 : i32
    return %arg0, %c0_i32 : i32, i32
  }
  func.func @transform_4(%arg0: i32, %arg1: i32) -> (i32, i32) {
    %c0_i32 = arith.constant 0 : i32
    %c0_i32_0 = arith.constant 0 : i32
    return %arg0, %c0_i32 : i32, i32
  }
  func.func @transform_5(%arg0: i32, %arg1: i32) -> (i32, i32) {
    %c0_i32 = arith.constant 0 : i32
    %c0_i32_0 = arith.constant 0 : i32
    return %arg0, %c0_i32 : i32, i32
  }
}

module attributes {stable_mosaic.version = 11 : i64} {
  func.func @_matmul_kernel(%arg0: i32, %arg1: i32, %arg2: i32, %arg3: memref<128x128xbf16, #tpu.memory_space<vmem>>, %arg4: memref<128x128xbf16, #tpu.memory_space<vmem>>, %arg5: memref<1x128xf32, #tpu.memory_space<vmem>>, %arg6: memref<128x128xbf16, #tpu.memory_space<vmem>>, %arg7: memref<128x128xf32, #tpu.memory_space<vmem>>) attributes {dimension_semantics = [#tpu.dimension_semantics<parallel>, #tpu.dimension_semantics<parallel>, #tpu.dimension_semantics<arbitrary>], iteration_bounds = array<i64: 1, 1, 1>, scalar_prefetch = 0 : i64, scratch_operands = 1 : i64, tpu.core_type = #tpu.core_type<tc>, window_params = [{transform_indices = @transform_0, window_bounds = array<i64: 128, 128>}, {transform_indices = @transform_1, window_bounds = array<i64: 128, 128>}, {transform_indices = @transform_2, window_bounds = array<i64: 1, 128>}, {transform_indices = @transform_3, window_bounds = array<i64: 128, 128>}]} {
    %c0_i32 = arith.constant 0 : i32
    %0 = arith.cmpi eq, %arg2, %c0_i32 : i32
    %1 = arith.extui %0 : i1 to i32
    %c0_i32_0 = arith.constant 0 : i32
    %2 = arith.cmpi ne, %1, %c0_i32_0 : i32
    scf.if %2 {
      %cst_10 = arith.constant 0.000000e+00 : f32
      %12 = vector.broadcast %cst_10 : f32 to vector<128x128xf32>
      %c0_11 = arith.constant 0 : index
      %c0_12 = arith.constant 0 : index
      %13 = vector.load %arg7[%c0_11, %c0_12] : memref<128x128xf32, #tpu.memory_space<vmem>>, vector<128x128xf32>
      tpu.vector_store %arg7[%c0_11, %c0_12], %12 {strides = array<i32>} : memref<128x128xf32, #tpu.memory_space<vmem>>, vector<128x128xf32>,
    } else {
    }
    %c0 = arith.constant 0 : index
    %c0_1 = arith.constant 0 : index
    %3 = vector.load %arg7[%c0, %c0_1] : memref<128x128xf32, #tpu.memory_space<vmem>>, vector<128x128xf32>
    %c0_2 = arith.constant 0 : index
    %c0_3 = arith.constant 0 : index
    %4 = vector.load %arg3[%c0_2, %c0_3] : memref<128x128xbf16, #tpu.memory_space<vmem>>, vector<128x128xbf16>
    %c0_4 = arith.constant 0 : index
    %c0_5 = arith.constant 0 : index
    %5 = vector.load %arg4[%c0_4, %c0_5] : memref<128x128xbf16, #tpu.memory_space<vmem>>, vector<128x128xbf16>
    %cst = arith.constant dense<0.000000e+00> : vector<128x128xf32>
    %6 = tpu.matmul %4, %5, %cst {dimension_numbers = #tpu.dot_dimension_numbers<[1], [0], [0], [1], [0, 0, 1, 1], [], []>} : vector<128x128xbf16>, vector<128x128xbf16>, vector<128x128xf32> -> vector<128x128xf32>
    %7 = arith.addf %3, %6 : vector<128x128xf32>
    %c0_6 = arith.constant 0 : index
    %c0_7 = arith.constant 0 : index
    %8 = vector.load %arg7[%c0_6, %c0_7] : memref<128x128xf32, #tpu.memory_space<vmem>>, vector<128x128xf32>
    tpu.vector_store %arg7[%c0_6, %c0_7], %7 {strides = array<i32>} : memref<128x128xf32, #tpu.memory_space<vmem>>, vector<128x128xf32>,
    %c0_i32_8 = arith.constant 0 : i32
    %9 = arith.cmpi eq, %arg2, %c0_i32_8 : i32
    %10 = arith.extui %9 : i1 to i32
    %c0_i32_9 = arith.constant 0 : i32
    %11 = arith.cmpi ne, %10, %c0_i32_9 : i32
    scf.if %11 {
      %c0_10 = arith.constant 0 : index
      %c0_11 = arith.constant 0 : index
      %12 = vector.load %arg7[%c0_10, %c0_11] : memref<128x128xf32, #tpu.memory_space<vmem>>, vector<128x128xf32>
      %c0_12 = arith.constant 0 : index
      %c0_13 = arith.constant 0 : index
      %13 = vector.load %arg5[%c0_12, %c0_13] : memref<1x128xf32, #tpu.memory_space<vmem>>, vector<1x128xf32>
      %14 = vector.broadcast %13 : vector<1x128xf32> to vector<128x128xf32>
      %15 = arith.addf %12, %14 : vector<128x128xf32>
      %cst_14 = arith.constant 0.000000e+00 : f32
      %16 = vector.broadcast %cst_14 : f32 to vector<128x128xf32>
      %17 = arith.maximumf %15, %16 : vector<128x128xf32>
      %18 = arith.truncf %17 : vector<128x128xf32> to vector<128x128xbf16>
      %c0_15 = arith.constant 0 : index
      %c0_16 = arith.constant 0 : index
      %19 = vector.load %arg6[%c0_15, %c0_16] : memref<128x128xbf16, #tpu.memory_space<vmem>>, vector<128x128xbf16>
      tpu.vector_store %arg6[%c0_15, %c0_16], %18 {strides = array<i32>} : memref<128x128xbf16, #tpu.memory_space<vmem>>, vector<128x128xbf16>,
    } else {
    }
    return
  }
  func.func @transform_0(%arg0: i32, %arg1: i32, %arg2: i32) -> (i32, i32) {
    %c0_i32 = arith.constant 0 : i32
    return %arg0, %arg2 : i32, i32
  }
  func.func @transform_1(%arg0: i32, %arg1: i32, %arg2: i32) -> (i32, i32) {
    %c0_i32 = arith.constant 0 : i32
    return %arg2, %arg1 : i32, i32
  }
  func.func @transform_2(%arg0: i32, %arg1: i32, %arg2: i32) -> (i32, i32) {
    %c0_i32 = arith.constant 0 : i32
    %c0_i32_0 = arith.constant 0 : i32
    return %c0_i32, %arg1 : i32, i32
  }
  func.func @transform_3(%arg0: i32, %arg1: i32, %arg2: i32) -> (i32, i32) {
    %c0_i32 = arith.constant 0 : i32
    return %arg0, %arg1 : i32, i32
  }
}

module attributes {stable_mosaic.version = 11 : i64} {
  func.func @_prob_bits_kernel(%arg0: i32, %arg1: i32, %arg2: memref<8x512xf32, #tpu.memory_space<vmem>>, %arg3: memref<8x512xf32, #tpu.memory_space<vmem>>) attributes {dimension_semantics = [#tpu.dimension_semantics<parallel>, #tpu.dimension_semantics<arbitrary>], iteration_bounds = array<i64: 1, 1>, scalar_prefetch = 0 : i64, scratch_operands = 0 : i64, tpu.core_type = #tpu.core_type<tc>, window_params = [{transform_indices = @transform_0, window_bounds = array<i64: 8, 512>}, {transform_indices = @transform_1, window_bounds = array<i64: 8, 512>}]} {
    %c0_i32 = arith.constant 0 : i32
    %0 = arith.cmpi eq, %arg1, %c0_i32 : i32
    %1 = arith.extui %0 : i1 to i32
    %c0_i32_0 = arith.constant 0 : i32
    %2 = arith.cmpi ne, %1, %c0_i32_0 : i32
    scf.if %2 {
      %cst_11 = arith.constant 0.000000e+00 : f32
      %20 = vector.broadcast %cst_11 : f32 to vector<8x512xf32>
      %c0_12 = arith.constant 0 : index
      %c0_13 = arith.constant 0 : index
      %21 = vector.load %arg3[%c0_12, %c0_13] : memref<8x512xf32, #tpu.memory_space<vmem>>, vector<8x512xf32>
      tpu.vector_store %arg3[%c0_12, %c0_13], %20 {strides = array<i32>} : memref<8x512xf32, #tpu.memory_space<vmem>>, vector<8x512xf32>,
    } else {
    }
    %c0 = arith.constant 0 : index
    %c0_1 = arith.constant 0 : index
    %3 = vector.load %arg2[%c0, %c0_1] : memref<8x512xf32, #tpu.memory_space<vmem>>, vector<8x512xf32>
    %cst = arith.constant 1.000000e-10 : f32
    %4 = vector.broadcast %cst : f32 to vector<8x512xf32>
    %5 = arith.addf %3, %4 : vector<8x512xf32>
    %6 = math.log %5 : vector<8x512xf32>
    %cst_2 = arith.constant 0.000000e+00 : f32
    %7 = vector.broadcast %cst_2 : f32 to vector<8x512xf32>
    %8 = arith.subf %7, %6 : vector<8x512xf32>
    %cst_3 = arith.constant 1.44269502 : f32
    %9 = vector.broadcast %cst_3 : f32 to vector<8x512xf32>
    %10 = arith.mulf %8, %9 : vector<8x512xf32>
    %cst_4 = arith.constant 0.000000e+00 : f32
    %cst_5 = arith.constant 5.000000e+01 : f32
    %11 = vector.broadcast %cst_4 : f32 to vector<8x512xf32>
    %12 = arith.maximumf %11, %10 : vector<8x512xf32>
    %13 = vector.broadcast %cst_5 : f32 to vector<8x512xf32>
    %14 = arith.minimumf %13, %12 : vector<8x512xf32>
    %c0_6 = arith.constant 0 : index
    %c0_7 = arith.constant 0 : index
    %15 = vector.load %arg3[%c0_6, %c0_7] : memref<8x512xf32, #tpu.memory_space<vmem>>, vector<8x512xf32>
    %16 = vector.shape_cast %14 : vector<8x512xf32> to vector<1x8x512xf32>
    %cst_8 = arith.constant dense<0.000000e+00> : vector<8x512xf32>
    %17 = vector.multi_reduction <add>, %16, %cst_8 [0] : vector<1x8x512xf32> to vector<8x512xf32>
    %18 = arith.addf %15, %17 : vector<8x512xf32>
    %c0_9 = arith.constant 0 : index
    %c0_10 = arith.constant 0 : index
    %19 = vector.load %arg3[%c0_9, %c0_10] : memref<8x512xf32, #tpu.memory_space<vmem>>, vector<8x512xf32>
    tpu.vector_store %arg3[%c0_9, %c0_10], %18 {strides = array<i32>} : memref<8x512xf32, #tpu.memory_space<vmem>>, vector<8x512xf32>,
    return
  }
  func.func @transform_0(%arg0: i32, %arg1: i32) -> (i32, i32) {
    %c1_i32 = arith.constant 1 : i32
    %0 = arith.muli %arg0, %c1_i32 : i32
    %1 = arith.addi %0, %arg1 : i32
    %c0_i32 = arith.constant 0 : i32
    %c0_i32_0 = arith.constant 0 : i32
    return %1, %c0_i32 : i32, i32
  }
  func.func @transform_1(%arg0: i32, %arg1: i32) -> (i32, i32) {
    %c0_i32 = arith.constant 0 : i32
    %c0_i32_0 = arith.constant 0 : i32
    return %arg0, %c0_i32 : i32, i32
  }
}

module attributes {stable_mosaic.version = 11 : i64} {
  func.func @_matmul_kernel(%arg0: i32, %arg1: i32, %arg2: i32, %arg3: memref<128x128xbf16, #tpu.memory_space<vmem>>, %arg4: memref<128x128xbf16, #tpu.memory_space<vmem>>, %arg5: memref<1x128xf32, #tpu.memory_space<vmem>>, %arg6: memref<128x128xf32, #tpu.memory_space<vmem>>, %arg7: memref<128x128xf32, #tpu.memory_space<vmem>>) attributes {dimension_semantics = [#tpu.dimension_semantics<parallel>, #tpu.dimension_semantics<parallel>, #tpu.dimension_semantics<arbitrary>], iteration_bounds = array<i64: 1, 1, 1>, scalar_prefetch = 0 : i64, scratch_operands = 1 : i64, tpu.core_type = #tpu.core_type<tc>, window_params = [{transform_indices = @transform_0, window_bounds = array<i64: 128, 128>}, {transform_indices = @transform_1, window_bounds = array<i64: 128, 128>}, {transform_indices = @transform_2, window_bounds = array<i64: 1, 128>}, {transform_indices = @transform_3, window_bounds = array<i64: 128, 128>}]} {
    %c0_i32 = arith.constant 0 : i32
    %0 = arith.cmpi eq, %arg2, %c0_i32 : i32
    %1 = arith.extui %0 : i1 to i32
    %c0_i32_0 = arith.constant 0 : i32
    %2 = arith.cmpi ne, %1, %c0_i32_0 : i32
    scf.if %2 {
      %cst_10 = arith.constant 0.000000e+00 : f32
      %12 = vector.broadcast %cst_10 : f32 to vector<128x128xf32>
      %c0_11 = arith.constant 0 : index
      %c0_12 = arith.constant 0 : index
      %13 = vector.load %arg7[%c0_11, %c0_12] : memref<128x128xf32, #tpu.memory_space<vmem>>, vector<128x128xf32>
      tpu.vector_store %arg7[%c0_11, %c0_12], %12 {strides = array<i32>} : memref<128x128xf32, #tpu.memory_space<vmem>>, vector<128x128xf32>,
    } else {
    }
    %c0 = arith.constant 0 : index
    %c0_1 = arith.constant 0 : index
    %3 = vector.load %arg7[%c0, %c0_1] : memref<128x128xf32, #tpu.memory_space<vmem>>, vector<128x128xf32>
    %c0_2 = arith.constant 0 : index
    %c0_3 = arith.constant 0 : index
    %4 = vector.load %arg3[%c0_2, %c0_3] : memref<128x128xbf16, #tpu.memory_space<vmem>>, vector<128x128xbf16>
    %c0_4 = arith.constant 0 : index
    %c0_5 = arith.constant 0 : index
    %5 = vector.load %arg4[%c0_4, %c0_5] : memref<128x128xbf16, #tpu.memory_space<vmem>>, vector<128x128xbf16>
    %cst = arith.constant dense<0.000000e+00> : vector<128x128xf32>
    %6 = tpu.matmul %4, %5, %cst {dimension_numbers = #tpu.dot_dimension_numbers<[1], [0], [0], [1], [0, 0, 1, 1], [], []>} : vector<128x128xbf16>, vector<128x128xbf16>, vector<128x128xf32> -> vector<128x128xf32>
    %7 = arith.addf %3, %6 : vector<128x128xf32>
    %c0_6 = arith.constant 0 : index
    %c0_7 = arith.constant 0 : index
    %8 = vector.load %arg7[%c0_6, %c0_7] : memref<128x128xf32, #tpu.memory_space<vmem>>, vector<128x128xf32>
    tpu.vector_store %arg7[%c0_6, %c0_7], %7 {strides = array<i32>} : memref<128x128xf32, #tpu.memory_space<vmem>>, vector<128x128xf32>,
    %c0_i32_8 = arith.constant 0 : i32
    %9 = arith.cmpi eq, %arg2, %c0_i32_8 : i32
    %10 = arith.extui %9 : i1 to i32
    %c0_i32_9 = arith.constant 0 : i32
    %11 = arith.cmpi ne, %10, %c0_i32_9 : i32
    scf.if %11 {
      %c0_10 = arith.constant 0 : index
      %c0_11 = arith.constant 0 : index
      %12 = vector.load %arg7[%c0_10, %c0_11] : memref<128x128xf32, #tpu.memory_space<vmem>>, vector<128x128xf32>
      %c0_12 = arith.constant 0 : index
      %c0_13 = arith.constant 0 : index
      %13 = vector.load %arg5[%c0_12, %c0_13] : memref<1x128xf32, #tpu.memory_space<vmem>>, vector<1x128xf32>
      %14 = vector.broadcast %13 : vector<1x128xf32> to vector<128x128xf32>
      %15 = arith.addf %12, %14 : vector<128x128xf32>
      %c0_14 = arith.constant 0 : index
      %c0_15 = arith.constant 0 : index
      %16 = vector.load %arg6[%c0_14, %c0_15] : memref<128x128xf32, #tpu.memory_space<vmem>>, vector<128x128xf32>
      tpu.vector_store %arg6[%c0_14, %c0_15], %15 {strides = array<i32>} : memref<128x128xf32, #tpu.memory_space<vmem>>, vector<128x128xf32>,
    } else {
    }
    return
  }
  func.func @transform_0(%arg0: i32, %arg1: i32, %arg2: i32) -> (i32, i32) {
    %c0_i32 = arith.constant 0 : i32
    return %arg0, %arg2 : i32, i32
  }
  func.func @transform_1(%arg0: i32, %arg1: i32, %arg2: i32) -> (i32, i32) {
    %c0_i32 = arith.constant 0 : i32
    return %arg2, %arg1 : i32, i32
  }
  func.func @transform_2(%arg0: i32, %arg1: i32, %arg2: i32) -> (i32, i32) {
    %c0_i32 = arith.constant 0 : i32
    %c0_i32_0 = arith.constant 0 : i32
    return %c0_i32, %arg1 : i32, i32
  }
  func.func @transform_3(%arg0: i32, %arg1: i32, %arg2: i32) -> (i32, i32) {
    %c0_i32 = arith.constant 0 : i32
    return %arg0, %arg1 : i32, i32
  }
}

module attributes {stable_mosaic.version = 11 : i64} {
  func.func @_laplace_bits_kernel(%arg0: i32, %arg1: i32, %arg2: memref<8x512xf32, #tpu.memory_space<vmem>>, %arg3: memref<8x512xf32, #tpu.memory_space<vmem>>, %arg4: memref<8x512xf32, #tpu.memory_space<vmem>>, %arg5: memref<8x512xf32, #tpu.memory_space<vmem>>) attributes {dimension_semantics = [#tpu.dimension_semantics<parallel>, #tpu.dimension_semantics<arbitrary>], iteration_bounds = array<i64: 1, 1>, scalar_prefetch = 0 : i64, scratch_operands = 0 : i64, tpu.core_type = #tpu.core_type<tc>, window_params = [{transform_indices = @transform_0, window_bounds = array<i64: 8, 512>}, {transform_indices = @transform_1, window_bounds = array<i64: 8, 512>}, {transform_indices = @transform_2, window_bounds = array<i64: 8, 512>}, {transform_indices = @transform_3, window_bounds = array<i64: 8, 512>}]} {
    %c0_i32 = arith.constant 0 : i32
    %0 = arith.cmpi eq, %arg1, %c0_i32 : i32
    %1 = arith.extui %0 : i1 to i32
    %c0_i32_0 = arith.constant 0 : i32
    %2 = arith.cmpi ne, %1, %c0_i32_0 : i32
    scf.if %2 {
      %cst_29 = arith.constant 0.000000e+00 : f32
      %62 = vector.broadcast %cst_29 : f32 to vector<8x512xf32>
      %c0_30 = arith.constant 0 : index
      %c0_31 = arith.constant 0 : index
      %63 = vector.load %arg5[%c0_30, %c0_31] : memref<8x512xf32, #tpu.memory_space<vmem>>, vector<8x512xf32>
      tpu.vector_store %arg5[%c0_30, %c0_31], %62 {strides = array<i32>} : memref<8x512xf32, #tpu.memory_space<vmem>>, vector<8x512xf32>,
    } else {
    }
    %c0 = arith.constant 0 : index
    %c0_1 = arith.constant 0 : index
    %3 = vector.load %arg2[%c0, %c0_1] : memref<8x512xf32, #tpu.memory_space<vmem>>, vector<8x512xf32>
    %c0_2 = arith.constant 0 : index
    %c0_3 = arith.constant 0 : index
    %4 = vector.load %arg3[%c0_2, %c0_3] : memref<8x512xf32, #tpu.memory_space<vmem>>, vector<8x512xf32>
    %cst = arith.constant 1.000000e-10 : f32
    %cst_4 = arith.constant 1.000000e+10 : f32
    %5 = vector.broadcast %cst : f32 to vector<8x512xf32>
    %6 = arith.maximumf %5, %4 : vector<8x512xf32>
    %7 = vector.broadcast %cst_4 : f32 to vector<8x512xf32>
    %8 = arith.minimumf %7, %6 : vector<8x512xf32>
    %9 = tpu.reciprocal %8 {approx = true} : vector<8x512xf32> -> vector<8x512xf32>
    %c0_5 = arith.constant 0 : index
    %c0_6 = arith.constant 0 : index
    %10 = vector.load %arg4[%c0_5, %c0_6] : memref<8x512xf32, #tpu.memory_space<vmem>>, vector<8x512xf32>
    %cst_7 = arith.constant 5.000000e-01 : f32
    %11 = vector.broadcast %cst_7 : f32 to vector<8x512xf32>
    %12 = arith.addf %3, %11 : vector<8x512xf32>
    %13 = arith.subf %12, %10 : vector<8x512xf32>
    %cst_8 = arith.constant 5.000000e-01 : f32
    %14 = vector.broadcast %cst_8 : f32 to vector<8x512xf32>
    %15 = arith.subf %3, %14 : vector<8x512xf32>
    %16 = arith.subf %15, %10 : vector<8x512xf32>
    %17 = math.absf %13 : vector<8x512xf32>
    %cst_9 = arith.constant 0.000000e+00 : f32
    %18 = vector.broadcast %cst_9 : f32 to vector<8x512xf32>
    %19 = arith.subf %18, %17 : vector<8x512xf32>
    %20 = arith.mulf %19, %9 : vector<8x512xf32>
    %21 = math.exp %20 : vector<8x512xf32>
    %22 = math.absf %16 : vector<8x512xf32>
    %cst_10 = arith.constant 0.000000e+00 : f32
    %23 = vector.broadcast %cst_10 : f32 to vector<8x512xf32>
    %24 = arith.subf %23, %22 : vector<8x512xf32>
    %25 = arith.mulf %24, %9 : vector<8x512xf32>
    %26 = math.exp %25 : vector<8x512xf32>
    %cst_11 = arith.constant 0.000000e+00 : f32
    %27 = vector.broadcast %cst_11 : f32 to vector<8x512xf32>
    %28 = arith.cmpf oge, %13, %27 : vector<8x512xf32>
    %cst_12 = arith.constant 5.000000e-01 : f32
    %29 = vector.broadcast %cst_12 : f32 to vector<8x512xf32>
    %30 = arith.mulf %29, %21 : vector<8x512xf32>
    %cst_13 = arith.constant 1.000000e+00 : f32
    %31 = vector.broadcast %cst_13 : f32 to vector<8x512xf32>
    %32 = arith.subf %31, %30 : vector<8x512xf32>
    %cst_14 = arith.constant 5.000000e-01 : f32
    %33 = vector.broadcast %cst_14 : f32 to vector<8x512xf32>
    %34 = arith.mulf %33, %21 : vector<8x512xf32>
    %35 = arith.select %28, %32, %34 : vector<8x512xi1>, vector<8x512xf32>
    %cst_15 = arith.constant 0.000000e+00 : f32
    %36 = vector.broadcast %cst_15 : f32 to vector<8x512xf32>
    %37 = arith.cmpf oge, %16, %36 : vector<8x512xf32>
    %cst_16 = arith.constant 5.000000e-01 : f32
    %38 = vector.broadcast %cst_16 : f32 to vector<8x512xf32>
    %39 = arith.mulf %38, %26 : vector<8x512xf32>
    %cst_17 = arith.constant 1.000000e+00 : f32
    %40 = vector.broadcast %cst_17 : f32 to vector<8x512xf32>
    %41 = arith.subf %40, %39 : vector<8x512xf32>
    %cst_18 = arith.constant 5.000000e-01 : f32
    %42 = vector.broadcast %cst_18 : f32 to vector<8x512xf32>
    %43 = arith.mulf %42, %26 : vector<8x512xf32>
    %44 = arith.select %37, %41, %43 : vector<8x512xi1>, vector<8x512xf32>
    %45 = arith.subf %35, %44 : vector<8x512xf32>
    %cst_19 = arith.constant 1.000000e-10 : f32
    %46 = vector.broadcast %cst_19 : f32 to vector<8x512xf32>
    %47 = arith.addf %45, %46 : vector<8x512xf32>
    %48 = math.log %47 : vector<8x512xf32>
    %cst_20 = arith.constant 0.000000e+00 : f32
    %49 = vector.broadcast %cst_20 : f32 to vector<8x512xf32>
    %50 = arith.subf %49, %48 : vector<8x512xf32>
    %cst_21 = arith.constant 1.44269502 : f32
    %51 = vector.broadcast %cst_21 : f32 to vector<8x512xf32>
    %52 = arith.mulf %50, %51 : vector<8x512xf32>
    %cst_22 = arith.constant 0.000000e+00 : f32
    %cst_23 = arith.constant 5.000000e+01 : f32
    %53 = vector.broadcast %cst_22 : f32 to vector<8x512xf32>
    %54 = arith.maximumf %53, %52 : vector<8x512xf32>
    %55 = vector.broadcast %cst_23 : f32 to vector<8x512xf32>
    %56 = arith.minimumf %55, %54 : vector<8x512xf32>
    %c0_24 = arith.constant 0 : index
    %c0_25 = arith.constant 0 : index
    %57 = vector.load %arg5[%c0_24, %c0_25] : memref<8x512xf32, #tpu.memory_space<vmem>>, vector<8x512xf32>
    %58 = vector.shape_cast %56 : vector<8x512xf32> to vector<1x8x512xf32>
    %cst_26 = arith.constant dense<0.000000e+00> : vector<8x512xf32>
    %59 = vector.multi_reduction <add>, %58, %cst_26 [0] : vector<1x8x512xf32> to vector<8x512xf32>
    %60 = arith.addf %57, %59 : vector<8x512xf32>
    %c0_27 = arith.constant 0 : index
    %c0_28 = arith.constant 0 : index
    %61 = vector.load %arg5[%c0_27, %c0_28] : memref<8x512xf32, #tpu.memory_space<vmem>>, vector<8x512xf32>
    tpu.vector_store %arg5[%c0_27, %c0_28], %60 {strides = array<i32>} : memref<8x512xf32, #tpu.memory_space<vmem>>, vector<8x512xf32>,
    return
  }
  func.func @transform_0(%arg0: i32, %arg1: i32) -> (i32, i32) {
    %c1_i32 = arith.constant 1 : i32
    %0 = arith.muli %arg0, %c1_i32 : i32
    %1 = arith.addi %0, %arg1 : i32
    %c0_i32 = arith.constant 0 : i32
    %c0_i32_0 = arith.constant 0 : i32
    return %1, %c0_i32 : i32, i32
  }
  func.func @transform_1(%arg0: i32, %arg1: i32) -> (i32, i32) {
    %c1_i32 = arith.constant 1 : i32
    %0 = arith.muli %arg0, %c1_i32 : i32
    %1 = arith.addi %0, %arg1 : i32
    %c0_i32 = arith.constant 0 : i32
    %c0_i32_0 = arith.constant 0 : i32
    return %1, %c0_i32 : i32, i32
  }
  func.func @transform_2(%arg0: i32, %arg1: i32) -> (i32, i32) {
    %c1_i32 = arith.constant 1 : i32
    %0 = arith.muli %arg0, %c1_i32 : i32
    %1 = arith.addi %0, %arg1 : i32
    %c0_i32 = arith.constant 0 : i32
    %c0_i32_0 = arith.constant 0 : i32
    return %1, %c0_i32 : i32, i32
  }
  func.func @transform_3(%arg0: i32, %arg1: i32) -> (i32, i32) {
    %c0_i32 = arith.constant 0 : i32
    %c0_i32_0 = arith.constant 0 : i32
    return %arg0, %c0_i32 : i32, i32
  }
}

module attributes {stable_mosaic.version = 11 : i64} {
  func.func @_matmul_kernel(%arg0: i32, %arg1: i32, %arg2: i32, %arg3: memref<512x128xbf16, #tpu.memory_space<vmem>>, %arg4: memref<128x128xbf16, #tpu.memory_space<vmem>>, %arg5: memref<1x128xf32, #tpu.memory_space<vmem>>, %arg6: memref<512x128xf32, #tpu.memory_space<vmem>>, %arg7: memref<512x128xf32, #tpu.memory_space<vmem>>) attributes {dimension_semantics = [#tpu.dimension_semantics<parallel>, #tpu.dimension_semantics<parallel>, #tpu.dimension_semantics<arbitrary>], iteration_bounds = array<i64: 1, 1, 1>, scalar_prefetch = 0 : i64, scratch_operands = 1 : i64, tpu.core_type = #tpu.core_type<tc>, window_params = [{transform_indices = @transform_0, window_bounds = array<i64: 512, 128>}, {transform_indices = @transform_1, window_bounds = array<i64: 128, 128>}, {transform_indices = @transform_2, window_bounds = array<i64: 1, 128>}, {transform_indices = @transform_3, window_bounds = array<i64: 512, 128>}]} {
    %c0_i32 = arith.constant 0 : i32
    %0 = arith.cmpi eq, %arg2, %c0_i32 : i32
    %1 = arith.extui %0 : i1 to i32
    %c0_i32_0 = arith.constant 0 : i32
    %2 = arith.cmpi ne, %1, %c0_i32_0 : i32
    scf.if %2 {
      %cst_10 = arith.constant 0.000000e+00 : f32
      %12 = vector.broadcast %cst_10 : f32 to vector<512x128xf32>
      %c0_11 = arith.constant 0 : index
      %c0_12 = arith.constant 0 : index
      %13 = vector.load %arg7[%c0_11, %c0_12] : memref<512x128xf32, #tpu.memory_space<vmem>>, vector<512x128xf32>
      tpu.vector_store %arg7[%c0_11, %c0_12], %12 {strides = array<i32>} : memref<512x128xf32, #tpu.memory_space<vmem>>, vector<512x128xf32>,
    } else {
    }
    %c0 = arith.constant 0 : index
    %c0_1 = arith.constant 0 : index
    %3 = vector.load %arg7[%c0, %c0_1] : memref<512x128xf32, #tpu.memory_space<vmem>>, vector<512x128xf32>
    %c0_2 = arith.constant 0 : index
    %c0_3 = arith.constant 0 : index
    %4 = vector.load %arg3[%c0_2, %c0_3] : memref<512x128xbf16, #tpu.memory_space<vmem>>, vector<512x128xbf16>
    %c0_4 = arith.constant 0 : index
    %c0_5 = arith.constant 0 : index
    %5 = vector.load %arg4[%c0_4, %c0_5] : memref<128x128xbf16, #tpu.memory_space<vmem>>, vector<128x128xbf16>
    %cst = arith.constant dense<0.000000e+00> : vector<512x128xf32>
    %6 = tpu.matmul %4, %5, %cst {dimension_numbers = #tpu.dot_dimension_numbers<[1], [0], [0], [1], [0, 0, 1, 1], [], []>} : vector<512x128xbf16>, vector<128x128xbf16>, vector<512x128xf32> -> vector<512x128xf32>
    %7 = arith.addf %3, %6 : vector<512x128xf32>
    %c0_6 = arith.constant 0 : index
    %c0_7 = arith.constant 0 : index
    %8 = vector.load %arg7[%c0_6, %c0_7] : memref<512x128xf32, #tpu.memory_space<vmem>>, vector<512x128xf32>
    tpu.vector_store %arg7[%c0_6, %c0_7], %7 {strides = array<i32>} : memref<512x128xf32, #tpu.memory_space<vmem>>, vector<512x128xf32>,
    %c0_i32_8 = arith.constant 0 : i32
    %9 = arith.cmpi eq, %arg2, %c0_i32_8 : i32
    %10 = arith.extui %9 : i1 to i32
    %c0_i32_9 = arith.constant 0 : i32
    %11 = arith.cmpi ne, %10, %c0_i32_9 : i32
    scf.if %11 {
      %c0_10 = arith.constant 0 : index
      %c0_11 = arith.constant 0 : index
      %12 = vector.load %arg7[%c0_10, %c0_11] : memref<512x128xf32, #tpu.memory_space<vmem>>, vector<512x128xf32>
      %c0_12 = arith.constant 0 : index
      %c0_13 = arith.constant 0 : index
      %13 = vector.load %arg5[%c0_12, %c0_13] : memref<1x128xf32, #tpu.memory_space<vmem>>, vector<1x128xf32>
      %14 = vector.broadcast %13 : vector<1x128xf32> to vector<512x128xf32>
      %15 = arith.addf %12, %14 : vector<512x128xf32>
      %c0_14 = arith.constant 0 : index
      %c0_15 = arith.constant 0 : index
      %16 = vector.load %arg6[%c0_14, %c0_15] : memref<512x128xf32, #tpu.memory_space<vmem>>, vector<512x128xf32>
      tpu.vector_store %arg6[%c0_14, %c0_15], %15 {strides = array<i32>} : memref<512x128xf32, #tpu.memory_space<vmem>>, vector<512x128xf32>,
    } else {
    }
    return
  }
  func.func @transform_0(%arg0: i32, %arg1: i32, %arg2: i32) -> (i32, i32) {
    %c0_i32 = arith.constant 0 : i32
    return %arg0, %arg2 : i32, i32
  }
  func.func @transform_1(%arg0: i32, %arg1: i32, %arg2: i32) -> (i32, i32) {
    %c0_i32 = arith.constant 0 : i32
    return %arg2, %arg1 : i32, i32
  }
  func.func @transform_2(%arg0: i32, %arg1: i32, %arg2: i32) -> (i32, i32) {
    %c0_i32 = arith.constant 0 : i32
    %c0_i32_0 = arith.constant 0 : i32
    return %c0_i32, %arg1 : i32, i32
  }
  func.func @transform_3(%arg0: i32, %arg1: i32, %arg2: i32) -> (i32, i32) {
    %c0_i32 = arith.constant 0 : i32
    return %arg0, %arg1 : i32, i32
  }
}

</mosaic_0001>

<bundles_post_ra>
// kernel: _video_coder_forward.101
= control target key start
LH: loop header
LB: loop body
LE: loop exit
PB: predicated region body
PF: predicated region fallthrough
CT: control target
= control target key end

     0   :  { %s2251_s1 = inlined_call_operand.vmem [shape: bf16[128,128], index: 1, kind: input, shape index: {}]   ;;  %s2252_s0 = inlined_call_operand.vmem [shape: bf16[512,128], index: 0, kind: input, shape index: {}]   ;;  %s2253_s2 = inlined_call_operand.vmem [shape: f32[1,128], index: 2, kind: input, shape index: {}]   ;;  %s2254_s3 = inlined_call_operand.vmem [shape: bf16[512,128], index: 3, kind: output, shape index: {}]  }
   0x1   :  { %v1906_v0 = vld [vmem:[%s2251_s1 + $0x38] sm:$0xff]   ;;  %v1907_v1 = vld [vmem:[%s2251_s1 + $0x30] sm:$0xff]   ;;  %v1908_v2 = vld [vmem:[%s2251_s1 + $0x28] sm:$0xff]  }
   0x2   :  { %1810 = vmatprep.subr.bf16.mxu0 %v1906_v0  ;;  %1890 = vmatprep.subr.bf16.mxu1 %v1906_v0  ;;  %v1909_v3 = vld [vmem:[%s2251_s1 + $0x20] sm:$0xff]   ;;  %v1910_v6 = vld [vmem:[%s2251_s1 + $0x18] sm:$0xff]   ;;  %v1911_v7 = vld [vmem:[%s2251_s1 + $0x10] sm:$0xff]  }
   0x3   :  { %1811 = vmatpush3.bf16.msra.mxu0 %v1906_v0  ;;  %1898 = vmatpush3.bf16.msra.mxu1 %v1906_v0  ;;  %v1914_v4 = vld [vmem:[%s2252_s0] sm:$0xff]   ;;  %v1912_v8 = vld [vmem:[%s2251_s1 + $0x8] sm:$0xff]   ;;  %v1918_v12 = vld [vmem:[%s2252_s0 + $0x10] sm:$0xff]  }
   0x4   :  { %1812 = vmatprep.subr.bf16.mxu0 %v1907_v1  ;;  %1891 = vmatprep.subr.bf16.mxu1 %v1907_v1  ;;  %v1915_v5 = vld [vmem:[%s2252_s0 + $0x80] sm:$0xff]   ;;  %v1916_v10 = vld [vmem:[%s2252_s0 + $0x8] sm:$0xff]   ;;  %v1919_v13 = vld [vmem:[%s2252_s0 + $0x90] sm:$0xff]  }
   0x5   :  { %1826 = vmatprep.mubr.bf16.mxu0 %v1914_v4  ;;  %1858 = vmatprep.mubr.bf16.mxu1 %v1915_v5  ;;  %v1913_v9 = vld [vmem:[%s2251_s1] sm:$0xff]   ;;  %v1917_v11 = vld [vmem:[%s2252_s0 + $0x88] sm:$0xff]   ;;  %v1920_v14 = vld [vmem:[%s2252_s0 + $0x18] sm:$0xff]  }
   0x6   :  { %v1921_v15 = vld [vmem:[%s2252_s0 + $0x98] sm:$0xff]   ;;  %v1922_v16 = vld [vmem:[%s2252_s0 + $0x20] sm:$0xff]   ;;  %v1924_v18 = vld [vmem:[%s2252_s0 + $0x28] sm:$0xff]  }
   0x7   :  { %1813 = vmatpush3.bf16.msra.mxu0 %v1907_v1  ;;  %1899 = vmatpush3.bf16.msra.mxu1 %v1907_v1  ;;  %v1923_v17 = vld [vmem:[%s2252_s0 + $0xa0] sm:$0xff]   ;;  %v1925_v19 = vld [vmem:[%s2252_s0 + $0xa8] sm:$0xff]   ;;  %v1926_v20 = vld [vmem:[%s2252_s0 + $0x30] sm:$0xff]  }
   0x8   :  { %1814 = vmatprep.subr.bf16.mxu0 %v1908_v2  ;;  %1892 = vmatprep.subr.bf16.mxu1 %v1908_v2  ;;  %v1927_v21 = vld [vmem:[%s2252_s0 + $0xb0] sm:$0xff]   ;;  %v1928_v22 = vld [vmem:[%s2252_s0 + $0x38] sm:$0xff]   ;;  %v1930_v24 = vld [vmem:[%s2252_s0 + $0x40] sm:$0xff]  }
   0x9   :  { %v1929_v23 = vld [vmem:[%s2252_s0 + $0xb8] sm:$0xff]   ;;  %v1931_v25 = vld [vmem:[%s2252_s0 + $0xc0] sm:$0xff]   ;;  %v1932_v26 = vld [vmem:[%s2252_s0 + $0x48] sm:$0xff]  }
   0xa   :  { %v1933_v27 = vld [vmem:[%s2252_s0 + $0xc8] sm:$0xff]   ;;  %v1934_v28 = vld [vmem:[%s2252_s0 + $0x50] sm:$0xff]   ;;  %v1936_v30 = vld [vmem:[%s2252_s0 + $0x58] sm:$0xff]  }
   0xb   :  { %1815 = vmatpush3.bf16.msra.mxu0 %v1908_v2  ;;  %1900 = vmatpush3.bf16.msra.mxu1 %v1908_v2  ;;  %v1935_v29 = vld [vmem:[%s2252_s0 + $0xd0] sm:$0xff]   ;;  %v1937_v31 = vld [vmem:[%s2252_s0 + $0xd8] sm:$0xff]   ;;  %v1938_v32 = vld [vmem:[%s2252_s0 + $0x60] sm:$0xff]  }
   0xc   :  { %1816 = vmatprep.subr.bf16.mxu0 %v1909_v3  ;;  %1893 = vmatprep.subr.bf16.mxu1 %v1909_v3  ;;  %v1939_v33 = vld [vmem:[%s2252_s0 + $0xe0] sm:$0xff]   ;;  %v1940_v34 = vld [vmem:[%s2252_s0 + $0x68] sm:$0xff]   ;;  %v1942_v36 = vld [vmem:[%s2252_s0 + $0x70] sm:$0xff]  }
   0xd   :  { %v1941_v35 = vld [vmem:[%s2252_s0 + $0xe8] sm:$0xff]   ;;  %v1943_v37 = vld [vmem:[%s2252_s0 + $0xf0] sm:$0xff]   ;;  %v1944_v38 = vld [vmem:[%s2252_s0 + $0x78] sm:$0xff]  }
   0xe   :  { %v1945_v39 = vld [vmem:[%s2252_s0 + $0xf8] sm:$0xff]   ;;  %v2089_v40 = vld [vmem:[%s2253_s2] ss:$0 sm:$0xff] }
   0xf   :  { %1817 = vmatpush3.bf16.msra.mxu0 %v1909_v3  ;;  %1901 = vmatpush3.bf16.msra.mxu1 %v1909_v3 }
  0x10   :  { %1818 = vmatprep.subr.bf16.mxu0 %v1910_v6  ;;  %1894 = vmatprep.subr.bf16.mxu1 %v1910_v6 }
  0x13   :  { %1819 = vmatpush3.bf16.msra.mxu0 %v1910_v6  ;;  %1902 = vmatpush3.bf16.msra.mxu1 %v1910_v6 }
  0x14   :  { %1820 = vmatprep.subr.bf16.mxu0 %v1911_v7  ;;  %1895 = vmatprep.subr.bf16.mxu1 %v1911_v7 }
  0x17   :  { %1821 = vmatpush3.bf16.msra.mxu0 %v1911_v7  ;;  %1903 = vmatpush3.bf16.msra.mxu1 %v1911_v7 }
  0x18   :  { %1822 = vmatprep.subr.bf16.mxu0 %v1912_v8  ;;  %1896 = vmatprep.subr.bf16.mxu1 %v1912_v8 }
  0x1b   :  { %1823 = vmatpush3.bf16.msra.mxu0 %v1912_v8  ;;  %1904 = vmatpush3.bf16.msra.mxu1 %v1912_v8 }
  0x1c   :  { %1824 = vmatprep.subr.bf16.mxu0 %v1913_v9  ;;  %1897 = vmatprep.subr.bf16.mxu1 %v1913_v9 }
  0x1f   :  { %1825 = vmatpush3.bf16.msra.mxu0 %v1913_v9  ;;  %1905 = vmatpush3.bf16.msra.mxu1 %v1913_v9 }
  0x22   :  { %1827 = vmatmul.mubr.bf16.vlgmr.msra.gmra.mxu0 %v1916_v10  ;;  %1859 = vmatmul.mubr.bf16.vlgmr.msra.gmra.mxu1 %v1917_v11 }
  0x23   :  { %1830 = vmatprep.mubr.bf16.mxu0 %v1918_v12  ;;  %1862 = vmatprep.mubr.bf16.mxu1 %v1919_v13 }
  0x2a   :  { %1831 = vmatmul.mubr.bf16.gmra.mxu0 %v1920_v14  ;;  %1863 = vmatmul.mubr.bf16.gmra.mxu1 %v1921_v15 }
  0x2b   :  { %1834 = vmatprep.mubr.bf16.mxu0 %v1922_v16  ;;  %1866 = vmatprep.mubr.bf16.mxu1 %v1923_v17 }
  0x32   :  { %1835 = vmatmul.mubr.bf16.gmra.mxu0 %v1924_v18  ;;  %1867 = vmatmul.mubr.bf16.gmra.mxu1 %v1925_v19 }
  0x33   :  { %1838 = vmatprep.mubr.bf16.mxu0 %v1926_v20  ;;  %1870 = vmatprep.mubr.bf16.mxu1 %v1927_v21 }
  0x3a   :  { %1839 = vmatmul.mubr.bf16.gmra.mxu0 %v1928_v22  ;;  %1871 = vmatmul.mubr.bf16.gmra.mxu1 %v1929_v23 }
  0x3b   :  { %1842 = vmatprep.mubr.bf16.mxu0 %v1930_v24  ;;  %1874 = vmatprep.mubr.bf16.mxu1 %v1931_v25 }
  0x42   :  { %1843 = vmatmul.mubr.bf16.gmra.mxu0 %v1932_v26  ;;  %1875 = vmatmul.mubr.bf16.gmra.mxu1 %v1933_v27 }
  0x43   :  { %1846 = vmatprep.mubr.bf16.mxu0 %v1934_v28  ;;  %1878 = vmatprep.mubr.bf16.mxu1 %v1935_v29 }
  0x4a   :  { %1847 = vmatmul.mubr.bf16.gmra.mxu0 %v1936_v30  ;;  %1879 = vmatmul.mubr.bf16.gmra.mxu1 %v1937_v31 }
  0x4b   :  { %1850 = vmatprep.mubr.bf16.mxu0 %v1938_v32  ;;  %1882 = vmatprep.mubr.bf16.mxu1 %v1939_v33 }
  0x52   :  { %1851 = vmatmul.mubr.bf16.gmra.mxu0 %v1940_v34  ;;  %1883 = vmatmul.mubr.bf16.gmra.mxu1 %v1941_v35 }
  0x53   :  { %1854 = vmatprep.mubr.bf16.mxu0 %v1942_v36  ;;  %1886 = vmatprep.mubr.bf16.mxu1 %v1943_v37 }
  0x5a   :  { %1855 = vmatmul.mubr.bf16.gmra.mxu0 %v1944_v38  ;;  %1887 = vmatmul.mubr.bf16.gmra.mxu1 %v1945_v39 }
  0xe2   :  { %v1828_v41 = vpop.f32.mrf.mxu0  ;;  %v1860_v42 = vpop.f32.mrf.mxu1 }
  0xe3   :  { %v960_v43 = vadd.f32 %v1828_v41, %v2089_v40  ;;  %v992_v44 = vadd.f32 %v1860_v42, %v2089_v40 }
  0xe4   :  { %v501_v45 = vpop.f32.mrf.mxu0  ;;  %v629_v46 = vpop.f32.mrf.mxu1 }
  0xe5   :  { %v958_v47 = vadd.f32 %v2089_v40, %v501_v45  ;;  %v990_v48 = vadd.f32 %v2089_v40, %v629_v46  ;;  %v1024_v53 = vmax.f32 %v960_v43, 0.0  ;;  %v1056_v54 = vmax.f32 %v992_v44, 0.0 }
  0xe6   :  { %v1829_v49 = vpop.f32.mrf.mxu0  ;;  %v1861_v50 = vpop.f32.mrf.mxu1 }
  0xe7   :  { %v961_v51 = vadd.f32 %v1829_v49, %v2089_v40  ;;  %v993_v52 = vadd.f32 %v1861_v50, %v2089_v40  ;;  %v1022_v61 = vmax.f32 %v958_v47, 0.0  ;;  %v1054_v62 = vmax.f32 %v990_v48, 0.0 }
  0xe8   :  { %v504_v55 = vpop.f32.mrf.mxu0  ;;  %v632_v56 = vpop.f32.mrf.mxu1 }
  0xe9   :  { %v1025_v57 = vmax.f32 %v961_v51, 0.0  ;;  %v1057_v58 = vmax.f32 %v993_v52, 0.0  ;;  %v959_v59 = vadd.f32 %v2089_v40, %v504_v55  ;;  %v991_v60 = vadd.f32 %v2089_v40, %v632_v56 }
  0xea   :  { %v1832_v63 = vpop.f32.mrf.mxu0  ;;  %v1864_v0 = vpop.f32.mrf.mxu1 }
  0xeb   :  { %v1587_v1 = vpack.c.bf16 %v1025_v57, %v1024_v53  ;;  %v1667_v2 = vpack.c.bf16 %v1057_v58, %v1056_v54  ;;  %v1023_v3 = vmax.f32 %v959_v59, 0.0  ;;  %v1055_v4 = vmax.f32 %v991_v60, 0.0 }
  0xec   :  { %v964_v5 = vadd.f32 %v1832_v63, %v2089_v40  ;;  %v996_v6 = vadd.f32 %v1864_v0, %v2089_v40  ;;  %v517_v7 = vpop.f32.mrf.mxu0  ;;  %v645_v8 = vpop.f32.mrf.mxu1 }
  0xed   :  { %1739 = vst [vmem:[%s2254_s3 + $0x8] sm:$0xff] %v1587_v1   ;;  %1755 = vst [vmem:[%s2254_s3 + $0x88] sm:$0xff] %v1667_v2   ;;  %v1582_v9 = vpack.c.bf16 %v1023_v3, %v1022_v61  ;;  %v1662_v10 = vpack.c.bf16 %v1055_v4, %v1054_v62  ;;  %v962_v11 = vadd.f32 %v2089_v40, %v517_v7 }
  0xee   :  { %v994_v12 = vadd.f32 %v2089_v40, %v645_v8  ;;  %v1833_v13 = vpop.f32.mrf.mxu0  ;;  %v1865_v14 = vpop.f32.mrf.mxu1  ;;  %v1028_v17 = vmax.f32 %v964_v5, 0.0  ;;  %v1060_v18 = vmax.f32 %v996_v6, 0.0 }
  0xef   :  { %1583 = vst [vmem:[%s2254_s3] sm:$0xff] %v1582_v9   ;;  %1754 = vst [vmem:[%s2254_s3 + $0x80] sm:$0xff] %v1662_v10   ;;  %v965_v15 = vadd.f32 %v1833_v13, %v2089_v40  ;;  %v997_v16 = vadd.f32 %v1865_v14, %v2089_v40  ;;  %v1026_v25 = vmax.f32 %v962_v11, 0.0 }
  0xf0   :  { %v520_v19 = vpop.f32.mrf.mxu0  ;;  %v648_v20 = vpop.f32.mrf.mxu1  ;;  %v1058_v26 = vmax.f32 %v994_v12, 0.0 }
  0xf1   :  { %v1029_v21 = vmax.f32 %v965_v15, 0.0  ;;  %v1061_v22 = vmax.f32 %v997_v16, 0.0  ;;  %v963_v23 = vadd.f32 %v2089_v40, %v520_v19  ;;  %v995_v24 = vadd.f32 %v2089_v40, %v648_v20 }
  0xf2   :  { %v1836_v27 = vpop.f32.mrf.mxu0  ;;  %v1868_v28 = vpop.f32.mrf.mxu1 }
  0xf3   :  { %v1597_v29 = vpack.c.bf16 %v1029_v21, %v1028_v17  ;;  %v1677_v30 = vpack.c.bf16 %v1061_v22, %v1060_v18  ;;  %v1027_v31 = vmax.f32 %v963_v23, 0.0  ;;  %v1059_v32 = vmax.f32 %v995_v24, 0.0 }
  0xf4   :  { %v968_v33 = vadd.f32 %v1836_v27, %v2089_v40  ;;  %v1000_v34 = vadd.f32 %v1868_v28, %v2089_v40  ;;  %v533_v35 = vpop.f32.mrf.mxu0  ;;  %v661_v36 = vpop.f32.mrf.mxu1 }
  0xf5   :  { %1741 = vst [vmem:[%s2254_s3 + $0x18] sm:$0xff] %v1597_v29   ;;  %1757 = vst [vmem:[%s2254_s3 + $0x98] sm:$0xff] %v1677_v30   ;;  %v1592_v37 = vpack.c.bf16 %v1027_v31, %v1026_v25  ;;  %v1672_v38 = vpack.c.bf16 %v1059_v32, %v1058_v26  ;;  %v966_v39 = vadd.f32 %v2089_v40, %v533_v35 }
  0xf6   :  { %v998_v41 = vadd.f32 %v2089_v40, %v661_v36  ;;  %v1837_v42 = vpop.f32.mrf.mxu0  ;;  %v1869_v43 = vpop.f32.mrf.mxu1  ;;  %v1032_v46 = vmax.f32 %v968_v33, 0.0  ;;  %v1064_v47 = vmax.f32 %v1000_v34, 0.0 }
  0xf7   :  { %1740 = vst [vmem:[%s2254_s3 + $0x10] sm:$0xff] %v1592_v37   ;;  %1756 = vst [vmem:[%s2254_s3 + $0x90] sm:$0xff] %v1672_v38   ;;  %v969_v44 = vadd.f32 %v1837_v42, %v2089_v40  ;;  %v1001_v45 = vadd.f32 %v1869_v43, %v2089_v40  ;;  %v1030_v54 = vmax.f32 %v966_v39, 0.0 }
  0xf8   :  { %v536_v48 = vpop.f32.mrf.mxu0  ;;  %v664_v49 = vpop.f32.mrf.mxu1  ;;  %v1062_v55 = vmax.f32 %v998_v41, 0.0 }
  0xf9   :  { %v1033_v50 = vmax.f32 %v969_v44, 0.0  ;;  %v1065_v51 = vmax.f32 %v1001_v45, 0.0  ;;  %v967_v52 = vadd.f32 %v2089_v40, %v536_v48  ;;  %v999_v53 = vadd.f32 %v2089_v40, %v664_v49 }
  0xfa   :  { %v1840_v56 = vpop.f32.mrf.mxu0  ;;  %v1872_v57 = vpop.f32.mrf.mxu1 }
  0xfb   :  { %v1607_v58 = vpack.c.bf16 %v1033_v50, %v1032_v46  ;;  %v1687_v59 = vpack.c.bf16 %v1065_v51, %v1064_v47  ;;  %v1031_v60 = vmax.f32 %v967_v52, 0.0  ;;  %v1063_v61 = vmax.f32 %v999_v53, 0.0 }
  0xfc   :  { %v972_v62 = vadd.f32 %v1840_v56, %v2089_v40  ;;  %v1004_v63 = vadd.f32 %v1872_v57, %v2089_v40  ;;  %v549_v0 = vpop.f32.mrf.mxu0  ;;  %v677_v1 = vpop.f32.mrf.mxu1 }
  0xfd   :  { %1743 = vst [vmem:[%s2254_s3 + $0x28] sm:$0xff] %v1607_v58   ;;  %1759 = vst [vmem:[%s2254_s3 + $0xa8] sm:$0xff] %v1687_v59   ;;  %v1602_v2 = vpack.c.bf16 %v1031_v60, %v1030_v54  ;;  %v1682_v3 = vpack.c.bf16 %v1063_v61, %v1062_v55  ;;  %v970_v4 = vadd.f32 %v2089_v40, %v549_v0 }
  0xfe   :  { %v1002_v5 = vadd.f32 %v2089_v40, %v677_v1  ;;  %v1841_v6 = vpop.f32.mrf.mxu0  ;;  %v1873_v7 = vpop.f32.mrf.mxu1  ;;  %v1036_v10 = vmax.f32 %v972_v62, 0.0  ;;  %v1068_v11 = vmax.f32 %v1004_v63, 0.0 }
  0xff   :  { %1742 = vst [vmem:[%s2254_s3 + $0x20] sm:$0xff] %v1602_v2   ;;  %1758 = vst [vmem:[%s2254_s3 + $0xa0] sm:$0xff] %v1682_v3   ;;  %v973_v8 = vadd.f32 %v1841_v6, %v2089_v40  ;;  %v1005_v9 = vadd.f32 %v1873_v7, %v2089_v40  ;;  %v1034_v18 = vmax.f32 %v970_v4, 0.0 }
 0x100   :  { %v552_v12 = vpop.f32.mrf.mxu0  ;;  %v680_v13 = vpop.f32.mrf.mxu1  ;;  %v1066_v19 = vmax.f32 %v1002_v5, 0.0 }
 0x101   :  { %v1037_v14 = vmax.f32 %v973_v8, 0.0  ;;  %v1069_v15 = vmax.f32 %v1005_v9, 0.0  ;;  %v971_v16 = vadd.f32 %v2089_v40, %v552_v12  ;;  %v1003_v17 = vadd.f32 %v2089_v40, %v680_v13 }
 0x102   :  { %v1844_v20 = vpop.f32.mrf.mxu0  ;;  %v1876_v21 = vpop.f32.mrf.mxu1 }
 0x103   :  { %v1617_v22 = vpack.c.bf16 %v1037_v14, %v1036_v10  ;;  %v1697_v23 = vpack.c.bf16 %v1069_v15, %v1068_v11  ;;  %v1035_v24 = vmax.f32 %v971_v16, 0.0  ;;  %v1067_v25 = vmax.f32 %v1003_v17, 0.0 }
 0x104   :  { %v976_v26 = vadd.f32 %v1844_v20, %v2089_v40  ;;  %v1008_v27 = vadd.f32 %v1876_v21, %v2089_v40  ;;  %v565_v28 = vpop.f32.mrf.mxu0  ;;  %v693_v29 = vpop.f32.mrf.mxu1 }
 0x105   :  { %1745 = vst [vmem:[%s2254_s3 + $0x38] sm:$0xff] %v1617_v22   ;;  %1761 = vst [vmem:[%s2254_s3 + $0xb8] sm:$0xff] %v1697_v23   ;;  %v1612_v30 = vpack.c.bf16 %v1035_v24, %v1034_v18  ;;  %v1692_v31 = vpack.c.bf16 %v1067_v25, %v1066_v19  ;;  %v974_v32 = vadd.f32 %v2089_v40, %v565_v28 }
 0x106   :  { %v1006_v33 = vadd.f32 %v2089_v40, %v693_v29  ;;  %v1845_v34 = vpop.f32.mrf.mxu0  ;;  %v1877_v35 = vpop.f32.mrf.mxu1  ;;  %v1040_v38 = vmax.f32 %v976_v26, 0.0  ;;  %v1072_v39 = vmax.f32 %v1008_v27, 0.0 }
 0x107   :  { %1744 = vst [vmem:[%s2254_s3 + $0x30] sm:$0xff] %v1612_v30   ;;  %1760 = vst [vmem:[%s2254_s3 + $0xb0] sm:$0xff] %v1692_v31   ;;  %v977_v36 = vadd.f32 %v1845_v34, %v2089_v40  ;;  %v1009_v37 = vadd.f32 %v1877_v35, %v2089_v40  ;;  %v1038_v47 = vmax.f32 %v974_v32, 0.0 }
 0x108   :  { %v568_v41 = vpop.f32.mrf.mxu0  ;;  %v696_v42 = vpop.f32.mrf.mxu1  ;;  %v1070_v48 = vmax.f32 %v1006_v33, 0.0 }
 0x109   :  { %v1041_v43 = vmax.f32 %v977_v36, 0.0  ;;  %v1073_v44 = vmax.f32 %v1009_v37, 0.0  ;;  %v975_v45 = vadd.f32 %v2089_v40, %v568_v41  ;;  %v1007_v46 = vadd.f32 %v2089_v40, %v696_v42 }
 0x10a   :  { %v1848_v49 = vpop.f32.mrf.mxu0  ;;  %v1880_v50 = vpop.f32.mrf.mxu1 }
 0x10b   :  { %v1627_v51 = vpack.c.bf16 %v1041_v43, %v1040_v38  ;;  %v1707_v52 = vpack.c.bf16 %v1073_v44, %v1072_v39  ;;  %v1039_v53 = vmax.f32 %v975_v45, 0.0  ;;  %v1071_v54 = vmax.f32 %v1007_v46, 0.0 }
 0x10c   :  { %v980_v55 = vadd.f32 %v1848_v49, %v2089_v40  ;;  %v1012_v56 = vadd.f32 %v1880_v50, %v2089_v40  ;;  %v581_v57 = vpop.f32.mrf.mxu0  ;;  %v709_v58 = vpop.f32.mrf.mxu1 }
 0x10d   :  { %1747 = vst [vmem:[%s2254_s3 + $0x48] sm:$0xff] %v1627_v51   ;;  %1763 = vst [vmem:[%s2254_s3 + $0xc8] sm:$0xff] %v1707_v52   ;;  %v1622_v59 = vpack.c.bf16 %v1039_v53, %v1038_v47  ;;  %v1702_v60 = vpack.c.bf16 %v1071_v54, %v1070_v48  ;;  %v978_v61 = vadd.f32 %v2089_v40, %v581_v57 }
 0x10e   :  { %v1010_v62 = vadd.f32 %v2089_v40, %v709_v58  ;;  %v1849_v63 = vpop.f32.mrf.mxu0  ;;  %v1881_v0 = vpop.f32.mrf.mxu1  ;;  %v1044_v3 = vmax.f32 %v980_v55, 0.0  ;;  %v1076_v4 = vmax.f32 %v1012_v56, 0.0 }
 0x10f   :  { %1746 = vst [vmem:[%s2254_s3 + $0x40] sm:$0xff] %v1622_v59   ;;  %1762 = vst [vmem:[%s2254_s3 + $0xc0] sm:$0xff] %v1702_v60   ;;  %v981_v1 = vadd.f32 %v1849_v63, %v2089_v40  ;;  %v1013_v2 = vadd.f32 %v1881_v0, %v2089_v40  ;;  %v1042_v11 = vmax.f32 %v978_v61, 0.0 }
 0x110   :  { %v584_v5 = vpop.f32.mrf.mxu0  ;;  %v712_v6 = vpop.f32.mrf.mxu1  ;;  %v1074_v12 = vmax.f32 %v1010_v62, 0.0 }
 0x111   :  { %v1045_v7 = vmax.f32 %v981_v1, 0.0  ;;  %v1077_v8 = vmax.f32 %v1013_v2, 0.0  ;;  %v979_v9 = vadd.f32 %v2089_v40, %v584_v5  ;;  %v1011_v10 = vadd.f32 %v2089_v40, %v712_v6 }
 0x112   :  { %v1852_v13 = vpop.f32.mrf.mxu0  ;;  %v1884_v14 = vpop.f32.mrf.mxu1 }
 0x113   :  { %v1637_v15 = vpack.c.bf16 %v1045_v7, %v1044_v3  ;;  %v1717_v16 = vpack.c.bf16 %v1077_v8, %v1076_v4  ;;  %v1043_v17 = vmax.f32 %v979_v9, 0.0  ;;  %v1075_v18 = vmax.f32 %v1011_v10, 0.0 }
 0x114   :  { %v984_v19 = vadd.f32 %v1852_v13, %v2089_v40  ;;  %v1016_v20 = vadd.f32 %v1884_v14, %v2089_v40  ;;  %v597_v21 = vpop.f32.mrf.mxu0  ;;  %v725_v22 = vpop.f32.mrf.mxu1 }
 0x115   :  { %1749 = vst [vmem:[%s2254_s3 + $0x58] sm:$0xff] %v1637_v15   ;;  %1765 = vst [vmem:[%s2254_s3 + $0xd8] sm:$0xff] %v1717_v16   ;;  %v1632_v23 = vpack.c.bf16 %v1043_v17, %v1042_v11  ;;  %v1712_v24 = vpack.c.bf16 %v1075_v18, %v1074_v12  ;;  %v982_v25 = vadd.f32 %v2089_v40, %v597_v21 }
 0x116   :  { %v1014_v26 = vadd.f32 %v2089_v40, %v725_v22  ;;  %v1853_v27 = vpop.f32.mrf.mxu0  ;;  %v1885_v28 = vpop.f32.mrf.mxu1  ;;  %v1048_v31 = vmax.f32 %v984_v19, 0.0  ;;  %v1080_v32 = vmax.f32 %v1016_v20, 0.0 }
 0x117   :  { %1748 = vst [vmem:[%s2254_s3 + $0x50] sm:$0xff] %v1632_v23   ;;  %1764 = vst [vmem:[%s2254_s3 + $0xd0] sm:$0xff] %v1712_v24   ;;  %v985_v29 = vadd.f32 %v1853_v27, %v2089_v40  ;;  %v1017_v30 = vadd.f32 %v1885_v28, %v2089_v40  ;;  %v1046_v39 = vmax.f32 %v982_v25, 0.0 }
 0x118   :  { %v600_v33 = vpop.f32.mrf.mxu0  ;;  %v728_v34 = vpop.f32.mrf.mxu1  ;;  %v1078_v41 = vmax.f32 %v1014_v26, 0.0 }
 0x119   :  { %v1049_v35 = vmax.f32 %v985_v29, 0.0  ;;  %v1081_v36 = vmax.f32 %v1017_v30, 0.0  ;;  %v983_v37 = vadd.f32 %v2089_v40, %v600_v33  ;;  %v1015_v38 = vadd.f32 %v2089_v40, %v728_v34 }
 0x11a   :  { %v1856_v42 = vpop.f32.mrf.mxu0  ;;  %v1888_v43 = vpop.f32.mrf.mxu1 }
 0x11b   :  { %v1647_v44 = vpack.c.bf16 %v1049_v35, %v1048_v31  ;;  %v1727_v45 = vpack.c.bf16 %v1081_v36, %v1080_v32  ;;  %v1047_v46 = vmax.f32 %v983_v37, 0.0  ;;  %v1079_v47 = vmax.f32 %v1015_v38, 0.0 }
 0x11c   :  { %v988_v48 = vadd.f32 %v1856_v42, %v2089_v40  ;;  %v1020_v49 = vadd.f32 %v1888_v43, %v2089_v40  ;;  %v613_v50 = vpop.f32.mrf.mxu0  ;;  %v741_v51 = vpop.f32.mrf.mxu1 }
 0x11d   :  { %1751 = vst [vmem:[%s2254_s3 + $0x68] sm:$0xff] %v1647_v44   ;;  %1767 = vst [vmem:[%s2254_s3 + $0xe8] sm:$0xff] %v1727_v45   ;;  %v1642_v52 = vpack.c.bf16 %v1047_v46, %v1046_v39  ;;  %v1722_v53 = vpack.c.bf16 %v1079_v47, %v1078_v41  ;;  %v986_v54 = vadd.f32 %v2089_v40, %v613_v50 }
 0x11e   :  { %v1018_v55 = vadd.f32 %v2089_v40, %v741_v51  ;;  %v1857_v56 = vpop.f32.mrf.mxu0  ;;  %v1889_v57 = vpop.f32.mrf.mxu1  ;;  %v1052_v60 = vmax.f32 %v988_v48, 0.0  ;;  %v1084_v61 = vmax.f32 %v1020_v49, 0.0 }
 0x11f   :  { %1750 = vst [vmem:[%s2254_s3 + $0x60] sm:$0xff] %v1642_v52   ;;  %1766 = vst [vmem:[%s2254_s3 + $0xe0] sm:$0xff] %v1722_v53   ;;  %v989_v58 = vadd.f32 %v1857_v56, %v2089_v40  ;;  %v1021_v59 = vadd.f32 %v1889_v57, %v2089_v40  ;;  %v1050_v4 = vmax.f32 %v986_v54, 0.0 }
 0x120   :  { %v616_v62 = vpop.f32.mrf.mxu0  ;;  %v744_v63 = vpop.f32.mrf.mxu1  ;;  %v1082_v5 = vmax.f32 %v1018_v55, 0.0 }
 0x121   :  { %v1053_v0 = vmax.f32 %v989_v58, 0.0  ;;  %v1085_v1 = vmax.f32 %v1021_v59, 0.0  ;;  %v987_v2 = vadd.f32 %v2089_v40, %v616_v62  ;;  %v1019_v3 = vadd.f32 %v2089_v40, %v744_v63 }
 0x123   :  { %v1657_v6 = vpack.c.bf16 %v1053_v0, %v1052_v60  ;;  %v1737_v7 = vpack.c.bf16 %v1085_v1, %v1084_v61  ;;  %v1051_v8 = vmax.f32 %v987_v2, 0.0  ;;  %v1083_v9 = vmax.f32 %v1019_v3, 0.0 }
 0x125   :  { %1753 = vst [vmem:[%s2254_s3 + $0x78] sm:$0xff] %v1657_v6   ;;  %1769 = vst [vmem:[%s2254_s3 + $0xf8] sm:$0xff] %v1737_v7   ;;  %v1652_v10 = vpack.c.bf16 %v1051_v8, %v1050_v4  ;;  %v1732_v11 = vpack.c.bf16 %v1083_v9, %v1082_v5 }
 0x127   :  { %1752 = vst [vmem:[%s2254_s3 + $0x70] sm:$0xff] %v1652_v10   ;;  %1768 = vst [vmem:[%s2254_s3 + $0xf0] sm:$0xff] %v1732_v11  }

// kernel: _video_coder_forward.102
= control target key start
LH: loop header
LB: loop body
LE: loop exit
PB: predicated region body
PF: predicated region fallthrough
CT: control target
= control target key end

     0   :  { %s939_s1 = inlined_call_operand.vmem [shape: bf16[256,128], index: 1, kind: input, shape index: {}]   ;;  %s940_s0 = inlined_call_operand.vmem [shape: bf16[128,256], index: 0, kind: input, shape index: {}]   ;;  %s941_s2 = inlined_call_operand.vmem [shape: f32[1,128], index: 2, kind: input, shape index: {}]   ;;  %s942_s3 = inlined_call_operand.vmem [shape: bf16[128,128], index: 3, kind: output, shape index: {}]  }
   0x1   :  { %v738_v0 = vld [vmem:[%s939_s1 + $0x78] sm:$0xff]   ;;  %v740_v2 = vld [vmem:[%s939_s1 + $0x70] sm:$0xff]   ;;  %v742_v4 = vld [vmem:[%s939_s1 + $0x68] sm:$0xff]  }
   0x2   :  { %v739_v1 = vld [vmem:[%s939_s1 + $0x38] sm:$0xff]   ;;  %658 = vmatprep.subr.bf16.mxu0 %v738_v0  ;;  %722 = vmatprep.subr.bf16.mxu1 %v738_v0  ;;  %v741_v3 = vld [vmem:[%s939_s1 + $0x30] sm:$0xff]   ;;  %v743_v5 = vld [vmem:[%s939_s1 + $0x28] sm:$0xff]  }
   0x3   :  { %659 = vmatpush3.bf16.msra.mxu0 %v739_v1  ;;  %730 = vmatpush3.bf16.msra.mxu1 %v739_v1  ;;  %v744_v6 = vld [vmem:[%s939_s1 + $0x60] sm:$0xff]   ;;  %v746_v8 = vld [vmem:[%s939_s1 + $0x58] sm:$0xff]   ;;  %v748_v10 = vld [vmem:[%s939_s1 + $0x50] sm:$0xff]  }
   0x4   :  { %660 = vmatprep.subr.bf16.mxu0 %v740_v2  ;;  %723 = vmatprep.subr.bf16.mxu1 %v740_v2  ;;  %v745_v7 = vld [vmem:[%s939_s1 + $0x20] sm:$0xff]   ;;  %v747_v9 = vld [vmem:[%s939_s1 + $0x18] sm:$0xff]   ;;  %v749_v13 = vld [vmem:[%s939_s1 + $0x10] sm:$0xff]  }
   0x5   :  { %v756_v11 = vld [vmem:[%s940_s0 + $0x4] ss:$8 sps:$4 sm:$0xff]   ;;  %v754_v18 = vld [vmem:[%s940_s0] ss:$8 sps:$4 sm:$0xff]   ;;  %v760_v20 = vld [vmem:[%s940_s0 + $0x14] ss:$8 sps:$4 sm:$0xff]  }
   0x6   :  { %v759_v12 = vld [vmem:[%s940_s0 + $0x44] ss:$8 sps:$4 sm:$0xff]   ;;  %307 = vmatprep.mubr.bf16.mxu0 %v756_v11  ;;  %v757_v19 = vld [vmem:[%s940_s0 + $0x40] ss:$8 sps:$4 sm:$0xff]   ;;  %v762_v21 = vld [vmem:[%s940_s0 + $0x54] ss:$8 sps:$4 sm:$0xff]  }
   0x7   :  { %661 = vmatpush3.bf16.msra.mxu0 %v741_v3  ;;  %731 = vmatpush3.bf16.msra.mxu1 %v741_v3  ;;  %v750_v14 = vld [vmem:[%s939_s1 + $0x48] sm:$0xff]   ;;  %v752_v16 = vld [vmem:[%s939_s1 + $0x40] sm:$0xff]   ;;  %v764_v22 = vld [vmem:[%s940_s0 + $0x10] ss:$8 sps:$4 sm:$0xff]  }
   0x8   :  { %662 = vmatprep.subr.bf16.mxu0 %v742_v4  ;;  %724 = vmatprep.subr.bf16.mxu1 %v742_v4  ;;  %v751_v15 = vld [vmem:[%s939_s1 + $0x8] sm:$0xff]   ;;  %v753_v17 = vld [vmem:[%s939_s1] sm:$0xff]   ;;  %v765_v23 = vld [vmem:[%s940_s0 + $0x50] ss:$8 sps:$4 sm:$0xff]  }
   0x9   :  { %339 = vmatprep.mubr.bf16.mxu1 %v759_v12  ;;  %v766_v24 = vld [vmem:[%s940_s0 + $0x24] ss:$8 sps:$4 sm:$0xff]   ;;  %v770_v26 = vld [vmem:[%s940_s0 + $0x20] ss:$8 sps:$4 sm:$0xff]   ;;  %v772_v28 = vld [vmem:[%s940_s0 + $0x34] ss:$8 sps:$4 sm:$0xff]  }
   0xa   :  { %v768_v25 = vld [vmem:[%s940_s0 + $0x64] ss:$8 sps:$4 sm:$0xff]   ;;  %v771_v27 = vld [vmem:[%s940_s0 + $0x60] ss:$8 sps:$4 sm:$0xff]   ;;  %v774_v29 = vld [vmem:[%s940_s0 + $0x74] ss:$8 sps:$4 sm:$0xff]  }
   0xb   :  { %663 = vmatpush3.bf16.msra.mxu0 %v743_v5  ;;  %732 = vmatpush3.bf16.msra.mxu1 %v743_v5  ;;  %v776_v30 = vld [vmem:[%s940_s0 + $0x30] ss:$8 sps:$4 sm:$0xff]   ;;  %v897_v37 = vld [vmem:[%s941_s2] ss:$0 sm:$0xff] }
   0xc   :  { %664 = vmatprep.subr.bf16.mxu0 %v744_v6  ;;  %725 = vmatprep.subr.bf16.mxu1 %v744_v6  ;;  %v777_v31 = vld [vmem:[%s940_s0 + $0x70] ss:$8 sps:$4 sm:$0xff]  }
   0xf   :  { %665 = vmatpush3.bf16.msra.mxu0 %v745_v7  ;;  %733 = vmatpush3.bf16.msra.mxu1 %v745_v7 }
  0x10   :  { %666 = vmatprep.subr.bf16.mxu0 %v746_v8  ;;  %726 = vmatprep.subr.bf16.mxu1 %v746_v8 }
  0x13   :  { %667 = vmatpush3.bf16.msra.mxu0 %v747_v9  ;;  %734 = vmatpush3.bf16.msra.mxu1 %v747_v9 }
  0x14   :  { %668 = vmatprep.subr.bf16.mxu0 %v748_v10  ;;  %727 = vmatprep.subr.bf16.mxu1 %v748_v10 }
  0x17   :  { %669 = vmatpush3.bf16.msra.mxu0 %v749_v13  ;;  %735 = vmatpush3.bf16.msra.mxu1 %v749_v13 }
  0x18   :  { %670 = vmatprep.subr.bf16.mxu0 %v750_v14  ;;  %728 = vmatprep.subr.bf16.mxu1 %v750_v14 }
  0x1b   :  { %671 = vmatpush3.bf16.msra.mxu0 %v751_v15  ;;  %736 = vmatpush3.bf16.msra.mxu1 %v751_v15 }
  0x1c   :  { %672 = vmatprep.subr.bf16.mxu0 %v752_v16  ;;  %729 = vmatprep.subr.bf16.mxu1 %v752_v16 }
  0x1f   :  { %673 = vmatpush3.bf16.msra.mxu0 %v753_v17  ;;  %737 = vmatpush3.bf16.msra.mxu1 %v753_v17 }
  0x22   :  { %308 = vmatmul.mubr.bf16.vlgmr.msra.gmra.mxu0 %v754_v18  ;;  %340 = vmatmul.mubr.bf16.vlgmr.msra.gmra.mxu1 %v757_v19 }
  0x23   :  { %315 = vmatprep.mubr.bf16.mxu0 %v760_v20  ;;  %347 = vmatprep.mubr.bf16.mxu1 %v762_v21 }
  0x2a   :  { %316 = vmatmul.mubr.bf16.gmra.mxu0 %v764_v22  ;;  %348 = vmatmul.mubr.bf16.gmra.mxu1 %v765_v23 }
  0x2b   :  { %323 = vmatprep.mubr.bf16.mxu0 %v766_v24  ;;  %355 = vmatprep.mubr.bf16.mxu1 %v768_v25 }
  0x32   :  { %324 = vmatmul.mubr.bf16.gmra.mxu0 %v770_v26  ;;  %356 = vmatmul.mubr.bf16.gmra.mxu1 %v771_v27 }
  0x33   :  { %331 = vmatprep.mubr.bf16.mxu0 %v772_v28  ;;  %363 = vmatprep.mubr.bf16.mxu1 %v774_v29 }
  0x3a   :  { %332 = vmatmul.mubr.bf16.gmra.mxu0 %v776_v30  ;;  %364 = vmatmul.mubr.bf16.gmra.mxu1 %v777_v31 }
  0xe2   :  { %v674_v32 = vpop.f32.mrf.mxu0  ;;  %v698_v33 = vpop.f32.mrf.mxu1 }
  0xe4   :  { %v675_v34 = vpop.f32.mrf.mxu0  ;;  %v699_v35 = vpop.f32.mrf.mxu1 }
  0xe5   :  { %v676_v36 = vadd.f32 %v675_v34, %v674_v32  ;;  %v700_v38 = vadd.f32 %v699_v35, %v698_v33 }
  0xe6   :  { %v677_v39 = vpop.f32.mrf.mxu0  ;;  %v701_v40 = vpop.f32.mrf.mxu1 }
  0xe7   :  { %v430_v41 = vadd.f32 %v676_v36, %v897_v37  ;;  %v438_v42 = vadd.f32 %v700_v38, %v897_v37 }
  0xe8   :  { %v678_v43 = vpop.f32.mrf.mxu0  ;;  %v702_v44 = vpop.f32.mrf.mxu1 }
  0xe9   :  { %v679_v45 = vadd.f32 %v678_v43, %v677_v39  ;;  %v703_v46 = vadd.f32 %v702_v44, %v701_v40  ;;  %v446_v51 = vmax.f32 %v430_v41, 0.0  ;;  %v454_v52 = vmax.f32 %v438_v42, 0.0 }
  0xea   :  { %v680_v47 = vpop.f32.mrf.mxu0  ;;  %v704_v48 = vpop.f32.mrf.mxu1 }
  0xeb   :  { %v431_v49 = vadd.f32 %v679_v45, %v897_v37  ;;  %v439_v50 = vadd.f32 %v703_v46, %v897_v37 }
  0xec   :  { %v681_v53 = vpop.f32.mrf.mxu0  ;;  %v705_v54 = vpop.f32.mrf.mxu1 }
  0xed   :  { %v447_v55 = vmax.f32 %v431_v49, 0.0  ;;  %v455_v56 = vmax.f32 %v439_v50, 0.0  ;;  %v682_v57 = vadd.f32 %v681_v53, %v680_v47  ;;  %v706_v58 = vadd.f32 %v705_v54, %v704_v48 }
  0xee   :  { %v683_v59 = vpop.f32.mrf.mxu0  ;;  %v707_v60 = vpop.f32.mrf.mxu1 }
  0xef   :  { %v614_v61 = vpack.c.bf16 %v447_v55, %v446_v51  ;;  %v634_v62 = vpack.c.bf16 %v455_v56, %v454_v52  ;;  %v432_v63 = vadd.f32 %v682_v57, %v897_v37  ;;  %v440_v0 = vadd.f32 %v706_v58, %v897_v37 }
  0xf0   :  { %v684_v1 = vpop.f32.mrf.mxu0  ;;  %v708_v2 = vpop.f32.mrf.mxu1 }
  0xf1   :  { %615 = vst [vmem:[%s942_s3] sm:$0xff] %v614_v61   ;;  %654 = vst [vmem:[%s942_s3 + $0x20] sm:$0xff] %v634_v62   ;;  %v685_v3 = vadd.f32 %v684_v1, %v683_v59  ;;  %v709_v4 = vadd.f32 %v708_v2, %v707_v60  ;;  %v448_v9 = vmax.f32 %v432_v63, 0.0  ;;  %v456_v10 = vmax.f32 %v440_v0, 0.0 }
  0xf2   :  { %v686_v5 = vpop.f32.mrf.mxu0  ;;  %v710_v6 = vpop.f32.mrf.mxu1 }
  0xf3   :  { %v433_v7 = vadd.f32 %v685_v3, %v897_v37  ;;  %v441_v8 = vadd.f32 %v709_v4, %v897_v37 }
  0xf4   :  { %v687_v11 = vpop.f32.mrf.mxu0  ;;  %v711_v12 = vpop.f32.mrf.mxu1 }
  0xf5   :  { %v449_v13 = vmax.f32 %v433_v7, 0.0  ;;  %v457_v14 = vmax.f32 %v441_v8, 0.0  ;;  %v688_v15 = vadd.f32 %v687_v11, %v686_v5  ;;  %v712_v16 = vadd.f32 %v711_v12, %v710_v6 }
  0xf6   :  { %v689_v17 = vpop.f32.mrf.mxu0  ;;  %v713_v18 = vpop.f32.mrf.mxu1 }
  0xf7   :  { %v619_v19 = vpack.c.bf16 %v449_v13, %v448_v9  ;;  %v639_v20 = vpack.c.bf16 %v457_v14, %v456_v10  ;;  %v434_v21 = vadd.f32 %v688_v15, %v897_v37  ;;  %v442_v22 = vadd.f32 %v712_v16, %v897_v37 }
  0xf8   :  { %v690_v23 = vpop.f32.mrf.mxu0  ;;  %v714_v24 = vpop.f32.mrf.mxu1 }
  0xf9   :  { %651 = vst [vmem:[%s942_s3 + $0x8] sm:$0xff] %v619_v19   ;;  %655 = vst [vmem:[%s942_s3 + $0x28] sm:$0xff] %v639_v20   ;;  %v691_v25 = vadd.f32 %v690_v23, %v689_v17  ;;  %v715_v26 = vadd.f32 %v714_v24, %v713_v18  ;;  %v450_v31 = vmax.f32 %v434_v21, 0.0  ;;  %v458_v32 = vmax.f32 %v442_v22, 0.0 }
  0xfa   :  { %v692_v27 = vpop.f32.mrf.mxu0  ;;  %v716_v28 = vpop.f32.mrf.mxu1 }
  0xfb   :  { %v435_v29 = vadd.f32 %v691_v25, %v897_v37  ;;  %v443_v30 = vadd.f32 %v715_v26, %v897_v37 }
  0xfc   :  { %v693_v33 = vpop.f32.mrf.mxu0  ;;  %v717_v34 = vpop.f32.mrf.mxu1 }
  0xfd   :  { %v451_v35 = vmax.f32 %v435_v29, 0.0  ;;  %v459_v36 = vmax.f32 %v443_v30, 0.0  ;;  %v694_v38 = vadd.f32 %v693_v33, %v692_v27  ;;  %v718_v39 = vadd.f32 %v717_v34, %v716_v28 }
  0xfe   :  { %v695_v40 = vpop.f32.mrf.mxu0  ;;  %v719_v41 = vpop.f32.mrf.mxu1 }
  0xff   :  { %v624_v42 = vpack.c.bf16 %v451_v35, %v450_v31  ;;  %v644_v43 = vpack.c.bf16 %v459_v36, %v458_v32  ;;  %v436_v46 = vadd.f32 %v694_v38, %v897_v37  ;;  %v444_v47 = vadd.f32 %v718_v39, %v897_v37 }
 0x100   :  { %v696_v44 = vpop.f32.mrf.mxu0  ;;  %v720_v45 = vpop.f32.mrf.mxu1 }
 0x101   :  { %652 = vst [vmem:[%s942_s3 + $0x10] sm:$0xff] %v624_v42   ;;  %656 = vst [vmem:[%s942_s3 + $0x30] sm:$0xff] %v644_v43   ;;  %v697_v48 = vadd.f32 %v696_v44, %v695_v40  ;;  %v721_v49 = vadd.f32 %v720_v45, %v719_v41  ;;  %v452_v52 = vmax.f32 %v436_v46, 0.0  ;;  %v460_v53 = vmax.f32 %v444_v47, 0.0 }
 0x103   :  { %v437_v50 = vadd.f32 %v697_v48, %v897_v37  ;;  %v445_v51 = vadd.f32 %v721_v49, %v897_v37 }
 0x105   :  { %v453_v54 = vmax.f32 %v437_v50, 0.0  ;;  %v461_v55 = vmax.f32 %v445_v51, 0.0 }
 0x107   :  { %v629_v56 = vpack.c.bf16 %v453_v54, %v452_v52  ;;  %v649_v57 = vpack.c.bf16 %v461_v55, %v460_v53 }
 0x109   :  { %653 = vst [vmem:[%s942_s3 + $0x18] sm:$0xff] %v629_v56   ;;  %657 = vst [vmem:[%s942_s3 + $0x38] sm:$0xff] %v649_v57  }

// kernel: _video_coder_forward.103
= control target key start
LH: loop header
LB: loop body
LE: loop exit
PB: predicated region body
PF: predicated region fallthrough
CT: control target
= control target key end

     0   :  { %s804_s1 = inlined_call_operand.vmem [shape: bf16[256,128], index: 1, kind: input, shape index: {}]   ;;  %s805_s0 = inlined_call_operand.vmem [shape: bf16[128,256], index: 0, kind: input, shape index: {}]   ;;  %s806_s2 = inlined_call_operand.vmem [shape: f32[1,128], index: 2, kind: input, shape index: {}]   ;;  %s807_s3 = inlined_call_operand.vmem [shape: f32[128,128], index: 3, kind: output, shape index: {}]  }
   0x1   :  { %v579_v0 = vld [vmem:[%s804_s1 + $0x78] sm:$0xff]   ;;  %v581_v2 = vld [vmem:[%s804_s1 + $0x70] sm:$0xff]   ;;  %v583_v4 = vld [vmem:[%s804_s1 + $0x68] sm:$0xff]  }
   0x2   :  { %v580_v1 = vld [vmem:[%s804_s1 + $0x38] sm:$0xff]   ;;  %499 = vmatprep.subr.bf16.mxu0 %v579_v0  ;;  %563 = vmatprep.subr.bf16.mxu1 %v579_v0  ;;  %v582_v3 = vld [vmem:[%s804_s1 + $0x30] sm:$0xff]   ;;  %v584_v5 = vld [vmem:[%s804_s1 + $0x28] sm:$0xff]  }
   0x3   :  { %500 = vmatpush3.bf16.msra.mxu0 %v580_v1  ;;  %571 = vmatpush3.bf16.msra.mxu1 %v580_v1  ;;  %v585_v6 = vld [vmem:[%s804_s1 + $0x60] sm:$0xff]   ;;  %v587_v8 = vld [vmem:[%s804_s1 + $0x58] sm:$0xff]   ;;  %v589_v10 = vld [vmem:[%s804_s1 + $0x50] sm:$0xff]  }
   0x4   :  { %501 = vmatprep.subr.bf16.mxu0 %v581_v2  ;;  %564 = vmatprep.subr.bf16.mxu1 %v581_v2  ;;  %v586_v7 = vld [vmem:[%s804_s1 + $0x20] sm:$0xff]   ;;  %v588_v9 = vld [vmem:[%s804_s1 + $0x18] sm:$0xff]   ;;  %v590_v13 = vld [vmem:[%s804_s1 + $0x10] sm:$0xff]  }
   0x5   :  { %v597_v11 = vld [vmem:[%s805_s0 + $0x4] ss:$8 sps:$4 sm:$0xff]   ;;  %v595_v18 = vld [vmem:[%s805_s0] ss:$8 sps:$4 sm:$0xff]   ;;  %v601_v20 = vld [vmem:[%s805_s0 + $0x14] ss:$8 sps:$4 sm:$0xff]  }
   0x6   :  { %v600_v12 = vld [vmem:[%s805_s0 + $0x44] ss:$8 sps:$4 sm:$0xff]   ;;  %307 = vmatprep.mubr.bf16.mxu0 %v597_v11  ;;  %v598_v19 = vld [vmem:[%s805_s0 + $0x40] ss:$8 sps:$4 sm:$0xff]   ;;  %v603_v21 = vld [vmem:[%s805_s0 + $0x54] ss:$8 sps:$4 sm:$0xff]  }
   0x7   :  { %502 = vmatpush3.bf16.msra.mxu0 %v582_v3  ;;  %572 = vmatpush3.bf16.msra.mxu1 %v582_v3  ;;  %v591_v14 = vld [vmem:[%s804_s1 + $0x48] sm:$0xff]   ;;  %v593_v16 = vld [vmem:[%s804_s1 + $0x40] sm:$0xff]   ;;  %v605_v22 = vld [vmem:[%s805_s0 + $0x10] ss:$8 sps:$4 sm:$0xff]  }
   0x8   :  { %503 = vmatprep.subr.bf16.mxu0 %v583_v4  ;;  %565 = vmatprep.subr.bf16.mxu1 %v583_v4  ;;  %v592_v15 = vld [vmem:[%s804_s1 + $0x8] sm:$0xff]   ;;  %v594_v17 = vld [vmem:[%s804_s1] sm:$0xff]   ;;  %v606_v23 = vld [vmem:[%s805_s0 + $0x50] ss:$8 sps:$4 sm:$0xff]  }
   0x9   :  { %339 = vmatprep.mubr.bf16.mxu1 %v600_v12  ;;  %v607_v24 = vld [vmem:[%s805_s0 + $0x24] ss:$8 sps:$4 sm:$0xff]   ;;  %v611_v26 = vld [vmem:[%s805_s0 + $0x20] ss:$8 sps:$4 sm:$0xff]   ;;  %v613_v28 = vld [vmem:[%s805_s0 + $0x34] ss:$8 sps:$4 sm:$0xff]  }
   0xa   :  { %v609_v25 = vld [vmem:[%s805_s0 + $0x64] ss:$8 sps:$4 sm:$0xff]   ;;  %v612_v27 = vld [vmem:[%s805_s0 + $0x60] ss:$8 sps:$4 sm:$0xff]   ;;  %v615_v29 = vld [vmem:[%s805_s0 + $0x74] ss:$8 sps:$4 sm:$0xff]  }
   0xb   :  { %504 = vmatpush3.bf16.msra.mxu0 %v584_v5  ;;  %573 = vmatpush3.bf16.msra.mxu1 %v584_v5  ;;  %v617_v30 = vld [vmem:[%s805_s0 + $0x30] ss:$8 sps:$4 sm:$0xff]   ;;  %v738_v35 = vld [vmem:[%s806_s2] ss:$0 sm:$0xff] }
   0xc   :  { %505 = vmatprep.subr.bf16.mxu0 %v585_v6  ;;  %566 = vmatprep.subr.bf16.mxu1 %v585_v6  ;;  %v618_v31 = vld [vmem:[%s805_s0 + $0x70] ss:$8 sps:$4 sm:$0xff]  }
   0xf   :  { %506 = vmatpush3.bf16.msra.mxu0 %v586_v7  ;;  %574 = vmatpush3.bf16.msra.mxu1 %v586_v7 }
  0x10   :  { %507 = vmatprep.subr.bf16.mxu0 %v587_v8  ;;  %567 = vmatprep.subr.bf16.mxu1 %v587_v8 }
  0x13   :  { %508 = vmatpush3.bf16.msra.mxu0 %v588_v9  ;;  %575 = vmatpush3.bf16.msra.mxu1 %v588_v9 }
  0x14   :  { %509 = vmatprep.subr.bf16.mxu0 %v589_v10  ;;  %568 = vmatprep.subr.bf16.mxu1 %v589_v10 }
  0x17   :  { %510 = vmatpush3.bf16.msra.mxu0 %v590_v13  ;;  %576 = vmatpush3.bf16.msra.mxu1 %v590_v13 }
  0x18   :  { %511 = vmatprep.subr.bf16.mxu0 %v591_v14  ;;  %569 = vmatprep.subr.bf16.mxu1 %v591_v14 }
  0x1b   :  { %512 = vmatpush3.bf16.msra.mxu0 %v592_v15  ;;  %577 = vmatpush3.bf16.msra.mxu1 %v592_v15 }
  0x1c   :  { %513 = vmatprep.subr.bf16.mxu0 %v593_v16  ;;  %570 = vmatprep.subr.bf16.mxu1 %v593_v16 }
  0x1f   :  { %514 = vmatpush3.bf16.msra.mxu0 %v594_v17  ;;  %578 = vmatpush3.bf16.msra.mxu1 %v594_v17 }
  0x22   :  { %308 = vmatmul.mubr.bf16.vlgmr.msra.gmra.mxu0 %v595_v18  ;;  %340 = vmatmul.mubr.bf16.vlgmr.msra.gmra.mxu1 %v598_v19 }
  0x23   :  { %315 = vmatprep.mubr.bf16.mxu0 %v601_v20  ;;  %347 = vmatprep.mubr.bf16.mxu1 %v603_v21 }
  0x2a   :  { %316 = vmatmul.mubr.bf16.gmra.mxu0 %v605_v22  ;;  %348 = vmatmul.mubr.bf16.gmra.mxu1 %v606_v23 }
  0x2b   :  { %323 = vmatprep.mubr.bf16.mxu0 %v607_v24  ;;  %355 = vmatprep.mubr.bf16.mxu1 %v609_v25 }
  0x32   :  { %324 = vmatmul.mubr.bf16.gmra.mxu0 %v611_v26  ;;  %356 = vmatmul.mubr.bf16.gmra.mxu1 %v612_v27 }
  0x33   :  { %331 = vmatprep.mubr.bf16.mxu0 %v613_v28  ;;  %363 = vmatprep.mubr.bf16.mxu1 %v615_v29 }
  0x3a   :  { %332 = vmatmul.mubr.bf16.gmra.mxu0 %v617_v30  ;;  %364 = vmatmul.mubr.bf16.gmra.mxu1 %v618_v31 }
  0xe2   :  { %v515_v32 = vpop.f32.mrf.mxu0  ;;  %v539_v33 = vpop.f32.mrf.mxu1 }
  0xe4   :  { %v516_v34 = vpop.f32.mrf.mxu0  ;;  %v540_v36 = vpop.f32.mrf.mxu1 }
  0xe5   :  { %v517_v37 = vadd.f32 %v516_v34, %v515_v32  ;;  %v541_v38 = vadd.f32 %v540_v36, %v539_v33 }
  0xe6   :  { %v518_v39 = vpop.f32.mrf.mxu0  ;;  %v542_v40 = vpop.f32.mrf.mxu1 }
  0xe7   :  { %v430_v41 = vadd.f32 %v517_v37, %v738_v35  ;;  %v438_v42 = vadd.f32 %v541_v38, %v738_v35 }
  0xe8   :  { %v519_v43 = vpop.f32.mrf.mxu0  ;;  %v543_v44 = vpop.f32.mrf.mxu1 }
  0xe9   :  { %446 = vst [vmem:[%s807_s3] sm:$0xff] %v430_v41  ;;  %454 = vst [vmem:[%s807_s3 + $0x40] sm:$0xff] %v438_v42  ;;  %v520_v45 = vadd.f32 %v519_v43, %v518_v39  ;;  %v544_v46 = vadd.f32 %v543_v44, %v542_v40 }
  0xea   :  { %v521_v47 = vpop.f32.mrf.mxu0  ;;  %v545_v48 = vpop.f32.mrf.mxu1 }
  0xeb   :  { %v431_v49 = vadd.f32 %v520_v45, %v738_v35  ;;  %v439_v50 = vadd.f32 %v544_v46, %v738_v35 }
  0xec   :  { %v522_v51 = vpop.f32.mrf.mxu0  ;;  %v546_v52 = vpop.f32.mrf.mxu1 }
  0xed   :  { %447 = vst [vmem:[%s807_s3 + $0x8] sm:$0xff] %v431_v49  ;;  %455 = vst [vmem:[%s807_s3 + $0x48] sm:$0xff] %v439_v50  ;;  %v523_v53 = vadd.f32 %v522_v51, %v521_v47  ;;  %v547_v54 = vadd.f32 %v546_v52, %v545_v48 }
  0xee   :  { %v524_v55 = vpop.f32.mrf.mxu0  ;;  %v548_v56 = vpop.f32.mrf.mxu1 }
  0xef   :  { %v432_v57 = vadd.f32 %v523_v53, %v738_v35  ;;  %v440_v58 = vadd.f32 %v547_v54, %v738_v35 }
  0xf0   :  { %v525_v59 = vpop.f32.mrf.mxu0  ;;  %v549_v60 = vpop.f32.mrf.mxu1 }
  0xf1   :  { %448 = vst [vmem:[%s807_s3 + $0x10] sm:$0xff] %v432_v57  ;;  %456 = vst [vmem:[%s807_s3 + $0x50] sm:$0xff] %v440_v58  ;;  %v526_v61 = vadd.f32 %v525_v59, %v524_v55  ;;  %v550_v62 = vadd.f32 %v549_v60, %v548_v56 }
  0xf2   :  { %v527_v63 = vpop.f32.mrf.mxu0  ;;  %v551_v0 = vpop.f32.mrf.mxu1 }
  0xf3   :  { %v433_v1 = vadd.f32 %v526_v61, %v738_v35  ;;  %v441_v2 = vadd.f32 %v550_v62, %v738_v35 }
  0xf4   :  { %v528_v3 = vpop.f32.mrf.mxu0  ;;  %v552_v4 = vpop.f32.mrf.mxu1 }
  0xf5   :  { %449 = vst [vmem:[%s807_s3 + $0x18] sm:$0xff] %v433_v1  ;;  %457 = vst [vmem:[%s807_s3 + $0x58] sm:$0xff] %v441_v2  ;;  %v529_v5 = vadd.f32 %v528_v3, %v527_v63  ;;  %v553_v6 = vadd.f32 %v552_v4, %v551_v0 }
  0xf6   :  { %v530_v7 = vpop.f32.mrf.mxu0  ;;  %v554_v8 = vpop.f32.mrf.mxu1 }
  0xf7   :  { %v434_v9 = vadd.f32 %v529_v5, %v738_v35  ;;  %v442_v10 = vadd.f32 %v553_v6, %v738_v35 }
  0xf8   :  { %v531_v11 = vpop.f32.mrf.mxu0  ;;  %v555_v12 = vpop.f32.mrf.mxu1 }
  0xf9   :  { %450 = vst [vmem:[%s807_s3 + $0x20] sm:$0xff] %v434_v9  ;;  %458 = vst [vmem:[%s807_s3 + $0x60] sm:$0xff] %v442_v10  ;;  %v532_v13 = vadd.f32 %v531_v11, %v530_v7  ;;  %v556_v14 = vadd.f32 %v555_v12, %v554_v8 }
  0xfa   :  { %v533_v15 = vpop.f32.mrf.mxu0  ;;  %v557_v16 = vpop.f32.mrf.mxu1 }
  0xfb   :  { %v435_v17 = vadd.f32 %v532_v13, %v738_v35  ;;  %v443_v18 = vadd.f32 %v556_v14, %v738_v35 }
  0xfc   :  { %v534_v19 = vpop.f32.mrf.mxu0  ;;  %v558_v20 = vpop.f32.mrf.mxu1 }
  0xfd   :  { %451 = vst [vmem:[%s807_s3 + $0x28] sm:$0xff] %v435_v17  ;;  %459 = vst [vmem:[%s807_s3 + $0x68] sm:$0xff] %v443_v18  ;;  %v535_v21 = vadd.f32 %v534_v19, %v533_v15  ;;  %v559_v22 = vadd.f32 %v558_v20, %v557_v16 }
  0xfe   :  { %v536_v23 = vpop.f32.mrf.mxu0  ;;  %v560_v24 = vpop.f32.mrf.mxu1 }
  0xff   :  { %v436_v25 = vadd.f32 %v535_v21, %v738_v35  ;;  %v444_v26 = vadd.f32 %v559_v22, %v738_v35 }
 0x100   :  { %v537_v27 = vpop.f32.mrf.mxu0  ;;  %v561_v28 = vpop.f32.mrf.mxu1 }
 0x101   :  { %452 = vst [vmem:[%s807_s3 + $0x30] sm:$0xff] %v436_v25  ;;  %460 = vst [vmem:[%s807_s3 + $0x70] sm:$0xff] %v444_v26  ;;  %v538_v29 = vadd.f32 %v537_v27, %v536_v23  ;;  %v562_v30 = vadd.f32 %v561_v28, %v560_v24 }
 0x103   :  { %v437_v31 = vadd.f32 %v538_v29, %v738_v35  ;;  %v445_v32 = vadd.f32 %v562_v30, %v738_v35 }
 0x105   :  { %453 = vst [vmem:[%s807_s3 + $0x38] sm:$0xff] %v437_v31  ;;  %461 = vst [vmem:[%s807_s3 + $0x78] sm:$0xff] %v445_v32 }

// kernel: squeeze.48
= control target key start
LH: loop header
LB: loop body
LE: loop exit
PB: predicated region body
PF: predicated region fallthrough
CT: control target
= control target key end

     0   :  { %s581_s0 = inlined_call_operand.vmem [shape: f32[2,1,4,4,512], index: 0, kind: input, shape index: {}]   ;;  %s582_s1 = inlined_call_operand.vmem [shape: f32[32,512], index: 1, kind: output, shape index: {}]  }
   0x1   :  { %v317_v0 = vld [vmem:[%s581_s0 + $0x7c] sm:$0xf]  ;;  %v318_v1 = vld [vmem:[%s581_s0 + $0x78] sm:$0xf]  ;;  %v319_v2 = vld [vmem:[%s581_s0 + $0x74] sm:$0xf] }
   0x2   :  { %9 = vst [vmem:[#allocation0 + $0x48] sm:$0xf] %v317_v0  ;;  %14 = vst [vmem:[#allocation0 + $0xf8] sm:$0xf] %v318_v1  ;;  %v320_v3 = vld [vmem:[%s581_s0 + $0x70] sm:$0xf] }
   0x3   :  { %19 = vst [vmem:[#allocation0 + $0x20] sm:$0xf] %v319_v2  ;;  %v321_v4 = vld [vmem:[%s581_s0 + $0x6c] sm:$0xf]  ;;  %v322_v5 = vld [vmem:[%s581_s0 + $0x68] sm:$0xf] }
   0x4   :  { %24 = vst [vmem:[#allocation0 + $0xe0] sm:$0xf] %v320_v3  ;;  %29 = vst [vmem:[#allocation0 + $0xa8] sm:$0xf] %v321_v4  ;;  %v323_v6 = vld [vmem:[%s581_s0 + $0x64] sm:$0xf] }
   0x5   :  { %34 = vst [vmem:[#allocation0 + $0x90] sm:$0xf] %v322_v5  ;;  %v324_v7 = vld [vmem:[%s581_s0 + $0x60] sm:$0xf]  ;;  %v325_v8 = vld [vmem:[%s581_s0 + $0x5c] sm:$0xf] }
   0x6   :  { %39 = vst [vmem:[#allocation0 + $0xc8] sm:$0xf] %v323_v6  ;;  %44 = vst [vmem:[#allocation0 + $0xb0] sm:$0xf] %v324_v7  ;;  %v326_v9 = vld [vmem:[%s581_s0 + $0x58] sm:$0xf] }
   0x7   :  { %49 = vst [vmem:[#allocation0 + $0x78] sm:$0xf] %v325_v8  ;;  %v327_v10 = vld [vmem:[%s581_s0 + $0x54] sm:$0xf]  ;;  %v328_v11 = vld [vmem:[%s581_s0 + $0x50] sm:$0xf] }
   0x8   :  { %54 = vst [vmem:[#allocation0 + $0x70] sm:$0xf] %v326_v9  ;;  %59 = vst [vmem:[#allocation0 + $0x10] sm:$0xf] %v327_v10  ;;  %v329_v12 = vld [vmem:[%s581_s0 + $0x4c] sm:$0xf] }
   0x9   :  { %64 = vst [vmem:[#allocation0 + $0x40] sm:$0xf] %v328_v11  ;;  %v330_v13 = vld [vmem:[%s581_s0 + $0x48] sm:$0xf]  ;;  %v331_v14 = vld [vmem:[%s581_s0 + $0x44] sm:$0xf] }
   0xa   :  { %69 = vst [vmem:[#allocation0 + $0x98] sm:$0xf] %v329_v12  ;;  %74 = vst [vmem:[#allocation0 + $0x8] sm:$0xf] %v330_v13  ;;  %v332_v15 = vld [vmem:[%s581_s0 + $0x40] sm:$0xf] }
   0xb   :  { %79 = vst [vmem:[#allocation0 + $0xf0] sm:$0xf] %v331_v14  ;;  %v333_v16 = vld [vmem:[%s581_s0 + $0x3c] sm:$0xf]  ;;  %v334_v17 = vld [vmem:[%s581_s0 + $0x38] sm:$0xf] }
   0xc   :  { %84 = vst [vmem:[#allocation0 + $0x80] sm:$0xf] %v332_v15  ;;  %89 = vst [vmem:[#allocation0 + $0xc0] sm:$0xf] %v333_v16  ;;  %v335_v18 = vld [vmem:[%s581_s0 + $0x34] sm:$0xf] }
   0xd   :  { %94 = vst [vmem:[#allocation0 + $0xa0] sm:$0xf] %v334_v17  ;;  %v336_v19 = vld [vmem:[%s581_s0 + $0x30] sm:$0xf]  ;;  %v337_v20 = vld [vmem:[%s581_s0 + $0x2c] sm:$0xf] }
   0xe   :  { %99 = vst [vmem:[#allocation0 + $0xb8] sm:$0xf] %v335_v18  ;;  %104 = vst [vmem:[#allocation0 + $0x30] sm:$0xf] %v336_v19  ;;  %v338_v21 = vld [vmem:[%s581_s0 + $0x28] sm:$0xf] }
   0xf   :  { %109 = vst [vmem:[#allocation0 + $0x18] sm:$0xf] %v337_v20  ;;  %v339_v22 = vld [vmem:[%s581_s0 + $0x24] sm:$0xf]  ;;  %v340_v23 = vld [vmem:[%s581_s0 + $0x20] sm:$0xf] }
  0x10   :  { %114 = vst [vmem:[#allocation0 + $0x68] sm:$0xf] %v338_v21  ;;  %119 = vst [vmem:[#allocation0 + $0x88] sm:$0xf] %v339_v22  ;;  %v341_v24 = vld [vmem:[%s581_s0 + $0x1c] sm:$0xf] }
  0x11   :  { %124 = vst [vmem:[#allocation0 + $0x38] sm:$0xf] %v340_v23  ;;  %v342_v25 = vld [vmem:[%s581_s0 + $0x18] sm:$0xf]  ;;  %v343_v26 = vld [vmem:[%s581_s0 + $0x14] sm:$0xf] }
  0x12   :  { %129 = vst [vmem:[#allocation0 + $0x50] sm:$0xf] %v341_v24  ;;  %134 = vst [vmem:[#allocation0 + $0x28] sm:$0xf] %v342_v25  ;;  %v344_v27 = vld [vmem:[%s581_s0 + $0x10] sm:$0xf] }
  0x13   :  { %139 = vst [vmem:[#allocation0 + $0xe8] sm:$0xf] %v343_v26  ;;  %v345_v28 = vld [vmem:[%s581_s0 + $0xc] sm:$0xf]  ;;  %v346_v29 = vld [vmem:[%s581_s0 + $0x8] sm:$0xf] }
  0x14   :  { %144 = vst [vmem:[#allocation0 + $0xd0] sm:$0xf] %v344_v27  ;;  %149 = vst [vmem:[#allocation0 + $0x58] sm:$0xf] %v345_v28  ;;  %v347_v30 = vld [vmem:[%s581_s0 + $0x4] sm:$0xf] }
  0x15   :  { %154 = vst [vmem:[#allocation0] sm:$0xf] %v346_v29  ;;  %v159_v31 = vld [vmem:[%s581_s0] sm:$0xf]  ;;  %v252_v32 = vld [vmem:[#allocation0 + $0x78] sm:$0xf]  }
  0x16   :  { %158 = vst [vmem:[#allocation0 + $0xd8] sm:$0xf] %v347_v30  ;;  %160 = vst [vmem:[#allocation0 + $0x60] sm:$0xf] %v159_v31  ;;  %v240_v33 = vld [vmem:[#allocation0 + $0x40] sm:$0xf]  }
  0x17   :  { %v244_v34 = vld [vmem:[#allocation0 + $0x10] sm:$0xf]   ;;  %370 = vst [vmem:[%s582_s1 + $0x5c] sm:$0xf] %v252_v32   ;;  %v232_v37 = vld [vmem:[#allocation0 + $0x8] sm:$0xf]  }
  0x18   :  { %v248_v35 = vld [vmem:[#allocation0 + $0x70] sm:$0xf]   ;;  %v236_v38 = vld [vmem:[#allocation0 + $0x98] sm:$0xf]   ;;  %367 = vst [vmem:[%s582_s1 + $0x44] sm:$0xf] %v240_v33  }
  0x19   :  { %v228_v36 = vld [vmem:[#allocation0 + $0xf0] sm:$0xf]   ;;  %368 = vst [vmem:[%s582_s1 + $0x4c] sm:$0xf] %v244_v34   ;;  %369 = vst [vmem:[%s582_s1 + $0x54] sm:$0xf] %v248_v35  }
  0x1a   :  { %v216_v39 = vld [vmem:[#allocation0 + $0xa0] sm:$0xf]   ;;  %364 = vst [vmem:[%s582_s1 + $0x48] sm:$0xf] %v228_v36   ;;  %365 = vst [vmem:[%s582_s1 + $0x50] sm:$0xf] %v232_v37  }
  0x1b   :  { %v220_v40 = vld [vmem:[#allocation0 + $0xc0] sm:$0xf]   ;;  %366 = vst [vmem:[%s582_s1 + $0x58] sm:$0xf] %v236_v38   ;;  %v204_v42 = vld [vmem:[#allocation0 + $0x18] sm:$0xf]  }
  0x1c   :  { %v224_v41 = vld [vmem:[#allocation0 + $0x80] sm:$0xf]   ;;  %v208_v43 = vld [vmem:[#allocation0 + $0x30] sm:$0xf]   ;;  %v212_v44 = vld [vmem:[#allocation0 + $0xb8] sm:$0xf]  }
  0x1d   :  { %361 = vst [vmem:[%s582_s1 + $0x34] sm:$0xf] %v216_v39   ;;  %362 = vst [vmem:[%s582_s1 + $0x3c] sm:$0xf] %v220_v40   ;;  %v192_v45 = vld [vmem:[#allocation0 + $0x38] sm:$0xf]  }
  0x1e   :  { %363 = vst [vmem:[%s582_s1 + $0x40] sm:$0xf] %v224_v41   ;;  %v196_v46 = vld [vmem:[#allocation0 + $0x88] sm:$0xf]   ;;  %358 = vst [vmem:[%s582_s1 + $0x38] sm:$0xf] %v204_v42  }
  0x1f   :  { %v200_v47 = vld [vmem:[#allocation0 + $0x68] sm:$0xf]   ;;  %359 = vst [vmem:[%s582_s1 + $0x24] sm:$0xf] %v208_v43   ;;  %360 = vst [vmem:[%s582_s1 + $0x2c] sm:$0xf] %v212_v44  }
  0x20   :  { %v180_v48 = vld [vmem:[#allocation0 + $0xe8] sm:$0xf]   ;;  %v188_v50 = vld [vmem:[#allocation0 + $0x50] sm:$0xf]   ;;  %355 = vst [vmem:[%s582_s1 + $0x20] sm:$0xf] %v192_v45  }
  0x21   :  { %v184_v49 = vld [vmem:[#allocation0 + $0x28] sm:$0xf]   ;;  %356 = vst [vmem:[%s582_s1 + $0x28] sm:$0xf] %v196_v46   ;;  %357 = vst [vmem:[%s582_s1 + $0x30] sm:$0xf] %v200_v47  }
  0x22   :  { %v168_v51 = vld [vmem:[#allocation0] sm:$0xf]   ;;  %v172_v52 = vld [vmem:[#allocation0 + $0x58] sm:$0xf]   ;;  %v176_v53 = vld [vmem:[#allocation0 + $0xd0] sm:$0xf]  }
  0x23   :  { %352 = vst [vmem:[%s582_s1 + $0xc] sm:$0xf] %v180_v48   ;;  %353 = vst [vmem:[%s582_s1 + $0x14] sm:$0xf] %v184_v49   ;;  %v161_v54 = vld [vmem:[#allocation0 + $0x60] sm:$0xf]  }
  0x24   :  { %354 = vst [vmem:[%s582_s1 + $0x1c] sm:$0xf] %v188_v50   ;;  %v164_v55 = vld [vmem:[#allocation0 + $0xd8] sm:$0xf]   ;;  %349 = vst [vmem:[%s582_s1 + $0x10] sm:$0xf] %v168_v51  }
  0x25   :  { %350 = vst [vmem:[%s582_s1 + $0x18] sm:$0xf] %v172_v52   ;;  %351 = vst [vmem:[%s582_s1 + $0x4] sm:$0xf] %v176_v53   ;;  %v256_v56 = vld [vmem:[#allocation0 + $0xb0] sm:$0xf]  }
  0x26   :  { %162 = vst [vmem:[%s582_s1] sm:$0xf] %v161_v54   ;;  %348 = vst [vmem:[%s582_s1 + $0x8] sm:$0xf] %v164_v55   ;;  %v260_v57 = vld [vmem:[#allocation0 + $0xc8] sm:$0xf]  }
  0x27   :  { %371 = vst [vmem:[%s582_s1 + $0x60] sm:$0xf] %v256_v56   ;;  %v264_v58 = vld [vmem:[#allocation0 + $0x90] sm:$0xf]   ;;  %v268_v59 = vld [vmem:[#allocation0 + $0xa8] sm:$0xf]  }
  0x28   :  { %372 = vst [vmem:[%s582_s1 + $0x68] sm:$0xf] %v260_v57   ;;  %373 = vst [vmem:[%s582_s1 + $0x70] sm:$0xf] %v264_v58   ;;  %v272_v60 = vld [vmem:[#allocation0 + $0xe0] sm:$0xf]  }
  0x29   :  { %374 = vst [vmem:[%s582_s1 + $0x78] sm:$0xf] %v268_v59   ;;  %v276_v61 = vld [vmem:[#allocation0 + $0x20] sm:$0xf]   ;;  %v280_v62 = vld [vmem:[#allocation0 + $0xf8] sm:$0xf]  }
  0x2a   :  { %375 = vst [vmem:[%s582_s1 + $0x64] sm:$0xf] %v272_v60   ;;  %376 = vst [vmem:[%s582_s1 + $0x6c] sm:$0xf] %v276_v61   ;;  %v284_v63 = vld [vmem:[#allocation0 + $0x48] sm:$0xf]  }
  0x2b   :  { %377 = vst [vmem:[%s582_s1 + $0x74] sm:$0xf] %v280_v62   ;;  %378 = vst [vmem:[%s582_s1 + $0x7c] sm:$0xf] %v284_v63  }

// kernel: _video_coder_forward.107
= control target key start
LH: loop header
LB: loop body
LE: loop exit
PB: predicated region body
PF: predicated region fallthrough
CT: control target
= control target key end

     0   :  { %v1763_v1 = vmov 0   ;;  %v1370_v49 = vlaneseq  ;;  %s2483_s1 = inlined_call_operand.vmem [shape: bf16[128,512], index: 1, kind: input, shape index: {}]   ;;  %s2484_s0 = inlined_call_operand.vmem [shape: bf16[256,128], index: 0, kind: input, shape index: {}]   ;;  %s2485_s2 = inlined_call_operand.vmem [shape: f32[1,512], index: 2, kind: input, shape index: {}]   ;;  %s2486_s3 = inlined_call_operand.vmem [shape: f32[256,512], index: 3, kind: output, shape index: {}]  }
   0x1   :  { %v1699_v0 = vld [vmem:[%s2483_s1 + $0xe4] ss:$16 sps:$4 sm:$0xff]   ;;  %627 = vmatprep.mubr.bf16.mxu0 %v1763_v1  ;;  %820 = vmatprep.mubr.bf16.mxu1 %v1763_v1  ;;  %v1701_v2 = vld [vmem:[%s2483_s1 + $0xec] ss:$16 sps:$4 sm:$0xff]   ;;  %v1703_v3 = vld [vmem:[%s2483_s1 + $0xe0] ss:$16 sps:$4 sm:$0xff]  }
   0x2   :  { %595 = vmatprep.subr.bf16.mxu0 %v1699_v0  ;;  %v1704_v4 = vld [vmem:[%s2483_s1 + $0xe8] ss:$16 sps:$4 sm:$0xff]   ;;  %788 = vmatprep.subr.bf16.mxu1 %v1701_v2  ;;  %v1705_v5 = vld [vmem:[%s2483_s1 + $0xc4] ss:$16 sps:$4 sm:$0xff]   ;;  %v1707_v6 = vld [vmem:[%s2483_s1 + $0xcc] ss:$16 sps:$4 sm:$0xff]  }
   0x3   :  { %596 = vmatpush1.bf16.msra.mxu0 %v1703_v3  ;;  %789 = vmatpush1.bf16.msra.mxu1 %v1704_v4  ;;  %v1709_v7 = vld [vmem:[%s2483_s1 + $0xc0] ss:$16 sps:$4 sm:$0xff]   ;;  %v1710_v8 = vld [vmem:[%s2483_s1 + $0xc8] ss:$16 sps:$4 sm:$0xff]   ;;  %v1711_v9 = vld [vmem:[%s2483_s1 + $0xa4] ss:$16 sps:$4 sm:$0xff]  }
   0x4   :  { %597 = vmatprep.subr.bf16.mxu0 %v1705_v5  ;;  %790 = vmatprep.subr.bf16.mxu1 %v1707_v6  ;;  %v1713_v10 = vld [vmem:[%s2483_s1 + $0xac] ss:$16 sps:$4 sm:$0xff]   ;;  %v1715_v11 = vld [vmem:[%s2483_s1 + $0xa0] ss:$16 sps:$4 sm:$0xff]   ;;  %v1716_v12 = vld [vmem:[%s2483_s1 + $0xa8] ss:$16 sps:$4 sm:$0xff]  }
   0x5   :  { %v1717_v13 = vld [vmem:[%s2483_s1 + $0x84] ss:$16 sps:$4 sm:$0xff]   ;;  %v1719_v14 = vld [vmem:[%s2483_s1 + $0x8c] ss:$16 sps:$4 sm:$0xff]   ;;  %v1721_v15 = vld [vmem:[%s2483_s1 + $0x80] ss:$16 sps:$4 sm:$0xff]  }
   0x6   :  { %v1722_v16 = vld [vmem:[%s2483_s1 + $0x88] ss:$16 sps:$4 sm:$0xff]   ;;  %v1723_v17 = vld [vmem:[%s2483_s1 + $0x64] ss:$16 sps:$4 sm:$0xff]   ;;  %v1725_v18 = vld [vmem:[%s2483_s1 + $0x6c] ss:$16 sps:$4 sm:$0xff]  }
   0x7   :  { %598 = vmatpush1.bf16.msra.mxu0 %v1709_v7  ;;  %791 = vmatpush1.bf16.msra.mxu1 %v1710_v8  ;;  %v1727_v19 = vld [vmem:[%s2483_s1 + $0x60] ss:$16 sps:$4 sm:$0xff]   ;;  %v1728_v20 = vld [vmem:[%s2483_s1 + $0x68] ss:$16 sps:$4 sm:$0xff]   ;;  %v1729_v21 = vld [vmem:[%s2483_s1 + $0x44] ss:$16 sps:$4 sm:$0xff]  }
   0x8   :  { %599 = vmatprep.subr.bf16.mxu0 %v1711_v9  ;;  %792 = vmatprep.subr.bf16.mxu1 %v1713_v10  ;;  %v1731_v22 = vld [vmem:[%s2483_s1 + $0x4c] ss:$16 sps:$4 sm:$0xff]   ;;  %v1733_v23 = vld [vmem:[%s2483_s1 + $0x40] ss:$16 sps:$4 sm:$0xff]   ;;  %v1734_v24 = vld [vmem:[%s2483_s1 + $0x48] ss:$16 sps:$4 sm:$0xff]  }
   0x9   :  { %v1735_v25 = vld [vmem:[%s2483_s1 + $0x24] ss:$16 sps:$4 sm:$0xff]   ;;  %v1737_v26 = vld [vmem:[%s2483_s1 + $0x2c] ss:$16 sps:$4 sm:$0xff]   ;;  %v1739_v27 = vld [vmem:[%s2483_s1 + $0x20] ss:$16 sps:$4 sm:$0xff]  }
   0xa   :  { %v1740_v28 = vld [vmem:[%s2483_s1 + $0x28] ss:$16 sps:$4 sm:$0xff]   ;;  %v1741_v29 = vld [vmem:[%s2483_s1 + $0x4] ss:$16 sps:$4 sm:$0xff]   ;;  %v1743_v30 = vld [vmem:[%s2483_s1 + $0xc] ss:$16 sps:$4 sm:$0xff]  }
   0xb   :  { %600 = vmatpush1.bf16.msra.mxu0 %v1715_v11  ;;  %793 = vmatpush1.bf16.msra.mxu1 %v1716_v12  ;;  %v1745_v31 = vld [vmem:[%s2483_s1] ss:$16 sps:$4 sm:$0xff]   ;;  %v1746_v32 = vld [vmem:[%s2483_s1 + $0x8] ss:$16 sps:$4 sm:$0xff]   ;;  %v1371_v50 = vshrl.u32 %v1370_v49, 7 }
   0xc   :  { %601 = vmatprep.subr.bf16.mxu0 %v1717_v13  ;;  %794 = vmatprep.subr.bf16.mxu1 %v1719_v14  ;;  %v1747_v33 = vld [vmem:[%s2484_s0] sm:$0xff]   ;;  %v1748_v34 = vld [vmem:[%s2484_s0 + $0x8] sm:$0xff]   ;;  %v1749_v35 = vld [vmem:[%s2484_s0 + $0x10] sm:$0xff]  }
   0xd   :  { %v1750_v36 = vld [vmem:[%s2484_s0 + $0x18] sm:$0xff]   ;;  %v1751_v37 = vld [vmem:[%s2484_s0 + $0x20] sm:$0xff]   ;;  %v1752_v38 = vld [vmem:[%s2484_s0 + $0x28] sm:$0xff]   ;;  %v1372_v51 = vsub.s32 0, %v1371_v50  ;;  %v1380_v52 = vsub.s32 2, %v1371_v50  ;;  %v1376_v54 = vsub.s32 1, %v1371_v50 }
   0xe   :  { %v1753_v39 = vld [vmem:[%s2484_s0 + $0x30] sm:$0xff]   ;;  %v1754_v40 = vld [vmem:[%s2484_s0 + $0x38] sm:$0xff]   ;;  %v1755_v41 = vld [vmem:[%s2484_s0 + $0x40] sm:$0xff]   ;;  %v1384_v55 = vsub.s32 3, %v1371_v50 }
   0xf   :  { %602 = vmatpush1.bf16.msra.mxu0 %v1721_v15  ;;  %795 = vmatpush1.bf16.msra.mxu1 %v1722_v16  ;;  %v1756_v42 = vld [vmem:[%s2484_s0 + $0x48] sm:$0xff]   ;;  %v1757_v43 = vld [vmem:[%s2484_s0 + $0x50] sm:$0xff]   ;;  %v1758_v44 = vld [vmem:[%s2484_s0 + $0x58] sm:$0xff]  }
  0x10   :  { %603 = vmatprep.subr.bf16.mxu0 %v1723_v17  ;;  %796 = vmatprep.subr.bf16.mxu1 %v1725_v18  ;;  %v1759_v45 = vld [vmem:[%s2484_s0 + $0x60] sm:$0xff]   ;;  %v1760_v46 = vld [vmem:[%s2484_s0 + $0x68] sm:$0xff]   ;;  %v1761_v47 = vld [vmem:[%s2484_s0 + $0x70] sm:$0xff]  }
  0x11   :  { %v1762_v48 = vld [vmem:[%s2484_s0 + $0x78] sm:$0xff]   ;;  %v1368_v53 = vld [vmem:[%s2485_s2] sm:$0xf] }
  0x12   :  { %v1963_v56 = vrot.slane %v1368_v53, %v1372_v51  ;;  %v1965_v57 = vrot.slane %v1368_v53, %v1380_v52  ;;  %v1967_v58 = vrot.slane %v1368_v53, %v1376_v54  ;;  %v1969_v59 = vrot.slane %v1368_v53, %v1384_v55 }
  0x13   :  { %604 = vmatpush1.bf16.msra.mxu0 %v1727_v19  ;;  %797 = vmatpush1.bf16.msra.mxu1 %v1728_v20 }
  0x14   :  { %605 = vmatprep.subr.bf16.mxu0 %v1729_v21  ;;  %798 = vmatprep.subr.bf16.mxu1 %v1731_v22 }
  0x17   :  { %606 = vmatpush1.bf16.msra.mxu0 %v1733_v23  ;;  %799 = vmatpush1.bf16.msra.mxu1 %v1734_v24 }
  0x18   :  { %607 = vmatprep.subr.bf16.mxu0 %v1735_v25  ;;  %800 = vmatprep.subr.bf16.mxu1 %v1737_v26 }
  0x1b   :  { %608 = vmatpush1.bf16.msra.mxu0 %v1739_v27  ;;  %801 = vmatpush1.bf16.msra.mxu1 %v1740_v28 }
  0x1c   :  { %609 = vmatprep.subr.bf16.mxu0 %v1741_v29  ;;  %802 = vmatprep.subr.bf16.mxu1 %v1743_v30 }
  0x1f   :  { %610 = vmatpush1.bf16.msra.mxu0 %v1745_v31  ;;  %803 = vmatpush1.bf16.msra.mxu1 %v1746_v32 }
  0x22   :  { %628 = vmatmul.mubr.bf16.vlgmr.msra.gmra.mxu0 %v1747_v33  ;;  %821 = vmatmul.mubr.bf16.vlgmr.msra.gmra.mxu1 %v1747_v33 }
  0x23   :  { %637 = vmatprep.mubr.bf16.mxu0 %v1763_v1  ;;  %830 = vmatprep.mubr.bf16.mxu1 %v1763_v1 }
  0x2a   :  { %638 = vmatmul.mubr.bf16.gmra.mxu0 %v1748_v34  ;;  %831 = vmatmul.mubr.bf16.gmra.mxu1 %v1748_v34 }
  0x2b   :  { %647 = vmatprep.mubr.bf16.mxu0 %v1763_v1  ;;  %840 = vmatprep.mubr.bf16.mxu1 %v1763_v1 }
  0x32   :  { %648 = vmatmul.mubr.bf16.gmra.mxu0 %v1749_v35  ;;  %841 = vmatmul.mubr.bf16.gmra.mxu1 %v1749_v35 }
  0x33   :  { %657 = vmatprep.mubr.bf16.mxu0 %v1763_v1  ;;  %850 = vmatprep.mubr.bf16.mxu1 %v1763_v1 }
  0x3a   :  { %658 = vmatmul.mubr.bf16.gmra.mxu0 %v1750_v36  ;;  %851 = vmatmul.mubr.bf16.gmra.mxu1 %v1750_v36 }
  0x3b   :  { %667 = vmatprep.mubr.bf16.mxu0 %v1763_v1  ;;  %860 = vmatprep.mubr.bf16.mxu1 %v1763_v1 }
  0x42   :  { %668 = vmatmul.mubr.bf16.gmra.mxu0 %v1751_v37  ;;  %861 = vmatmul.mubr.bf16.gmra.mxu1 %v1751_v37 }
  0x43   :  { %677 = vmatprep.mubr.bf16.mxu0 %v1763_v1  ;;  %870 = vmatprep.mubr.bf16.mxu1 %v1763_v1 }
  0x4a   :  { %678 = vmatmul.mubr.bf16.gmra.mxu0 %v1752_v38  ;;  %871 = vmatmul.mubr.bf16.gmra.mxu1 %v1752_v38 }
  0x4b   :  { %687 = vmatprep.mubr.bf16.mxu0 %v1763_v1  ;;  %880 = vmatprep.mubr.bf16.mxu1 %v1763_v1 }
  0x52   :  { %688 = vmatmul.mubr.bf16.gmra.mxu0 %v1753_v39  ;;  %881 = vmatmul.mubr.bf16.gmra.mxu1 %v1753_v39 }
  0x53   :  { %697 = vmatprep.mubr.bf16.mxu0 %v1763_v1  ;;  %890 = vmatprep.mubr.bf16.mxu1 %v1763_v1 }
  0x5a   :  { %698 = vmatmul.mubr.bf16.gmra.mxu0 %v1754_v40  ;;  %891 = vmatmul.mubr.bf16.gmra.mxu1 %v1754_v40 }
  0x5b   :  { %707 = vmatprep.mubr.bf16.mxu0 %v1763_v1  ;;  %900 = vmatprep.mubr.bf16.mxu1 %v1763_v1 }
  0x62   :  { %708 = vmatmul.mubr.bf16.gmra.mxu0 %v1755_v41  ;;  %901 = vmatmul.mubr.bf16.gmra.mxu1 %v1755_v41 }
  0x63   :  { %717 = vmatprep.mubr.bf16.mxu0 %v1763_v1  ;;  %910 = vmatprep.mubr.bf16.mxu1 %v1763_v1 }
  0x6a   :  { %718 = vmatmul.mubr.bf16.gmra.mxu0 %v1756_v42  ;;  %911 = vmatmul.mubr.bf16.gmra.mxu1 %v1756_v42 }
  0x6b   :  { %727 = vmatprep.mubr.bf16.mxu0 %v1763_v1  ;;  %920 = vmatprep.mubr.bf16.mxu1 %v1763_v1 }
  0x72   :  { %728 = vmatmul.mubr.bf16.gmra.mxu0 %v1757_v43  ;;  %921 = vmatmul.mubr.bf16.gmra.mxu1 %v1757_v43 }
  0x73   :  { %737 = vmatprep.mubr.bf16.mxu0 %v1763_v1  ;;  %930 = vmatprep.mubr.bf16.mxu1 %v1763_v1 }
  0x7a   :  { %738 = vmatmul.mubr.bf16.gmra.mxu0 %v1758_v44  ;;  %931 = vmatmul.mubr.bf16.gmra.mxu1 %v1758_v44 }
  0x7b   :  { %747 = vmatprep.mubr.bf16.mxu0 %v1763_v1  ;;  %940 = vmatprep.mubr.bf16.mxu1 %v1763_v1 }
  0x82   :  { %748 = vmatmul.mubr.bf16.gmra.mxu0 %v1759_v45  ;;  %941 = vmatmul.mubr.bf16.gmra.mxu1 %v1759_v45 }
  0x83   :  { %757 = vmatprep.mubr.bf16.mxu0 %v1763_v1  ;;  %950 = vmatprep.mubr.bf16.mxu1 %v1763_v1 }
  0x8a   :  { %758 = vmatmul.mubr.bf16.gmra.mxu0 %v1760_v46  ;;  %951 = vmatmul.mubr.bf16.gmra.mxu1 %v1760_v46 }
  0x8b   :  { %767 = vmatprep.mubr.bf16.mxu0 %v1763_v1  ;;  %960 = vmatprep.mubr.bf16.mxu1 %v1763_v1 }
  0x92   :  { %768 = vmatmul.mubr.bf16.gmra.mxu0 %v1761_v47  ;;  %961 = vmatmul.mubr.bf16.gmra.mxu1 %v1761_v47 }
  0x93   :  { %777 = vmatprep.mubr.bf16.mxu0 %v1763_v1  ;;  %970 = vmatprep.mubr.bf16.mxu1 %v1763_v1 }
  0x9a   :  { %778 = vmatmul.mubr.bf16.gmra.mxu0 %v1762_v48  ;;  %971 = vmatmul.mubr.bf16.gmra.mxu1 %v1762_v48 }
  0xe2   :  { %v629_v60 = vpop.f32.mrf.mxu0  ;;  %v822_v61 = vpop.f32.mrf.mxu1 }
  0xe3   :  { %v1390_v62 = vadd.f32 %v1963_v56, %v629_v60  ;;  %v1392_v63 = vadd.f32 %v1965_v57, %v822_v61 }
  0xe4   :  { %v631_v0 = vpop.f32.mrf.mxu0  ;;  %v824_v1 = vpop.f32.mrf.mxu1 }
  0xe5   :  { %1518 = vst [vmem:[%s2486_s3] sm:$0xff] %v1390_v62  ;;  %1520 = vst [vmem:[%s2486_s3 + $0x10] sm:$0xff] %v1392_v63  ;;  %v1391_v2 = vadd.f32 %v1967_v58, %v631_v0  ;;  %v1393_v3 = vadd.f32 %v1969_v59, %v824_v1 }
  0xe6   :  { %v633_v4 = vpop.f32.mrf.mxu0  ;;  %v826_v5 = vpop.f32.mrf.mxu1 }
  0xe7   :  { %1519 = vst [vmem:[%s2486_s3 + $0x8] sm:$0xff] %v1391_v2  ;;  %1521 = vst [vmem:[%s2486_s3 + $0x18] sm:$0xff] %v1393_v3  ;;  %v1394_v6 = vadd.f32 %v1963_v56, %v633_v4  ;;  %v1396_v7 = vadd.f32 %v1965_v57, %v826_v5 }
  0xe8   :  { %v635_v8 = vpop.f32.mrf.mxu0  ;;  %v828_v9 = vpop.f32.mrf.mxu1 }
  0xe9   :  { %1522 = vst [vmem:[%s2486_s3 + $0x20] sm:$0xff] %v1394_v6  ;;  %1524 = vst [vmem:[%s2486_s3 + $0x30] sm:$0xff] %v1396_v7  ;;  %v1395_v10 = vadd.f32 %v1967_v58, %v635_v8  ;;  %v1397_v11 = vadd.f32 %v1969_v59, %v828_v9 }
  0xea   :  { %v639_v12 = vpop.f32.mrf.mxu0  ;;  %v832_v13 = vpop.f32.mrf.mxu1 }
  0xeb   :  { %1523 = vst [vmem:[%s2486_s3 + $0x28] sm:$0xff] %v1395_v10  ;;  %1525 = vst [vmem:[%s2486_s3 + $0x38] sm:$0xff] %v1397_v11  ;;  %v1398_v14 = vadd.f32 %v1963_v56, %v639_v12  ;;  %v1400_v15 = vadd.f32 %v1965_v57, %v832_v13 }
  0xec   :  { %v641_v16 = vpop.f32.mrf.mxu0  ;;  %v834_v17 = vpop.f32.mrf.mxu1 }
  0xed   :  { %1526 = vst [vmem:[%s2486_s3 + $0x40] sm:$0xff] %v1398_v14  ;;  %1528 = vst [vmem:[%s2486_s3 + $0x50] sm:$0xff] %v1400_v15  ;;  %v1399_v18 = vadd.f32 %v1967_v58, %v641_v16  ;;  %v1401_v19 = vadd.f32 %v1969_v59, %v834_v17 }
  0xee   :  { %v643_v20 = vpop.f32.mrf.mxu0  ;;  %v836_v21 = vpop.f32.mrf.mxu1 }
  0xef   :  { %1527 = vst [vmem:[%s2486_s3 + $0x48] sm:$0xff] %v1399_v18  ;;  %1529 = vst [vmem:[%s2486_s3 + $0x58] sm:$0xff] %v1401_v19  ;;  %v1402_v22 = vadd.f32 %v1963_v56, %v643_v20  ;;  %v1404_v23 = vadd.f32 %v1965_v57, %v836_v21 }
  0xf0   :  { %v645_v24 = vpop.f32.mrf.mxu0  ;;  %v838_v25 = vpop.f32.mrf.mxu1 }
  0xf1   :  { %1530 = vst [vmem:[%s2486_s3 + $0x60] sm:$0xff] %v1402_v22  ;;  %1532 = vst [vmem:[%s2486_s3 + $0x70] sm:$0xff] %v1404_v23  ;;  %v1403_v26 = vadd.f32 %v1967_v58, %v645_v24  ;;  %v1405_v27 = vadd.f32 %v1969_v59, %v838_v25 }
  0xf2   :  { %v649_v28 = vpop.f32.mrf.mxu0  ;;  %v842_v29 = vpop.f32.mrf.mxu1 }
  0xf3   :  { %1531 = vst [vmem:[%s2486_s3 + $0x68] sm:$0xff] %v1403_v26  ;;  %1533 = vst [vmem:[%s2486_s3 + $0x78] sm:$0xff] %v1405_v27  ;;  %v1406_v30 = vadd.f32 %v1963_v56, %v649_v28  ;;  %v1408_v31 = vadd.f32 %v1965_v57, %v842_v29 }
  0xf4   :  { %v651_v32 = vpop.f32.mrf.mxu0  ;;  %v844_v33 = vpop.f32.mrf.mxu1 }
  0xf5   :  { %1534 = vst [vmem:[%s2486_s3 + $0x80] sm:$0xff] %v1406_v30  ;;  %1536 = vst [vmem:[%s2486_s3 + $0x90] sm:$0xff] %v1408_v31  ;;  %v1407_v34 = vadd.f32 %v1967_v58, %v651_v32  ;;  %v1409_v35 = vadd.f32 %v1969_v59, %v844_v33 }
  0xf6   :  { %v653_v36 = vpop.f32.mrf.mxu0  ;;  %v846_v37 = vpop.f32.mrf.mxu1 }
  0xf7   :  { %1535 = vst [vmem:[%s2486_s3 + $0x88] sm:$0xff] %v1407_v34  ;;  %1537 = vst [vmem:[%s2486_s3 + $0x98] sm:$0xff] %v1409_v35  ;;  %v1410_v38 = vadd.f32 %v1963_v56, %v653_v36  ;;  %v1412_v39 = vadd.f32 %v1965_v57, %v846_v37 }
  0xf8   :  { %v655_v40 = vpop.f32.mrf.mxu0  ;;  %v848_v41 = vpop.f32.mrf.mxu1 }
  0xf9   :  { %1538 = vst [vmem:[%s2486_s3 + $0xa0] sm:$0xff] %v1410_v38  ;;  %1540 = vst [vmem:[%s2486_s3 + $0xb0] sm:$0xff] %v1412_v39  ;;  %v1411_v42 = vadd.f32 %v1967_v58, %v655_v40  ;;  %v1413_v43 = vadd.f32 %v1969_v59, %v848_v41 }
  0xfa   :  { %v659_v44 = vpop.f32.mrf.mxu0  ;;  %v852_v45 = vpop.f32.mrf.mxu1 }
  0xfb   :  { %1539 = vst [vmem:[%s2486_s3 + $0xa8] sm:$0xff] %v1411_v42  ;;  %1541 = vst [vmem:[%s2486_s3 + $0xb8] sm:$0xff] %v1413_v43  ;;  %v1414_v46 = vadd.f32 %v1963_v56, %v659_v44  ;;  %v1416_v47 = vadd.f32 %v1965_v57, %v852_v45 }
  0xfc   :  { %v661_v48 = vpop.f32.mrf.mxu0  ;;  %v854_v49 = vpop.f32.mrf.mxu1 }
  0xfd   :  { %1542 = vst [vmem:[%s2486_s3 + $0xc0] sm:$0xff] %v1414_v46  ;;  %1544 = vst [vmem:[%s2486_s3 + $0xd0] sm:$0xff] %v1416_v47  ;;  %v1415_v50 = vadd.f32 %v1967_v58, %v661_v48  ;;  %v1417_v51 = vadd.f32 %v1969_v59, %v854_v49 }
  0xfe   :  { %v663_v52 = vpop.f32.mrf.mxu0  ;;  %v856_v53 = vpop.f32.mrf.mxu1 }
  0xff   :  { %1543 = vst [vmem:[%s2486_s3 + $0xc8] sm:$0xff] %v1415_v50  ;;  %1545 = vst [vmem:[%s2486_s3 + $0xd8] sm:$0xff] %v1417_v51  ;;  %v1418_v54 = vadd.f32 %v1963_v56, %v663_v52  ;;  %v1420_v55 = vadd.f32 %v1965_v57, %v856_v53 }
 0x100   :  { %v665_v60 = vpop.f32.mrf.mxu0  ;;  %v858_v61 = vpop.f32.mrf.mxu1 }
 0x101   :  { %1546 = vst [vmem:[%s2486_s3 + $0xe0] sm:$0xff] %v1418_v54  ;;  %1548 = vst [vmem:[%s2486_s3 + $0xf0] sm:$0xff] %v1420_v55  ;;  %v1419_v62 = vadd.f32 %v1967_v58, %v665_v60  ;;  %v1421_v63 = vadd.f32 %v1969_v59, %v858_v61 }
 0x102   :  { %v669_v0 = vpop.f32.mrf.mxu0  ;;  %v862_v1 = vpop.f32.mrf.mxu1 }
 0x103   :  { %1547 = vst [vmem:[%s2486_s3 + $0xe8] sm:$0xff] %v1419_v62  ;;  %1549 = vst [vmem:[%s2486_s3 + $0xf8] sm:$0xff] %v1421_v63  ;;  %v1422_v2 = vadd.f32 %v1963_v56, %v669_v0  ;;  %v1424_v3 = vadd.f32 %v1965_v57, %v862_v1 }
 0x104   :  { %v671_v4 = vpop.f32.mrf.mxu0  ;;  %v864_v5 = vpop.f32.mrf.mxu1 }
 0x105   :  { %1550 = vst [vmem:[%s2486_s3 + $0x100] sm:$0xff] %v1422_v2  ;;  %1552 = vst [vmem:[%s2486_s3 + $0x110] sm:$0xff] %v1424_v3  ;;  %v1423_v6 = vadd.f32 %v1967_v58, %v671_v4  ;;  %v1425_v7 = vadd.f32 %v1969_v59, %v864_v5 }
 0x106   :  { %v673_v8 = vpop.f32.mrf.mxu0  ;;  %v866_v9 = vpop.f32.mrf.mxu1 }
 0x107   :  { %1551 = vst [vmem:[%s2486_s3 + $0x108] sm:$0xff] %v1423_v6  ;;  %1553 = vst [vmem:[%s2486_s3 + $0x118] sm:$0xff] %v1425_v7  ;;  %v1426_v10 = vadd.f32 %v1963_v56, %v673_v8  ;;  %v1428_v11 = vadd.f32 %v1965_v57, %v866_v9 }
 0x108   :  { %v675_v12 = vpop.f32.mrf.mxu0  ;;  %v868_v13 = vpop.f32.mrf.mxu1 }
 0x109   :  { %1554 = vst [vmem:[%s2486_s3 + $0x120] sm:$0xff] %v1426_v10  ;;  %1556 = vst [vmem:[%s2486_s3 + $0x130] sm:$0xff] %v1428_v11  ;;  %v1427_v14 = vadd.f32 %v1967_v58, %v675_v12  ;;  %v1429_v15 = vadd.f32 %v1969_v59, %v868_v13 }
 0x10a   :  { %v679_v16 = vpop.f32.mrf.mxu0  ;;  %v872_v17 = vpop.f32.mrf.mxu1 }
 0x10b   :  { %1555 = vst [vmem:[%s2486_s3 + $0x128] sm:$0xff] %v1427_v14  ;;  %1557 = vst [vmem:[%s2486_s3 + $0x138] sm:$0xff] %v1429_v15  ;;  %v1430_v18 = vadd.f32 %v1963_v56, %v679_v16  ;;  %v1432_v19 = vadd.f32 %v1965_v57, %v872_v17 }
 0x10c   :  { %v681_v20 = vpop.f32.mrf.mxu0  ;;  %v874_v21 = vpop.f32.mrf.mxu1 }
 0x10d   :  { %1558 = vst [vmem:[%s2486_s3 + $0x140] sm:$0xff] %v1430_v18  ;;  %1560 = vst [vmem:[%s2486_s3 + $0x150] sm:$0xff] %v1432_v19  ;;  %v1431_v22 = vadd.f32 %v1967_v58, %v681_v20  ;;  %v1433_v23 = vadd.f32 %v1969_v59, %v874_v21 }
 0x10e   :  { %v683_v24 = vpop.f32.mrf.mxu0  ;;  %v876_v25 = vpop.f32.mrf.mxu1 }
 0x10f   :  { %1559 = vst [vmem:[%s2486_s3 + $0x148] sm:$0xff] %v1431_v22  ;;  %1561 = vst [vmem:[%s2486_s3 + $0x158] sm:$0xff] %v1433_v23  ;;  %v1434_v26 = vadd.f32 %v1963_v56, %v683_v24  ;;  %v1436_v27 = vadd.f32 %v1965_v57, %v876_v25 }
 0x110   :  { %v685_v28 = vpop.f32.mrf.mxu0  ;;  %v878_v29 = vpop.f32.mrf.mxu1 }
 0x111   :  { %1562 = vst [vmem:[%s2486_s3 + $0x160] sm:$0xff] %v1434_v26  ;;  %1564 = vst [vmem:[%s2486_s3 + $0x170] sm:$0xff] %v1436_v27  ;;  %v1435_v30 = vadd.f32 %v1967_v58, %v685_v28  ;;  %v1437_v31 = vadd.f32 %v1969_v59, %v878_v29 }
 0x112   :  { %v689_v32 = vpop.f32.mrf.mxu0  ;;  %v882_v33 = vpop.f32.mrf.mxu1 }
 0x113   :  { %1563 = vst [vmem:[%s2486_s3 + $0x168] sm:$0xff] %v1435_v30  ;;  %1565 = vst [vmem:[%s2486_s3 + $0x178] sm:$0xff] %v1437_v31  ;;  %v1438_v34 = vadd.f32 %v1963_v56, %v689_v32  ;;  %v1440_v35 = vadd.f32 %v1965_v57, %v882_v33 }
 0x114   :  { %v691_v36 = vpop.f32.mrf.mxu0  ;;  %v884_v37 = vpop.f32.mrf.mxu1 }
 0x115   :  { %1566 = vst [vmem:[%s2486_s3 + $0x180] sm:$0xff] %v1438_v34  ;;  %1568 = vst [vmem:[%s2486_s3 + $0x190] sm:$0xff] %v1440_v35  ;;  %v1439_v38 = vadd.f32 %v1967_v58, %v691_v36  ;;  %v1441_v39 = vadd.f32 %v1969_v59, %v884_v37 }
 0x116   :  { %v693_v40 = vpop.f32.mrf.mxu0  ;;  %v886_v41 = vpop.f32.mrf.mxu1 }
 0x117   :  { %1567 = vst [vmem:[%s2486_s3 + $0x188] sm:$0xff] %v1439_v38  ;;  %1569 = vst [vmem:[%s2486_s3 + $0x198] sm:$0xff] %v1441_v39  ;;  %v1442_v42 = vadd.f32 %v1963_v56, %v693_v40  ;;  %v1444_v43 = vadd.f32 %v1965_v57, %v886_v41 }
 0x118   :  { %v695_v44 = vpop.f32.mrf.mxu0  ;;  %v888_v45 = vpop.f32.mrf.mxu1 }
 0x119   :  { %1570 = vst [vmem:[%s2486_s3 + $0x1a0] sm:$0xff] %v1442_v42  ;;  %1572 = vst [vmem:[%s2486_s3 + $0x1b0] sm:$0xff] %v1444_v43  ;;  %v1443_v46 = vadd.f32 %v1967_v58, %v695_v44  ;;  %v1445_v47 = vadd.f32 %v1969_v59, %v888_v45 }
 0x11a   :  { %v699_v48 = vpop.f32.mrf.mxu0  ;;  %v892_v49 = vpop.f32.mrf.mxu1 }
 0x11b   :  { %1571 = vst [vmem:[%s2486_s3 + $0x1a8] sm:$0xff] %v1443_v46  ;;  %1573 = vst [vmem:[%s2486_s3 + $0x1b8] sm:$0xff] %v1445_v47  ;;  %v1446_v50 = vadd.f32 %v1963_v56, %v699_v48  ;;  %v1448_v51 = vadd.f32 %v1965_v57, %v892_v49 }
 0x11c   :  { %v701_v52 = vpop.f32.mrf.mxu0  ;;  %v894_v53 = vpop.f32.mrf.mxu1 }
 0x11d   :  { %1574 = vst [vmem:[%s2486_s3 + $0x1c0] sm:$0xff] %v1446_v50  ;;  %1576 = vst [vmem:[%s2486_s3 + $0x1d0] sm:$0xff] %v1448_v51  ;;  %v1447_v54 = vadd.f32 %v1967_v58, %v701_v52  ;;  %v1449_v55 = vadd.f32 %v1969_v59, %v894_v53 }
 0x11e   :  { %v703_v60 = vpop.f32.mrf.mxu0  ;;  %v896_v61 = vpop.f32.mrf.mxu1 }
 0x11f   :  { %1575 = vst [vmem:[%s2486_s3 + $0x1c8] sm:$0xff] %v1447_v54  ;;  %1577 = vst [vmem:[%s2486_s3 + $0x1d8] sm:$0xff] %v1449_v55  ;;  %v1450_v62 = vadd.f32 %v1963_v56, %v703_v60  ;;  %v1452_v63 = vadd.f32 %v1965_v57, %v896_v61 }
 0x120   :  { %v705_v0 = vpop.f32.mrf.mxu0  ;;  %v898_v1 = vpop.f32.mrf.mxu1 }
 0x121   :  { %1578 = vst [vmem:[%s2486_s3 + $0x1e0] sm:$0xff] %v1450_v62  ;;  %1580 = vst [vmem:[%s2486_s3 + $0x1f0] sm:$0xff] %v1452_v63  ;;  %v1451_v2 = vadd.f32 %v1967_v58, %v705_v0  ;;  %v1453_v3 = vadd.f32 %v1969_v59, %v898_v1 }
 0x122   :  { %v709_v4 = vpop.f32.mrf.mxu0  ;;  %v902_v5 = vpop.f32.mrf.mxu1 }
 0x123   :  { %1579 = vst [vmem:[%s2486_s3 + $0x1e8] sm:$0xff] %v1451_v2  ;;  %1581 = vst [vmem:[%s2486_s3 + $0x1f8] sm:$0xff] %v1453_v3  ;;  %v1454_v6 = vadd.f32 %v1963_v56, %v709_v4  ;;  %v1456_v7 = vadd.f32 %v1965_v57, %v902_v5 }
 0x124   :  { %v711_v8 = vpop.f32.mrf.mxu0  ;;  %v904_v9 = vpop.f32.mrf.mxu1 }
 0x125   :  { %1582 = vst [vmem:[%s2486_s3 + $0x200] sm:$0xff] %v1454_v6  ;;  %1584 = vst [vmem:[%s2486_s3 + $0x210] sm:$0xff] %v1456_v7  ;;  %v1455_v10 = vadd.f32 %v1967_v58, %v711_v8  ;;  %v1457_v11 = vadd.f32 %v1969_v59, %v904_v9 }
 0x126   :  { %v713_v12 = vpop.f32.mrf.mxu0  ;;  %v906_v13 = vpop.f32.mrf.mxu1 }
 0x127   :  { %1583 = vst [vmem:[%s2486_s3 + $0x208] sm:$0xff] %v1455_v10  ;;  %1585 = vst [vmem:[%s2486_s3 + $0x218] sm:$0xff] %v1457_v11  ;;  %v1458_v14 = vadd.f32 %v1963_v56, %v713_v12  ;;  %v1460_v15 = vadd.f32 %v1965_v57, %v906_v13 }
 0x128   :  { %v715_v16 = vpop.f32.mrf.mxu0  ;;  %v908_v17 = vpop.f32.mrf.mxu1 }
 0x129   :  { %1586 = vst [vmem:[%s2486_s3 + $0x220] sm:$0xff] %v1458_v14  ;;  %1588 = vst [vmem:[%s2486_s3 + $0x230] sm:$0xff] %v1460_v15  ;;  %v1459_v18 = vadd.f32 %v1967_v58, %v715_v16  ;;  %v1461_v19 = vadd.f32 %v1969_v59, %v908_v17 }
 0x12a   :  { %v719_v20 = vpop.f32.mrf.mxu0  ;;  %v912_v21 = vpop.f32.mrf.mxu1 }
 0x12b   :  { %1587 = vst [vmem:[%s2486_s3 + $0x228] sm:$0xff] %v1459_v18  ;;  %1589 = vst [vmem:[%s2486_s3 + $0x238] sm:$0xff] %v1461_v19  ;;  %v1462_v22 = vadd.f32 %v1963_v56, %v719_v20  ;;  %v1464_v23 = vadd.f32 %v1965_v57, %v912_v21 }
 0x12c   :  { %v721_v24 = vpop.f32.mrf.mxu0  ;;  %v914_v25 = vpop.f32.mrf.mxu1 }
 0x12d   :  { %1590 = vst [vmem:[%s2486_s3 + $0x240] sm:$0xff] %v1462_v22  ;;  %1592 = vst [vmem:[%s2486_s3 + $0x250] sm:$0xff] %v1464_v23  ;;  %v1463_v26 = vadd.f32 %v1967_v58, %v721_v24  ;;  %v1465_v27 = vadd.f32 %v1969_v59, %v914_v25 }
 0x12e   :  { %v723_v28 = vpop.f32.mrf.mxu0  ;;  %v916_v29 = vpop.f32.mrf.mxu1 }
 0x12f   :  { %1591 = vst [vmem:[%s2486_s3 + $0x248] sm:$0xff] %v1463_v26  ;;  %1593 = vst [vmem:[%s2486_s3 + $0x258] sm:$0xff] %v1465_v27  ;;  %v1466_v30 = vadd.f32 %v1963_v56, %v723_v28  ;;  %v1468_v31 = vadd.f32 %v1965_v57, %v916_v29 }
 0x130   :  { %v725_v32 = vpop.f32.mrf.mxu0  ;;  %v918_v33 = vpop.f32.mrf.mxu1 }
 0x131   :  { %1594 = vst [vmem:[%s2486_s3 + $0x260] sm:$0xff] %v1466_v30  ;;  %1596 = vst [vmem:[%s2486_s3 + $0x270] sm:$0xff] %v1468_v31  ;;  %v1467_v34 = vadd.f32 %v1967_v58, %v725_v32  ;;  %v1469_v35 = vadd.f32 %v1969_v59, %v918_v33 }
 0x132   :  { %v729_v36 = vpop.f32.mrf.mxu0  ;;  %v922_v37 = vpop.f32.mrf.mxu1 }
 0x133   :  { %1595 = vst [vmem:[%s2486_s3 + $0x268] sm:$0xff] %v1467_v34  ;;  %1597 = vst [vmem:[%s2486_s3 + $0x278] sm:$0xff] %v1469_v35  ;;  %v1470_v38 = vadd.f32 %v1963_v56, %v729_v36  ;;  %v1472_v39 = vadd.f32 %v1965_v57, %v922_v37 }
 0x134   :  { %v731_v40 = vpop.f32.mrf.mxu0  ;;  %v924_v41 = vpop.f32.mrf.mxu1 }
 0x135   :  { %1598 = vst [vmem:[%s2486_s3 + $0x280] sm:$0xff] %v1470_v38  ;;  %1600 = vst [vmem:[%s2486_s3 + $0x290] sm:$0xff] %v1472_v39  ;;  %v1471_v42 = vadd.f32 %v1967_v58, %v731_v40  ;;  %v1473_v43 = vadd.f32 %v1969_v59, %v924_v41 }
 0x136   :  { %v733_v44 = vpop.f32.mrf.mxu0  ;;  %v926_v45 = vpop.f32.mrf.mxu1 }
 0x137   :  { %1599 = vst [vmem:[%s2486_s3 + $0x288] sm:$0xff] %v1471_v42  ;;  %1601 = vst [vmem:[%s2486_s3 + $0x298] sm:$0xff] %v1473_v43  ;;  %v1474_v46 = vadd.f32 %v1963_v56, %v733_v44  ;;  %v1476_v47 = vadd.f32 %v1965_v57, %v926_v45 }
 0x138   :  { %v735_v48 = vpop.f32.mrf.mxu0  ;;  %v928_v49 = vpop.f32.mrf.mxu1 }
 0x139   :  { %1602 = vst [vmem:[%s2486_s3 + $0x2a0] sm:$0xff] %v1474_v46  ;;  %1604 = vst [vmem:[%s2486_s3 + $0x2b0] sm:$0xff] %v1476_v47  ;;  %v1475_v50 = vadd.f32 %v1967_v58, %v735_v48  ;;  %v1477_v51 = vadd.f32 %v1969_v59, %v928_v49 }
 0x13a   :  { %v739_v52 = vpop.f32.mrf.mxu0  ;;  %v932_v53 = vpop.f32.mrf.mxu1 }
 0x13b   :  { %1603 = vst [vmem:[%s2486_s3 + $0x2a8] sm:$0xff] %v1475_v50  ;;  %1605 = vst [vmem:[%s2486_s3 + $0x2b8] sm:$0xff] %v1477_v51  ;;  %v1478_v54 = vadd.f32 %v1963_v56, %v739_v52  ;;  %v1480_v55 = vadd.f32 %v1965_v57, %v932_v53 }
 0x13c   :  { %v741_v60 = vpop.f32.mrf.mxu0  ;;  %v934_v61 = vpop.f32.mrf.mxu1 }
 0x13d   :  { %1606 = vst [vmem:[%s2486_s3 + $0x2c0] sm:$0xff] %v1478_v54  ;;  %1608 = vst [vmem:[%s2486_s3 + $0x2d0] sm:$0xff] %v1480_v55  ;;  %v1479_v62 = vadd.f32 %v1967_v58, %v741_v60  ;;  %v1481_v63 = vadd.f32 %v1969_v59, %v934_v61 }
 0x13e   :  { %v743_v0 = vpop.f32.mrf.mxu0  ;;  %v936_v1 = vpop.f32.mrf.mxu1 }
 0x13f   :  { %1607 = vst [vmem:[%s2486_s3 + $0x2c8] sm:$0xff] %v1479_v62  ;;  %1609 = vst [vmem:[%s2486_s3 + $0x2d8] sm:$0xff] %v1481_v63  ;;  %v1482_v2 = vadd.f32 %v1963_v56, %v743_v0  ;;  %v1484_v3 = vadd.f32 %v1965_v57, %v936_v1 }
 0x140   :  { %v745_v4 = vpop.f32.mrf.mxu0  ;;  %v938_v5 = vpop.f32.mrf.mxu1 }
 0x141   :  { %1610 = vst [vmem:[%s2486_s3 + $0x2e0] sm:$0xff] %v1482_v2  ;;  %1612 = vst [vmem:[%s2486_s3 + $0x2f0] sm:$0xff] %v1484_v3  ;;  %v1483_v6 = vadd.f32 %v1967_v58, %v745_v4  ;;  %v1485_v7 = vadd.f32 %v1969_v59, %v938_v5 }
 0x142   :  { %v749_v8 = vpop.f32.mrf.mxu0  ;;  %v942_v9 = vpop.f32.mrf.mxu1 }
 0x143   :  { %1611 = vst [vmem:[%s2486_s3 + $0x2e8] sm:$0xff] %v1483_v6  ;;  %1613 = vst [vmem:[%s2486_s3 + $0x2f8] sm:$0xff] %v1485_v7  ;;  %v1486_v10 = vadd.f32 %v1963_v56, %v749_v8  ;;  %v1488_v11 = vadd.f32 %v1965_v57, %v942_v9 }
 0x144   :  { %v751_v12 = vpop.f32.mrf.mxu0  ;;  %v944_v13 = vpop.f32.mrf.mxu1 }
 0x145   :  { %1614 = vst [vmem:[%s2486_s3 + $0x300] sm:$0xff] %v1486_v10  ;;  %1616 = vst [vmem:[%s2486_s3 + $0x310] sm:$0xff] %v1488_v11  ;;  %v1487_v14 = vadd.f32 %v1967_v58, %v751_v12  ;;  %v1489_v15 = vadd.f32 %v1969_v59, %v944_v13 }
 0x146   :  { %v753_v16 = vpop.f32.mrf.mxu0  ;;  %v946_v17 = vpop.f32.mrf.mxu1 }
 0x147   :  { %1615 = vst [vmem:[%s2486_s3 + $0x308] sm:$0xff] %v1487_v14  ;;  %1617 = vst [vmem:[%s2486_s3 + $0x318] sm:$0xff] %v1489_v15  ;;  %v1490_v18 = vadd.f32 %v1963_v56, %v753_v16  ;;  %v1492_v19 = vadd.f32 %v1965_v57, %v946_v17 }
 0x148   :  { %v755_v20 = vpop.f32.mrf.mxu0  ;;  %v948_v21 = vpop.f32.mrf.mxu1 }
 0x149   :  { %1618 = vst [vmem:[%s2486_s3 + $0x320] sm:$0xff] %v1490_v18  ;;  %1620 = vst [vmem:[%s2486_s3 + $0x330] sm:$0xff] %v1492_v19  ;;  %v1491_v22 = vadd.f32 %v1967_v58, %v755_v20  ;;  %v1493_v23 = vadd.f32 %v1969_v59, %v948_v21 }
 0x14a   :  { %v759_v24 = vpop.f32.mrf.mxu0  ;;  %v952_v25 = vpop.f32.mrf.mxu1 }
 0x14b   :  { %1619 = vst [vmem:[%s2486_s3 + $0x328] sm:$0xff] %v1491_v22  ;;  %1621 = vst [vmem:[%s2486_s3 + $0x338] sm:$0xff] %v1493_v23  ;;  %v1494_v26 = vadd.f32 %v1963_v56, %v759_v24  ;;  %v1496_v27 = vadd.f32 %v1965_v57, %v952_v25 }
 0x14c   :  { %v761_v28 = vpop.f32.mrf.mxu0  ;;  %v954_v29 = vpop.f32.mrf.mxu1 }
 0x14d   :  { %1622 = vst [vmem:[%s2486_s3 + $0x340] sm:$0xff] %v1494_v26  ;;  %1624 = vst [vmem:[%s2486_s3 + $0x350] sm:$0xff] %v1496_v27  ;;  %v1495_v30 = vadd.f32 %v1967_v58, %v761_v28  ;;  %v1497_v31 = vadd.f32 %v1969_v59, %v954_v29 }
 0x14e   :  { %v763_v32 = vpop.f32.mrf.mxu0  ;;  %v956_v33 = vpop.f32.mrf.mxu1 }
 0x14f   :  { %1623 = vst [vmem:[%s2486_s3 + $0x348] sm:$0xff] %v1495_v30  ;;  %1625 = vst [vmem:[%s2486_s3 + $0x358] sm:$0xff] %v1497_v31  ;;  %v1498_v34 = vadd.f32 %v1963_v56, %v763_v32  ;;  %v1500_v35 = vadd.f32 %v1965_v57, %v956_v33 }
 0x150   :  { %v765_v36 = vpop.f32.mrf.mxu0  ;;  %v958_v37 = vpop.f32.mrf.mxu1 }
 0x151   :  { %1626 = vst [vmem:[%s2486_s3 + $0x360] sm:$0xff] %v1498_v34  ;;  %1628 = vst [vmem:[%s2486_s3 + $0x370] sm:$0xff] %v1500_v35  ;;  %v1499_v38 = vadd.f32 %v1967_v58, %v765_v36  ;;  %v1501_v39 = vadd.f32 %v1969_v59, %v958_v37 }
 0x152   :  { %v769_v40 = vpop.f32.mrf.mxu0  ;;  %v962_v41 = vpop.f32.mrf.mxu1 }
 0x153   :  { %1627 = vst [vmem:[%s2486_s3 + $0x368] sm:$0xff] %v1499_v38  ;;  %1629 = vst [vmem:[%s2486_s3 + $0x378] sm:$0xff] %v1501_v39  ;;  %v1502_v42 = vadd.f32 %v1963_v56, %v769_v40  ;;  %v1504_v43 = vadd.f32 %v1965_v57, %v962_v41 }
 0x154   :  { %v771_v44 = vpop.f32.mrf.mxu0  ;;  %v964_v45 = vpop.f32.mrf.mxu1 }
 0x155   :  { %1630 = vst [vmem:[%s2486_s3 + $0x380] sm:$0xff] %v1502_v42  ;;  %1632 = vst [vmem:[%s2486_s3 + $0x390] sm:$0xff] %v1504_v43  ;;  %v1503_v46 = vadd.f32 %v1967_v58, %v771_v44  ;;  %v1505_v47 = vadd.f32 %v1969_v59, %v964_v45 }
 0x156   :  { %v773_v48 = vpop.f32.mrf.mxu0  ;;  %v966_v49 = vpop.f32.mrf.mxu1 }
 0x157   :  { %1631 = vst [vmem:[%s2486_s3 + $0x388] sm:$0xff] %v1503_v46  ;;  %1633 = vst [vmem:[%s2486_s3 + $0x398] sm:$0xff] %v1505_v47  ;;  %v1506_v50 = vadd.f32 %v1963_v56, %v773_v48  ;;  %v1508_v51 = vadd.f32 %v1965_v57, %v966_v49 }
 0x158   :  { %v775_v52 = vpop.f32.mrf.mxu0  ;;  %v968_v53 = vpop.f32.mrf.mxu1 }
 0x159   :  { %1634 = vst [vmem:[%s2486_s3 + $0x3a0] sm:$0xff] %v1506_v50  ;;  %1636 = vst [vmem:[%s2486_s3 + $0x3b0] sm:$0xff] %v1508_v51  ;;  %v1507_v54 = vadd.f32 %v1967_v58, %v775_v52  ;;  %v1509_v55 = vadd.f32 %v1969_v59, %v968_v53 }
 0x15a   :  { %v779_v60 = vpop.f32.mrf.mxu0  ;;  %v972_v61 = vpop.f32.mrf.mxu1 }
 0x15b   :  { %1635 = vst [vmem:[%s2486_s3 + $0x3a8] sm:$0xff] %v1507_v54  ;;  %1637 = vst [vmem:[%s2486_s3 + $0x3b8] sm:$0xff] %v1509_v55  ;;  %v1510_v62 = vadd.f32 %v1963_v56, %v779_v60  ;;  %v1512_v63 = vadd.f32 %v1965_v57, %v972_v61 }
 0x15c   :  { %v781_v0 = vpop.f32.mrf.mxu0  ;;  %v974_v1 = vpop.f32.mrf.mxu1 }
 0x15d   :  { %1638 = vst [vmem:[%s2486_s3 + $0x3c0] sm:$0xff] %v1510_v62  ;;  %1640 = vst [vmem:[%s2486_s3 + $0x3d0] sm:$0xff] %v1512_v63  ;;  %v1511_v2 = vadd.f32 %v1967_v58, %v781_v0  ;;  %v1513_v3 = vadd.f32 %v1969_v59, %v974_v1 }
 0x15e   :  { %v783_v4 = vpop.f32.mrf.mxu0  ;;  %v976_v5 = vpop.f32.mrf.mxu1 }
 0x15f   :  { %1639 = vst [vmem:[%s2486_s3 + $0x3c8] sm:$0xff] %v1511_v2  ;;  %1641 = vst [vmem:[%s2486_s3 + $0x3d8] sm:$0xff] %v1513_v3  ;;  %v1514_v6 = vadd.f32 %v1963_v56, %v783_v4  ;;  %v1516_v7 = vadd.f32 %v1965_v57, %v976_v5 }
 0x160   :  { %v785_v8 = vpop.f32.mrf.mxu0  ;;  %v978_v9 = vpop.f32.mrf.mxu1 }
 0x161   :  { %1642 = vst [vmem:[%s2486_s3 + $0x3e0] sm:$0xff] %v1514_v6  ;;  %1644 = vst [vmem:[%s2486_s3 + $0x3f0] sm:$0xff] %v1516_v7  ;;  %v1515_v10 = vadd.f32 %v1967_v58, %v785_v8  ;;  %v1517_v11 = vadd.f32 %v1969_v59, %v978_v9 }
 0x163   :  { %1643 = vst [vmem:[%s2486_s3 + $0x3e8] sm:$0xff] %v1515_v10  ;;  %1645 = vst [vmem:[%s2486_s3 + $0x3f8] sm:$0xff] %v1517_v11 }

// kernel: _video_coder_forward.108
= control target key start
LH: loop header
LB: loop body
LE: loop exit
PB: predicated region body
PF: predicated region fallthrough
CT: control target
= control target key end

     0   :  { %v1798_v1 = vmov 0   ;;  %s2352_s1 = inlined_call_operand.vmem [shape: bf16[128,512], index: 1, kind: input, shape index: {}]   ;;  %s2353_s0 = inlined_call_operand.vmem [shape: bf16[128,128], index: 0, kind: input, shape index: {}]   ;;  %s2354_s2 = inlined_call_operand.vmem [shape: f32[128,512], index: 2, kind: input, shape index: {}]   ;;  %s2355_s3 = inlined_call_operand.vmem [shape: f32[128,128], index: 3, kind: input, shape index: {}]   ;;  %s2356_s5 = inlined_call_operand.vmem [shape: f32[128,128], index: 5, kind: output, shape index: {1}]   ;;  %s2357_s4 = inlined_call_operand.vmem [shape: f32[128,128], index: 4, kind: output, shape index: {0}]  }
   0x1   :  { %v1486_v0 = vld [vmem:[%s2352_s1 + $0xe4] ss:$16 sps:$4 sm:$0xff]   ;;  %440 = vmatprep.mubr.bf16.mxu0 %v1798_v1  ;;  %553 = vmatprep.mubr.bf16.mxu1 %v1798_v1  ;;  %v1488_v2 = vld [vmem:[%s2352_s1 + $0xe0] ss:$16 sps:$4 sm:$0xff]   ;;  %v1497_v6 = vld [vmem:[%s2352_s1 + $0xec] ss:$16 sps:$4 sm:$0xff]  }
   0x2   :  { %408 = vmatprep.subr.bf16.mxu0 %v1486_v0  ;;  %v1489_v3 = vld [vmem:[%s2352_s1 + $0xc4] ss:$16 sps:$4 sm:$0xff]   ;;  %v1491_v4 = vld [vmem:[%s2352_s1 + $0xc0] ss:$16 sps:$4 sm:$0xff]   ;;  %v1500_v7 = vld [vmem:[%s2352_s1 + $0xe8] ss:$16 sps:$4 sm:$0xff]   ;;  %521 = vmatprep.subr.bf16.mxu1 %v1497_v6 }
   0x3   :  { %409 = vmatpush1.bf16.msra.mxu0 %v1488_v2  ;;  %v1492_v5 = vld [vmem:[%s2352_s1 + $0xa4] ss:$16 sps:$4 sm:$0xff]   ;;  %v1494_v8 = vld [vmem:[%s2352_s1 + $0xa0] ss:$16 sps:$4 sm:$0xff]   ;;  %522 = vmatpush1.bf16.msra.mxu1 %v1500_v7  ;;  %v1503_v10 = vld [vmem:[%s2352_s1 + $0xcc] ss:$16 sps:$4 sm:$0xff]  }
   0x4   :  { %410 = vmatprep.subr.bf16.mxu0 %v1489_v3  ;;  %v1495_v9 = vld [vmem:[%s2352_s1 + $0x84] ss:$16 sps:$4 sm:$0xff]   ;;  %v1506_v11 = vld [vmem:[%s2352_s1 + $0xc8] ss:$16 sps:$4 sm:$0xff]   ;;  %523 = vmatprep.subr.bf16.mxu1 %v1503_v10  ;;  %v1499_v12 = vld [vmem:[%s2352_s1 + $0x80] ss:$16 sps:$4 sm:$0xff]  }
   0x5   :  { %v1501_v13 = vld [vmem:[%s2352_s1 + $0x64] ss:$16 sps:$4 sm:$0xff]   ;;  %v1509_v14 = vld [vmem:[%s2352_s1 + $0xac] ss:$16 sps:$4 sm:$0xff]   ;;  %v1512_v15 = vld [vmem:[%s2352_s1 + $0xa8] ss:$16 sps:$4 sm:$0xff]  }
   0x6   :  { %v1515_v16 = vld [vmem:[%s2352_s1 + $0x8c] ss:$16 sps:$4 sm:$0xff]   ;;  %v1505_v17 = vld [vmem:[%s2352_s1 + $0x60] ss:$16 sps:$4 sm:$0xff]   ;;  %v1507_v18 = vld [vmem:[%s2352_s1 + $0x44] ss:$16 sps:$4 sm:$0xff]  }
   0x7   :  { %411 = vmatpush1.bf16.msra.mxu0 %v1491_v4  ;;  %524 = vmatpush1.bf16.msra.mxu1 %v1506_v11  ;;  %v1518_v19 = vld [vmem:[%s2352_s1 + $0x88] ss:$16 sps:$4 sm:$0xff]   ;;  %v1521_v20 = vld [vmem:[%s2352_s1 + $0x6c] ss:$16 sps:$4 sm:$0xff]   ;;  %v1511_v21 = vld [vmem:[%s2352_s1 + $0x40] ss:$16 sps:$4 sm:$0xff]  }
   0x8   :  { %412 = vmatprep.subr.bf16.mxu0 %v1492_v5  ;;  %525 = vmatprep.subr.bf16.mxu1 %v1509_v14  ;;  %v1513_v22 = vld [vmem:[%s2352_s1 + $0x24] ss:$16 sps:$4 sm:$0xff]   ;;  %v1524_v23 = vld [vmem:[%s2352_s1 + $0x68] ss:$16 sps:$4 sm:$0xff]   ;;  %v1526_v24 = vld [vmem:[%s2352_s1 + $0x4c] ss:$16 sps:$4 sm:$0xff]  }
   0x9   :  { %v1517_v25 = vld [vmem:[%s2352_s1 + $0x20] ss:$16 sps:$4 sm:$0xff]   ;;  %v1519_v26 = vld [vmem:[%s2352_s1 + $0x4] ss:$16 sps:$4 sm:$0xff]   ;;  %v1528_v27 = vld [vmem:[%s2352_s1 + $0x48] ss:$16 sps:$4 sm:$0xff]  }
   0xa   :  { %v1529_v28 = vld [vmem:[%s2352_s1 + $0x2c] ss:$16 sps:$4 sm:$0xff]   ;;  %v1523_v29 = vld [vmem:[%s2352_s1] ss:$16 sps:$4 sm:$0xff]   ;;  %v1531_v30 = vld [vmem:[%s2352_s1 + $0x28] ss:$16 sps:$4 sm:$0xff]  }
   0xb   :  { %413 = vmatpush1.bf16.msra.mxu0 %v1494_v8  ;;  %526 = vmatpush1.bf16.msra.mxu1 %v1512_v15  ;;  %v1533_v31 = vld [vmem:[%s2352_s1 + $0xc] ss:$16 sps:$4 sm:$0xff]   ;;  %v1525_v32 = vld [vmem:[%s2353_s0] sm:$0xff]   ;;  %v1535_v33 = vld [vmem:[%s2352_s1 + $0x8] ss:$16 sps:$4 sm:$0xff]  }
   0xc   :  { %414 = vmatprep.subr.bf16.mxu0 %v1495_v9  ;;  %527 = vmatprep.subr.bf16.mxu1 %v1515_v16  ;;  %v1532_v34 = vld [vmem:[%s2353_s0 + $0x8] sm:$0xff]   ;;  %v1536_v35 = vld [vmem:[%s2353_s0 + $0x10] sm:$0xff]   ;;  %v1537_v36 = vld [vmem:[%s2353_s0 + $0x18] sm:$0xff]  }
   0xd   :  { %v1538_v37 = vld [vmem:[%s2353_s0 + $0x20] sm:$0xff]   ;;  %v1539_v38 = vld [vmem:[%s2353_s0 + $0x28] sm:$0xff]   ;;  %v1540_v39 = vld [vmem:[%s2353_s0 + $0x30] sm:$0xff]  }
   0xe   :  { %v1541_v40 = vld [vmem:[%s2353_s0 + $0x38] sm:$0xff]   ;;  %v829_v41 = vld [vmem:[%s2354_s2] sm:$0xff]  ;;  %v830_v43 = vld [vmem:[%s2354_s2 + $0x8] sm:$0xff] }
   0xf   :  { %415 = vmatpush1.bf16.msra.mxu0 %v1499_v12  ;;  %528 = vmatpush1.bf16.msra.mxu1 %v1518_v19  ;;  %v833_v46 = vld [vmem:[%s2354_s2 + $0x20] sm:$0xff]  ;;  %v831_v49 = vld [vmem:[%s2354_s2 + $0x10] sm:$0xff]  ;;  %v834_v51 = vld [vmem:[%s2354_s2 + $0x28] sm:$0xff] }
  0x10   :  { %416 = vmatprep.subr.bf16.mxu0 %v1501_v13  ;;  %529 = vmatprep.subr.bf16.mxu1 %v1521_v20  ;;  %v837_v56 = vld [vmem:[%s2354_s2 + $0x40] sm:$0xff]  ;;  %v835_v61 = vld [vmem:[%s2354_s2 + $0x30] sm:$0xff]  ;;  %v838_v63 = vld [vmem:[%s2354_s2 + $0x48] sm:$0xff] }
  0x11   :  { %v832_v3 = vld [vmem:[%s2354_s2 + $0x18] sm:$0xff]  ;;  %v841_v6 = vld [vmem:[%s2354_s2 + $0x60] sm:$0xff]  ;;  %v839_v11 = vld [vmem:[%s2354_s2 + $0x50] sm:$0xff] }
  0x12   :  { %v842_v13 = vld [vmem:[%s2354_s2 + $0x68] sm:$0xff] }
  0x13   :  { %417 = vmatpush1.bf16.msra.mxu0 %v1505_v17  ;;  %530 = vmatpush1.bf16.msra.mxu1 %v1524_v23 }
  0x14   :  { %418 = vmatprep.subr.bf16.mxu0 %v1507_v18  ;;  %531 = vmatprep.subr.bf16.mxu1 %v1526_v24  ;;  %v836_v18 = vld [vmem:[%s2354_s2 + $0x38] sm:$0xff] }
  0x17   :  { %419 = vmatpush1.bf16.msra.mxu0 %v1511_v21  ;;  %532 = vmatpush1.bf16.msra.mxu1 %v1528_v27  ;;  %v845_v21 = vld [vmem:[%s2354_s2 + $0x80] sm:$0xff]  ;;  %v846_v27 = vld [vmem:[%s2354_s2 + $0x88] sm:$0xff] }
  0x18   :  { %420 = vmatprep.subr.bf16.mxu0 %v1513_v22  ;;  %533 = vmatprep.subr.bf16.mxu1 %v1529_v28 }
  0x1b   :  { %421 = vmatpush1.bf16.msra.mxu0 %v1517_v25  ;;  %534 = vmatpush1.bf16.msra.mxu1 %v1531_v30 }
  0x1c   :  { %422 = vmatprep.subr.bf16.mxu0 %v1519_v26  ;;  %535 = vmatprep.subr.bf16.mxu1 %v1533_v31 }
  0x1f   :  { %423 = vmatpush1.bf16.msra.mxu0 %v1523_v29  ;;  %536 = vmatpush1.bf16.msra.mxu1 %v1535_v33 }
  0x22   :  { %441 = vmatmul.mubr.bf16.vlgmr.msra.gmra.mxu0 %v1525_v32  ;;  %554 = vmatmul.mubr.bf16.vlgmr.msra.gmra.mxu1 %v1525_v32 }
  0x23   :  { %450 = vmatprep.mubr.bf16.mxu0 %v1798_v1  ;;  %563 = vmatprep.mubr.bf16.mxu1 %v1798_v1 }
  0x2a   :  { %451 = vmatmul.mubr.bf16.gmra.mxu0 %v1532_v34  ;;  %564 = vmatmul.mubr.bf16.gmra.mxu1 %v1532_v34  ;;  %v849_v34 = vld [vmem:[%s2354_s2 + $0xa0] sm:$0xff] }
  0x2b   :  { %460 = vmatprep.mubr.bf16.mxu0 %v1798_v1  ;;  %573 = vmatprep.mubr.bf16.mxu1 %v1798_v1 }
  0x32   :  { %461 = vmatmul.mubr.bf16.gmra.mxu0 %v1536_v35  ;;  %574 = vmatmul.mubr.bf16.gmra.mxu1 %v1536_v35 }
  0x33   :  { %470 = vmatprep.mubr.bf16.mxu0 %v1798_v1  ;;  %583 = vmatprep.mubr.bf16.mxu1 %v1798_v1 }
  0x3a   :  { %471 = vmatmul.mubr.bf16.gmra.mxu0 %v1537_v36  ;;  %584 = vmatmul.mubr.bf16.gmra.mxu1 %v1537_v36 }
  0x3b   :  { %480 = vmatprep.mubr.bf16.mxu0 %v1798_v1  ;;  %593 = vmatprep.mubr.bf16.mxu1 %v1798_v1 }
  0x42   :  { %481 = vmatmul.mubr.bf16.gmra.mxu0 %v1538_v37  ;;  %594 = vmatmul.mubr.bf16.gmra.mxu1 %v1538_v37 }
  0x43   :  { %490 = vmatprep.mubr.bf16.mxu0 %v1798_v1  ;;  %603 = vmatprep.mubr.bf16.mxu1 %v1798_v1 }
  0x4a   :  { %491 = vmatmul.mubr.bf16.gmra.mxu0 %v1539_v38  ;;  %604 = vmatmul.mubr.bf16.gmra.mxu1 %v1539_v38  ;;  %v840_v38 = vld [vmem:[%s2354_s2 + $0x58] sm:$0xff] }
  0x4b   :  { %500 = vmatprep.mubr.bf16.mxu0 %v1798_v1  ;;  %613 = vmatprep.mubr.bf16.mxu1 %v1798_v1 }
  0x52   :  { %501 = vmatmul.mubr.bf16.gmra.mxu0 %v1540_v39  ;;  %614 = vmatmul.mubr.bf16.gmra.mxu1 %v1540_v39 }
  0x53   :  { %510 = vmatprep.mubr.bf16.mxu0 %v1798_v1  ;;  %623 = vmatprep.mubr.bf16.mxu1 %v1798_v1 }
  0x5a   :  { %511 = vmatmul.mubr.bf16.gmra.mxu0 %v1541_v40  ;;  %624 = vmatmul.mubr.bf16.gmra.mxu1 %v1541_v40 }
  0xe2   :  { %v442_v42 = vpop.f32.mrf.mxu0  ;;  %v555_v54 = vpop.f32.mrf.mxu1 }
  0xe3   :  { %v893_v44 = vadd.f32 %v829_v41, %v442_v42  ;;  %v895_v57 = vadd.f32 %v831_v49, %v555_v54 }
  0xe4   :  { %v444_v45 = vpop.f32.mrf.mxu0  ;;  %v557_v60 = vpop.f32.mrf.mxu1 }
  0xe5   :  { %v1437_v47 = vmul.f32 -1.442695, %v893_v44  ;;  %v894_v48 = vadd.f32 %v830_v43, %v444_v45  ;;  %v1469_v0 = vmul.f32 -1.442695, %v895_v57  ;;  %v896_v14 = vadd.f32 %v832_v3, %v557_v60  ;;  %v850_v45 = vld [vmem:[%s2354_s2 + $0xa8] sm:$0xff]  ;;  %v853_v57 = vld [vmem:[%s2354_s2 + $0xc0] sm:$0xff] }
  0xe6   :  { %v446_v50 = vpop.f32.mrf.mxu0  ;;  %v559_v4 = vpop.f32.mrf.mxu1  ;;  %v843_v60 = vld [vmem:[%s2354_s2 + $0x70] sm:$0xff] }
  0xe7   :  { %1542 = vpow2.f32 %v1437_v47  ;;  %v1453_v52 = vmul.f32 -1.442695, %v894_v48  ;;  %v897_v53 = vadd.f32 %v833_v46, %v446_v50  ;;  %v899_v7 = vadd.f32 %v835_v61, %v559_v4  ;;  %v854_v4 = vld [vmem:[%s2354_s2 + $0xc8] sm:$0xff] }
  0xe8   :  { %v448_v55 = vpop.f32.mrf.mxu0  ;;  %v561_v10 = vpop.f32.mrf.mxu1 }
  0xe9   :  { %1544 = vpow2.f32 %v1453_v52  ;;  %v1438_v58 = vmul.f32 -1.442695, %v897_v53  ;;  %v898_v59 = vadd.f32 %v834_v51, %v448_v55  ;;  %v1470_v15 = vmul.f32 -1.442695, %v899_v7 }
  0xea   :  { %v452_v62 = vpop.f32.mrf.mxu0  ;;  %v565_v19 = vpop.f32.mrf.mxu1  ;;  %v900_v28 = vadd.f32 %v836_v18, %v561_v10  ;;  %v857_v18 = vld [vmem:[%s2354_s2 + $0xe0] sm:$0xff] }
  0xeb   :  { %1546 = vpow2.f32 %v1438_v58  ;;  %v1454_v1 = vmul.f32 -1.442695, %v898_v59  ;;  %v901_v2 = vadd.f32 %v837_v56, %v452_v62  ;;  %v903_v22 = vadd.f32 %v839_v11, %v565_v19 }
  0xec   :  { %v454_v5 = vpop.f32.mrf.mxu0  ;;  %1548 = vpow2.f32 %v1469_v0  ;;  %v567_v25 = vpop.f32.mrf.mxu1 }
  0xed   :  { %1550 = vpow2.f32 %v1454_v1  ;;  %v1439_v8 = vmul.f32 -1.442695, %v901_v2  ;;  %v902_v9 = vadd.f32 %v838_v63, %v454_v5  ;;  %v1471_v29 = vmul.f32 -1.442695, %v903_v22 }
  0xee   :  { %v456_v12 = vpop.f32.mrf.mxu0  ;;  %v569_v39 = vpop.f32.mrf.mxu1  ;;  %v904_v48 = vadd.f32 %v840_v38, %v567_v25  ;;  %v1262_v38 = vld [vmem:[%s2355_s3 + $0x8] sm:$0xff] }
  0xef   :  { %1552 = vpow2.f32 %v1439_v8  ;;  %v1455_v16 = vmul.f32 -1.442695, %v902_v9  ;;  %v905_v17 = vadd.f32 %v841_v6, %v456_v12  ;;  %v907_v8 = vadd.f32 %v843_v60, %v569_v39 }
  0xf0   :  { %v458_v20 = vpop.f32.mrf.mxu0  ;;  %1554 = vpow2.f32 %v1470_v15  ;;  %v2019_v51 = vpop.f32.mrf.mxu1 }
  0xf1   :  { %1556 = vpow2.f32 %v1455_v16  ;;  %v1440_v23 = vmul.f32 -1.442695, %v905_v17  ;;  %v906_v24 = vadd.f32 %v842_v13, %v458_v20  ;;  %v1472_v20 = vmul.f32 -1.442695, %v907_v8 }
  0xf2   :  { %1558 = vtanh.f32 %v896_v14  ;;  %v462_v26 = vpop.f32.mrf.mxu0  ;;  %v575_v0 = vpop.f32.mrf.mxu1 }
  0xf3   :  { %1560 = vpow2.f32 %v1440_v23  ;;  %v1456_v30 = vmul.f32 -1.442695, %v906_v24  ;;  %v909_v31 = vadd.f32 %v845_v21, %v462_v26  ;;  %v1261_v23 = vld [vmem:[%s2355_s3] sm:$0xff]  ;;  %v844_v26 = vld [vmem:[%s2354_s2 + $0x78] sm:$0xff] }
  0xf4   :  { %v1543_v32 = vpop.eup %1542  ;;  %v464_v33 = vpop.f32.mrf.mxu0  ;;  %1562 = vpow2.f32 %v1471_v29  ;;  %v908_v39 = vadd.f32 %v844_v26, %v2019_v51 }
  0xf5   :  { %v1005_v35 = vadd.f32 1.0, %v1543_v32  ;;  %1564 = vpow2.f32 %v1456_v30  ;;  %v1441_v36 = vmul.f32 -1.442695, %v909_v31  ;;  %v910_v37 = vadd.f32 %v846_v27, %v464_v33  ;;  %v2030_v14 = vpop.f32.mrf.mxu1  ;;  %v858_v33 = vld [vmem:[%s2354_s2 + $0xe8] sm:$0xff] }
  0xf6   :  { %v1545_v40 = vpop.eup %1544  ;;  %1566 = vtanh.f32 %v900_v28  ;;  %v466_v41 = vpop.f32.mrf.mxu0  ;;  %v847_v28 = vld [vmem:[%s2354_s2 + $0x90] sm:$0xff] }
  0xf7   :  { %1568 = vrcp.f32 %v1005_v35  ;;  %v1101_v42 = vadd.f32 1.0, %v1545_v40  ;;  %v1457_v43 = vmul.f32 -1.442695, %v910_v37  ;;  %v913_v44 = vadd.f32 %v849_v34, %v466_v41  ;;  %v579_v30 = vpop.f32.mrf.mxu1 }
  0xf8   :  { %v1547_v46 = vpop.eup %1546  ;;  %1570 = vpow2.f32 %v1441_v36  ;;  %v468_v47 = vpop.f32.mrf.mxu0  ;;  %v911_v40 = vadd.f32 %v847_v28, %v575_v0 }
  0xf9   :  { %v1549_v49 = vpop.eup %1548  ;;  %1572 = vrcp.f32 %v1101_v42  ;;  %v1006_v50 = vadd.f32 1.0, %v1547_v46  ;;  %v1442_v53 = vmul.f32 -1.442695, %v913_v44  ;;  %v914_v54 = vadd.f32 %v850_v45, %v468_v47  ;;  %v2051_v46 = vpop.f32.mrf.mxu1 }
  0xfa   :  { %v1551_v52 = vpop.eup %1550  ;;  %1574 = vpow2.f32 %v1457_v43  ;;  %v472_v55 = vpop.f32.mrf.mxu0  ;;  %v1197_v59 = vadd.f32 1.0, %v1549_v49  ;;  %v861_v49 = vld [vmem:[%s2354_s2 + $0x100] sm:$0xff] }
  0xfb   :  { %1576 = vrcp.f32 %v1006_v50  ;;  %v1102_v56 = vadd.f32 1.0, %v1551_v52  ;;  %v1458_v2 = vmul.f32 -1.442695, %v914_v54  ;;  %v917_v3 = vadd.f32 %v853_v57, %v472_v55  ;;  %v1263_v54 = vld [vmem:[%s2355_s3 + $0x10] sm:$0xff] }
  0xfc   :  { %v1553_v58 = vpop.eup %1552  ;;  %1578 = vtanh.f32 %v904_v48  ;;  %v474_v63 = vpop.f32.mrf.mxu0  ;;  %v1473_v55 = vmul.f32 -1.442695, %v911_v40 }
  0xfd   :  { %v1555_v61 = vpop.eup %1554  ;;  %1580 = vrcp.f32 %v1102_v56  ;;  %v1007_v62 = vadd.f32 1.0, %v1553_v58  ;;  %v918_v12 = vadd.f32 %v854_v4, %v474_v63  ;;  %v1443_v17 = vmul.f32 -1.442695, %v917_v3  ;;  %v585_v63 = vpop.f32.mrf.mxu1 }
  0xfe   :  { %v1557_v1 = vpop.eup %1556  ;;  %1582 = vpow2.f32 %v1442_v53  ;;  %v1198_v7 = vadd.f32 1.0, %v1555_v61  ;;  %v476_v13 = vpop.f32.mrf.mxu0  ;;  %v851_v61 = vld [vmem:[%s2354_s2 + $0xb0] sm:$0xff] }
  0xff   :  { %v1559_v5 = vpop.eup %1558  ;;  %1584 = vrcp.f32 %v1007_v62  ;;  %v1103_v6 = vadd.f32 1.0, %v1557_v1  ;;  %v1459_v25 = vmul.f32 -1.442695, %v918_v12  ;;  %v921_v27 = vadd.f32 %v857_v18, %v476_v13  ;;  %v865_v13 = vld [vmem:[%s2354_s2 + $0x120] sm:$0xff] }
 0x100   :  { %v1561_v9 = vpop.eup %1560  ;;  %1586 = vrcp.f32 %v1197_v59  ;;  %v478_v29 = vpop.f32.mrf.mxu0  ;;  %v848_v59 = vld [vmem:[%s2354_s2 + $0x98] sm:$0xff]  ;;  %v915_v8 = vadd.f32 %v851_v61, %v579_v30 }
 0x101   :  { %v1563_v10 = vpop.eup %1562  ;;  %1588 = vrcp.f32 %v1103_v6  ;;  %v1008_v11 = vadd.f32 1.0, %v1561_v9  ;;  %v1444_v43 = vmul.f32 -1.442695, %v921_v27  ;;  %v922_v44 = vadd.f32 %v858_v33, %v478_v29  ;;  %v1264_v27 = vld [vmem:[%s2355_s3 + $0x18] sm:$0xff] }
 0x102   :  { %v1565_v15 = vpop.eup %1564  ;;  %v1199_v16 = vadd.f32 1.0, %v1563_v10  ;;  %1590 = vpow2.f32 %v1458_v2  ;;  %v482_v45 = vpop.f32.mrf.mxu0 }
 0x103   :  { %v1567_v19 = vpop.eup %1566  ;;  %1592 = vrcp.f32 %v1198_v7  ;;  %v1104_v22 = vadd.f32 1.0, %v1565_v15  ;;  %v1460_v58 = vmul.f32 -1.442695, %v922_v44  ;;  %v925_v60 = vadd.f32 %v861_v49, %v482_v45  ;;  %v2082_v15 = vpop.f32.mrf.mxu1 }
 0x104   :  { %v1569_v21 = vpop.eup %1568  ;;  %1594 = vrcp.f32 %v1008_v11  ;;  %v484_v62 = vpop.f32.mrf.mxu0  ;;  %v912_v7 = vadd.f32 %v848_v59, %v2030_v14 }
 0x105   :  { %v1571_v24 = vpop.eup %1570  ;;  %1596 = vrcp.f32 %v1199_v16  ;;  %v1293_v36 = vmul.f32 %v1569_v21, %v1559_v5  ;;  %v862_v5 = vld [vmem:[%s2354_s2 + $0x108] sm:$0xff]  ;;  %v1445_v11 = vmul.f32 -1.442695, %v925_v60  ;;  %v1474_v21 = vmul.f32 -1.442695, %v915_v8  ;;  %v589_v29 = vpop.f32.mrf.mxu1 }
 0x106   :  { %v1573_v31 = vpop.eup %1572  ;;  %v1009_v32 = vadd.f32 1.0, %v1571_v24  ;;  %1598 = vpow2.f32 %v1443_v17  ;;  %v486_v12 = vpop.f32.mrf.mxu0  ;;  %v926_v18 = vadd.f32 %v862_v5, %v484_v62  ;;  %v855_v24 = vld [vmem:[%s2354_s2 + $0xd0] sm:$0xff] }
 0x107   :  { %v1575_v34 = vpop.eup %1574  ;;  %v1277_v35 = vmul.f32 %v1573_v31, %v1261_v23  ;;  %1600 = vpow2.f32 %v1472_v20  ;;  %v929_v23 = vadd.f32 %v865_v13, %v486_v12  ;;  %v2106_v44 = vpop.f32.mrf.mxu1 }
 0x108   :  { %v1577_v37 = vpop.eup %1576  ;;  %1602 = vrcp.f32 %v1104_v22  ;;  %v1105_v48 = vadd.f32 1.0, %v1575_v34  ;;  %v852_v22 = vld [vmem:[%s2354_s2 + $0xb8] sm:$0xff]  ;;  %v488_v28 = vpop.f32.mrf.mxu0  ;;  %v1461_v31 = vmul.f32 -1.442695, %v926_v18  ;;  %v919_v34 = vadd.f32 %v855_v24, %v585_v63  ;;  %v863_v24 = vld [vmem:[%s2354_s2 + $0x110] sm:$0xff] }
 0x109   :  { %v1579_v41 = vpop.eup %1578  ;;  %v1309_v42 = vadd.f32 %v1293_v36, %v1277_v35  ;;  %1604 = vpow2.f32 %v1459_v25  ;;  %v1294_v52 = vmul.f32 %v1577_v37, %v1567_v19  ;;  %v916_v33 = vadd.f32 %v852_v22, %v2051_v46  ;;  %v866_v35 = vld [vmem:[%s2354_s2 + $0x128] sm:$0xff]  ;;  %v595_v60 = vpop.f32.mrf.mxu1  ;;  %v860_v22 = vld [vmem:[%s2354_s2 + $0xf8] sm:$0xff] }
 0x10a   :  { %v1581_v47 = vpop.eup %1580  ;;  %1606 = vrcp.f32 %v1009_v32  ;;  %v1475_v49 = vmul.f32 -1.442695, %v919_v34  ;;  %v874_v34 = vld [vmem:[%s2354_s2 + $0x168] sm:$0xff] }
 0x10b   :  { %v1583_v50 = vpop.eup %1582  ;;  %1608 = vtanh.f32 %v1309_v42  ;;  %1373 = vst [vmem:[%s2356_s5] sm:$0xff] %v1309_v42  ;;  %v1278_v51 = vmul.f32 %v1581_v47, %v1262_v38  ;;  %v1446_v38 = vmul.f32 -1.442695, %v929_v23  ;;  %v492_v42 = vpop.f32.mrf.mxu0  ;;  %v930_v47 = vadd.f32 %v866_v35, %v488_v28 }
 0x10c   :  { %v1585_v53 = vpop.eup %1584  ;;  %1610 = vtanh.f32 %v908_v39  ;;  %v1010_v1 = vadd.f32 1.0, %v1583_v50 }
 0x10d   :  { %v2062_v56 = vpop.eup %1586  ;;  %v1310_v57 = vadd.f32 %v1294_v52, %v1278_v51  ;;  %1612 = vpow2.f32 %v1444_v43  ;;  %v1295_v4 = vmul.f32 %v1585_v53, %v1579_v41  ;;  %v869_v43 = vld [vmem:[%s2354_s2 + $0x140] sm:$0xff]  ;;  %v856_v53 = vld [vmem:[%s2354_s2 + $0xd8] sm:$0xff]  ;;  %v494_v59 = vpop.f32.mrf.mxu0  ;;  %v1462_v63 = vmul.f32 -1.442695, %v930_v47 }
 0x10e   :  { %v1589_v0 = vpop.eup %1588  ;;  %1614 = vrcp.f32 %v1105_v48 }
 0x10f   :  { %v1591_v2 = vpop.eup %1590  ;;  %1616 = vtanh.f32 %v1310_v57  ;;  %1374 = vst [vmem:[%s2356_s5 + $0x8] sm:$0xff] %v1310_v57  ;;  %v1279_v3 = vmul.f32 %v1589_v0, %v1263_v54  ;;  %v933_v54 = vadd.f32 %v869_v43, %v492_v42 }
 0x110   :  { %v2076_v6 = vpop.eup %1592  ;;  %1618 = vpow2.f32 %v1473_v55  ;;  %v1106_v17 = vadd.f32 1.0, %v1591_v2  ;;  %v859_v55 = vld [vmem:[%s2354_s2 + $0xf0] sm:$0xff] }
 0x111   :  { %v1595_v9 = vpop.eup %1594  ;;  %v1311_v10 = vadd.f32 %v1295_v4, %v1279_v3  ;;  %1620 = vpow2.f32 %v1460_v58  ;;  %v1265_v58 = vld [vmem:[%s2355_s3 + $0x20] sm:$0xff]  ;;  %v923_v2 = vadd.f32 %v859_v55, %v589_v29  ;;  %v870_v3 = vld [vmem:[%s2354_s2 + $0x148] sm:$0xff] }
 0x112   :  { %v2084_v16 = vpop.eup %1596  ;;  %1622 = vrcp.f32 %v1010_v1  ;;  %v920_v1 = vadd.f32 %v856_v53, %v2082_v15  ;;  %v934_v15 = vadd.f32 %v870_v3, %v494_v59  ;;  %v864_v53 = vld [vmem:[%s2354_s2 + $0x118] sm:$0xff] }
 0x113   :  { %v1599_v19 = vpop.eup %1598  ;;  %1624 = vtanh.f32 %v1311_v10  ;;  %1375 = vst [vmem:[%s2356_s5 + $0x10] sm:$0xff] %v1311_v10  ;;  %v496_v10 = vpop.f32.mrf.mxu0  ;;  %v1476_v18 = vmul.f32 -1.442695, %v923_v2 }
 0x114   :  { %v1601_v14 = vpop.eup %1600  ;;  %v1011_v20 = vadd.f32 1.0, %v1599_v19  ;;  %1626 = vtanh.f32 %v912_v7  ;;  %v1463_v29 = vmul.f32 -1.442695, %v934_v15 }
 0x115   :  { %v1603_v25 = vpop.eup %1602  ;;  %v1200_v26 = vadd.f32 1.0, %v1601_v14  ;;  %1628 = vpow2.f32 %v1445_v11  ;;  %v2132_v11 = vpop.f32.mrf.mxu1 }
 0x116   :  { %v1605_v30 = vpop.eup %1604  ;;  %1630 = vrcp.f32 %v1106_v17  ;;  %v1280_v37 = vmul.f32 %v1603_v25, %v1264_v27  ;;  %v498_v25 = vpop.f32.mrf.mxu0 }
 0x117   :  { %v1607_v32 = vpop.eup %1606  ;;  %1632 = vrcp.f32 %v1011_v20  ;;  %v1107_v41 = vadd.f32 1.0, %v1605_v30 }
 0x118   :  { %v1609_v36 = vpop.eup %1608  ;;  %1634 = vpow2.f32 %v1474_v21  ;;  %v1266_v21 = vld [vmem:[%s2355_s3 + $0x28] sm:$0xff] }
 0x119   :  { %v1611_v39 = vpop.eup %1610  ;;  %v1341_v40 = vmul.f32 %v1609_v36, %v2062_v56  ;;  %1636 = vrcp.f32 %v1200_v26  ;;  %v599_v26 = vpop.f32.mrf.mxu1 }
 0x11a   :  { %v1613_v45 = vpop.eup %1612  ;;  %v1296_v46 = vmul.f32 %v1611_v39, %v1595_v9  ;;  %1638 = vpow2.f32 %v1461_v31 }
 0x11b   :  { %v1615_v48 = vpop.eup %1614  ;;  %1357 = vst [vmem:[%s2357_s4] sm:$0xff] %v1341_v40  ;;  %1640 = vtanh.f32 %v916_v33  ;;  %v1012_v52 = vadd.f32 1.0, %v1613_v45  ;;  %v924_v33 = vadd.f32 %v860_v22, %v2106_v44  ;;  %v502_v40 = vpop.f32.mrf.mxu0  ;;  %v938_v45 = vadd.f32 %v874_v34, %v498_v25  ;;  %v871_v22 = vld [vmem:[%s2354_s2 + $0x150] sm:$0xff] }
 0x11c   :  { %v1617_v50 = vpop.eup %1616  ;;  %v1312_v51 = vadd.f32 %v1296_v46, %v1280_v37  ;;  %1642 = vpow2.f32 %v1446_v38  ;;  %v1281_v5 = vmul.f32 %v1615_v48, %v1265_v58  ;;  %v927_v37 = vadd.f32 %v863_v24, %v595_v60  ;;  %v877_v48 = vld [vmem:[%s2354_s2 + $0x180] sm:$0xff] }
 0x11d   :  { %v1619_v56 = vpop.eup %1618  ;;  %v1342_v57 = vmul.f32 %v1617_v50, %v2076_v6  ;;  %1644 = vrcp.f32 %v1107_v41  ;;  %v1447_v6 = vmul.f32 -1.442695, %v933_v54  ;;  %v2158_v41 = vpop.f32.mrf.mxu1  ;;  %v1464_v60 = vmul.f32 -1.442695, %v938_v45 }
 0x11e   :  { %v1621_v61 = vpop.eup %1620  ;;  %1646 = vtanh.f32 %v1312_v51  ;;  %1376 = vst [vmem:[%s2356_s5 + $0x18] sm:$0xff] %v1312_v51  ;;  %v1201_v62 = vadd.f32 1.0, %v1619_v56  ;;  %v1267_v51 = vld [vmem:[%s2355_s3 + $0x30] sm:$0xff] }
 0x11f   :  { %v1623_v0 = vpop.eup %1622  ;;  %1358 = vst [vmem:[%s2357_s4 + $0x8] sm:$0xff] %v1342_v57  ;;  %1648 = vpow2.f32 %v1475_v49  ;;  %v1108_v9 = vadd.f32 1.0, %v1621_v61  ;;  %v867_v56 = vld [vmem:[%s2354_s2 + $0x130] sm:$0xff]  ;;  %v504_v57 = vpop.f32.mrf.mxu0  ;;  %v941_v61 = vadd.f32 %v877_v48, %v502_v40 }
 0x120   :  { %v1625_v4 = vpop.eup %1624  ;;  %1650 = vrcp.f32 %v1012_v52  ;;  %v1477_v52 = vmul.f32 -1.442695, %v927_v37  ;;  %v605_v58 = vpop.f32.mrf.mxu1 }
 0x121   :  { %v1627_v7 = vpop.eup %1626  ;;  %v1343_v8 = vmul.f32 %v1625_v4, %v2084_v16  ;;  %1652 = vrcp.f32 %v1201_v62  ;;  %v873_v16 = vld [vmem:[%s2354_s2 + $0x160] sm:$0xff]  ;;  %v931_v4 = vadd.f32 %v867_v56, %v599_v26 }
 0x122   :  { %v1629_v12 = vpop.eup %1628  ;;  %v1297_v13 = vmul.f32 %v1627_v7, %v1607_v32  ;;  %1654 = vpow2.f32 %v1462_v63  ;;  %v937_v30 = vadd.f32 %v873_v16, %v496_v10  ;;  %v506_v7 = vpop.f32.mrf.mxu0 }
 0x123   :  { %v1631_v17 = vpop.eup %1630  ;;  %1359 = vst [vmem:[%s2357_s4 + $0x10] sm:$0xff] %v1343_v8  ;;  %1656 = vtanh.f32 %v920_v1  ;;  %v1013_v20 = vadd.f32 1.0, %v1629_v12  ;;  %v878_v1 = vld [vmem:[%s2354_s2 + $0x188] sm:$0xff]  ;;  %v881_v8 = vld [vmem:[%s2354_s2 + $0x1a0] sm:$0xff] }
 0x124   :  { %v2140_v19 = vpop.eup %1632  ;;  %v1313_v14 = vadd.f32 %v1297_v13, %v1281_v5  ;;  %1658 = vpow2.f32 %v1447_v6  ;;  %v1282_v32 = vmul.f32 %v1631_v17, %v1266_v21  ;;  %v1448_v43 = vmul.f32 -1.442695, %v937_v30  ;;  %v508_v25 = vpop.f32.mrf.mxu0 }
 0x125   :  { %v1635_v23 = vpop.eup %1634  ;;  %1660 = vrcp.f32 %v1108_v9  ;;  %v2188_v9 = vpop.f32.mrf.mxu1  ;;  %v942_v12 = vadd.f32 %v878_v1, %v504_v57  ;;  %v945_v21 = vadd.f32 %v881_v8, %v506_v7 }
 0x126   :  { %v1637_v27 = vpop.eup %1636  ;;  %1662 = vtanh.f32 %v1313_v14  ;;  %1377 = vst [vmem:[%s2356_s5 + $0x20] sm:$0xff] %v1313_v14  ;;  %v1202_v28 = vadd.f32 1.0, %v1635_v23  ;;  %v1478_v14 = vmul.f32 -1.442695, %v931_v4 }
 0x127   :  { %v1639_v31 = vpop.eup %1638  ;;  %1664 = vpow2.f32 %v1476_v18  ;;  %v609_v26 = vpop.f32.mrf.mxu1 }
 0x128   :  { %v1641_v35 = vpop.eup %1640  ;;  %1666 = vrcp.f32 %v1013_v20  ;;  %v1109_v36 = vadd.f32 1.0, %v1639_v31  ;;  %v868_v20 = vld [vmem:[%s2354_s2 + $0x138] sm:$0xff] }
 0x129   :  { %v1643_v38 = vpop.eup %1642  ;;  %1668 = vrcp.f32 %v1202_v28  ;;  %v1298_v39 = vmul.f32 %v1641_v35, %v1623_v0  ;;  %v928_v0 = vadd.f32 %v864_v53, %v2132_v11  ;;  %v1449_v11 = vmul.f32 -1.442695, %v941_v61  ;;  %v2213_v40 = vpop.f32.mrf.mxu1 }
 0x12a   :  { %v1645_v42 = vpop.eup %1644  ;;  %1670 = vpow2.f32 %v1463_v29  ;;  %v1014_v47 = vadd.f32 1.0, %v1643_v38  ;;  %v1465_v28 = vmul.f32 -1.442695, %v942_v12  ;;  %v932_v31 = vadd.f32 %v868_v20, %v2158_v41  ;;  %v512_v38 = vpop.f32.mrf.mxu0 }
 0x12b   :  { %v1647_v46 = vpop.eup %1646  ;;  %v1314_v44 = vadd.f32 %v1298_v39, %v1282_v32  ;;  %1672 = vtanh.f32 %v924_v33  ;;  %v1283_v63 = vmul.f32 %v1645_v42, %v1267_v51  ;;  %v935_v32 = vadd.f32 %v871_v22, %v605_v58  ;;  %v882_v33 = vld [vmem:[%s2354_s2 + $0x1a8] sm:$0xff]  ;;  %v885_v39 = vld [vmem:[%s2354_s2 + $0x1c0] sm:$0xff]  ;;  %v872_v51 = vld [vmem:[%s2354_s2 + $0x158] sm:$0xff] }
 0x12c   :  { %v1649_v49 = vpop.eup %1648  ;;  %v1344_v50 = vmul.f32 %v1647_v46, %v1637_v27  ;;  %1674 = vrcp.f32 %v1109_v36  ;;  %v1450_v35 = vmul.f32 -1.442695, %v945_v21  ;;  %v879_v21 = vld [vmem:[%s2354_s2 + $0x190] sm:$0xff] }
 0x12d   :  { %v2169_v54 = vpop.eup %1650  ;;  %1676 = vtanh.f32 %v1314_v44  ;;  %1378 = vst [vmem:[%s2356_s5 + $0x28] sm:$0xff] %v1314_v44  ;;  %v1203_v55 = vadd.f32 1.0, %v1649_v49 }
 0x12e   :  { %v1653_v59 = vpop.eup %1652  ;;  %1360 = vst [vmem:[%s2357_s4 + $0x18] sm:$0xff] %v1344_v50  ;;  %1678 = vpow2.f32 %v1448_v43  ;;  %v946_v43 = vadd.f32 %v882_v33, %v508_v25  ;;  %v1269_v50 = vld [vmem:[%s2355_s3 + $0x40] sm:$0xff] }
 0x12f   :  { %v1655_v62 = vpop.eup %1654  ;;  %1680 = vrcp.f32 %v1014_v47  ;;  %v1479_v47 = vmul.f32 -1.442695, %v935_v32 }
 0x130   :  { %v1657_v2 = vpop.eup %1656  ;;  %v1110_v3 = vadd.f32 1.0, %v1655_v62  ;;  %1682 = vpow2.f32 %v1477_v52  ;;  %v949_v52 = vadd.f32 %v885_v39, %v512_v38  ;;  %v1466_v58 = vmul.f32 -1.442695, %v946_v43 }
 0x131   :  { %v1659_v5 = vpop.eup %1658  ;;  %1684 = vrcp.f32 %v1203_v55  ;;  %v1299_v6 = vmul.f32 %v1657_v2, %v2140_v19  ;;  %v1268_v19 = vld [vmem:[%s2355_s3 + $0x38] sm:$0xff]  ;;  %v615_v55 = vpop.f32.mrf.mxu1 }
 0x132   :  { %v1661_v10 = vpop.eup %1660  ;;  %1686 = vpow2.f32 %v1464_v60  ;;  %v1015_v17 = vadd.f32 1.0, %v1659_v5  ;;  %v886_v60 = vld [vmem:[%s2354_s2 + $0x1c8] sm:$0xff]  ;;  %v1451_v1 = vmul.f32 -1.442695, %v949_v52  ;;  %v943_v33 = vadd.f32 %v879_v21, %v615_v55 }
 0x133   :  { %v1663_v13 = vpop.eup %1662  ;;  %v1315_v15 = vadd.f32 %v1299_v6, %v1283_v63  ;;  %1688 = vtanh.f32 %v928_v0  ;;  %v1284_v30 = vmul.f32 %v1661_v10, %v1268_v19  ;;  %v936_v63 = vadd.f32 %v872_v51, %v2188_v9  ;;  %v2236_v6 = vpop.f32.mrf.mxu1  ;;  %v889_v9 = vld [vmem:[%s2354_s2 + $0x1e0] sm:$0xff]  ;;  %v876_v19 = vld [vmem:[%s2354_s2 + $0x178] sm:$0xff] }
 0x134   :  { %v1665_v18 = vpop.eup %1664  ;;  %v1345_v16 = vmul.f32 %v1663_v13, %v1653_v59  ;;  %1690 = vrcp.f32 %v1110_v3  ;;  %v514_v59 = vpop.f32.mrf.mxu0 }
 0x135   :  { %v1667_v23 = vpop.eup %1666  ;;  %1692 = vtanh.f32 %v1315_v15  ;;  %1379 = vst [vmem:[%s2356_s5 + $0x30] sm:$0xff] %v1315_v15  ;;  %v1204_v24 = vadd.f32 1.0, %v1665_v18  ;;  %v950_v5 = vadd.f32 %v886_v60, %v514_v59  ;;  %v1270_v18 = vld [vmem:[%s2355_s3 + $0x48] sm:$0xff]  ;;  %v619_v22 = vpop.f32.mrf.mxu1 }
 0x136   :  { %v1669_v27 = vpop.eup %1668  ;;  %1361 = vst [vmem:[%s2357_s4 + $0x20] sm:$0xff] %v1345_v16  ;;  %1694 = vpow2.f32 %v1449_v11  ;;  %v516_v10 = vpop.f32.mrf.mxu0 }
 0x137   :  { %v1671_v29 = vpop.eup %1670  ;;  %1696 = vrcp.f32 %v1015_v17  ;;  %v1467_v20 = vmul.f32 -1.442695, %v950_v5  ;;  %v953_v25 = vadd.f32 %v889_v9, %v516_v10 }
 0x138   :  { %v1673_v34 = vpop.eup %1672  ;;  %1698 = vpow2.f32 %v1478_v14  ;;  %v1111_v42 = vadd.f32 1.0, %v1671_v29 }
 0x139   :  { %v1675_v36 = vpop.eup %1674  ;;  %1700 = vrcp.f32 %v1204_v24  ;;  %v1300_v37 = vmul.f32 %v1673_v34, %v2169_v54  ;;  %v875_v54 = vld [vmem:[%s2354_s2 + $0x170] sm:$0xff]  ;;  %v1452_v39 = vmul.f32 -1.442695, %v953_v25 }
 0x13a   :  { %v1677_v41 = vpop.eup %1676  ;;  %1702 = vpow2.f32 %v1465_v28  ;;  %v1285_v62 = vmul.f32 %v1675_v36, %v1269_v50  ;;  %v939_v2 = vadd.f32 %v875_v54, %v609_v26  ;;  %v518_v26 = vpop.f32.mrf.mxu0 }
 0x13b   :  { %v1679_v45 = vpop.eup %1678  ;;  %v1346_v46 = vmul.f32 %v1677_v41, %v1669_v27  ;;  %v1316_v44 = vadd.f32 %v1300_v37, %v1284_v30  ;;  %1704 = vtanh.f32 %v932_v31  ;;  %v890_v27 = vld [vmem:[%s2354_s2 + $0x1e8] sm:$0xff]  ;;  %v940_v30 = vadd.f32 %v876_v19, %v2213_v40  ;;  %v621_v37 = vpop.f32.mrf.mxu1  ;;  %v883_v40 = vld [vmem:[%s2354_s2 + $0x1b0] sm:$0xff] }
 0x13c   :  { %v2215_v48 = vpop.eup %1680  ;;  %v1016_v49 = vadd.f32 1.0, %v1679_v45  ;;  %1706 = vpow2.f32 %v1450_v35  ;;  %v1480_v16 = vmul.f32 -1.442695, %v939_v2  ;;  %v954_v36 = vadd.f32 %v890_v27, %v518_v26  ;;  %v892_v27 = vld [vmem:[%s2354_s2 + $0x1f8] sm:$0xff] }
 0x13d   :  { %v1683_v53 = vpop.eup %1682  ;;  %1362 = vst [vmem:[%s2357_s4 + $0x28] sm:$0xff] %v1346_v46  ;;  %1708 = vtanh.f32 %v1316_v44  ;;  %1380 = vst [vmem:[%s2356_s5 + $0x38] sm:$0xff] %v1316_v44  ;;  %v1271_v44 = vld [vmem:[%s2355_s3 + $0x50] sm:$0xff]  ;;  %v625_v51 = vpop.f32.mrf.mxu1  ;;  %v947_v54 = vadd.f32 %v883_v40, %v619_v22 }
 0x13e   :  { %v1685_v56 = vpop.eup %1684  ;;  %1710 = vrcp.f32 %v1111_v42  ;;  %v1205_v57 = vadd.f32 1.0, %v1683_v53  ;;  %v1468_v50 = vmul.f32 -1.442695, %v954_v36 }
 0x13f   :  { %v1687_v61 = vpop.eup %1686  ;;  %1712 = vpow2.f32 %v1479_v47  ;;  %v1481_v47 = vmul.f32 -1.442695, %v943_v33  ;;  %v1482_v2 = vmul.f32 -1.442695, %v947_v54 }
 0x140   :  { %v1689_v0 = vpop.eup %1688  ;;  %1714 = vrcp.f32 %v1016_v49  ;;  %v1112_v8 = vadd.f32 1.0, %v1687_v61 }
 0x141   :  { %v1691_v3 = vpop.eup %1690  ;;  %1716 = vrcp.f32 %v1205_v57  ;;  %v1301_v4 = vmul.f32 %v1689_v0, %v1667_v23  ;;  %v627_v0 = vpop.f32.mrf.mxu1 }
 0x142   :  { %v1693_v7 = vpop.eup %1692  ;;  %1718 = vpow2.f32 %v1466_v58  ;;  %v1286_v29 = vmul.f32 %v1691_v3, %v1270_v18  ;;  %v887_v58 = vld [vmem:[%s2354_s2 + $0x1d0] sm:$0xff] }
 0x143   :  { %v1695_v11 = vpop.eup %1694  ;;  %v1347_v12 = vmul.f32 %v1693_v7, %v1685_v56  ;;  %v1317_v13 = vadd.f32 %v1301_v4, %v1285_v62  ;;  %1720 = vtanh.f32 %v936_v63  ;;  %v884_v63 = vld [vmem:[%s2354_s2 + $0x1b8] sm:$0xff]  ;;  %v951_v3 = vadd.f32 %v887_v58, %v625_v51 }
 0x144   :  { %v2241_v15 = vpop.eup %1696  ;;  %v1017_v17 = vadd.f32 1.0, %v1695_v11  ;;  %1722 = vpow2.f32 %v1451_v1  ;;  %v1272_v11 = vld [vmem:[%s2355_s3 + $0x58] sm:$0xff] }
 0x145   :  { %v1699_v14 = vpop.eup %1698  ;;  %1363 = vst [vmem:[%s2357_s4 + $0x30] sm:$0xff] %v1347_v12  ;;  %1724 = vtanh.f32 %v1317_v13  ;;  %1381 = vst [vmem:[%s2356_s5 + $0x40] sm:$0xff] %v1317_v13  ;;  %v948_v12 = vadd.f32 %v884_v63, %v621_v37  ;;  %v888_v13 = vld [vmem:[%s2354_s2 + $0x1d8] sm:$0xff]  ;;  %v1483_v18 = vmul.f32 -1.442695, %v951_v3 }
 0x146   :  { %v1701_v23 = vpop.eup %1700  ;;  %1726 = vrcp.f32 %v1112_v8  ;;  %v1206_v24 = vadd.f32 1.0, %v1699_v14  ;;  %v891_v8 = vld [vmem:[%s2354_s2 + $0x1f0] sm:$0xff]  ;;  %v952_v21 = vadd.f32 %v888_v13, %v627_v0 }
 0x147   :  { %v1703_v28 = vpop.eup %1702  ;;  %1728 = vrcp.f32 %v1017_v17 }
 0x148   :  { %v1705_v31 = vpop.eup %1704  ;;  %v1113_v32 = vadd.f32 1.0, %v1703_v28  ;;  %1730 = vpow2.f32 %v1480_v16 }
 0x149   :  { %v1707_v34 = vpop.eup %1706  ;;  %v1302_v35 = vmul.f32 %v1705_v31, %v2215_v48  ;;  %1732 = vpow2.f32 %v1467_v20  ;;  %v880_v48 = vld [vmem:[%s2354_s2 + $0x198] sm:$0xff] }
 0x14a   :  { %v1709_v38 = vpop.eup %1708  ;;  %1734 = vrcp.f32 %v1206_v24  ;;  %v1018_v45 = vadd.f32 1.0, %v1707_v34  ;;  %v944_v57 = vadd.f32 %v880_v48, %v2236_v6 }
 0x14b   :  { %v1711_v41 = vpop.eup %1710  ;;  %v1348_v42 = vmul.f32 %v1709_v38, %v1701_v23  ;;  %v1318_v43 = vadd.f32 %v1302_v35, %v1286_v29  ;;  %1736 = vtanh.f32 %v940_v30  ;;  %v1273_v35 = vld [vmem:[%s2355_s3 + $0x60] sm:$0xff] }
 0x14c   :  { %v1713_v46 = vpop.eup %1712  ;;  %1738 = vrcp.f32 %v1113_v32  ;;  %v1287_v56 = vmul.f32 %v1711_v41, %v1271_v44  ;;  %v1274_v44 = vld [vmem:[%s2355_s3 + $0x68] sm:$0xff] }
 0x14d   :  { %v1715_v49 = vpop.eup %1714  ;;  %1364 = vst [vmem:[%s2357_s4 + $0x38] sm:$0xff] %v1348_v42  ;;  %1740 = vtanh.f32 %v1318_v43  ;;  %1382 = vst [vmem:[%s2356_s5 + $0x48] sm:$0xff] %v1318_v43  ;;  %v1207_v53 = vadd.f32 1.0, %v1713_v46 }
 0x14e   :  { %v1717_v52 = vpop.eup %1716  ;;  %1742 = vpow2.f32 %v1452_v39 }
 0x14f   :  { %v1719_v55 = vpop.eup %1718  ;;  %1744 = vrcp.f32 %v1018_v45 }
 0x150   :  { %v1721_v59 = vpop.eup %1720  ;;  %v1114_v60 = vadd.f32 1.0, %v1719_v55  ;;  %1746 = vpow2.f32 %v1481_v47 }
 0x151   :  { %v1723_v61 = vpop.eup %1722  ;;  %v1303_v62 = vmul.f32 %v1721_v59, %v2241_v15  ;;  %1748 = vpow2.f32 %v1468_v50  ;;  %v629_v15 = vpop.f32.mrf.mxu1 }
 0x152   :  { %v1725_v1 = vpop.eup %1724  ;;  %1750 = vrcp.f32 %v1207_v53  ;;  %v1019_v7 = vadd.f32 1.0, %v1723_v61  ;;  %v955_v16 = vadd.f32 %v891_v8, %v629_v15  ;;  %v1275_v53 = vld [vmem:[%s2355_s3 + $0x70] sm:$0xff] }
 0x153   :  { %v1727_v4 = vpop.eup %1726  ;;  %v1349_v5 = vmul.f32 %v1725_v1, %v1717_v52  ;;  %v1319_v6 = vadd.f32 %v1303_v62, %v1287_v56  ;;  %1752 = vtanh.f32 %v944_v57  ;;  %v631_v26 = vpop.f32.mrf.mxu1 }
 0x154   :  { %v1729_v10 = vpop.eup %1728  ;;  %1754 = vrcp.f32 %v1114_v60  ;;  %v1288_v20 = vmul.f32 %v1727_v4, %v1272_v11  ;;  %v1484_v29 = vmul.f32 -1.442695, %v955_v16  ;;  %v956_v36 = vadd.f32 %v892_v27, %v631_v26 }
 0x155   :  { %v1731_v9 = vpop.eup %1730  ;;  %1365 = vst [vmem:[%s2357_s4 + $0x40] sm:$0xff] %v1349_v5  ;;  %1756 = vtanh.f32 %v1319_v6  ;;  %1383 = vst [vmem:[%s2356_s5 + $0x50] sm:$0xff] %v1319_v6  ;;  %v1276_v6 = vld [vmem:[%s2355_s3 + $0x78] sm:$0xff] }
 0x156   :  { %v1733_v17 = vpop.eup %1732  ;;  %1758 = vpow2.f32 %v1482_v2  ;;  %v1208_v23 = vadd.f32 1.0, %v1731_v9 }
 0x157   :  { %v1735_v19 = vpop.eup %1734  ;;  %1760 = vrcp.f32 %v1019_v7  ;;  %v1115_v14 = vadd.f32 1.0, %v1733_v17 }
 0x158   :  { %v1737_v22 = vpop.eup %1736  ;;  %1762 = vtanh.f32 %v948_v12 }
 0x159   :  { %v1739_v24 = vpop.eup %1738  ;;  %1764 = vrcp.f32 %v1115_v14  ;;  %v1304_v25 = vmul.f32 %v1737_v22, %v1715_v49 }
 0x15a   :  { %v1741_v28 = vpop.eup %1740  ;;  %1766 = vpow2.f32 %v1483_v18  ;;  %v1289_v42 = vmul.f32 %v1739_v24, %v1273_v35 }
 0x15b   :  { %v1743_v30 = vpop.eup %1742  ;;  %v1350_v31 = vmul.f32 %v1741_v28, %v1735_v19  ;;  %v1320_v32 = vadd.f32 %v1304_v25, %v1288_v20  ;;  %1768 = vtanh.f32 %v952_v21 }
 0x15c   :  { %v1745_v33 = vpop.eup %1744  ;;  %1770 = vrcp.f32 %v1208_v23  ;;  %v1020_v34 = vadd.f32 1.0, %v1743_v30 }
 0x15d   :  { %v1747_v37 = vpop.eup %1746  ;;  %1366 = vst [vmem:[%s2357_s4 + $0x48] sm:$0xff] %v1350_v31  ;;  %1772 = vtanh.f32 %v1320_v32  ;;  %1384 = vst [vmem:[%s2356_s5 + $0x58] sm:$0xff] %v1320_v32 }
 0x15e   :  { %v1749_v38 = vpop.eup %1748  ;;  %1774 = vpow2.f32 %v1484_v29  ;;  %v1209_v45 = vadd.f32 1.0, %v1747_v37 }
 0x15f   :  { %v1751_v39 = vpop.eup %1750  ;;  %1776 = vrcp.f32 %v1020_v34  ;;  %v1116_v41 = vadd.f32 1.0, %v1749_v38 }
 0x160   :  { %v1753_v43 = vpop.eup %1752  ;;  %1778 = vtanh.f32 %v956_v36 }
 0x161   :  { %v1755_v40 = vpop.eup %1754  ;;  %1780 = vrcp.f32 %v1116_v41  ;;  %v1305_v46 = vmul.f32 %v1753_v43, %v1729_v10 }
 0x162   :  { %v1757_v47 = vpop.eup %1756  ;;  %1782 = vrcp.f32 %v1209_v45  ;;  %v1290_v52 = vmul.f32 %v1755_v40, %v1274_v44 }
 0x163   :  { %v1759_v48 = vpop.eup %1758  ;;  %v1351_v49 = vmul.f32 %v1757_v47, %v1751_v39  ;;  %v1321_v50 = vadd.f32 %v1305_v46, %v1289_v42 }
 0x164   :  { %v1761_v51 = vpop.eup %1760  ;;  %v1210_v55 = vadd.f32 1.0, %v1759_v48 }
 0x165   :  { %v1763_v54 = vpop.eup %1762  ;;  %1367 = vst [vmem:[%s2357_s4 + $0x50] sm:$0xff] %v1351_v49  ;;  %1784 = vtanh.f32 %v1321_v50  ;;  %1385 = vst [vmem:[%s2356_s5 + $0x60] sm:$0xff] %v1321_v50 }
 0x166   :  { %v1765_v56 = vpop.eup %1764  ;;  %v1306_v57 = vmul.f32 %v1763_v54, %v1745_v33  ;;  %1786 = vrcp.f32 %v1210_v55 }
 0x167   :  { %v1767_v58 = vpop.eup %1766  ;;  %v1291_v59 = vmul.f32 %v1765_v56, %v1275_v53 }
 0x168   :  { %v1769_v60 = vpop.eup %1768  ;;  %v1322_v61 = vadd.f32 %v1306_v57, %v1290_v52  ;;  %v1211_v62 = vadd.f32 1.0, %v1767_v58 }
 0x169   :  { %v1771_v63 = vpop.eup %1770  ;;  %v1307_v0 = vmul.f32 %v1769_v60, %v1761_v51 }
 0x16a   :  { %v1773_v1 = vpop.eup %1772  ;;  %1788 = vtanh.f32 %v1322_v61  ;;  %1386 = vst [vmem:[%s2356_s5 + $0x68] sm:$0xff] %v1322_v61 }
 0x16b   :  { %v1775_v2 = vpop.eup %1774  ;;  %v1352_v3 = vmul.f32 %v1773_v1, %v1771_v63  ;;  %v1323_v4 = vadd.f32 %v1307_v0, %v1291_v59  ;;  %1790 = vrcp.f32 %v1211_v62 }
 0x16c   :  { %v1777_v5 = vpop.eup %1776  ;;  %v1212_v10 = vadd.f32 1.0, %v1775_v2 }
 0x16d   :  { %v1779_v7 = vpop.eup %1778  ;;  %1368 = vst [vmem:[%s2357_s4 + $0x58] sm:$0xff] %v1352_v3  ;;  %1792 = vtanh.f32 %v1323_v4  ;;  %1387 = vst [vmem:[%s2356_s5 + $0x70] sm:$0xff] %v1323_v4 }
 0x16e   :  { %v1781_v8 = vpop.eup %1780  ;;  %v1308_v12 = vmul.f32 %v1779_v7, %v1777_v5  ;;  %1794 = vrcp.f32 %v1212_v10 }
 0x16f   :  { %v1292_v11 = vmul.f32 %v1781_v8, %v1276_v6  ;;  %v1783_v13 = vpop.eup %1782 }
 0x171   :  { %v1324_v9 = vadd.f32 %v1308_v12, %v1292_v11 }
 0x172   :  { %v1785_v15 = vpop.eup %1784 }
 0x173   :  { %v1353_v17 = vmul.f32 %v1785_v15, %v1783_v13  ;;  %1796 = vtanh.f32 %v1324_v9  ;;  %1388 = vst [vmem:[%s2356_s5 + $0x78] sm:$0xff] %v1324_v9  ;;  %v1787_v18 = vpop.eup %1786 }
 0x175   :  { %1369 = vst [vmem:[%s2357_s4 + $0x60] sm:$0xff] %v1353_v17 }
 0x177   :  { %v1789_v16 = vpop.eup %1788 }
 0x178   :  { %v1354_v19 = vmul.f32 %v1789_v16, %v1787_v18  ;;  %v1791_v14 = vpop.eup %1790 }
 0x17a   :  { %v1793_v20 = vpop.eup %1792  ;;  %1370 = vst [vmem:[%s2357_s4 + $0x68] sm:$0xff] %v1354_v19 }
 0x17b   :  { %v1355_v21 = vmul.f32 %v1793_v20, %v1791_v14  ;;  %v1795_v22 = vpop.eup %1794 }
 0x17d   :  { %1371 = vst [vmem:[%s2357_s4 + $0x70] sm:$0xff] %v1355_v21 }
 0x180   :  { %v1797_v23 = vpop.eup %1796 }
 0x181   :  { %v1356_v24 = vmul.f32 %v1797_v23, %v1795_v22 }
 0x183   :  { %1372 = vst [vmem:[%s2357_s4 + $0x78] sm:$0xff] %v1356_v24 }

// kernel: _video_coder_forward.113
= control target key start
LH: loop header
LB: loop body
LE: loop exit
PB: predicated region body
PF: predicated region fallthrough
CT: control target
= control target key end

     0   :  { %v1836_v2 = vmov 0   ;;  %s2345_s0 = inlined_call_operand.vmem [shape: bf16[128,128], index: 0, kind: input, shape index: {}]   ;;  %s2346_s1 = inlined_call_operand.vmem [shape: bf16[128,512], index: 1, kind: input, shape index: {}]   ;;  %s2347_s2 = inlined_call_operand.vmem [shape: f32[128,512], index: 2, kind: input, shape index: {}]   ;;  %s2348_s3 = inlined_call_operand.vmem [shape: f32[128,128], index: 3, kind: input, shape index: {}]   ;;  %s2349_s4 = inlined_call_operand.vmem [shape: f32[128,128], index: 4, kind: output, shape index: {0}]   ;;  %s2350_s5 = inlined_call_operand.hbm [shape: f32[128,128], index: 5, kind: output, shape index: {1}]  }
   0x1   :  { %v1502_v0 = vld [vmem:[%s2346_s1 + $0xe4] ss:$16 sps:$4 sm:$0xff]   ;;  %v1504_v1 = vld [vmem:[%s2346_s1 + $0xe0] ss:$16 sps:$4 sm:$0xff]   ;;  %441 = vmatprep.mubr.bf16.mxu0 %v1836_v2  ;;  %554 = vmatprep.mubr.bf16.mxu1 %v1836_v2  ;;  %v1513_v6 = vld [vmem:[%s2346_s1 + $0xec] ss:$16 sps:$4 sm:$0xff]  }
   0x2   :  { %409 = vmatprep.subr.bf16.mxu0 %v1502_v0  ;;  %v1505_v3 = vld [vmem:[%s2346_s1 + $0xc4] ss:$16 sps:$4 sm:$0xff]   ;;  %v1507_v4 = vld [vmem:[%s2346_s1 + $0xc0] ss:$16 sps:$4 sm:$0xff]   ;;  %v1516_v7 = vld [vmem:[%s2346_s1 + $0xe8] ss:$16 sps:$4 sm:$0xff]   ;;  %522 = vmatprep.subr.bf16.mxu1 %v1513_v6 }
   0x3   :  { %410 = vmatpush1.bf16.msra.mxu0 %v1504_v1  ;;  %v1508_v5 = vld [vmem:[%s2346_s1 + $0xa4] ss:$16 sps:$4 sm:$0xff]   ;;  %v1510_v8 = vld [vmem:[%s2346_s1 + $0xa0] ss:$16 sps:$4 sm:$0xff]   ;;  %523 = vmatpush1.bf16.msra.mxu1 %v1516_v7  ;;  %v1519_v10 = vld [vmem:[%s2346_s1 + $0xcc] ss:$16 sps:$4 sm:$0xff]  }
   0x4   :  { %411 = vmatprep.subr.bf16.mxu0 %v1505_v3  ;;  %v1511_v9 = vld [vmem:[%s2346_s1 + $0x84] ss:$16 sps:$4 sm:$0xff]   ;;  %v1522_v11 = vld [vmem:[%s2346_s1 + $0xc8] ss:$16 sps:$4 sm:$0xff]   ;;  %524 = vmatprep.subr.bf16.mxu1 %v1519_v10  ;;  %v1515_v12 = vld [vmem:[%s2346_s1 + $0x80] ss:$16 sps:$4 sm:$0xff]  }
   0x5   :  { %v1517_v13 = vld [vmem:[%s2346_s1 + $0x64] ss:$16 sps:$4 sm:$0xff]   ;;  %v1525_v14 = vld [vmem:[%s2346_s1 + $0xac] ss:$16 sps:$4 sm:$0xff]   ;;  %v1528_v15 = vld [vmem:[%s2346_s1 + $0xa8] ss:$16 sps:$4 sm:$0xff]  }
   0x6   :  { %v1531_v16 = vld [vmem:[%s2346_s1 + $0x8c] ss:$16 sps:$4 sm:$0xff]   ;;  %v1521_v17 = vld [vmem:[%s2346_s1 + $0x60] ss:$16 sps:$4 sm:$0xff]   ;;  %v1523_v18 = vld [vmem:[%s2346_s1 + $0x44] ss:$16 sps:$4 sm:$0xff]  }
   0x7   :  { %412 = vmatpush1.bf16.msra.mxu0 %v1507_v4  ;;  %525 = vmatpush1.bf16.msra.mxu1 %v1522_v11  ;;  %v1534_v19 = vld [vmem:[%s2346_s1 + $0x88] ss:$16 sps:$4 sm:$0xff]   ;;  %v1537_v20 = vld [vmem:[%s2346_s1 + $0x6c] ss:$16 sps:$4 sm:$0xff]   ;;  %v1527_v21 = vld [vmem:[%s2346_s1 + $0x40] ss:$16 sps:$4 sm:$0xff]  }
   0x8   :  { %413 = vmatprep.subr.bf16.mxu0 %v1508_v5  ;;  %526 = vmatprep.subr.bf16.mxu1 %v1525_v14  ;;  %v1529_v22 = vld [vmem:[%s2346_s1 + $0x24] ss:$16 sps:$4 sm:$0xff]   ;;  %v1540_v23 = vld [vmem:[%s2346_s1 + $0x68] ss:$16 sps:$4 sm:$0xff]   ;;  %v1542_v24 = vld [vmem:[%s2346_s1 + $0x4c] ss:$16 sps:$4 sm:$0xff]  }
   0x9   :  { %v1533_v25 = vld [vmem:[%s2346_s1 + $0x20] ss:$16 sps:$4 sm:$0xff]   ;;  %v1535_v26 = vld [vmem:[%s2346_s1 + $0x4] ss:$16 sps:$4 sm:$0xff]   ;;  %v1544_v27 = vld [vmem:[%s2346_s1 + $0x48] ss:$16 sps:$4 sm:$0xff]  }
   0xa   :  { %v1545_v28 = vld [vmem:[%s2346_s1 + $0x2c] ss:$16 sps:$4 sm:$0xff]   ;;  %v1539_v29 = vld [vmem:[%s2346_s1] ss:$16 sps:$4 sm:$0xff]   ;;  %v1547_v30 = vld [vmem:[%s2346_s1 + $0x28] ss:$16 sps:$4 sm:$0xff]  }
   0xb   :  { %414 = vmatpush1.bf16.msra.mxu0 %v1510_v8  ;;  %527 = vmatpush1.bf16.msra.mxu1 %v1528_v15  ;;  %v1549_v31 = vld [vmem:[%s2346_s1 + $0xc] ss:$16 sps:$4 sm:$0xff]  }
   0xc   :  { %415 = vmatprep.subr.bf16.mxu0 %v1511_v9  ;;  %528 = vmatprep.subr.bf16.mxu1 %v1531_v16 }
   0xf   :  { %416 = vmatpush1.bf16.msra.mxu0 %v1515_v12  ;;  %529 = vmatpush1.bf16.msra.mxu1 %v1534_v19 }
  0x10   :  { %417 = vmatprep.subr.bf16.mxu0 %v1517_v13  ;;  %530 = vmatprep.subr.bf16.mxu1 %v1537_v20 }
  0x13   :  { %418 = vmatpush1.bf16.msra.mxu0 %v1521_v17  ;;  %531 = vmatpush1.bf16.msra.mxu1 %v1540_v23 }
  0x14   :  { %419 = vmatprep.subr.bf16.mxu0 %v1523_v18  ;;  %532 = vmatprep.subr.bf16.mxu1 %v1542_v24 }
  0x17   :  { %420 = vmatpush1.bf16.msra.mxu0 %v1527_v21  ;;  %533 = vmatpush1.bf16.msra.mxu1 %v1544_v27 }
  0x18   :  { %421 = vmatprep.subr.bf16.mxu0 %v1529_v22  ;;  %534 = vmatprep.subr.bf16.mxu1 %v1545_v28 }
  0x1b   :  { %422 = vmatpush1.bf16.msra.mxu0 %v1533_v25 }
  0x1c   :  { %423 = vmatprep.subr.bf16.mxu0 %v1535_v26 }
  0x1d   :  { %11 = vsyncpa [#allocation4], 0  ;;  %v1541_v32 = vld [vmem:[%s2345_s0] sm:$0xff]   ;;  %535 = vmatpush1.bf16.msra.mxu1 %v1547_v30  ;;  %v1551_v33 = vld [vmem:[%s2346_s1 + $0x8] ss:$16 sps:$4 sm:$0xff]   ;;  %s1837_s16 = smov [#allocation3]  }
  0x1e   :  { %536 = vmatprep.subr.bf16.mxu1 %v1549_v31  ;;  %v1548_v34 = vld [vmem:[%s2345_s0 + $0x8] sm:$0xff]   ;;  %v1552_v35 = vld [vmem:[%s2345_s0 + $0x10] sm:$0xff]   ;;  %v1553_v36 = vld [vmem:[%s2345_s0 + $0x18] sm:$0xff]   ;;  %s1397_s17 = sshll.u32 %s1837_s16, 4  ;;  %s1398_s17 = int_to_ptr.vmem [resolvable:$true] %s1397_s17 }
  0x1f   :  { %424 = vmatpush1.bf16.msra.mxu0 %v1539_v29  ;;  %v1554_v37 = vld [vmem:[%s2345_s0 + $0x20] sm:$0xff]   ;;  %v1555_v38 = vld [vmem:[%s2345_s0 + $0x28] sm:$0xff]   ;;  %v1556_v39 = vld [vmem:[%s2345_s0 + $0x30] sm:$0xff]   ;;  %p1819_p1 = scmp.lt.s32.totalorder %s1398_s17, %s1398_s17 }
  0x20   :  { %v1557_v40 = vld [vmem:[%s2345_s0 + $0x38] sm:$0xff]   ;;  %v830_v41 = vld [vmem:[%s2347_s2] sm:$0xff]  ;;  %v831_v43 = vld [vmem:[%s2347_s2 + $0x8] sm:$0xff] }
  0x21   :  { %537 = vmatpush1.bf16.msra.mxu1 %v1551_v33  ;;  %v834_v46 = vld [vmem:[%s2347_s2 + $0x20] sm:$0xff]  ;;  %v832_v49 = vld [vmem:[%s2347_s2 + $0x10] sm:$0xff]  ;;  %v835_v51 = vld [vmem:[%s2347_s2 + $0x28] sm:$0xff] }
  0x22   :  { %442 = vmatmul.mubr.bf16.vlgmr.msra.gmra.mxu0 %v1541_v32  ;;  %v838_v56 = vld [vmem:[%s2347_s2 + $0x40] sm:$0xff]  ;;  %v836_v61 = vld [vmem:[%s2347_s2 + $0x30] sm:$0xff]  ;;  %v839_v63 = vld [vmem:[%s2347_s2 + $0x48] sm:$0xff] }
  0x23   :  { %451 = vmatprep.mubr.bf16.mxu0 %v1836_v2  ;;  %v833_v3 = vld [vmem:[%s2347_s2 + $0x18] sm:$0xff]  ;;  %v842_v6 = vld [vmem:[%s2347_s2 + $0x60] sm:$0xff]  ;;  %v840_v11 = vld [vmem:[%s2347_s2 + $0x50] sm:$0xff] }
  0x24   :  { %555 = vmatmul.mubr.bf16.vlgmr.msra.gmra.mxu1 %v1541_v32  ;;  %v843_v13 = vld [vmem:[%s2347_s2 + $0x68] sm:$0xff]  ;;  %v837_v18 = vld [vmem:[%s2347_s2 + $0x38] sm:$0xff]  ;;  %v846_v21 = vld [vmem:[%s2347_s2 + $0x80] sm:$0xff] }
  0x25   :  { %564 = vmatprep.mubr.bf16.mxu1 %v1836_v2  ;;  %v847_v27 = vld [vmem:[%s2347_s2 + $0x88] sm:$0xff] }
  0x2a   :  { %452 = vmatmul.mubr.bf16.gmra.mxu0 %v1548_v34 }
  0x2b   :  { %461 = vmatprep.mubr.bf16.mxu0 %v1836_v2 }
  0x2c   :  { %565 = vmatmul.mubr.bf16.gmra.mxu1 %v1548_v34  ;;  %v850_v34 = vld [vmem:[%s2347_s2 + $0xa0] sm:$0xff] }
  0x2d   :  { %574 = vmatprep.mubr.bf16.mxu1 %v1836_v2 }
  0x32   :  { %462 = vmatmul.mubr.bf16.gmra.mxu0 %v1552_v35 }
  0x33   :  { %471 = vmatprep.mubr.bf16.mxu0 %v1836_v2 }
  0x34   :  { %575 = vmatmul.mubr.bf16.gmra.mxu1 %v1552_v35 }
  0x35   :  { %584 = vmatprep.mubr.bf16.mxu1 %v1836_v2 }
  0x3a   :  { %472 = vmatmul.mubr.bf16.gmra.mxu0 %v1553_v36 }
  0x3b   :  { %481 = vmatprep.mubr.bf16.mxu0 %v1836_v2 }
  0x3c   :  { %585 = vmatmul.mubr.bf16.gmra.mxu1 %v1553_v36 }
  0x3d   :  { %594 = vmatprep.mubr.bf16.mxu1 %v1836_v2 }
  0x42   :  { %482 = vmatmul.mubr.bf16.gmra.mxu0 %v1554_v37 }
  0x43   :  { %491 = vmatprep.mubr.bf16.mxu0 %v1836_v2 }
  0x44   :  { %595 = vmatmul.mubr.bf16.gmra.mxu1 %v1554_v37 }
  0x45   :  { %604 = vmatprep.mubr.bf16.mxu1 %v1836_v2 }
  0x4a   :  { %492 = vmatmul.mubr.bf16.gmra.mxu0 %v1555_v38 }
  0x4b   :  { %501 = vmatprep.mubr.bf16.mxu0 %v1836_v2 }
  0x4c   :  { %605 = vmatmul.mubr.bf16.gmra.mxu1 %v1555_v38  ;;  %v841_v38 = vld [vmem:[%s2347_s2 + $0x58] sm:$0xff] }
  0x4d   :  { %614 = vmatprep.mubr.bf16.mxu1 %v1836_v2 }
  0x52   :  { %502 = vmatmul.mubr.bf16.gmra.mxu0 %v1556_v39 }
  0x53   :  { %511 = vmatprep.mubr.bf16.mxu0 %v1836_v2 }
  0x54   :  { %615 = vmatmul.mubr.bf16.gmra.mxu1 %v1556_v39 }
  0x55   :  { %624 = vmatprep.mubr.bf16.mxu1 %v1836_v2 }
  0x5a   :  { %512 = vmatmul.mubr.bf16.gmra.mxu0 %v1557_v40 }
  0x5c   :  { %625 = vmatmul.mubr.bf16.gmra.mxu1 %v1557_v40 }
  0xe2   :  { %v443_v42 = vpop.f32.mrf.mxu0 }
  0xe3   :  { %v894_v44 = vadd.f32 %v830_v41, %v443_v42 }
  0xe4   :  { %v445_v45 = vpop.f32.mrf.mxu0  ;;  %v556_v54 = vpop.f32.mrf.mxu1 }
  0xe5   :  { %v1450_v47 = vmul.f32 -1.442695, %v894_v44  ;;  %v895_v48 = vadd.f32 %v831_v43, %v445_v45  ;;  %v896_v57 = vadd.f32 %v832_v49, %v556_v54  ;;  %v851_v45 = vld [vmem:[%s2347_s2 + $0xa8] sm:$0xff] }
  0xe6   :  { %v447_v50 = vpop.f32.mrf.mxu0  ;;  %v558_v60 = vpop.f32.mrf.mxu1 }
  0xe7   :  { %1558 = vpow2.f32 %v1450_v47  ;;  %v1466_v52 = vmul.f32 -1.442695, %v895_v48  ;;  %v898_v53 = vadd.f32 %v834_v46, %v447_v50  ;;  %v1482_v0 = vmul.f32 -1.442695, %v896_v57  ;;  %v854_v57 = vld [vmem:[%s2347_s2 + $0xc0] sm:$0xff] }
  0xe8   :  { %v449_v55 = vpop.f32.mrf.mxu0  ;;  %v560_v4 = vpop.f32.mrf.mxu1  ;;  %v897_v14 = vadd.f32 %v833_v3, %v558_v60  ;;  %v844_v60 = vld [vmem:[%s2347_s2 + $0x70] sm:$0xff] }
  0xe9   :  { %1560 = vpow2.f32 %v1466_v52  ;;  %v1451_v58 = vmul.f32 -1.442695, %v898_v53  ;;  %v899_v59 = vadd.f32 %v835_v51, %v449_v55  ;;  %v900_v7 = vadd.f32 %v836_v61, %v560_v4  ;;  %v855_v4 = vld [vmem:[%s2347_s2 + $0xc8] sm:$0xff] }
  0xea   :  { %v453_v62 = vpop.f32.mrf.mxu0  ;;  %v562_v10 = vpop.f32.mrf.mxu1 }
  0xeb   :  { %1562 = vpow2.f32 %v1451_v58  ;;  %v1467_v1 = vmul.f32 -1.442695, %v899_v59  ;;  %v902_v2 = vadd.f32 %v838_v56, %v453_v62  ;;  %v1483_v15 = vmul.f32 -1.442695, %v900_v7 }
  0xec   :  { %v455_v5 = vpop.f32.mrf.mxu0  ;;  %1564 = vpow2.f32 %v1482_v0  ;;  %v566_v19 = vpop.f32.mrf.mxu1  ;;  %v901_v28 = vadd.f32 %v837_v18, %v562_v10  ;;  %v858_v18 = vld [vmem:[%s2347_s2 + $0xe0] sm:$0xff] }
  0xed   :  { %1566 = vpow2.f32 %v1467_v1  ;;  %v1452_v8 = vmul.f32 -1.442695, %v902_v2  ;;  %v903_v9 = vadd.f32 %v839_v63, %v455_v5  ;;  %v904_v22 = vadd.f32 %v840_v11, %v566_v19 }
  0xee   :  { %v457_v12 = vpop.f32.mrf.mxu0  ;;  %v568_v25 = vpop.f32.mrf.mxu1 }
  0xef   :  { %1568 = vpow2.f32 %v1452_v8  ;;  %v1468_v16 = vmul.f32 -1.442695, %v903_v9  ;;  %v906_v17 = vadd.f32 %v842_v6, %v457_v12  ;;  %v1484_v29 = vmul.f32 -1.442695, %v904_v22 }
  0xf0   :  { %v459_v20 = vpop.f32.mrf.mxu0  ;;  %1570 = vpow2.f32 %v1483_v15  ;;  %v570_v39 = vpop.f32.mrf.mxu1  ;;  %v905_v48 = vadd.f32 %v841_v38, %v568_v25  ;;  %v1263_v38 = vld [vmem:[%s2348_s3 + $0x8] sm:$0xff] }
  0xf1   :  { %1572 = vpow2.f32 %v1468_v16  ;;  %v1453_v23 = vmul.f32 -1.442695, %v906_v17  ;;  %v907_v24 = vadd.f32 %v843_v13, %v459_v20  ;;  %v908_v8 = vadd.f32 %v844_v60, %v570_v39 }
  0xf2   :  { %1574 = vtanh.f32 %v897_v14  ;;  %v463_v26 = vpop.f32.mrf.mxu0  ;;  %v2060_v51 = vpop.f32.mrf.mxu1 }
  0xf3   :  { %1576 = vpow2.f32 %v1453_v23  ;;  %v1469_v30 = vmul.f32 -1.442695, %v907_v24  ;;  %v910_v31 = vadd.f32 %v846_v21, %v463_v26  ;;  %v1485_v20 = vmul.f32 -1.442695, %v908_v8  ;;  %v1262_v23 = vld [vmem:[%s2348_s3] sm:$0xff]  ;;  %v845_v26 = vld [vmem:[%s2347_s2 + $0x78] sm:$0xff] }
  0xf4   :  { %v1559_v32 = vpop.eup %1558  ;;  %v465_v33 = vpop.f32.mrf.mxu0  ;;  %1578 = vpow2.f32 %v1484_v29  ;;  %v909_v39 = vadd.f32 %v845_v26, %v2060_v51 }
  0xf5   :  { %v1006_v35 = vadd.f32 1.0, %v1559_v32  ;;  %1580 = vpow2.f32 %v1469_v30  ;;  %v1454_v36 = vmul.f32 -1.442695, %v910_v31  ;;  %v911_v37 = vadd.f32 %v847_v27, %v465_v33  ;;  %v576_v0 = vpop.f32.mrf.mxu1  ;;  %v859_v33 = vld [vmem:[%s2347_s2 + $0xe8] sm:$0xff] }
  0xf6   :  { %v1561_v40 = vpop.eup %1560  ;;  %1582 = vtanh.f32 %v901_v28  ;;  %v467_v41 = vpop.f32.mrf.mxu0  ;;  %v848_v28 = vld [vmem:[%s2347_s2 + $0x90] sm:$0xff] }
  0xf7   :  { %1584 = vrcp.f32 %v1006_v35  ;;  %v1102_v42 = vadd.f32 1.0, %v1561_v40  ;;  %v1470_v43 = vmul.f32 -1.442695, %v911_v37  ;;  %v914_v44 = vadd.f32 %v850_v34, %v467_v41  ;;  %v2071_v14 = vpop.f32.mrf.mxu1 }
  0xf8   :  { %v1563_v46 = vpop.eup %1562  ;;  %1586 = vpow2.f32 %v1454_v36  ;;  %v469_v47 = vpop.f32.mrf.mxu0  ;;  %v912_v40 = vadd.f32 %v848_v28, %v576_v0 }
  0xf9   :  { %v1565_v49 = vpop.eup %1564  ;;  %1588 = vrcp.f32 %v1102_v42  ;;  %v1007_v50 = vadd.f32 1.0, %v1563_v46  ;;  %v1455_v53 = vmul.f32 -1.442695, %v914_v44  ;;  %v915_v54 = vadd.f32 %v851_v45, %v469_v47  ;;  %v580_v30 = vpop.f32.mrf.mxu1 }
  0xfa   :  { %v1567_v52 = vpop.eup %1566  ;;  %1590 = vpow2.f32 %v1470_v43  ;;  %v473_v55 = vpop.f32.mrf.mxu0  ;;  %v1198_v59 = vadd.f32 1.0, %v1565_v49  ;;  %v862_v49 = vld [vmem:[%s2347_s2 + $0x100] sm:$0xff] }
  0xfb   :  { %1592 = vrcp.f32 %v1007_v50  ;;  %v1103_v56 = vadd.f32 1.0, %v1567_v52  ;;  %v1471_v2 = vmul.f32 -1.442695, %v915_v54  ;;  %v918_v3 = vadd.f32 %v854_v57, %v473_v55  ;;  %v2092_v46 = vpop.f32.mrf.mxu1  ;;  %v1264_v54 = vld [vmem:[%s2348_s3 + $0x10] sm:$0xff] }
  0xfc   :  { %v1569_v58 = vpop.eup %1568  ;;  %1594 = vtanh.f32 %v905_v48  ;;  %v475_v63 = vpop.f32.mrf.mxu0  ;;  %v1486_v55 = vmul.f32 -1.442695, %v912_v40 }
  0xfd   :  { %v1571_v61 = vpop.eup %1570  ;;  %1596 = vrcp.f32 %v1103_v56  ;;  %v1008_v62 = vadd.f32 1.0, %v1569_v58  ;;  %v919_v12 = vadd.f32 %v855_v4, %v475_v63  ;;  %v1456_v17 = vmul.f32 -1.442695, %v918_v3  ;;  %v586_v63 = vpop.f32.mrf.mxu1 }
  0xfe   :  { %v1573_v1 = vpop.eup %1572  ;;  %1598 = vpow2.f32 %v1455_v53  ;;  %v1199_v7 = vadd.f32 1.0, %v1571_v61  ;;  %v477_v13 = vpop.f32.mrf.mxu0  ;;  %v852_v61 = vld [vmem:[%s2347_s2 + $0xb0] sm:$0xff] }
  0xff   :  { %v1575_v5 = vpop.eup %1574  ;;  %1600 = vrcp.f32 %v1008_v62  ;;  %v1104_v6 = vadd.f32 1.0, %v1573_v1  ;;  %v1472_v25 = vmul.f32 -1.442695, %v919_v12  ;;  %v922_v27 = vadd.f32 %v858_v18, %v477_v13  ;;  %v866_v13 = vld [vmem:[%s2347_s2 + $0x120] sm:$0xff] }
 0x100   :  { %v1577_v9 = vpop.eup %1576  ;;  %1602 = vrcp.f32 %v1198_v59  ;;  %v479_v29 = vpop.f32.mrf.mxu0  ;;  %v849_v59 = vld [vmem:[%s2347_s2 + $0x98] sm:$0xff]  ;;  %v916_v8 = vadd.f32 %v852_v61, %v580_v30 }
 0x101   :  { %v1579_v10 = vpop.eup %1578  ;;  %1604 = vrcp.f32 %v1104_v6  ;;  %v1009_v11 = vadd.f32 1.0, %v1577_v9  ;;  %v1457_v43 = vmul.f32 -1.442695, %v922_v27  ;;  %v923_v44 = vadd.f32 %v859_v33, %v479_v29  ;;  %v1265_v27 = vld [vmem:[%s2348_s3 + $0x18] sm:$0xff] }
 0x102   :  { %v1581_v15 = vpop.eup %1580  ;;  %v1200_v16 = vadd.f32 1.0, %v1579_v10  ;;  %1606 = vpow2.f32 %v1471_v2  ;;  %v483_v45 = vpop.f32.mrf.mxu0 }
 0x103   :  { %v1583_v19 = vpop.eup %1582  ;;  %1608 = vrcp.f32 %v1199_v7  ;;  %v1105_v22 = vadd.f32 1.0, %v1581_v15  ;;  %v1473_v58 = vmul.f32 -1.442695, %v923_v44  ;;  %v926_v60 = vadd.f32 %v862_v49, %v483_v45  ;;  %v2115_v15 = vpop.f32.mrf.mxu1 }
 0x104   :  { %v1585_v21 = vpop.eup %1584  ;;  %1610 = vrcp.f32 %v1009_v11  ;;  %v485_v62 = vpop.f32.mrf.mxu0  ;;  %v913_v7 = vadd.f32 %v849_v59, %v2071_v14 }
 0x105   :  { %v1587_v24 = vpop.eup %1586  ;;  %1612 = vrcp.f32 %v1200_v16  ;;  %v1294_v36 = vmul.f32 %v1585_v21, %v1575_v5  ;;  %v863_v5 = vld [vmem:[%s2347_s2 + $0x108] sm:$0xff]  ;;  %v1458_v11 = vmul.f32 -1.442695, %v926_v60  ;;  %v1487_v21 = vmul.f32 -1.442695, %v916_v8  ;;  %v590_v29 = vpop.f32.mrf.mxu1 }
 0x106   :  { %v1589_v31 = vpop.eup %1588  ;;  %v1010_v32 = vadd.f32 1.0, %v1587_v24  ;;  %1614 = vpow2.f32 %v1456_v17  ;;  %v487_v12 = vpop.f32.mrf.mxu0  ;;  %v927_v18 = vadd.f32 %v863_v5, %v485_v62  ;;  %v856_v24 = vld [vmem:[%s2347_s2 + $0xd0] sm:$0xff] }
 0x107   :  { %v1591_v34 = vpop.eup %1590  ;;  %v1278_v35 = vmul.f32 %v1589_v31, %v1262_v23  ;;  %1616 = vpow2.f32 %v1485_v20  ;;  %v930_v23 = vadd.f32 %v866_v13, %v487_v12  ;;  %v2135_v44 = vpop.f32.mrf.mxu1 }
 0x108   :  { %v1593_v37 = vpop.eup %1592  ;;  %1618 = vrcp.f32 %v1105_v22  ;;  %v1106_v48 = vadd.f32 1.0, %v1591_v34  ;;  %v853_v22 = vld [vmem:[%s2347_s2 + $0xb8] sm:$0xff]  ;;  %v489_v28 = vpop.f32.mrf.mxu0  ;;  %v1474_v31 = vmul.f32 -1.442695, %v927_v18  ;;  %v920_v34 = vadd.f32 %v856_v24, %v586_v63  ;;  %v864_v24 = vld [vmem:[%s2347_s2 + $0x110] sm:$0xff] }
 0x109   :  { %v1595_v41 = vpop.eup %1594  ;;  %v1310_v42 = vadd.f32 %v1294_v36, %v1278_v35  ;;  %1620 = vpow2.f32 %v1472_v25  ;;  %v1295_v52 = vmul.f32 %v1593_v37, %v1583_v19  ;;  %v917_v33 = vadd.f32 %v853_v22, %v2092_v46  ;;  %v867_v35 = vld [vmem:[%s2347_s2 + $0x128] sm:$0xff]  ;;  %v596_v60 = vpop.f32.mrf.mxu1  ;;  %v861_v22 = vld [vmem:[%s2347_s2 + $0xf8] sm:$0xff] }
 0x10a   :  { %v1597_v47 = vpop.eup %1596  ;;  %1622 = vrcp.f32 %v1010_v32  ;;  %v1488_v49 = vmul.f32 -1.442695, %v920_v34  ;;  %v875_v34 = vld [vmem:[%s2347_s2 + $0x168] sm:$0xff] }
 0x10b   :  { %v1599_v50 = vpop.eup %1598  ;;  %1624 = vtanh.f32 %v1310_v42  ;;  %1374 = vst [vmem:[#allocation3] sm:$0xff] %v1310_v42  ;;  %v1279_v51 = vmul.f32 %v1597_v47, %v1263_v38  ;;  %v1459_v38 = vmul.f32 -1.442695, %v930_v23  ;;  %v493_v42 = vpop.f32.mrf.mxu0  ;;  %v931_v47 = vadd.f32 %v867_v35, %v489_v28 }
 0x10c   :  { %v1601_v53 = vpop.eup %1600  ;;  %1626 = vtanh.f32 %v909_v39  ;;  %v1011_v1 = vadd.f32 1.0, %v1599_v50 }
 0x10d   :  { %v1603_v56 = vpop.eup %1602  ;;  %v1311_v57 = vadd.f32 %v1295_v52, %v1279_v51  ;;  %1628 = vpow2.f32 %v1457_v43  ;;  %v1296_v4 = vmul.f32 %v1601_v53, %v1595_v41  ;;  %v870_v43 = vld [vmem:[%s2347_s2 + $0x140] sm:$0xff]  ;;  %v857_v53 = vld [vmem:[%s2347_s2 + $0xd8] sm:$0xff]  ;;  %v495_v59 = vpop.f32.mrf.mxu0  ;;  %v1475_v63 = vmul.f32 -1.442695, %v931_v47 }
 0x10e   :  { %v1605_v0 = vpop.eup %1604  ;;  %1630 = vrcp.f32 %v1106_v48 }
 0x10f   :  { %v1607_v2 = vpop.eup %1606  ;;  %1632 = vtanh.f32 %v1311_v57  ;;  %1375 = vst [vmem:[#allocation3 + $0x8] sm:$0xff] %v1311_v57  ;;  %v1280_v3 = vmul.f32 %v1605_v0, %v1264_v54  ;;  %v934_v54 = vadd.f32 %v870_v43, %v493_v42 }
 0x110   :  { %v2109_v6 = vpop.eup %1608  ;;  %1634 = vpow2.f32 %v1486_v55  ;;  %v1107_v17 = vadd.f32 1.0, %v1607_v2  ;;  %v860_v55 = vld [vmem:[%s2347_s2 + $0xf0] sm:$0xff] }
 0x111   :  { %v1611_v9 = vpop.eup %1610  ;;  %v1312_v10 = vadd.f32 %v1296_v4, %v1280_v3  ;;  %1636 = vpow2.f32 %v1473_v58  ;;  %v1266_v58 = vld [vmem:[%s2348_s3 + $0x20] sm:$0xff]  ;;  %v924_v2 = vadd.f32 %v860_v55, %v590_v29  ;;  %v871_v3 = vld [vmem:[%s2347_s2 + $0x148] sm:$0xff] }
 0x112   :  { %v2117_v16 = vpop.eup %1612  ;;  %1638 = vrcp.f32 %v1011_v1  ;;  %v921_v1 = vadd.f32 %v857_v53, %v2115_v15  ;;  %v935_v15 = vadd.f32 %v871_v3, %v495_v59  ;;  %v865_v53 = vld [vmem:[%s2347_s2 + $0x118] sm:$0xff] }
 0x113   :  { %v1615_v19 = vpop.eup %1614  ;;  %1640 = vtanh.f32 %v1312_v10  ;;  %1376 = vst [vmem:[#allocation3 + $0x10] sm:$0xff] %v1312_v10  ;;  %v497_v10 = vpop.f32.mrf.mxu0  ;;  %v1489_v18 = vmul.f32 -1.442695, %v924_v2 }
 0x114   :  { %v1617_v14 = vpop.eup %1616  ;;  %v1012_v20 = vadd.f32 1.0, %v1615_v19  ;;  %1642 = vtanh.f32 %v913_v7  ;;  %v1476_v29 = vmul.f32 -1.442695, %v935_v15 }
 0x115   :  { %v1619_v25 = vpop.eup %1618  ;;  %v1201_v26 = vadd.f32 1.0, %v1617_v14  ;;  %1644 = vpow2.f32 %v1458_v11  ;;  %v2158_v11 = vpop.f32.mrf.mxu1 }
 0x116   :  { %v1621_v30 = vpop.eup %1620  ;;  %1646 = vrcp.f32 %v1107_v17  ;;  %v1281_v37 = vmul.f32 %v1619_v25, %v1265_v27  ;;  %v499_v25 = vpop.f32.mrf.mxu0 }
 0x117   :  { %v1623_v32 = vpop.eup %1622  ;;  %1648 = vrcp.f32 %v1012_v20  ;;  %v1108_v41 = vadd.f32 1.0, %v1621_v30 }
 0x118   :  { %v1625_v36 = vpop.eup %1624  ;;  %1650 = vpow2.f32 %v1487_v21  ;;  %v1267_v21 = vld [vmem:[%s2348_s3 + $0x28] sm:$0xff] }
 0x119   :  { %v1627_v39 = vpop.eup %1626  ;;  %v1342_v40 = vmul.f32 %v1625_v36, %v1603_v56  ;;  %1652 = vrcp.f32 %v1201_v26  ;;  %v600_v26 = vpop.f32.mrf.mxu1 }
 0x11a   :  { %v1629_v45 = vpop.eup %1628  ;;  %v1297_v46 = vmul.f32 %v1627_v39, %v1611_v9  ;;  %1654 = vpow2.f32 %v1474_v31 }
 0x11b   :  { %v1631_v48 = vpop.eup %1630  ;;  %1358 = vst [vmem:[%s2349_s4] sm:$0xff] %v1342_v40  ;;  %1656 = vtanh.f32 %v917_v33  ;;  %v1013_v52 = vadd.f32 1.0, %v1629_v45  ;;  %v925_v33 = vadd.f32 %v861_v22, %v2135_v44  ;;  %v503_v40 = vpop.f32.mrf.mxu0  ;;  %v939_v45 = vadd.f32 %v875_v34, %v499_v25  ;;  %v872_v22 = vld [vmem:[%s2347_s2 + $0x150] sm:$0xff] }
 0x11c   :  { %v1633_v50 = vpop.eup %1632  ;;  %v1313_v51 = vadd.f32 %v1297_v46, %v1281_v37  ;;  %1658 = vpow2.f32 %v1459_v38  ;;  %v1282_v5 = vmul.f32 %v1631_v48, %v1266_v58  ;;  %v928_v37 = vadd.f32 %v864_v24, %v596_v60  ;;  %v878_v48 = vld [vmem:[%s2347_s2 + $0x180] sm:$0xff] }
 0x11d   :  { %v1635_v56 = vpop.eup %1634  ;;  %v1343_v57 = vmul.f32 %v1633_v50, %v2109_v6  ;;  %1660 = vrcp.f32 %v1108_v41  ;;  %v1460_v6 = vmul.f32 -1.442695, %v934_v54  ;;  %v2181_v41 = vpop.f32.mrf.mxu1  ;;  %v1477_v60 = vmul.f32 -1.442695, %v939_v45 }
 0x11e   :  { %v1637_v61 = vpop.eup %1636  ;;  %1662 = vtanh.f32 %v1313_v51  ;;  %1377 = vst [vmem:[#allocation3 + $0x18] sm:$0xff] %v1313_v51  ;;  %v1202_v62 = vadd.f32 1.0, %v1635_v56  ;;  %v1268_v51 = vld [vmem:[%s2348_s3 + $0x30] sm:$0xff] }
 0x11f   :  { %v1639_v0 = vpop.eup %1638  ;;  %1359 = vst [vmem:[%s2349_s4 + $0x8] sm:$0xff] %v1343_v57  ;;  %1664 = vpow2.f32 %v1488_v49  ;;  %v1109_v9 = vadd.f32 1.0, %v1637_v61  ;;  %v868_v56 = vld [vmem:[%s2347_s2 + $0x130] sm:$0xff]  ;;  %v505_v57 = vpop.f32.mrf.mxu0  ;;  %v942_v61 = vadd.f32 %v878_v48, %v503_v40 }
 0x120   :  { %v1641_v4 = vpop.eup %1640  ;;  %1666 = vrcp.f32 %v1013_v52  ;;  %v1490_v52 = vmul.f32 -1.442695, %v928_v37  ;;  %v606_v58 = vpop.f32.mrf.mxu1 }
 0x121   :  { %v1643_v7 = vpop.eup %1642  ;;  %v1344_v8 = vmul.f32 %v1641_v4, %v2117_v16  ;;  %1668 = vrcp.f32 %v1202_v62  ;;  %v874_v16 = vld [vmem:[%s2347_s2 + $0x160] sm:$0xff]  ;;  %v932_v4 = vadd.f32 %v868_v56, %v600_v26 }
 0x122   :  { %v1645_v12 = vpop.eup %1644  ;;  %v1298_v13 = vmul.f32 %v1643_v7, %v1623_v32  ;;  %1670 = vpow2.f32 %v1475_v63  ;;  %v938_v30 = vadd.f32 %v874_v16, %v497_v10  ;;  %v507_v7 = vpop.f32.mrf.mxu0 }
 0x123   :  { %v1647_v17 = vpop.eup %1646  ;;  %1360 = vst [vmem:[%s2349_s4 + $0x10] sm:$0xff] %v1344_v8  ;;  %1672 = vtanh.f32 %v921_v1  ;;  %v1014_v20 = vadd.f32 1.0, %v1645_v12  ;;  %v879_v1 = vld [vmem:[%s2347_s2 + $0x188] sm:$0xff]  ;;  %v882_v8 = vld [vmem:[%s2347_s2 + $0x1a0] sm:$0xff] }
 0x124   :  { %v2166_v19 = vpop.eup %1648  ;;  %v1314_v14 = vadd.f32 %v1298_v13, %v1282_v5  ;;  %1674 = vpow2.f32 %v1460_v6  ;;  %v1283_v32 = vmul.f32 %v1647_v17, %v1267_v21  ;;  %v1461_v43 = vmul.f32 -1.442695, %v938_v30  ;;  %v509_v25 = vpop.f32.mrf.mxu0 }
 0x125   :  { %v1651_v23 = vpop.eup %1650  ;;  %1676 = vrcp.f32 %v1109_v9  ;;  %v2208_v9 = vpop.f32.mrf.mxu1  ;;  %v943_v12 = vadd.f32 %v879_v1, %v505_v57  ;;  %v946_v21 = vadd.f32 %v882_v8, %v507_v7 }
 0x126   :  { %v1653_v27 = vpop.eup %1652  ;;  %1678 = vtanh.f32 %v1314_v14  ;;  %1378 = vst [vmem:[#allocation3 + $0x20] sm:$0xff] %v1314_v14  ;;  %v1203_v28 = vadd.f32 1.0, %v1651_v23  ;;  %v1491_v14 = vmul.f32 -1.442695, %v932_v4 }
 0x127   :  { %v1655_v31 = vpop.eup %1654  ;;  %1680 = vpow2.f32 %v1489_v18  ;;  %v610_v26 = vpop.f32.mrf.mxu1 }
 0x128   :  { %v1657_v35 = vpop.eup %1656  ;;  %1682 = vrcp.f32 %v1014_v20  ;;  %v1110_v36 = vadd.f32 1.0, %v1655_v31  ;;  %v869_v20 = vld [vmem:[%s2347_s2 + $0x138] sm:$0xff] }
 0x129   :  { %v1659_v38 = vpop.eup %1658  ;;  %1684 = vrcp.f32 %v1203_v28  ;;  %v1299_v39 = vmul.f32 %v1657_v35, %v1639_v0  ;;  %v929_v0 = vadd.f32 %v865_v53, %v2158_v11  ;;  %v1462_v11 = vmul.f32 -1.442695, %v942_v61  ;;  %v2230_v40 = vpop.f32.mrf.mxu1 }
 0x12a   :  { %v1661_v42 = vpop.eup %1660  ;;  %1686 = vpow2.f32 %v1476_v29  ;;  %v1015_v47 = vadd.f32 1.0, %v1659_v38  ;;  %v1478_v28 = vmul.f32 -1.442695, %v943_v12  ;;  %v933_v31 = vadd.f32 %v869_v20, %v2181_v41  ;;  %v513_v38 = vpop.f32.mrf.mxu0 }
 0x12b   :  { %v1663_v46 = vpop.eup %1662  ;;  %v1315_v44 = vadd.f32 %v1299_v39, %v1283_v32  ;;  %1688 = vtanh.f32 %v925_v33  ;;  %v1284_v63 = vmul.f32 %v1661_v42, %v1268_v51  ;;  %v936_v32 = vadd.f32 %v872_v22, %v606_v58  ;;  %v883_v33 = vld [vmem:[%s2347_s2 + $0x1a8] sm:$0xff]  ;;  %v886_v39 = vld [vmem:[%s2347_s2 + $0x1c0] sm:$0xff]  ;;  %v873_v51 = vld [vmem:[%s2347_s2 + $0x158] sm:$0xff] }
 0x12c   :  { %v1665_v49 = vpop.eup %1664  ;;  %v1345_v50 = vmul.f32 %v1663_v46, %v1653_v27  ;;  %1690 = vrcp.f32 %v1110_v36  ;;  %v1463_v35 = vmul.f32 -1.442695, %v946_v21  ;;  %v880_v21 = vld [vmem:[%s2347_s2 + $0x190] sm:$0xff] }
 0x12d   :  { %v2192_v54 = vpop.eup %1666  ;;  %1692 = vtanh.f32 %v1315_v44  ;;  %1379 = vst [vmem:[#allocation3 + $0x28] sm:$0xff] %v1315_v44  ;;  %v1204_v55 = vadd.f32 1.0, %v1665_v49 }
 0x12e   :  { %v1669_v59 = vpop.eup %1668  ;;  %1361 = vst [vmem:[%s2349_s4 + $0x18] sm:$0xff] %v1345_v50  ;;  %1694 = vpow2.f32 %v1461_v43  ;;  %v947_v43 = vadd.f32 %v883_v33, %v509_v25  ;;  %v1270_v50 = vld [vmem:[%s2348_s3 + $0x40] sm:$0xff] }
 0x12f   :  { %v1671_v62 = vpop.eup %1670  ;;  %1696 = vrcp.f32 %v1015_v47  ;;  %v1492_v47 = vmul.f32 -1.442695, %v936_v32 }
 0x130   :  { %v1673_v2 = vpop.eup %1672  ;;  %v1111_v3 = vadd.f32 1.0, %v1671_v62  ;;  %1698 = vpow2.f32 %v1490_v52  ;;  %v950_v52 = vadd.f32 %v886_v39, %v513_v38  ;;  %v1479_v58 = vmul.f32 -1.442695, %v947_v43 }
 0x131   :  { %v1675_v5 = vpop.eup %1674  ;;  %1700 = vrcp.f32 %v1204_v55  ;;  %v1300_v6 = vmul.f32 %v1673_v2, %v2166_v19  ;;  %v1269_v19 = vld [vmem:[%s2348_s3 + $0x38] sm:$0xff]  ;;  %v616_v55 = vpop.f32.mrf.mxu1 }
 0x132   :  { %v1677_v10 = vpop.eup %1676  ;;  %1702 = vpow2.f32 %v1477_v60  ;;  %v1016_v17 = vadd.f32 1.0, %v1675_v5  ;;  %v887_v60 = vld [vmem:[%s2347_s2 + $0x1c8] sm:$0xff]  ;;  %v1464_v1 = vmul.f32 -1.442695, %v950_v52  ;;  %v944_v33 = vadd.f32 %v880_v21, %v616_v55 }
 0x133   :  { %v1679_v13 = vpop.eup %1678  ;;  %v1316_v15 = vadd.f32 %v1300_v6, %v1284_v63  ;;  %1704 = vtanh.f32 %v929_v0  ;;  %v1285_v30 = vmul.f32 %v1677_v10, %v1269_v19  ;;  %v937_v63 = vadd.f32 %v873_v51, %v2208_v9  ;;  %v2250_v6 = vpop.f32.mrf.mxu1  ;;  %v890_v9 = vld [vmem:[%s2347_s2 + $0x1e0] sm:$0xff]  ;;  %v877_v19 = vld [vmem:[%s2347_s2 + $0x178] sm:$0xff] }
 0x134   :  { %v1681_v18 = vpop.eup %1680  ;;  %v1346_v16 = vmul.f32 %v1679_v13, %v1669_v59  ;;  %1706 = vrcp.f32 %v1111_v3  ;;  %v515_v59 = vpop.f32.mrf.mxu0 }
 0x135   :  { %v1683_v23 = vpop.eup %1682  ;;  %1708 = vtanh.f32 %v1316_v15  ;;  %1380 = vst [vmem:[#allocation3 + $0x30] sm:$0xff] %v1316_v15  ;;  %v1205_v24 = vadd.f32 1.0, %v1681_v18  ;;  %v951_v5 = vadd.f32 %v887_v60, %v515_v59  ;;  %v1271_v18 = vld [vmem:[%s2348_s3 + $0x48] sm:$0xff]  ;;  %v620_v22 = vpop.f32.mrf.mxu1 }
 0x136   :  { %v1685_v27 = vpop.eup %1684  ;;  %1362 = vst [vmem:[%s2349_s4 + $0x20] sm:$0xff] %v1346_v16  ;;  %1710 = vpow2.f32 %v1462_v11  ;;  %v517_v10 = vpop.f32.mrf.mxu0 }
 0x137   :  { %v1687_v29 = vpop.eup %1686  ;;  %1712 = vrcp.f32 %v1016_v17  ;;  %v1480_v20 = vmul.f32 -1.442695, %v951_v5  ;;  %v954_v25 = vadd.f32 %v890_v9, %v517_v10 }
 0x138   :  { %v1689_v34 = vpop.eup %1688  ;;  %1714 = vpow2.f32 %v1491_v14  ;;  %v1112_v42 = vadd.f32 1.0, %v1687_v29 }
 0x139   :  { %v1691_v36 = vpop.eup %1690  ;;  %1716 = vrcp.f32 %v1205_v24  ;;  %v1301_v37 = vmul.f32 %v1689_v34, %v2192_v54  ;;  %v876_v54 = vld [vmem:[%s2347_s2 + $0x170] sm:$0xff]  ;;  %v1465_v39 = vmul.f32 -1.442695, %v954_v25 }
 0x13a   :  { %v1693_v41 = vpop.eup %1692  ;;  %1718 = vpow2.f32 %v1478_v28  ;;  %v1286_v62 = vmul.f32 %v1691_v36, %v1270_v50  ;;  %v940_v2 = vadd.f32 %v876_v54, %v610_v26  ;;  %v519_v26 = vpop.f32.mrf.mxu0 }
 0x13b   :  { %v1695_v45 = vpop.eup %1694  ;;  %v1347_v46 = vmul.f32 %v1693_v41, %v1685_v27  ;;  %v1317_v44 = vadd.f32 %v1301_v37, %v1285_v30  ;;  %1720 = vtanh.f32 %v933_v31  ;;  %v891_v27 = vld [vmem:[%s2347_s2 + $0x1e8] sm:$0xff]  ;;  %v941_v30 = vadd.f32 %v877_v19, %v2230_v40  ;;  %v622_v37 = vpop.f32.mrf.mxu1  ;;  %v884_v40 = vld [vmem:[%s2347_s2 + $0x1b0] sm:$0xff] }
 0x13c   :  { %v2232_v48 = vpop.eup %1696  ;;  %v1017_v49 = vadd.f32 1.0, %v1695_v45  ;;  %1722 = vpow2.f32 %v1463_v35  ;;  %v1493_v16 = vmul.f32 -1.442695, %v940_v2  ;;  %v955_v36 = vadd.f32 %v891_v27, %v519_v26  ;;  %v893_v27 = vld [vmem:[%s2347_s2 + $0x1f8] sm:$0xff] }
 0x13d   :  { %v1699_v53 = vpop.eup %1698  ;;  %1363 = vst [vmem:[%s2349_s4 + $0x28] sm:$0xff] %v1347_v46  ;;  %1724 = vtanh.f32 %v1317_v44  ;;  %1381 = vst [vmem:[#allocation3 + $0x38] sm:$0xff] %v1317_v44  ;;  %v1272_v44 = vld [vmem:[%s2348_s3 + $0x50] sm:$0xff]  ;;  %v626_v51 = vpop.f32.mrf.mxu1  ;;  %v948_v54 = vadd.f32 %v884_v40, %v620_v22 }
 0x13e   :  { %v1701_v56 = vpop.eup %1700  ;;  %1726 = vrcp.f32 %v1112_v42  ;;  %v1206_v57 = vadd.f32 1.0, %v1699_v53  ;;  %v1481_v50 = vmul.f32 -1.442695, %v955_v36 }
 0x13f   :  { %v1703_v61 = vpop.eup %1702  ;;  %1728 = vpow2.f32 %v1492_v47  ;;  %v1494_v47 = vmul.f32 -1.442695, %v944_v33  ;;  %v1495_v2 = vmul.f32 -1.442695, %v948_v54 }
 0x140   :  { %v1705_v0 = vpop.eup %1704  ;;  %1730 = vrcp.f32 %v1017_v49  ;;  %v1113_v8 = vadd.f32 1.0, %v1703_v61 }
 0x141   :  { %v1707_v3 = vpop.eup %1706  ;;  %1732 = vrcp.f32 %v1206_v57  ;;  %v1302_v4 = vmul.f32 %v1705_v0, %v1683_v23  ;;  %v628_v0 = vpop.f32.mrf.mxu1 }
 0x142   :  { %v1709_v7 = vpop.eup %1708  ;;  %1734 = vpow2.f32 %v1479_v58  ;;  %v1287_v29 = vmul.f32 %v1707_v3, %v1271_v18  ;;  %v888_v58 = vld [vmem:[%s2347_s2 + $0x1d0] sm:$0xff] }
 0x143   :  { %v1711_v11 = vpop.eup %1710  ;;  %v1348_v12 = vmul.f32 %v1709_v7, %v1701_v56  ;;  %v1318_v13 = vadd.f32 %v1302_v4, %v1286_v62  ;;  %1736 = vtanh.f32 %v937_v63  ;;  %v885_v63 = vld [vmem:[%s2347_s2 + $0x1b8] sm:$0xff]  ;;  %v952_v3 = vadd.f32 %v888_v58, %v626_v51 }
 0x144   :  { %v2255_v15 = vpop.eup %1712  ;;  %v1018_v17 = vadd.f32 1.0, %v1711_v11  ;;  %1738 = vpow2.f32 %v1464_v1  ;;  %v1273_v11 = vld [vmem:[%s2348_s3 + $0x58] sm:$0xff] }
 0x145   :  { %v1715_v14 = vpop.eup %1714  ;;  %1364 = vst [vmem:[%s2349_s4 + $0x30] sm:$0xff] %v1348_v12  ;;  %1740 = vtanh.f32 %v1318_v13  ;;  %1382 = vst [vmem:[#allocation3 + $0x40] sm:$0xff] %v1318_v13  ;;  %v949_v12 = vadd.f32 %v885_v63, %v622_v37  ;;  %v889_v13 = vld [vmem:[%s2347_s2 + $0x1d8] sm:$0xff]  ;;  %v1496_v18 = vmul.f32 -1.442695, %v952_v3 }
 0x146   :  { %v1717_v23 = vpop.eup %1716  ;;  %1742 = vrcp.f32 %v1113_v8  ;;  %v1207_v24 = vadd.f32 1.0, %v1715_v14  ;;  %v892_v8 = vld [vmem:[%s2347_s2 + $0x1f0] sm:$0xff]  ;;  %v953_v21 = vadd.f32 %v889_v13, %v628_v0 }
 0x147   :  { %v1719_v28 = vpop.eup %1718  ;;  %1744 = vrcp.f32 %v1018_v17 }
 0x148   :  { %v1721_v31 = vpop.eup %1720  ;;  %v1114_v32 = vadd.f32 1.0, %v1719_v28  ;;  %1746 = vpow2.f32 %v1493_v16 }
 0x149   :  { %v1723_v34 = vpop.eup %1722  ;;  %v1303_v35 = vmul.f32 %v1721_v31, %v2232_v48  ;;  %1748 = vpow2.f32 %v1480_v20  ;;  %v881_v48 = vld [vmem:[%s2347_s2 + $0x198] sm:$0xff] }
 0x14a   :  { %v1725_v38 = vpop.eup %1724  ;;  %1750 = vrcp.f32 %v1207_v24  ;;  %v1019_v45 = vadd.f32 1.0, %v1723_v34  ;;  %v945_v57 = vadd.f32 %v881_v48, %v2250_v6 }
 0x14b   :  { %v1727_v41 = vpop.eup %1726  ;;  %v1349_v42 = vmul.f32 %v1725_v38, %v1717_v23  ;;  %v1319_v43 = vadd.f32 %v1303_v35, %v1287_v29  ;;  %1752 = vtanh.f32 %v941_v30  ;;  %v1274_v35 = vld [vmem:[%s2348_s3 + $0x60] sm:$0xff] }
 0x14c   :  { %v1729_v46 = vpop.eup %1728  ;;  %1754 = vrcp.f32 %v1114_v32  ;;  %v1288_v56 = vmul.f32 %v1727_v41, %v1272_v44  ;;  %v1275_v44 = vld [vmem:[%s2348_s3 + $0x68] sm:$0xff] }
 0x14d   :  { %v1731_v49 = vpop.eup %1730  ;;  %1365 = vst [vmem:[%s2349_s4 + $0x38] sm:$0xff] %v1349_v42  ;;  %1756 = vtanh.f32 %v1319_v43  ;;  %1383 = vst [vmem:[#allocation3 + $0x48] sm:$0xff] %v1319_v43  ;;  %v1208_v53 = vadd.f32 1.0, %v1729_v46 }
 0x14e   :  { %v1733_v52 = vpop.eup %1732  ;;  %1758 = vpow2.f32 %v1465_v39 }
 0x14f   :  { %v1735_v55 = vpop.eup %1734  ;;  %1760 = vrcp.f32 %v1019_v45 }
 0x150   :  { %v1737_v59 = vpop.eup %1736  ;;  %v1115_v60 = vadd.f32 1.0, %v1735_v55  ;;  %1762 = vpow2.f32 %v1494_v47 }
 0x151   :  { %v1739_v61 = vpop.eup %1738  ;;  %v1304_v62 = vmul.f32 %v1737_v59, %v2255_v15  ;;  %1764 = vpow2.f32 %v1481_v50  ;;  %v630_v15 = vpop.f32.mrf.mxu1 }
 0x152   :  { %v1741_v1 = vpop.eup %1740  ;;  %1766 = vrcp.f32 %v1208_v53  ;;  %v1020_v7 = vadd.f32 1.0, %v1739_v61  ;;  %v956_v16 = vadd.f32 %v892_v8, %v630_v15  ;;  %v1276_v53 = vld [vmem:[%s2348_s3 + $0x70] sm:$0xff] }
 0x153   :  { %v1743_v4 = vpop.eup %1742  ;;  %v1350_v5 = vmul.f32 %v1741_v1, %v1733_v52  ;;  %v1320_v6 = vadd.f32 %v1304_v62, %v1288_v56  ;;  %1768 = vtanh.f32 %v945_v57  ;;  %v632_v26 = vpop.f32.mrf.mxu1 }
 0x154   :  { %v1745_v10 = vpop.eup %1744  ;;  %1770 = vrcp.f32 %v1115_v60  ;;  %v1289_v20 = vmul.f32 %v1743_v4, %v1273_v11  ;;  %v1497_v29 = vmul.f32 -1.442695, %v956_v16  ;;  %v957_v36 = vadd.f32 %v893_v27, %v632_v26 }
 0x155   :  { %v1747_v9 = vpop.eup %1746  ;;  %1366 = vst [vmem:[%s2349_s4 + $0x40] sm:$0xff] %v1350_v5  ;;  %1772 = vtanh.f32 %v1320_v6  ;;  %1384 = vst [vmem:[#allocation3 + $0x50] sm:$0xff] %v1320_v6  ;;  %v1277_v6 = vld [vmem:[%s2348_s3 + $0x78] sm:$0xff]  ;;  %s1814_s3 = scalar_lea.vmem %s1398_s17, 2048 }
 0x156   :  { %v1749_v17 = vpop.eup %1748  ;;  %1774 = vpow2.f32 %v1495_v2  ;;  %v1209_v23 = vadd.f32 1.0, %v1747_v9  ;;  %p1815_p0 = scmp.ne.s32.totalorder %s1398_s17, %s1814_s3  ;;  %p1820_p2 = scmp.lt.s32.totalorder %s1814_s3, %s1814_s3 }
 0x157   :  { %v1751_v19 = vpop.eup %1750  ;;  %1776 = vrcp.f32 %v1020_v7  ;;  %v1116_v14 = vadd.f32 1.0, %v1749_v17 }
 0x158   :  { %v1753_v22 = vpop.eup %1752  ;;  %1778 = vtanh.f32 %v949_v12  ;;  %p1821_p3 = por %p1820_p2, %p1819_p1 }
 0x159   :  { %v1755_v24 = vpop.eup %1754  ;;  %1780 = vrcp.f32 %v1116_v14  ;;  %v1305_v25 = vmul.f32 %v1753_v22, %v1731_v49 }
 0x15a   :  { %v1757_v28 = vpop.eup %1756  ;;  %1782 = vpow2.f32 %v1496_v18  ;;  %v1290_v42 = vmul.f32 %v1755_v24, %v1274_v35  ;;  %p1822_p4 = pnand %p1821_p3, %p1815_p0 }
 0x15b   :  { %v1759_v30 = vpop.eup %1758  ;;  %v1351_v31 = vmul.f32 %v1757_v28, %v1751_v19  ;;  %v1321_v32 = vadd.f32 %v1305_v25, %v1289_v20  ;;  %1784 = vtanh.f32 %v953_v21 }
 0x15c   :  { %v1761_v33 = vpop.eup %1760  ;;  %1786 = vrcp.f32 %v1209_v23  ;;  %v1021_v34 = vadd.f32 1.0, %v1759_v30 }
 0x15d   :  { %v1763_v37 = vpop.eup %1762  ;;  %1367 = vst [vmem:[%s2349_s4 + $0x48] sm:$0xff] %v1351_v31  ;;  %1788 = vtanh.f32 %v1321_v32  ;;  %1385 = vst [vmem:[#allocation3 + $0x58] sm:$0xff] %v1321_v32 }
 0x15e   :  { %v1765_v38 = vpop.eup %1764  ;;  %1790 = vpow2.f32 %v1497_v29  ;;  %v1210_v45 = vadd.f32 1.0, %v1763_v37 }
 0x15f   :  { %v1767_v39 = vpop.eup %1766  ;;  %1792 = vrcp.f32 %v1021_v34  ;;  %v1117_v41 = vadd.f32 1.0, %v1765_v38 }
 0x160   :  { %v1769_v43 = vpop.eup %1768  ;;  %1794 = vtanh.f32 %v957_v36 }
 0x161   :  { %v1771_v40 = vpop.eup %1770  ;;  %1796 = vrcp.f32 %v1117_v41  ;;  %v1306_v46 = vmul.f32 %v1769_v43, %v1745_v10 }
 0x162   :  { %v1773_v47 = vpop.eup %1772  ;;  %1798 = vrcp.f32 %v1210_v45  ;;  %v1291_v52 = vmul.f32 %v1771_v40, %v1275_v44 }
 0x163   :  { %v1775_v48 = vpop.eup %1774  ;;  %v1352_v49 = vmul.f32 %v1773_v47, %v1767_v39  ;;  %v1322_v50 = vadd.f32 %v1306_v46, %v1290_v42 }
 0x164   :  { %v1777_v51 = vpop.eup %1776  ;;  %v1211_v55 = vadd.f32 1.0, %v1775_v48 }
 0x165   :  { %v1779_v54 = vpop.eup %1778  ;;  %1368 = vst [vmem:[%s2349_s4 + $0x50] sm:$0xff] %v1352_v49  ;;  %1800 = vtanh.f32 %v1322_v50  ;;  %1386 = vst [vmem:[#allocation3 + $0x60] sm:$0xff] %v1322_v50 }
 0x166   :  { %v1781_v56 = vpop.eup %1780  ;;  %v1307_v57 = vmul.f32 %v1779_v54, %v1761_v33  ;;  %1802 = vrcp.f32 %v1211_v55 }
 0x167   :  { %v1783_v58 = vpop.eup %1782  ;;  %v1292_v59 = vmul.f32 %v1781_v56, %v1276_v53 }
 0x168   :  { %v1785_v60 = vpop.eup %1784  ;;  %v1323_v61 = vadd.f32 %v1307_v57, %v1291_v52  ;;  %v1212_v62 = vadd.f32 1.0, %v1783_v58 }
 0x169   :  { %v1787_v63 = vpop.eup %1786  ;;  %v1308_v0 = vmul.f32 %v1785_v60, %v1777_v51 }
 0x16a   :  { %v1789_v1 = vpop.eup %1788  ;;  %1804 = vtanh.f32 %v1323_v61  ;;  %1387 = vst [vmem:[#allocation3 + $0x68] sm:$0xff] %v1323_v61 }
 0x16b   :  { %v1791_v2 = vpop.eup %1790  ;;  %v1353_v3 = vmul.f32 %v1789_v1, %v1787_v63  ;;  %v1324_v4 = vadd.f32 %v1308_v0, %v1292_v59  ;;  %1806 = vrcp.f32 %v1212_v62 }
 0x16c   :  { %v1793_v5 = vpop.eup %1792  ;;  %v1213_v10 = vadd.f32 1.0, %v1791_v2 }
 0x16d   :  { %v1795_v7 = vpop.eup %1794  ;;  %1369 = vst [vmem:[%s2349_s4 + $0x58] sm:$0xff] %v1353_v3  ;;  %1808 = vtanh.f32 %v1324_v4  ;;  %1388 = vst [vmem:[#allocation3 + $0x70] sm:$0xff] %v1324_v4 }
 0x16e   :  { %v1797_v8 = vpop.eup %1796  ;;  %v1309_v12 = vmul.f32 %v1795_v7, %v1793_v5  ;;  %1810 = vrcp.f32 %v1213_v10 }
 0x16f   :  { %v1293_v11 = vmul.f32 %v1797_v8, %v1277_v6  ;;  %v1799_v13 = vpop.eup %1798 }
 0x171   :  { %v1325_v9 = vadd.f32 %v1309_v12, %v1293_v11 }
 0x172   :  { %v1801_v15 = vpop.eup %1800 }
 0x173   :  { %v1354_v17 = vmul.f32 %v1801_v15, %v1799_v13  ;;  %1812 = vtanh.f32 %v1325_v9  ;;  %1389 = vst [vmem:[#allocation3 + $0x78] sm:$0xff] %v1325_v9 }
 0x174   :  { %1825 = shalt.err (!%p1822_p4)
}
 0x175   :  { %s1838_s18 = smov 128   ;;  %s1839_s19 = smov 8   ;;  %1370 = vst [vmem:[%s2349_s4 + $0x60] sm:$0xff] %v1354_v17  ;;  %v1803_v18 = vpop.eup %1802 }
 0x176   :  { %1403 = dma.vmem_to_hbm [thread:$0]  %s1398_s17, 2048, %s2350_s5, [#allocation4], %s1838_s18, %s1838_s18, %s1839_s19  }
 0x177   :  { %v1805_v16 = vpop.eup %1804 }
 0x178   :  { %v1355_v19 = vmul.f32 %v1805_v16, %v1803_v18  ;;  %v1807_v14 = vpop.eup %1806 }
 0x17a   :  { %v1809_v20 = vpop.eup %1808  ;;  %1371 = vst [vmem:[%s2349_s4 + $0x68] sm:$0xff] %v1355_v19 }
 0x17b   :  { %v1356_v21 = vmul.f32 %v1809_v20, %v1807_v14  ;;  %v1811_v22 = vpop.eup %1810 }
 0x17d   :  { %1372 = vst [vmem:[%s2349_s4 + $0x70] sm:$0xff] %v1356_v21 }
 0x180   :  { %v1813_v23 = vpop.eup %1812 }
 0x181   :  { %v1357_v24 = vmul.f32 %v1813_v23, %v1811_v22 }
 0x183   :  { %1373 = vst [vmem:[%s2349_s4 + $0x78] sm:$0xff] %v1357_v24 }
 0x184   :  { %1834 = dma.done.wait [#allocation4], 2048  }
 0x185   :  { %1835 = vsyncadd [#allocation4], 4294965248 }
 0x186   :  { %1409 = vsyncpa [#allocation4], 1 }

// kernel: _video_coder_forward.163
= control target key start
LH: loop header
LB: loop body
LE: loop exit
PB: predicated region body
PF: predicated region fallthrough
CT: control target
= control target key end

     0   :  { %s721_s1 = inlined_call_operand.vmem [shape: bf16[128,128], index: 1, kind: input, shape index: {}]   ;;  %s722_s0 = inlined_call_operand.vmem [shape: bf16[128,128], index: 0, kind: input, shape index: {}]   ;;  %s723_s2 = inlined_call_operand.vmem [shape: f32[1,128], index: 2, kind: input, shape index: {}]   ;;  %s724_s3 = inlined_call_operand.vmem [shape: bf16[128,128], index: 3, kind: output, shape index: {}]  }
   0x1   :  { %v610_v0 = vld [vmem:[%s721_s1 + $0x38] sm:$0xff]   ;;  %v611_v1 = vld [vmem:[%s721_s1 + $0x30] sm:$0xff]   ;;  %v612_v2 = vld [vmem:[%s721_s1 + $0x28] sm:$0xff]  }
   0x2   :  { %562 = vmatprep.subr.bf16.mxu0 %v610_v0  ;;  %594 = vmatprep.subr.bf16.mxu1 %v610_v0  ;;  %v613_v3 = vld [vmem:[%s721_s1 + $0x20] sm:$0xff]   ;;  %v614_v6 = vld [vmem:[%s721_s1 + $0x18] sm:$0xff]   ;;  %v615_v7 = vld [vmem:[%s721_s1 + $0x10] sm:$0xff]  }
   0x3   :  { %563 = vmatpush3.bf16.msra.mxu0 %v610_v0  ;;  %602 = vmatpush3.bf16.msra.mxu1 %v610_v0  ;;  %v618_v4 = vld [vmem:[%s722_s0] sm:$0xff]   ;;  %v616_v8 = vld [vmem:[%s721_s1 + $0x8] sm:$0xff]   ;;  %v622_v12 = vld [vmem:[%s722_s0 + $0x10] sm:$0xff]  }
   0x4   :  { %564 = vmatprep.subr.bf16.mxu0 %v611_v1  ;;  %595 = vmatprep.subr.bf16.mxu1 %v611_v1  ;;  %v619_v5 = vld [vmem:[%s722_s0 + $0x20] sm:$0xff]   ;;  %v620_v10 = vld [vmem:[%s722_s0 + $0x8] sm:$0xff]   ;;  %v623_v13 = vld [vmem:[%s722_s0 + $0x30] sm:$0xff]  }
   0x5   :  { %578 = vmatprep.mubr.bf16.mxu0 %v618_v4  ;;  %586 = vmatprep.mubr.bf16.mxu1 %v619_v5  ;;  %v617_v9 = vld [vmem:[%s721_s1] sm:$0xff]   ;;  %v621_v11 = vld [vmem:[%s722_s0 + $0x28] sm:$0xff]   ;;  %v624_v14 = vld [vmem:[%s722_s0 + $0x18] sm:$0xff]  }
   0x6   :  { %v625_v15 = vld [vmem:[%s722_s0 + $0x38] sm:$0xff]   ;;  %v466_v16 = vld [vmem:[%s723_s2] ss:$0 sm:$0xff] }
   0x7   :  { %565 = vmatpush3.bf16.msra.mxu0 %v611_v1  ;;  %603 = vmatpush3.bf16.msra.mxu1 %v611_v1 }
   0x8   :  { %566 = vmatprep.subr.bf16.mxu0 %v612_v2  ;;  %596 = vmatprep.subr.bf16.mxu1 %v612_v2 }
   0xb   :  { %567 = vmatpush3.bf16.msra.mxu0 %v612_v2  ;;  %604 = vmatpush3.bf16.msra.mxu1 %v612_v2 }
   0xc   :  { %568 = vmatprep.subr.bf16.mxu0 %v613_v3  ;;  %597 = vmatprep.subr.bf16.mxu1 %v613_v3 }
   0xf   :  { %569 = vmatpush3.bf16.msra.mxu0 %v613_v3  ;;  %605 = vmatpush3.bf16.msra.mxu1 %v613_v3 }
  0x10   :  { %570 = vmatprep.subr.bf16.mxu0 %v614_v6  ;;  %598 = vmatprep.subr.bf16.mxu1 %v614_v6 }
  0x13   :  { %571 = vmatpush3.bf16.msra.mxu0 %v614_v6  ;;  %606 = vmatpush3.bf16.msra.mxu1 %v614_v6 }
  0x14   :  { %572 = vmatprep.subr.bf16.mxu0 %v615_v7  ;;  %599 = vmatprep.subr.bf16.mxu1 %v615_v7 }
  0x17   :  { %573 = vmatpush3.bf16.msra.mxu0 %v615_v7  ;;  %607 = vmatpush3.bf16.msra.mxu1 %v615_v7 }
  0x18   :  { %574 = vmatprep.subr.bf16.mxu0 %v616_v8  ;;  %600 = vmatprep.subr.bf16.mxu1 %v616_v8 }
  0x1b   :  { %575 = vmatpush3.bf16.msra.mxu0 %v616_v8  ;;  %608 = vmatpush3.bf16.msra.mxu1 %v616_v8 }
  0x1c   :  { %576 = vmatprep.subr.bf16.mxu0 %v617_v9  ;;  %601 = vmatprep.subr.bf16.mxu1 %v617_v9 }
  0x1f   :  { %577 = vmatpush3.bf16.msra.mxu0 %v617_v9  ;;  %609 = vmatpush3.bf16.msra.mxu1 %v617_v9 }
  0x22   :  { %579 = vmatmul.mubr.bf16.vlgmr.msra.gmra.mxu0 %v620_v10  ;;  %587 = vmatmul.mubr.bf16.vlgmr.msra.gmra.mxu1 %v621_v11 }
  0x23   :  { %582 = vmatprep.mubr.bf16.mxu0 %v622_v12  ;;  %590 = vmatprep.mubr.bf16.mxu1 %v623_v13 }
  0x2a   :  { %583 = vmatmul.mubr.bf16.gmra.mxu0 %v624_v14  ;;  %591 = vmatmul.mubr.bf16.gmra.mxu1 %v625_v15 }
  0xe2   :  { %v580_v17 = vpop.f32.mrf.mxu0  ;;  %v588_v18 = vpop.f32.mrf.mxu1 }
  0xe3   :  { %v336_v19 = vadd.f32 %v580_v17, %v466_v16  ;;  %v344_v20 = vadd.f32 %v588_v18, %v466_v16 }
  0xe4   :  { %v213_v21 = vpop.f32.mrf.mxu0  ;;  %v245_v22 = vpop.f32.mrf.mxu1 }
  0xe5   :  { %v334_v23 = vadd.f32 %v466_v16, %v213_v21  ;;  %v342_v24 = vadd.f32 %v466_v16, %v245_v22  ;;  %v352_v29 = vmax.f32 %v336_v19, 0.0  ;;  %v360_v30 = vmax.f32 %v344_v20, 0.0 }
  0xe6   :  { %v581_v25 = vpop.f32.mrf.mxu0  ;;  %v589_v26 = vpop.f32.mrf.mxu1 }
  0xe7   :  { %v337_v27 = vadd.f32 %v581_v25, %v466_v16  ;;  %v345_v28 = vadd.f32 %v589_v26, %v466_v16  ;;  %v350_v37 = vmax.f32 %v334_v23, 0.0  ;;  %v358_v38 = vmax.f32 %v342_v24, 0.0 }
  0xe8   :  { %v216_v31 = vpop.f32.mrf.mxu0  ;;  %v248_v32 = vpop.f32.mrf.mxu1 }
  0xe9   :  { %v353_v33 = vmax.f32 %v337_v27, 0.0  ;;  %v361_v34 = vmax.f32 %v345_v28, 0.0  ;;  %v335_v35 = vadd.f32 %v466_v16, %v216_v31  ;;  %v343_v36 = vadd.f32 %v466_v16, %v248_v32 }
  0xea   :  { %v584_v39 = vpop.f32.mrf.mxu0  ;;  %v592_v40 = vpop.f32.mrf.mxu1 }
  0xeb   :  { %v507_v41 = vpack.c.bf16 %v353_v33, %v352_v29  ;;  %v527_v42 = vpack.c.bf16 %v361_v34, %v360_v30  ;;  %v351_v43 = vmax.f32 %v335_v35, 0.0  ;;  %v359_v44 = vmax.f32 %v343_v36, 0.0 }
  0xec   :  { %v340_v45 = vadd.f32 %v584_v39, %v466_v16  ;;  %v348_v46 = vadd.f32 %v592_v40, %v466_v16  ;;  %v229_v47 = vpop.f32.mrf.mxu0  ;;  %v261_v48 = vpop.f32.mrf.mxu1 }
  0xed   :  { %539 = vst [vmem:[%s724_s3 + $0x8] sm:$0xff] %v507_v41   ;;  %543 = vst [vmem:[%s724_s3 + $0x28] sm:$0xff] %v527_v42   ;;  %v502_v49 = vpack.c.bf16 %v351_v43, %v350_v37  ;;  %v522_v50 = vpack.c.bf16 %v359_v44, %v358_v38  ;;  %v338_v51 = vadd.f32 %v466_v16, %v229_v47 }
  0xee   :  { %v346_v52 = vadd.f32 %v466_v16, %v261_v48  ;;  %v585_v53 = vpop.f32.mrf.mxu0  ;;  %v593_v54 = vpop.f32.mrf.mxu1  ;;  %v356_v57 = vmax.f32 %v340_v45, 0.0  ;;  %v364_v58 = vmax.f32 %v348_v46, 0.0 }
  0xef   :  { %503 = vst [vmem:[%s724_s3] sm:$0xff] %v502_v49   ;;  %542 = vst [vmem:[%s724_s3 + $0x20] sm:$0xff] %v522_v50   ;;  %v341_v55 = vadd.f32 %v585_v53, %v466_v16  ;;  %v349_v56 = vadd.f32 %v593_v54, %v466_v16  ;;  %v354_v1 = vmax.f32 %v338_v51, 0.0 }
  0xf0   :  { %v232_v59 = vpop.f32.mrf.mxu0  ;;  %v264_v60 = vpop.f32.mrf.mxu1  ;;  %v362_v2 = vmax.f32 %v346_v52, 0.0 }
  0xf1   :  { %v357_v61 = vmax.f32 %v341_v55, 0.0  ;;  %v365_v62 = vmax.f32 %v349_v56, 0.0  ;;  %v339_v63 = vadd.f32 %v466_v16, %v232_v59  ;;  %v347_v0 = vadd.f32 %v466_v16, %v264_v60 }
  0xf3   :  { %v517_v3 = vpack.c.bf16 %v357_v61, %v356_v57  ;;  %v537_v4 = vpack.c.bf16 %v365_v62, %v364_v58  ;;  %v355_v5 = vmax.f32 %v339_v63, 0.0  ;;  %v363_v6 = vmax.f32 %v347_v0, 0.0 }
  0xf5   :  { %541 = vst [vmem:[%s724_s3 + $0x18] sm:$0xff] %v517_v3   ;;  %545 = vst [vmem:[%s724_s3 + $0x38] sm:$0xff] %v537_v4   ;;  %v512_v7 = vpack.c.bf16 %v355_v5, %v354_v1  ;;  %v532_v8 = vpack.c.bf16 %v363_v6, %v362_v2 }
  0xf7   :  { %540 = vst [vmem:[%s724_s3 + $0x10] sm:$0xff] %v512_v7   ;;  %544 = vst [vmem:[%s724_s3 + $0x30] sm:$0xff] %v532_v8  }

// kernel: _video_coder_forward.174
= control target key start
LH: loop header
LB: loop body
LE: loop exit
PB: predicated region body
PF: predicated region fallthrough
CT: control target
= control target key end

     0   :  { %s137_s0 = inlined_call_operand.vmem [shape: f32[8,512], index: 0, kind: input, shape index: {}]   ;;  %s138_s1 = inlined_call_operand.vmem [shape: f32[8,512], index: 1, kind: output, shape index: {}]  }
   0x1   :  { %v36_v0 = vld [vmem:[%s137_s0] sm:$0xff]  ;;  %v37_v1 = vld [vmem:[%s137_s0 + $0x8] sm:$0xff]  ;;  %v38_v2 = vld [vmem:[%s137_s0 + $0x10] sm:$0xff] }
   0x2   :  { %v40_v3 = vadd.f32 1e-10, %v36_v0  ;;  %v41_v4 = vadd.f32 1e-10, %v37_v1  ;;  %v42_v5 = vadd.f32 1e-10, %v38_v2 }
   0x3   :  { %v39_v6 = vld [vmem:[%s137_s0 + $0x18] sm:$0xff] }
   0x4   :  { %95 = vlog2.f32 %v40_v3  ;;  %v43_v7 = vadd.f32 1e-10, %v39_v6 }
   0x5   :  { %97 = vlog2.f32 %v41_v4 }
   0x6   :  { %99 = vlog2.f32 %v42_v5 }
   0x7   :  { %101 = vlog2.f32 %v43_v7 }
  0x11   :  { %v96_v8 = vpop.eup %95 }
  0x12   :  { %v98_v9 = vpop.eup %97  ;;  %v45_v10 = vmul.f32 0.6931472, %v96_v8 }
  0x13   :  { %v100_v11 = vpop.eup %99  ;;  %v47_v12 = vmul.f32 0.6931472, %v98_v9 }
  0x14   :  { %v102_v13 = vpop.eup %101  ;;  %v52_v14 = vsub.f32 0.0, %v45_v10  ;;  %v49_v15 = vmul.f32 0.6931472, %v100_v11 }
  0x15   :  { %v53_v16 = vsub.f32 0.0, %v47_v12  ;;  %v51_v17 = vmul.f32 0.6931472, %v102_v13 }
  0x16   :  { %v56_v18 = vmul.f32 1.442695, %v52_v14  ;;  %v54_v19 = vsub.f32 0.0, %v49_v15 }
  0x17   :  { %v57_v20 = vmul.f32 1.442695, %v53_v16  ;;  %v55_v21 = vsub.f32 0.0, %v51_v17 }
  0x18   :  { %v60_v22 = vmax.f32 %v56_v18, 0.0  ;;  %v58_v23 = vmul.f32 1.442695, %v54_v19 }
  0x19   :  { %v61_v24 = vmax.f32 %v57_v20, 0.0  ;;  %v59_v25 = vmul.f32 1.442695, %v55_v21 }
  0x1a   :  { %v64_v26 = vmin.f32 %v60_v22, 50.0  ;;  %v62_v27 = vmax.f32 %v58_v23, 0.0 }
  0x1b   :  { %v65_v28 = vmin.f32 %v61_v24, 50.0  ;;  %v63_v29 = vmax.f32 %v59_v25, 0.0 }
  0x1c   :  { %v66_v30 = vmin.f32 %v62_v27, 50.0  ;;  %80 = vst [vmem:[%s138_s1] sm:$0xff] %v64_v26 }
  0x1d   :  { %v67_v31 = vmin.f32 %v63_v29, 50.0  ;;  %81 = vst [vmem:[%s138_s1 + $0x8] sm:$0xff] %v65_v28 }
  0x1e   :  { %82 = vst [vmem:[%s138_s1 + $0x10] sm:$0xff] %v66_v30 }
  0x1f   :  { %83 = vst [vmem:[%s138_s1 + $0x18] sm:$0xff] %v67_v31 }

// kernel: _video_coder_forward.166
= control target key start
LH: loop header
LB: loop body
LE: loop exit
PB: predicated region body
PF: predicated region fallthrough
CT: control target
= control target key end

     0   :  { %s586_s1 = inlined_call_operand.vmem [shape: bf16[128,128], index: 1, kind: input, shape index: {}]   ;;  %s587_s0 = inlined_call_operand.vmem [shape: bf16[128,128], index: 0, kind: input, shape index: {}]   ;;  %s588_s2 = inlined_call_operand.vmem [shape: f32[1,128], index: 2, kind: input, shape index: {}]   ;;  %s589_s3 = inlined_call_operand.vmem [shape: f32[128,128], index: 3, kind: output, shape index: {}]  }
   0x1   :  { %v451_v0 = vld [vmem:[%s586_s1 + $0x38] sm:$0xff]   ;;  %v452_v1 = vld [vmem:[%s586_s1 + $0x30] sm:$0xff]   ;;  %v453_v2 = vld [vmem:[%s586_s1 + $0x28] sm:$0xff]  }
   0x2   :  { %403 = vmatprep.subr.bf16.mxu0 %v451_v0  ;;  %435 = vmatprep.subr.bf16.mxu1 %v451_v0  ;;  %v454_v3 = vld [vmem:[%s586_s1 + $0x20] sm:$0xff]   ;;  %v455_v6 = vld [vmem:[%s586_s1 + $0x18] sm:$0xff]   ;;  %v456_v7 = vld [vmem:[%s586_s1 + $0x10] sm:$0xff]  }
   0x3   :  { %404 = vmatpush3.bf16.msra.mxu0 %v451_v0  ;;  %443 = vmatpush3.bf16.msra.mxu1 %v451_v0  ;;  %v459_v4 = vld [vmem:[%s587_s0] sm:$0xff]   ;;  %v457_v8 = vld [vmem:[%s586_s1 + $0x8] sm:$0xff]   ;;  %v463_v12 = vld [vmem:[%s587_s0 + $0x10] sm:$0xff]  }
   0x4   :  { %405 = vmatprep.subr.bf16.mxu0 %v452_v1  ;;  %436 = vmatprep.subr.bf16.mxu1 %v452_v1  ;;  %v460_v5 = vld [vmem:[%s587_s0 + $0x20] sm:$0xff]   ;;  %v461_v10 = vld [vmem:[%s587_s0 + $0x8] sm:$0xff]   ;;  %v464_v13 = vld [vmem:[%s587_s0 + $0x30] sm:$0xff]  }
   0x5   :  { %419 = vmatprep.mubr.bf16.mxu0 %v459_v4  ;;  %427 = vmatprep.mubr.bf16.mxu1 %v460_v5  ;;  %v458_v9 = vld [vmem:[%s586_s1] sm:$0xff]   ;;  %v462_v11 = vld [vmem:[%s587_s0 + $0x28] sm:$0xff]   ;;  %v465_v14 = vld [vmem:[%s587_s0 + $0x18] sm:$0xff]  }
   0x6   :  { %v466_v15 = vld [vmem:[%s587_s0 + $0x38] sm:$0xff]   ;;  %v386_v16 = vld [vmem:[%s588_s2] ss:$0 sm:$0xff] }
   0x7   :  { %406 = vmatpush3.bf16.msra.mxu0 %v452_v1  ;;  %444 = vmatpush3.bf16.msra.mxu1 %v452_v1 }
   0x8   :  { %407 = vmatprep.subr.bf16.mxu0 %v453_v2  ;;  %437 = vmatprep.subr.bf16.mxu1 %v453_v2 }
   0xb   :  { %408 = vmatpush3.bf16.msra.mxu0 %v453_v2  ;;  %445 = vmatpush3.bf16.msra.mxu1 %v453_v2 }
   0xc   :  { %409 = vmatprep.subr.bf16.mxu0 %v454_v3  ;;  %438 = vmatprep.subr.bf16.mxu1 %v454_v3 }
   0xf   :  { %410 = vmatpush3.bf16.msra.mxu0 %v454_v3  ;;  %446 = vmatpush3.bf16.msra.mxu1 %v454_v3 }
  0x10   :  { %411 = vmatprep.subr.bf16.mxu0 %v455_v6  ;;  %439 = vmatprep.subr.bf16.mxu1 %v455_v6 }
  0x13   :  { %412 = vmatpush3.bf16.msra.mxu0 %v455_v6  ;;  %447 = vmatpush3.bf16.msra.mxu1 %v455_v6 }
  0x14   :  { %413 = vmatprep.subr.bf16.mxu0 %v456_v7  ;;  %440 = vmatprep.subr.bf16.mxu1 %v456_v7 }
  0x17   :  { %414 = vmatpush3.bf16.msra.mxu0 %v456_v7  ;;  %448 = vmatpush3.bf16.msra.mxu1 %v456_v7 }
  0x18   :  { %415 = vmatprep.subr.bf16.mxu0 %v457_v8  ;;  %441 = vmatprep.subr.bf16.mxu1 %v457_v8 }
  0x1b   :  { %416 = vmatpush3.bf16.msra.mxu0 %v457_v8  ;;  %449 = vmatpush3.bf16.msra.mxu1 %v457_v8 }
  0x1c   :  { %417 = vmatprep.subr.bf16.mxu0 %v458_v9  ;;  %442 = vmatprep.subr.bf16.mxu1 %v458_v9 }
  0x1f   :  { %418 = vmatpush3.bf16.msra.mxu0 %v458_v9  ;;  %450 = vmatpush3.bf16.msra.mxu1 %v458_v9 }
  0x22   :  { %420 = vmatmul.mubr.bf16.vlgmr.msra.gmra.mxu0 %v461_v10  ;;  %428 = vmatmul.mubr.bf16.vlgmr.msra.gmra.mxu1 %v462_v11 }
  0x23   :  { %423 = vmatprep.mubr.bf16.mxu0 %v463_v12  ;;  %431 = vmatprep.mubr.bf16.mxu1 %v464_v13 }
  0x2a   :  { %424 = vmatmul.mubr.bf16.gmra.mxu0 %v465_v14  ;;  %432 = vmatmul.mubr.bf16.gmra.mxu1 %v466_v15 }
  0xe2   :  { %v421_v17 = vpop.f32.mrf.mxu0  ;;  %v429_v18 = vpop.f32.mrf.mxu1 }
  0xe3   :  { %v336_v19 = vadd.f32 %v421_v17, %v386_v16  ;;  %v344_v20 = vadd.f32 %v429_v18, %v386_v16 }
  0xe4   :  { %v213_v21 = vpop.f32.mrf.mxu0  ;;  %v245_v22 = vpop.f32.mrf.mxu1 }
  0xe5   :  { %352 = vst [vmem:[%s589_s3 + $0x10] sm:$0xff] %v336_v19  ;;  %360 = vst [vmem:[%s589_s3 + $0x50] sm:$0xff] %v344_v20  ;;  %v334_v23 = vadd.f32 %v386_v16, %v213_v21  ;;  %v342_v24 = vadd.f32 %v386_v16, %v245_v22 }
  0xe6   :  { %v422_v25 = vpop.f32.mrf.mxu0  ;;  %v430_v26 = vpop.f32.mrf.mxu1 }
  0xe7   :  { %350 = vst [vmem:[%s589_s3] sm:$0xff] %v334_v23  ;;  %358 = vst [vmem:[%s589_s3 + $0x40] sm:$0xff] %v342_v24  ;;  %v337_v27 = vadd.f32 %v422_v25, %v386_v16  ;;  %v345_v28 = vadd.f32 %v430_v26, %v386_v16 }
  0xe8   :  { %v216_v29 = vpop.f32.mrf.mxu0  ;;  %v248_v30 = vpop.f32.mrf.mxu1 }
  0xe9   :  { %353 = vst [vmem:[%s589_s3 + $0x18] sm:$0xff] %v337_v27  ;;  %361 = vst [vmem:[%s589_s3 + $0x58] sm:$0xff] %v345_v28  ;;  %v335_v31 = vadd.f32 %v386_v16, %v216_v29  ;;  %v343_v32 = vadd.f32 %v386_v16, %v248_v30 }
  0xea   :  { %v425_v33 = vpop.f32.mrf.mxu0  ;;  %v433_v34 = vpop.f32.mrf.mxu1 }
  0xeb   :  { %351 = vst [vmem:[%s589_s3 + $0x8] sm:$0xff] %v335_v31  ;;  %359 = vst [vmem:[%s589_s3 + $0x48] sm:$0xff] %v343_v32  ;;  %v340_v35 = vadd.f32 %v425_v33, %v386_v16  ;;  %v348_v36 = vadd.f32 %v433_v34, %v386_v16 }
  0xec   :  { %v229_v37 = vpop.f32.mrf.mxu0  ;;  %v261_v38 = vpop.f32.mrf.mxu1 }
  0xed   :  { %356 = vst [vmem:[%s589_s3 + $0x30] sm:$0xff] %v340_v35  ;;  %364 = vst [vmem:[%s589_s3 + $0x70] sm:$0xff] %v348_v36  ;;  %v338_v39 = vadd.f32 %v386_v16, %v229_v37  ;;  %v346_v40 = vadd.f32 %v386_v16, %v261_v38 }
  0xee   :  { %v426_v41 = vpop.f32.mrf.mxu0  ;;  %v434_v42 = vpop.f32.mrf.mxu1 }
  0xef   :  { %354 = vst [vmem:[%s589_s3 + $0x20] sm:$0xff] %v338_v39  ;;  %362 = vst [vmem:[%s589_s3 + $0x60] sm:$0xff] %v346_v40  ;;  %v341_v43 = vadd.f32 %v426_v41, %v386_v16  ;;  %v349_v44 = vadd.f32 %v434_v42, %v386_v16 }
  0xf0   :  { %v232_v45 = vpop.f32.mrf.mxu0  ;;  %v264_v46 = vpop.f32.mrf.mxu1 }
  0xf1   :  { %357 = vst [vmem:[%s589_s3 + $0x38] sm:$0xff] %v341_v43  ;;  %365 = vst [vmem:[%s589_s3 + $0x78] sm:$0xff] %v349_v44  ;;  %v339_v47 = vadd.f32 %v386_v16, %v232_v45  ;;  %v347_v48 = vadd.f32 %v386_v16, %v264_v46 }
  0xf3   :  { %355 = vst [vmem:[%s589_s3 + $0x28] sm:$0xff] %v339_v47  ;;  %363 = vst [vmem:[%s589_s3 + $0x68] sm:$0xff] %v347_v48 }

// kernel: _video_coder_forward.173
= control target key start
LH: loop header
LB: loop body
LE: loop exit
PB: predicated region body
PF: predicated region fallthrough
CT: control target
= control target key end

     0   :  { %s401_s0 = inlined_call_operand.vmem [shape: f32[8,512], index: 0, kind: input, shape index: {}]   ;;  %s402_s1 = inlined_call_operand.vmem [shape: f32[8,512], index: 1, kind: input, shape index: {}]   ;;  %s403_s2 = inlined_call_operand.vmem [shape: f32[8,512], index: 2, kind: input, shape index: {}]   ;;  %s404_s3 = inlined_call_operand.vmem [shape: f32[8,512], index: 3, kind: output, shape index: {}]  }
   0x1   :  { %v82_v0 = vld [vmem:[%s401_s0] sm:$0xff]  ;;  %v83_v3 = vld [vmem:[%s401_s0 + $0x8] sm:$0xff]  ;;  %v88_v10 = vld [vmem:[%s402_s1 + $0x10] sm:$0xff] }
   0x2   :  { %v86_v1 = vld [vmem:[%s402_s1] sm:$0xff]  ;;  %v87_v4 = vld [vmem:[%s402_s1 + $0x8] sm:$0xff]  ;;  %v106_v5 = vadd.f32 0.5, %v82_v0  ;;  %v264_v9 = vadd.f32 -0.5, %v82_v0  ;;  %v107_v12 = vadd.f32 0.5, %v83_v3  ;;  %v265_v13 = vadd.f32 -0.5, %v83_v3 }
   0x3   :  { %v90_v2 = vmax.f32 %v86_v1, 1e-10  ;;  %v91_v6 = vmax.f32 %v87_v4, 1e-10  ;;  %v102_v8 = vld [vmem:[%s403_s2] sm:$0xff]  ;;  %v103_v15 = vld [vmem:[%s403_s2 + $0x8] sm:$0xff] }
   0x4   :  { %v92_v14 = vmax.f32 %v88_v10, 1e-10  ;;  %v84_v16 = vld [vmem:[%s401_s0 + $0x10] sm:$0xff]  ;;  %v345_v17 = vsub.f32 %v106_v5, %v102_v8  ;;  %v89_v18 = vld [vmem:[%s402_s1 + $0x18] sm:$0xff]  ;;  %v350_v19 = vsub.f32 %v264_v9, %v102_v8  ;;  %v352_v20 = vsub.f32 %v107_v12, %v103_v15 }
   0x5   :  { %v94_v7 = vmin.f32 %v90_v2, 1e+10  ;;  %v95_v11 = vmin.f32 %v91_v6, 1e+10  ;;  %v354_v21 = vsub.f32 %v265_v13, %v103_v15  ;;  %v108_v23 = vadd.f32 0.5, %v84_v16  ;;  %v85_v24 = vld [vmem:[%s401_s0 + $0x18] sm:$0xff] }
   0x6   :  { %v96_v22 = vmin.f32 %v92_v14, 1e+10  ;;  %v104_v25 = vld [vmem:[%s403_s2 + $0x10] sm:$0xff]  ;;  %v266_v26 = vadd.f32 -0.5, %v84_v16  ;;  %v93_v27 = vmax.f32 %v89_v18, 1e-10 }
   0x7   :  { %269 = vrcp.f32 %v94_v7  ;;  %v122_v28 = vand.u32 2147483647, %v345_v17  ;;  %v142_v29 = vand.u32 2147483647, %v350_v19  ;;  %v109_v31 = vadd.f32 0.5, %v85_v24  ;;  %v105_v37 = vld [vmem:[%s403_s2 + $0x18] sm:$0xff] }
   0x8   :  { %271 = vrcp.f32 %v95_v11  ;;  %v97_v30 = vmin.f32 %v93_v27, 1e+10  ;;  %v267_v32 = vadd.f32 -0.5, %v85_v24  ;;  %v123_v33 = vand.u32 2147483647, %v352_v20 }
   0x9   :  { %273 = vrcp.f32 %v96_v22  ;;  %v143_v34 = vand.u32 2147483647, %v354_v21  ;;  %v366_v35 = vsub.f32 %v108_v23, %v104_v25  ;;  %v368_v36 = vsub.f32 %v266_v26, %v104_v25 }
   0xa   :  { %275 = vrcp.f32 %v97_v30  ;;  %v126_v38 = vsub.f32 0.0, %v122_v28  ;;  %v146_v39 = vsub.f32 0.0, %v142_v29  ;;  %v373_v40 = vsub.f32 %v109_v31, %v105_v37 }
   0xb   :  { %v375_v41 = vsub.f32 %v267_v32, %v105_v37  ;;  %v127_v42 = vsub.f32 0.0, %v123_v33  ;;  %v147_v43 = vsub.f32 0.0, %v143_v34  ;;  %v124_v44 = vand.u32 2147483647, %v366_v35 }
   0xc   :  { %v144_v45 = vand.u32 2147483647, %v368_v36  ;;  %v125_v50 = vand.u32 2147483647, %v373_v40  ;;  %vm162_vm0 = vcmp.ge.f32.partialorder %v345_v17, 0.0  ;;  %vm178_vm1 = vcmp.ge.f32.partialorder %v350_v19, 0.0 }
   0xd   :  { %v145_v51 = vand.u32 2147483647, %v375_v41  ;;  %v128_v54 = vsub.f32 0.0, %v124_v44  ;;  %vm163_vm2 = vcmp.ge.f32.partialorder %v352_v20, 0.0  ;;  %vm179_vm3 = vcmp.ge.f32.partialorder %v354_v21, 0.0 }
   0xe   :  { %v148_v55 = vsub.f32 0.0, %v144_v45  ;;  %v129_v61 = vsub.f32 0.0, %v125_v50  ;;  %vm164_vm4 = vcmp.ge.f32.partialorder %v366_v35, 0.0  ;;  %vm180_vm5 = vcmp.ge.f32.partialorder %v368_v36, 0.0 }
   0xf   :  { %v149_v62 = vsub.f32 0.0, %v145_v51  ;;  %vm165_vm6 = vcmp.ge.f32.partialorder %v373_v40, 0.0  ;;  %vm181_vm7 = vcmp.ge.f32.partialorder %v375_v41, 0.0 }
  0x14   :  { %v270_v46 = vpop.eup %269 }
  0x15   :  { %v272_v47 = vpop.eup %271  ;;  %v130_v48 = vmul.f32 %v270_v46, %v126_v38  ;;  %v150_v49 = vmul.f32 %v270_v46, %v146_v39 }
  0x16   :  { %v131_v52 = vmul.f32 %v272_v47, %v127_v42  ;;  %v151_v53 = vmul.f32 %v272_v47, %v147_v43  ;;  %v274_v60 = vpop.eup %273 }
  0x17   :  { %v134_v56 = vmul.f32 1.442695, %v130_v48  ;;  %v154_v57 = vmul.f32 1.442695, %v150_v49  ;;  %v132_v63 = vmul.f32 %v274_v60, %v128_v54  ;;  %v152_v0 = vmul.f32 %v274_v60, %v148_v55  ;;  %v276_v1 = vpop.eup %275 }
  0x18   :  { %v136_v58 = vmul.f32 1.442695, %v131_v52  ;;  %v156_v59 = vmul.f32 1.442695, %v151_v53  ;;  %v133_v4 = vmul.f32 %v276_v1, %v129_v61  ;;  %v153_v5 = vmul.f32 %v276_v1, %v149_v62 }
  0x19   :  { %277 = vpow2.f32 %v134_v56  ;;  %v138_v2 = vmul.f32 1.442695, %v132_v63  ;;  %v158_v3 = vmul.f32 1.442695, %v152_v0 }
  0x1a   :  { %279 = vpow2.f32 %v154_v57  ;;  %v140_v6 = vmul.f32 1.442695, %v133_v4  ;;  %v160_v7 = vmul.f32 1.442695, %v153_v5 }
  0x1b   :  { %281 = vpow2.f32 %v136_v58 }
  0x1c   :  { %283 = vpow2.f32 %v156_v59 }
  0x1d   :  { %285 = vpow2.f32 %v138_v2 }
  0x1e   :  { %287 = vpow2.f32 %v158_v3 }
  0x1f   :  { %289 = vpow2.f32 %v140_v6 }
  0x20   :  { %291 = vpow2.f32 %v160_v7 }
  0x26   :  { %v278_v8 = vpop.eup %277 }
  0x27   :  { %v280_v9 = vpop.eup %279  ;;  %v166_v10 = vmul.f32 0.5, %v278_v8 }
  0x28   :  { %v282_v11 = vpop.eup %281  ;;  %v182_v12 = vmul.f32 0.5, %v280_v9 }
  0x29   :  { %v284_v13 = vpop.eup %283  ;;  %v170_v14 = vsub.f32 1.0, %v166_v10  ;;  %v167_v15 = vmul.f32 0.5, %v282_v11 }
  0x2a   :  { %v186_v16 = vsub.f32 1.0, %v182_v12  ;;  %v183_v18 = vmul.f32 0.5, %v284_v13  ;;  %v286_v22 = vpop.eup %285 }
  0x2b   :  { %v174_v23 = vsel %vm162_vm0, %v170_v14, %v166_v10  ;;  %v171_v24 = vsub.f32 1.0, %v167_v15  ;;  %v288_v25 = vpop.eup %287  ;;  %v168_v28 = vmul.f32 0.5, %v286_v22 }
  0x2c   :  { %v190_v26 = vsel %vm178_vm1, %v186_v16, %v182_v12  ;;  %v187_v27 = vsub.f32 1.0, %v183_v18  ;;  %v184_v30 = vmul.f32 0.5, %v288_v25  ;;  %v290_v19 = vpop.eup %289 }
  0x2d   :  { %v194_v17 = vsub.f32 %v174_v23, %v190_v26  ;;  %v175_v29 = vsel %vm163_vm2, %v171_v24, %v167_v15  ;;  %v172_v32 = vsub.f32 1.0, %v168_v28  ;;  %v292_v20 = vpop.eup %291  ;;  %v169_v38 = vmul.f32 0.5, %v290_v19 }
  0x2e   :  { %v191_v31 = vsel %vm179_vm3, %v187_v27, %v183_v18  ;;  %v188_v37 = vsub.f32 1.0, %v184_v30  ;;  %v185_v39 = vmul.f32 0.5, %v292_v20 }
  0x2f   :  { %v198_v33 = vadd.f32 1e-10, %v194_v17  ;;  %v195_v34 = vsub.f32 %v175_v29, %v191_v31  ;;  %v176_v21 = vsel %vm164_vm4, %v172_v32, %v168_v28  ;;  %v173_v43 = vsub.f32 1.0, %v169_v38 }
  0x30   :  { %v192_v35 = vsel %vm180_vm5, %v188_v37, %v184_v30  ;;  %v189_v45 = vsub.f32 1.0, %v185_v39 }
  0x31   :  { %293 = vlog2.f32 %v198_v33  ;;  %v199_v42 = vadd.f32 1e-10, %v195_v34  ;;  %v196_v44 = vsub.f32 %v176_v21, %v192_v35  ;;  %v177_v46 = vsel %vm165_vm6, %v173_v43, %v169_v38 }
  0x32   :  { %v193_v47 = vsel %vm181_vm7, %v189_v45, %v185_v39 }
  0x33   :  { %295 = vlog2.f32 %v199_v42  ;;  %v200_v36 = vadd.f32 1e-10, %v196_v44  ;;  %v197_v48 = vsub.f32 %v177_v46, %v193_v47 }
  0x35   :  { %297 = vlog2.f32 %v200_v36  ;;  %v201_v49 = vadd.f32 1e-10, %v197_v48 }
  0x37   :  { %299 = vlog2.f32 %v201_v49 }
  0x3e   :  { %v294_v50 = vpop.eup %293 }
  0x3f   :  { %v203_v51 = vmul.f32 0.6931472, %v294_v50 }
  0x40   :  { %v296_v40 = vpop.eup %295 }
  0x41   :  { %v210_v52 = vsub.f32 0.0, %v203_v51  ;;  %v205_v41 = vmul.f32 0.6931472, %v296_v40 }
  0x42   :  { %v298_v53 = vpop.eup %297 }
  0x43   :  { %v214_v54 = vmul.f32 1.442695, %v210_v52  ;;  %v211_v55 = vsub.f32 0.0, %v205_v41  ;;  %v207_v56 = vmul.f32 0.6931472, %v298_v53 }
  0x44   :  { %v300_v59 = vpop.eup %299 }
  0x45   :  { %v218_v57 = vmax.f32 %v214_v54, 0.0  ;;  %v215_v58 = vmul.f32 1.442695, %v211_v55  ;;  %v212_v60 = vsub.f32 0.0, %v207_v56  ;;  %v209_v63 = vmul.f32 0.6931472, %v300_v59 }
  0x47   :  { %v222_v61 = vmin.f32 %v218_v57, 50.0  ;;  %v219_v62 = vmax.f32 %v215_v58, 0.0  ;;  %v216_v0 = vmul.f32 1.442695, %v212_v60  ;;  %v213_v2 = vsub.f32 0.0, %v209_v63 }
  0x49   :  { %v223_v1 = vmin.f32 %v219_v62, 50.0  ;;  %v220_v3 = vmax.f32 %v216_v0, 0.0  ;;  %238 = vst [vmem:[%s404_s3] sm:$0xff] %v222_v61  ;;  %v217_v4 = vmul.f32 1.442695, %v213_v2 }
  0x4b   :  { %v224_v5 = vmin.f32 %v220_v3, 50.0  ;;  %239 = vst [vmem:[%s404_s3 + $0x8] sm:$0xff] %v223_v1  ;;  %v221_v6 = vmax.f32 %v217_v4, 0.0 }
  0x4d   :  { %v225_v7 = vmin.f32 %v221_v6, 50.0  ;;  %240 = vst [vmem:[%s404_s3 + $0x10] sm:$0xff] %v224_v5 }
  0x4f   :  { %241 = vst [vmem:[%s404_s3 + $0x18] sm:$0xff] %v225_v7 }

// kernel: _video_coder_forward.169
= control target key start
LH: loop header
LB: loop body
LE: loop exit
PB: predicated region body
PF: predicated region fallthrough
CT: control target
= control target key end

     0   :  { %s1708_s1 = inlined_call_operand.vmem [shape: bf16[128,128], index: 1, kind: input, shape index: {}]   ;;  %s1709_s0 = inlined_call_operand.vmem [shape: bf16[512,128], index: 0, kind: input, shape index: {}]   ;;  %s1710_s2 = inlined_call_operand.vmem [shape: f32[1,128], index: 2, kind: input, shape index: {}]   ;;  %s1711_s3 = inlined_call_operand.vmem [shape: f32[512,128], index: 3, kind: output, shape index: {}]  }
   0x1   :  { %v1267_v0 = vld [vmem:[%s1708_s1 + $0x38] sm:$0xff]   ;;  %v1268_v1 = vld [vmem:[%s1708_s1 + $0x30] sm:$0xff]   ;;  %v1269_v2 = vld [vmem:[%s1708_s1 + $0x28] sm:$0xff]  }
   0x2   :  { %1171 = vmatprep.subr.bf16.mxu0 %v1267_v0  ;;  %1251 = vmatprep.subr.bf16.mxu1 %v1267_v0  ;;  %v1270_v3 = vld [vmem:[%s1708_s1 + $0x20] sm:$0xff]   ;;  %v1271_v6 = vld [vmem:[%s1708_s1 + $0x18] sm:$0xff]   ;;  %v1272_v7 = vld [vmem:[%s1708_s1 + $0x10] sm:$0xff]  }
   0x3   :  { %1172 = vmatpush3.bf16.msra.mxu0 %v1267_v0  ;;  %1259 = vmatpush3.bf16.msra.mxu1 %v1267_v0  ;;  %v1275_v4 = vld [vmem:[%s1709_s0] sm:$0xff]   ;;  %v1273_v8 = vld [vmem:[%s1708_s1 + $0x8] sm:$0xff]   ;;  %v1279_v12 = vld [vmem:[%s1709_s0 + $0x10] sm:$0xff]  }
   0x4   :  { %1173 = vmatprep.subr.bf16.mxu0 %v1268_v1  ;;  %1252 = vmatprep.subr.bf16.mxu1 %v1268_v1  ;;  %v1276_v5 = vld [vmem:[%s1709_s0 + $0x80] sm:$0xff]   ;;  %v1277_v10 = vld [vmem:[%s1709_s0 + $0x8] sm:$0xff]   ;;  %v1280_v13 = vld [vmem:[%s1709_s0 + $0x90] sm:$0xff]  }
   0x5   :  { %1187 = vmatprep.mubr.bf16.mxu0 %v1275_v4  ;;  %1219 = vmatprep.mubr.bf16.mxu1 %v1276_v5  ;;  %v1274_v9 = vld [vmem:[%s1708_s1] sm:$0xff]   ;;  %v1278_v11 = vld [vmem:[%s1709_s0 + $0x88] sm:$0xff]   ;;  %v1281_v14 = vld [vmem:[%s1709_s0 + $0x18] sm:$0xff]  }
   0x6   :  { %v1282_v15 = vld [vmem:[%s1709_s0 + $0x98] sm:$0xff]   ;;  %v1283_v16 = vld [vmem:[%s1709_s0 + $0x20] sm:$0xff]   ;;  %v1285_v18 = vld [vmem:[%s1709_s0 + $0x28] sm:$0xff]  }
   0x7   :  { %1174 = vmatpush3.bf16.msra.mxu0 %v1268_v1  ;;  %1260 = vmatpush3.bf16.msra.mxu1 %v1268_v1  ;;  %v1284_v17 = vld [vmem:[%s1709_s0 + $0xa0] sm:$0xff]   ;;  %v1286_v19 = vld [vmem:[%s1709_s0 + $0xa8] sm:$0xff]   ;;  %v1287_v20 = vld [vmem:[%s1709_s0 + $0x30] sm:$0xff]  }
   0x8   :  { %1175 = vmatprep.subr.bf16.mxu0 %v1269_v2  ;;  %1253 = vmatprep.subr.bf16.mxu1 %v1269_v2  ;;  %v1288_v21 = vld [vmem:[%s1709_s0 + $0xb0] sm:$0xff]   ;;  %v1289_v22 = vld [vmem:[%s1709_s0 + $0x38] sm:$0xff]   ;;  %v1291_v24 = vld [vmem:[%s1709_s0 + $0x40] sm:$0xff]  }
   0x9   :  { %v1290_v23 = vld [vmem:[%s1709_s0 + $0xb8] sm:$0xff]   ;;  %v1292_v25 = vld [vmem:[%s1709_s0 + $0xc0] sm:$0xff]   ;;  %v1293_v26 = vld [vmem:[%s1709_s0 + $0x48] sm:$0xff]  }
   0xa   :  { %v1294_v27 = vld [vmem:[%s1709_s0 + $0xc8] sm:$0xff]   ;;  %v1295_v28 = vld [vmem:[%s1709_s0 + $0x50] sm:$0xff]   ;;  %v1297_v30 = vld [vmem:[%s1709_s0 + $0x58] sm:$0xff]  }
   0xb   :  { %1176 = vmatpush3.bf16.msra.mxu0 %v1269_v2  ;;  %1261 = vmatpush3.bf16.msra.mxu1 %v1269_v2  ;;  %v1296_v29 = vld [vmem:[%s1709_s0 + $0xd0] sm:$0xff]   ;;  %v1298_v31 = vld [vmem:[%s1709_s0 + $0xd8] sm:$0xff]   ;;  %v1299_v32 = vld [vmem:[%s1709_s0 + $0x60] sm:$0xff]  }
   0xc   :  { %1177 = vmatprep.subr.bf16.mxu0 %v1270_v3  ;;  %1254 = vmatprep.subr.bf16.mxu1 %v1270_v3  ;;  %v1300_v33 = vld [vmem:[%s1709_s0 + $0xe0] sm:$0xff]   ;;  %v1301_v34 = vld [vmem:[%s1709_s0 + $0x68] sm:$0xff]   ;;  %v1303_v36 = vld [vmem:[%s1709_s0 + $0x70] sm:$0xff]  }
   0xd   :  { %v1302_v35 = vld [vmem:[%s1709_s0 + $0xe8] sm:$0xff]   ;;  %v1304_v37 = vld [vmem:[%s1709_s0 + $0xf0] sm:$0xff]   ;;  %v1305_v38 = vld [vmem:[%s1709_s0 + $0x78] sm:$0xff]  }
   0xe   :  { %v1306_v39 = vld [vmem:[%s1709_s0 + $0xf8] sm:$0xff]   ;;  %v1450_v40 = vld [vmem:[%s1710_s2] ss:$0 sm:$0xff] }
   0xf   :  { %1178 = vmatpush3.bf16.msra.mxu0 %v1270_v3  ;;  %1262 = vmatpush3.bf16.msra.mxu1 %v1270_v3 }
  0x10   :  { %1179 = vmatprep.subr.bf16.mxu0 %v1271_v6  ;;  %1255 = vmatprep.subr.bf16.mxu1 %v1271_v6 }
  0x13   :  { %1180 = vmatpush3.bf16.msra.mxu0 %v1271_v6  ;;  %1263 = vmatpush3.bf16.msra.mxu1 %v1271_v6 }
  0x14   :  { %1181 = vmatprep.subr.bf16.mxu0 %v1272_v7  ;;  %1256 = vmatprep.subr.bf16.mxu1 %v1272_v7 }
  0x17   :  { %1182 = vmatpush3.bf16.msra.mxu0 %v1272_v7  ;;  %1264 = vmatpush3.bf16.msra.mxu1 %v1272_v7 }
  0x18   :  { %1183 = vmatprep.subr.bf16.mxu0 %v1273_v8  ;;  %1257 = vmatprep.subr.bf16.mxu1 %v1273_v8 }
  0x1b   :  { %1184 = vmatpush3.bf16.msra.mxu0 %v1273_v8  ;;  %1265 = vmatpush3.bf16.msra.mxu1 %v1273_v8 }
  0x1c   :  { %1185 = vmatprep.subr.bf16.mxu0 %v1274_v9  ;;  %1258 = vmatprep.subr.bf16.mxu1 %v1274_v9 }
  0x1f   :  { %1186 = vmatpush3.bf16.msra.mxu0 %v1274_v9  ;;  %1266 = vmatpush3.bf16.msra.mxu1 %v1274_v9 }
  0x22   :  { %1188 = vmatmul.mubr.bf16.vlgmr.msra.gmra.mxu0 %v1277_v10  ;;  %1220 = vmatmul.mubr.bf16.vlgmr.msra.gmra.mxu1 %v1278_v11 }
  0x23   :  { %1191 = vmatprep.mubr.bf16.mxu0 %v1279_v12  ;;  %1223 = vmatprep.mubr.bf16.mxu1 %v1280_v13 }
  0x2a   :  { %1192 = vmatmul.mubr.bf16.gmra.mxu0 %v1281_v14  ;;  %1224 = vmatmul.mubr.bf16.gmra.mxu1 %v1282_v15 }
  0x2b   :  { %1195 = vmatprep.mubr.bf16.mxu0 %v1283_v16  ;;  %1227 = vmatprep.mubr.bf16.mxu1 %v1284_v17 }
  0x32   :  { %1196 = vmatmul.mubr.bf16.gmra.mxu0 %v1285_v18  ;;  %1228 = vmatmul.mubr.bf16.gmra.mxu1 %v1286_v19 }
  0x33   :  { %1199 = vmatprep.mubr.bf16.mxu0 %v1287_v20  ;;  %1231 = vmatprep.mubr.bf16.mxu1 %v1288_v21 }
  0x3a   :  { %1200 = vmatmul.mubr.bf16.gmra.mxu0 %v1289_v22  ;;  %1232 = vmatmul.mubr.bf16.gmra.mxu1 %v1290_v23 }
  0x3b   :  { %1203 = vmatprep.mubr.bf16.mxu0 %v1291_v24  ;;  %1235 = vmatprep.mubr.bf16.mxu1 %v1292_v25 }
  0x42   :  { %1204 = vmatmul.mubr.bf16.gmra.mxu0 %v1293_v26  ;;  %1236 = vmatmul.mubr.bf16.gmra.mxu1 %v1294_v27 }
  0x43   :  { %1207 = vmatprep.mubr.bf16.mxu0 %v1295_v28  ;;  %1239 = vmatprep.mubr.bf16.mxu1 %v1296_v29 }
  0x4a   :  { %1208 = vmatmul.mubr.bf16.gmra.mxu0 %v1297_v30  ;;  %1240 = vmatmul.mubr.bf16.gmra.mxu1 %v1298_v31 }
  0x4b   :  { %1211 = vmatprep.mubr.bf16.mxu0 %v1299_v32  ;;  %1243 = vmatprep.mubr.bf16.mxu1 %v1300_v33 }
  0x52   :  { %1212 = vmatmul.mubr.bf16.gmra.mxu0 %v1301_v34  ;;  %1244 = vmatmul.mubr.bf16.gmra.mxu1 %v1302_v35 }
  0x53   :  { %1215 = vmatprep.mubr.bf16.mxu0 %v1303_v36  ;;  %1247 = vmatprep.mubr.bf16.mxu1 %v1304_v37 }
  0x5a   :  { %1216 = vmatmul.mubr.bf16.gmra.mxu0 %v1305_v38  ;;  %1248 = vmatmul.mubr.bf16.gmra.mxu1 %v1306_v39 }
  0xe2   :  { %v1189_v41 = vpop.f32.mrf.mxu0  ;;  %v1221_v42 = vpop.f32.mrf.mxu1 }
  0xe3   :  { %v960_v43 = vadd.f32 %v1189_v41, %v1450_v40  ;;  %v992_v44 = vadd.f32 %v1221_v42, %v1450_v40 }
  0xe4   :  { %v501_v45 = vpop.f32.mrf.mxu0  ;;  %v629_v46 = vpop.f32.mrf.mxu1 }
  0xe5   :  { %1024 = vst [vmem:[%s1711_s3 + $0x10] sm:$0xff] %v960_v43  ;;  %1056 = vst [vmem:[%s1711_s3 + $0x110] sm:$0xff] %v992_v44  ;;  %v958_v47 = vadd.f32 %v1450_v40, %v501_v45  ;;  %v990_v48 = vadd.f32 %v1450_v40, %v629_v46 }
  0xe6   :  { %v1190_v49 = vpop.f32.mrf.mxu0  ;;  %v1222_v50 = vpop.f32.mrf.mxu1 }
  0xe7   :  { %1022 = vst [vmem:[%s1711_s3] sm:$0xff] %v958_v47  ;;  %1054 = vst [vmem:[%s1711_s3 + $0x100] sm:$0xff] %v990_v48  ;;  %v961_v51 = vadd.f32 %v1190_v49, %v1450_v40  ;;  %v993_v52 = vadd.f32 %v1222_v50, %v1450_v40 }
  0xe8   :  { %v504_v53 = vpop.f32.mrf.mxu0  ;;  %v632_v54 = vpop.f32.mrf.mxu1 }
  0xe9   :  { %1025 = vst [vmem:[%s1711_s3 + $0x18] sm:$0xff] %v961_v51  ;;  %1057 = vst [vmem:[%s1711_s3 + $0x118] sm:$0xff] %v993_v52  ;;  %v959_v55 = vadd.f32 %v1450_v40, %v504_v53  ;;  %v991_v56 = vadd.f32 %v1450_v40, %v632_v54 }
  0xea   :  { %v1193_v57 = vpop.f32.mrf.mxu0  ;;  %v1225_v58 = vpop.f32.mrf.mxu1 }
  0xeb   :  { %1023 = vst [vmem:[%s1711_s3 + $0x8] sm:$0xff] %v959_v55  ;;  %1055 = vst [vmem:[%s1711_s3 + $0x108] sm:$0xff] %v991_v56  ;;  %v964_v59 = vadd.f32 %v1193_v57, %v1450_v40  ;;  %v996_v60 = vadd.f32 %v1225_v58, %v1450_v40 }
  0xec   :  { %v517_v61 = vpop.f32.mrf.mxu0  ;;  %v645_v62 = vpop.f32.mrf.mxu1 }
  0xed   :  { %1028 = vst [vmem:[%s1711_s3 + $0x30] sm:$0xff] %v964_v59  ;;  %1060 = vst [vmem:[%s1711_s3 + $0x130] sm:$0xff] %v996_v60  ;;  %v962_v63 = vadd.f32 %v1450_v40, %v517_v61  ;;  %v994_v0 = vadd.f32 %v1450_v40, %v645_v62 }
  0xee   :  { %v1194_v1 = vpop.f32.mrf.mxu0  ;;  %v1226_v2 = vpop.f32.mrf.mxu1 }
  0xef   :  { %1026 = vst [vmem:[%s1711_s3 + $0x20] sm:$0xff] %v962_v63  ;;  %1058 = vst [vmem:[%s1711_s3 + $0x120] sm:$0xff] %v994_v0  ;;  %v965_v3 = vadd.f32 %v1194_v1, %v1450_v40  ;;  %v997_v4 = vadd.f32 %v1226_v2, %v1450_v40 }
  0xf0   :  { %v520_v5 = vpop.f32.mrf.mxu0  ;;  %v648_v6 = vpop.f32.mrf.mxu1 }
  0xf1   :  { %1029 = vst [vmem:[%s1711_s3 + $0x38] sm:$0xff] %v965_v3  ;;  %1061 = vst [vmem:[%s1711_s3 + $0x138] sm:$0xff] %v997_v4  ;;  %v963_v7 = vadd.f32 %v1450_v40, %v520_v5  ;;  %v995_v8 = vadd.f32 %v1450_v40, %v648_v6 }
  0xf2   :  { %v1197_v9 = vpop.f32.mrf.mxu0  ;;  %v1229_v10 = vpop.f32.mrf.mxu1 }
  0xf3   :  { %1027 = vst [vmem:[%s1711_s3 + $0x28] sm:$0xff] %v963_v7  ;;  %1059 = vst [vmem:[%s1711_s3 + $0x128] sm:$0xff] %v995_v8  ;;  %v968_v11 = vadd.f32 %v1197_v9, %v1450_v40  ;;  %v1000_v12 = vadd.f32 %v1229_v10, %v1450_v40 }
  0xf4   :  { %v533_v13 = vpop.f32.mrf.mxu0  ;;  %v661_v14 = vpop.f32.mrf.mxu1 }
  0xf5   :  { %1032 = vst [vmem:[%s1711_s3 + $0x50] sm:$0xff] %v968_v11  ;;  %1064 = vst [vmem:[%s1711_s3 + $0x150] sm:$0xff] %v1000_v12  ;;  %v966_v15 = vadd.f32 %v1450_v40, %v533_v13  ;;  %v998_v16 = vadd.f32 %v1450_v40, %v661_v14 }
  0xf6   :  { %v1198_v17 = vpop.f32.mrf.mxu0  ;;  %v1230_v18 = vpop.f32.mrf.mxu1 }
  0xf7   :  { %1030 = vst [vmem:[%s1711_s3 + $0x40] sm:$0xff] %v966_v15  ;;  %1062 = vst [vmem:[%s1711_s3 + $0x140] sm:$0xff] %v998_v16  ;;  %v969_v19 = vadd.f32 %v1198_v17, %v1450_v40  ;;  %v1001_v20 = vadd.f32 %v1230_v18, %v1450_v40 }
  0xf8   :  { %v536_v21 = vpop.f32.mrf.mxu0  ;;  %v664_v22 = vpop.f32.mrf.mxu1 }
  0xf9   :  { %1033 = vst [vmem:[%s1711_s3 + $0x58] sm:$0xff] %v969_v19  ;;  %1065 = vst [vmem:[%s1711_s3 + $0x158] sm:$0xff] %v1001_v20  ;;  %v967_v23 = vadd.f32 %v1450_v40, %v536_v21  ;;  %v999_v24 = vadd.f32 %v1450_v40, %v664_v22 }
  0xfa   :  { %v1201_v25 = vpop.f32.mrf.mxu0  ;;  %v1233_v26 = vpop.f32.mrf.mxu1 }
  0xfb   :  { %1031 = vst [vmem:[%s1711_s3 + $0x48] sm:$0xff] %v967_v23  ;;  %1063 = vst [vmem:[%s1711_s3 + $0x148] sm:$0xff] %v999_v24  ;;  %v972_v27 = vadd.f32 %v1201_v25, %v1450_v40  ;;  %v1004_v28 = vadd.f32 %v1233_v26, %v1450_v40 }
  0xfc   :  { %v549_v29 = vpop.f32.mrf.mxu0  ;;  %v677_v30 = vpop.f32.mrf.mxu1 }
  0xfd   :  { %1036 = vst [vmem:[%s1711_s3 + $0x70] sm:$0xff] %v972_v27  ;;  %1068 = vst [vmem:[%s1711_s3 + $0x170] sm:$0xff] %v1004_v28  ;;  %v970_v31 = vadd.f32 %v1450_v40, %v549_v29  ;;  %v1002_v32 = vadd.f32 %v1450_v40, %v677_v30 }
  0xfe   :  { %v1202_v33 = vpop.f32.mrf.mxu0  ;;  %v1234_v34 = vpop.f32.mrf.mxu1 }
  0xff   :  { %1034 = vst [vmem:[%s1711_s3 + $0x60] sm:$0xff] %v970_v31  ;;  %1066 = vst [vmem:[%s1711_s3 + $0x160] sm:$0xff] %v1002_v32  ;;  %v973_v35 = vadd.f32 %v1202_v33, %v1450_v40  ;;  %v1005_v36 = vadd.f32 %v1234_v34, %v1450_v40 }
 0x100   :  { %v552_v37 = vpop.f32.mrf.mxu0  ;;  %v680_v38 = vpop.f32.mrf.mxu1 }
 0x101   :  { %1037 = vst [vmem:[%s1711_s3 + $0x78] sm:$0xff] %v973_v35  ;;  %1069 = vst [vmem:[%s1711_s3 + $0x178] sm:$0xff] %v1005_v36  ;;  %v971_v39 = vadd.f32 %v1450_v40, %v552_v37  ;;  %v1003_v41 = vadd.f32 %v1450_v40, %v680_v38 }
 0x102   :  { %v1205_v42 = vpop.f32.mrf.mxu0  ;;  %v1237_v43 = vpop.f32.mrf.mxu1 }
 0x103   :  { %1035 = vst [vmem:[%s1711_s3 + $0x68] sm:$0xff] %v971_v39  ;;  %1067 = vst [vmem:[%s1711_s3 + $0x168] sm:$0xff] %v1003_v41  ;;  %v976_v44 = vadd.f32 %v1205_v42, %v1450_v40  ;;  %v1008_v45 = vadd.f32 %v1237_v43, %v1450_v40 }
 0x104   :  { %v565_v46 = vpop.f32.mrf.mxu0  ;;  %v693_v47 = vpop.f32.mrf.mxu1 }
 0x105   :  { %1040 = vst [vmem:[%s1711_s3 + $0x90] sm:$0xff] %v976_v44  ;;  %1072 = vst [vmem:[%s1711_s3 + $0x190] sm:$0xff] %v1008_v45  ;;  %v974_v48 = vadd.f32 %v1450_v40, %v565_v46  ;;  %v1006_v49 = vadd.f32 %v1450_v40, %v693_v47 }
 0x106   :  { %v1206_v50 = vpop.f32.mrf.mxu0  ;;  %v1238_v51 = vpop.f32.mrf.mxu1 }
 0x107   :  { %1038 = vst [vmem:[%s1711_s3 + $0x80] sm:$0xff] %v974_v48  ;;  %1070 = vst [vmem:[%s1711_s3 + $0x180] sm:$0xff] %v1006_v49  ;;  %v977_v52 = vadd.f32 %v1206_v50, %v1450_v40  ;;  %v1009_v53 = vadd.f32 %v1238_v51, %v1450_v40 }
 0x108   :  { %v568_v54 = vpop.f32.mrf.mxu0  ;;  %v696_v55 = vpop.f32.mrf.mxu1 }
 0x109   :  { %1041 = vst [vmem:[%s1711_s3 + $0x98] sm:$0xff] %v977_v52  ;;  %1073 = vst [vmem:[%s1711_s3 + $0x198] sm:$0xff] %v1009_v53  ;;  %v975_v56 = vadd.f32 %v1450_v40, %v568_v54  ;;  %v1007_v57 = vadd.f32 %v1450_v40, %v696_v55 }
 0x10a   :  { %v1209_v58 = vpop.f32.mrf.mxu0  ;;  %v1241_v59 = vpop.f32.mrf.mxu1 }
 0x10b   :  { %1039 = vst [vmem:[%s1711_s3 + $0x88] sm:$0xff] %v975_v56  ;;  %1071 = vst [vmem:[%s1711_s3 + $0x188] sm:$0xff] %v1007_v57  ;;  %v980_v60 = vadd.f32 %v1209_v58, %v1450_v40  ;;  %v1012_v61 = vadd.f32 %v1241_v59, %v1450_v40 }
 0x10c   :  { %v581_v62 = vpop.f32.mrf.mxu0  ;;  %v709_v63 = vpop.f32.mrf.mxu1 }
 0x10d   :  { %1044 = vst [vmem:[%s1711_s3 + $0xb0] sm:$0xff] %v980_v60  ;;  %1076 = vst [vmem:[%s1711_s3 + $0x1b0] sm:$0xff] %v1012_v61  ;;  %v978_v0 = vadd.f32 %v1450_v40, %v581_v62  ;;  %v1010_v1 = vadd.f32 %v1450_v40, %v709_v63 }
 0x10e   :  { %v1210_v2 = vpop.f32.mrf.mxu0  ;;  %v1242_v3 = vpop.f32.mrf.mxu1 }
 0x10f   :  { %1042 = vst [vmem:[%s1711_s3 + $0xa0] sm:$0xff] %v978_v0  ;;  %1074 = vst [vmem:[%s1711_s3 + $0x1a0] sm:$0xff] %v1010_v1  ;;  %v981_v4 = vadd.f32 %v1210_v2, %v1450_v40  ;;  %v1013_v5 = vadd.f32 %v1242_v3, %v1450_v40 }
 0x110   :  { %v584_v6 = vpop.f32.mrf.mxu0  ;;  %v712_v7 = vpop.f32.mrf.mxu1 }
 0x111   :  { %1045 = vst [vmem:[%s1711_s3 + $0xb8] sm:$0xff] %v981_v4  ;;  %1077 = vst [vmem:[%s1711_s3 + $0x1b8] sm:$0xff] %v1013_v5  ;;  %v979_v8 = vadd.f32 %v1450_v40, %v584_v6  ;;  %v1011_v9 = vadd.f32 %v1450_v40, %v712_v7 }
 0x112   :  { %v1213_v10 = vpop.f32.mrf.mxu0  ;;  %v1245_v11 = vpop.f32.mrf.mxu1 }
 0x113   :  { %1043 = vst [vmem:[%s1711_s3 + $0xa8] sm:$0xff] %v979_v8  ;;  %1075 = vst [vmem:[%s1711_s3 + $0x1a8] sm:$0xff] %v1011_v9  ;;  %v984_v12 = vadd.f32 %v1213_v10, %v1450_v40  ;;  %v1016_v13 = vadd.f32 %v1245_v11, %v1450_v40 }
 0x114   :  { %v597_v14 = vpop.f32.mrf.mxu0  ;;  %v725_v15 = vpop.f32.mrf.mxu1 }
 0x115   :  { %1048 = vst [vmem:[%s1711_s3 + $0xd0] sm:$0xff] %v984_v12  ;;  %1080 = vst [vmem:[%s1711_s3 + $0x1d0] sm:$0xff] %v1016_v13  ;;  %v982_v16 = vadd.f32 %v1450_v40, %v597_v14  ;;  %v1014_v17 = vadd.f32 %v1450_v40, %v725_v15 }
 0x116   :  { %v1214_v18 = vpop.f32.mrf.mxu0  ;;  %v1246_v19 = vpop.f32.mrf.mxu1 }
 0x117   :  { %1046 = vst [vmem:[%s1711_s3 + $0xc0] sm:$0xff] %v982_v16  ;;  %1078 = vst [vmem:[%s1711_s3 + $0x1c0] sm:$0xff] %v1014_v17  ;;  %v985_v20 = vadd.f32 %v1214_v18, %v1450_v40  ;;  %v1017_v21 = vadd.f32 %v1246_v19, %v1450_v40 }
 0x118   :  { %v600_v22 = vpop.f32.mrf.mxu0  ;;  %v728_v23 = vpop.f32.mrf.mxu1 }
 0x119   :  { %1049 = vst [vmem:[%s1711_s3 + $0xd8] sm:$0xff] %v985_v20  ;;  %1081 = vst [vmem:[%s1711_s3 + $0x1d8] sm:$0xff] %v1017_v21  ;;  %v983_v24 = vadd.f32 %v1450_v40, %v600_v22  ;;  %v1015_v25 = vadd.f32 %v1450_v40, %v728_v23 }
 0x11a   :  { %v1217_v26 = vpop.f32.mrf.mxu0  ;;  %v1249_v27 = vpop.f32.mrf.mxu1 }
 0x11b   :  { %1047 = vst [vmem:[%s1711_s3 + $0xc8] sm:$0xff] %v983_v24  ;;  %1079 = vst [vmem:[%s1711_s3 + $0x1c8] sm:$0xff] %v1015_v25  ;;  %v988_v28 = vadd.f32 %v1217_v26, %v1450_v40  ;;  %v1020_v29 = vadd.f32 %v1249_v27, %v1450_v40 }
 0x11c   :  { %v613_v30 = vpop.f32.mrf.mxu0  ;;  %v741_v31 = vpop.f32.mrf.mxu1 }
 0x11d   :  { %1052 = vst [vmem:[%s1711_s3 + $0xf0] sm:$0xff] %v988_v28  ;;  %1084 = vst [vmem:[%s1711_s3 + $0x1f0] sm:$0xff] %v1020_v29  ;;  %v986_v32 = vadd.f32 %v1450_v40, %v613_v30  ;;  %v1018_v33 = vadd.f32 %v1450_v40, %v741_v31 }
 0x11e   :  { %v1218_v34 = vpop.f32.mrf.mxu0  ;;  %v1250_v35 = vpop.f32.mrf.mxu1 }
 0x11f   :  { %1050 = vst [vmem:[%s1711_s3 + $0xe0] sm:$0xff] %v986_v32  ;;  %1082 = vst [vmem:[%s1711_s3 + $0x1e0] sm:$0xff] %v1018_v33  ;;  %v989_v36 = vadd.f32 %v1218_v34, %v1450_v40  ;;  %v1021_v37 = vadd.f32 %v1250_v35, %v1450_v40 }
 0x120   :  { %v616_v38 = vpop.f32.mrf.mxu0  ;;  %v744_v39 = vpop.f32.mrf.mxu1 }
 0x121   :  { %1053 = vst [vmem:[%s1711_s3 + $0xf8] sm:$0xff] %v989_v36  ;;  %1085 = vst [vmem:[%s1711_s3 + $0x1f8] sm:$0xff] %v1021_v37  ;;  %v987_v41 = vadd.f32 %v1450_v40, %v616_v38  ;;  %v1019_v42 = vadd.f32 %v1450_v40, %v744_v39 }
 0x123   :  { %1051 = vst [vmem:[%s1711_s3 + $0xe8] sm:$0xff] %v987_v41  ;;  %1083 = vst [vmem:[%s1711_s3 + $0x1e8] sm:$0xff] %v1019_v42 }

</bundles_post_ra>
